<compile_context>
chip_gen: v7x
topology: tpu7x:2x2x1
jax: 0.10.0
libtpu: 0.0.40
codegen_flags: <defaults>
</compile_context>

<pallas_src>
import functools

import jax
import jax.numpy as jnp
from jax.experimental import pallas as pl
from jax.experimental.pallas import tpu as pltpu

C_IN = 2176
C_HID = 512
C_OUT = 1


def _round_up(a, b):
    return ((a + b - 1) // b) * b


def local_disc_kernel(x_ref, w0_ref, b0_ref, w1_ref, b1_ref, w2_ref, b2_ref,
                      o_ref):
    # x_ref : (C_IN, thw)  f32      w*: (C_out, C_in) bf16    b*: (C_out, 1) f32
    x = x_ref[...].astype(jnp.bfloat16)  # in-kernel cast: no extra HBM pass
    h = jnp.dot(w0_ref[...], x, preferred_element_type=jnp.float32)
    h = jnp.maximum(h + b0_ref[...], 0.0)          # bias + ReLU in f32
    h = jnp.dot(w1_ref[...], h.astype(jnp.bfloat16),
                preferred_element_type=jnp.float32)
    h = jnp.maximum(h + b1_ref[...], 0.0)
    y = jnp.dot(w2_ref[...], h.astype(jnp.bfloat16),
                preferred_element_type=jnp.float32)
    o_ref[...] = (y + b2_ref[...]).astype(o_ref.dtype)


@functools.partial(jax.jit, static_argnames=("thw",))
def local_discriminator(x_nchw, params, *, thw=512):
    """x_nchw: (N, 2176, H, W) float32 -> (N, 1, H, W) float32."""
    w0, b0, w1, b1, w2, b2 = params
    N, C, H, W = x_nchw.shape
    assert C == C_IN
    HW = H * W

    # Tile size over the spatial (lane) axis: multiple of 128, no bigger than
    # the (128-rounded) spatial extent.  Pad H*W only when needed.
    thw = max(128, min(_round_up(thw, 128), _round_up(HW, 128)))
    HW_pad = _round_up(HW, thw)

    x = x_nchw.reshape(N, C, HW)                  # free view, no data movement
    if HW_pad != HW:
        x = jnp.pad(x, ((0, 0), (0, 0), (0, HW_pad - HW)))

    # One-time cast of the (small) resident weights to bf16; biases stay f32.
    w0b = w0.astype(jnp.bfloat16)
    w1b = w1.astype(jnp.bfloat16)
    w2b = w2.astype(jnp.bfloat16)

    grid = (N, HW_pad // thw)

    flops = 2 * N * HW_pad * (C_IN * C_HID + C_HID * C_HID + C_HID * C_OUT)
    bytes_accessed = (N * C_IN * HW_pad * 4                       # x (f32)
                      + 2 * (C_IN * C_HID + C_HID * C_HID + C_HID * C_OUT)
                      + 4 * (2 * C_HID + C_OUT)                   # biases
                      + N * C_OUT * HW_pad * 4)                   # output

    out = pl.pallas_call(
        local_disc_kernel,
        out_shape=jax.ShapeDtypeStruct((N, C_OUT, HW_pad), jnp.float32),
        grid_spec=pltpu.PrefetchScalarGridSpec(
            num_scalar_prefetch=0,
            grid=grid,
            in_specs=[
                pl.BlockSpec((None, C_IN, thw), lambda n, j: (n, 0, j)),  # x
                pl.BlockSpec((C_HID, C_IN), lambda n, j: (0, 0)),         # w0
                pl.BlockSpec((C_HID, 1), lambda n, j: (0, 0)),            # b0
                pl.BlockSpec((C_HID, C_HID), lambda n, j: (0, 0)),        # w1
                pl.BlockSpec((C_HID, 1), lambda n, j: (0, 0)),            # b1
                pl.BlockSpec((C_OUT, C_HID), lambda n, j: (0, 0)),        # w2
                pl.BlockSpec((C_OUT, 1), lambda n, j: (0, 0)),            # b2
            ],
            out_specs=pl.BlockSpec((None, C_OUT, thw), lambda n, j: (n, 0, j)),
        ),
        compiler_params=pltpu.CompilerParams(
            dimension_semantics=("parallel", "parallel"),
            vmem_limit_bytes=48 * 1024 * 1024,
        ),
        cost_estimate=pl.CostEstimate(
            flops=flops, transcendentals=0, bytes_accessed=bytes_accessed),
    )(x, w0b, b0, w1b, b1, w2b, b2)

    # Drop spatial padding; (N, 1, HW) -> (N, 1, H, W) is a free reshape.
    return out[:, :, :HW].reshape(N, C_OUT, H, W)


def init_params(key):
    """Deterministic synthetic parameters (PyTorch-native (C_out, C_in) layout)."""
    k0, k1, k2 = jax.random.split(key, 3)
    w0 = jax.random.normal(k0, (C_HID, C_IN), jnp.float32) * (1.0 / C_IN ** 0.5)
    b0 = jnp.full((C_HID, 1), 0.01, jnp.float32)
    w1 = jax.random.normal(k1, (C_HID, C_HID), jnp.float32) * (1.0 / C_HID ** 0.5)
    b1 = jnp.full((C_HID, 1), -0.01, jnp.float32)
    w2 = jax.random.normal(k2, (C_OUT, C_HID), jnp.float32) * (1.0 / C_HID ** 0.5)
    b2 = jnp.full((C_OUT, 1), 0.02, jnp.float32)
    return (w0, b0, w1, b1, w2, b2)


def reference_forward(x_nchw, params):
    """Pure-JAX reference mirroring the kernel numerics (bf16 operands, f32 acc)."""
    w0, b0, w1, b1, w2, b2 = params
    N, C, H, W = x_nchw.shape
    x = x_nchw.reshape(N, C, H * W).astype(jnp.bfloat16)

    def mm(w, a):
        return jnp.einsum("oi,nij->noj", w.astype(jnp.bfloat16), a,
                          preferred_element_type=jnp.float32)

    h = jnp.maximum(mm(w0, x) + b0[None], 0.0)
    h = jnp.maximum(mm(w1, h.astype(jnp.bfloat16)) + b1[None], 0.0)
    y = mm(w2, h.astype(jnp.bfloat16)) + b2[None]
    return y.reshape(N, C_OUT, H, W)


if __name__ == "__main__":
    key = jax.random.PRNGKey(0)
    kx, kp = jax.random.split(key)

    # Small batch/spatial; the channel count (2176) is fixed by the module.
    N, H, W = 2, 16, 16
    x = jax.random.normal(kx, (N, C_IN, H, W), jnp.float32)
    params = init_params(kp)

    out = jax.block_until_ready(local_discriminator(x, params))
    ref = reference_forward(x, params)

    assert out.shape == (N, 1, H, W), out.shape
    max_err = float(jnp.max(jnp.abs(out - ref)))
    assert jnp.allclose(out, ref, atol=1e-2, rtol=1e-2), max_err

    print("KERNEL_OK")
</pallas_src>

<mosaic_0001>
module attributes {stable_mosaic.version = 11 : i64} {
  func.func @local_disc_kernel(%arg0: i32, %arg1: i32, %arg2: memref<1x2176x256xf32, #tpu.memory_space<vmem>>, %arg3: memref<512x2176xbf16, #tpu.memory_space<vmem>>, %arg4: memref<512x1xf32, #tpu.memory_space<vmem>>, %arg5: memref<512x512xbf16, #tpu.memory_space<vmem>>, %arg6: memref<512x1xf32, #tpu.memory_space<vmem>>, %arg7: memref<1x512xbf16, #tpu.memory_space<vmem>>, %arg8: memref<1x1xf32, #tpu.memory_space<vmem>>, %arg9: memref<1x1x256xf32, #tpu.memory_space<vmem>>) attributes {dimension_semantics = [#tpu.dimension_semantics<parallel>, #tpu.dimension_semantics<parallel>], iteration_bounds = array<i64: 2, 1>, scalar_prefetch = 0 : i64, scratch_operands = 0 : i64, tpu.core_type = #tpu.core_type<tc>, window_params = [{transform_indices = @transform_0, window_bounds = array<i64: 1, 2176, 256>}, {pipeline_mode = #tpu.pipeline_mode<synchronous>, transform_indices = @transform_1, window_bounds = array<i64: 512, 2176>}, {pipeline_mode = #tpu.pipeline_mode<synchronous>, transform_indices = @transform_2, window_bounds = array<i64: 512, 1>}, {pipeline_mode = #tpu.pipeline_mode<synchronous>, transform_indices = @transform_3, window_bounds = array<i64: 512, 512>}, {pipeline_mode = #tpu.pipeline_mode<synchronous>, transform_indices = @transform_4, window_bounds = array<i64: 512, 1>}, {pipeline_mode = #tpu.pipeline_mode<synchronous>, transform_indices = @transform_5, window_bounds = array<i64: 1, 512>}, {pipeline_mode = #tpu.pipeline_mode<synchronous>, transform_indices = @transform_6, window_bounds = array<i64: 1, 1>}, {transform_indices = @transform_7, window_bounds = array<i64: 1, 1, 256>}]} {
    %c0 = arith.constant 0 : index
    %c0_0 = arith.constant 0 : index
    %c0_1 = arith.constant 0 : index
    %0 = vector.load %arg2[%c0, %c0_0, %c0_1] : memref<1x2176x256xf32, #tpu.memory_space<vmem>>, vector<1x2176x256xf32>
    %1 = vector.shape_cast %0 : vector<1x2176x256xf32> to vector<2176x256xf32>
    %2 = arith.truncf %1 : vector<2176x256xf32> to vector<2176x256xbf16>
    %c0_2 = arith.constant 0 : index
    %c0_3 = arith.constant 0 : index
    %3 = vector.load %arg3[%c0_2, %c0_3] : memref<512x2176xbf16, #tpu.memory_space<vmem>>, vector<512x2176xbf16>
    %cst = arith.constant dense<0.000000e+00> : vector<512x256xf32>
    %4 = tpu.matmul %3, %2, %cst {dimension_numbers = #tpu.dot_dimension_numbers<[1], [0], [0], [1], [0, 0, 1, 1], [], []>} : vector<512x2176xbf16>, vector<2176x256xbf16>, vector<512x256xf32> -> vector<512x256xf32>
    %c0_4 = arith.constant 0 : index
    %c0_5 = arith.constant 0 : index
    %5 = vector.load %arg4[%c0_4, %c0_5] : memref<512x1xf32, #tpu.memory_space<vmem>>, vector<512x1xf32>
    %6 = vector.broadcast %5 : vector<512x1xf32> to vector<512x256xf32>
    %7 = arith.addf %4, %6 : vector<512x256xf32>
    %cst_6 = arith.constant 0.000000e+00 : f32
    %8 = vector.broadcast %cst_6 : f32 to vector<512x256xf32>
    %9 = arith.maximumf %7, %8 : vector<512x256xf32>
    %c0_7 = arith.constant 0 : index
    %c0_8 = arith.constant 0 : index
    %10 = vector.load %arg5[%c0_7, %c0_8] : memref<512x512xbf16, #tpu.memory_space<vmem>>, vector<512x512xbf16>
    %11 = arith.truncf %9 : vector<512x256xf32> to vector<512x256xbf16>
    %cst_9 = arith.constant dense<0.000000e+00> : vector<512x256xf32>
    %12 = tpu.matmul %10, %11, %cst_9 {dimension_numbers = #tpu.dot_dimension_numbers<[1], [0], [0], [1], [0, 0, 1, 1], [], []>} : vector<512x512xbf16>, vector<512x256xbf16>, vector<512x256xf32> -> vector<512x256xf32>
    %c0_10 = arith.constant 0 : index
    %c0_11 = arith.constant 0 : index
    %13 = vector.load %arg6[%c0_10, %c0_11] : memref<512x1xf32, #tpu.memory_space<vmem>>, vector<512x1xf32>
    %14 = vector.broadcast %13 : vector<512x1xf32> to vector<512x256xf32>
    %15 = arith.addf %12, %14 : vector<512x256xf32>
    %cst_12 = arith.constant 0.000000e+00 : f32
    %16 = vector.broadcast %cst_12 : f32 to vector<512x256xf32>
    %17 = arith.maximumf %15, %16 : vector<512x256xf32>
    %c0_13 = arith.constant 0 : index
    %c0_14 = arith.constant 0 : index
    %18 = vector.load %arg7[%c0_13, %c0_14] : memref<1x512xbf16, #tpu.memory_space<vmem>>, vector<1x512xbf16>
    %19 = arith.truncf %17 : vector<512x256xf32> to vector<512x256xbf16>
    %cst_15 = arith.constant dense<0.000000e+00> : vector<1x256xf32>
    %20 = tpu.matmul %18, %19, %cst_15 {dimension_numbers = #tpu.dot_dimension_numbers<[1], [0], [0], [1], [0, 0, 1, 1], [], []>} : vector<1x512xbf16>, vector<512x256xbf16>, vector<1x256xf32> -> vector<1x256xf32>
    %c0_16 = arith.constant 0 : index
    %c0_17 = arith.constant 0 : index
    %21 = vector.load %arg8[%c0_16, %c0_17] : memref<1x1xf32, #tpu.memory_space<vmem>>, vector<1x1xf32>
    %22 = vector.broadcast %21 : vector<1x1xf32> to vector<1x256xf32>
    %23 = arith.addf %20, %22 : vector<1x256xf32>
    %c0_18 = arith.constant 0 : index
    %c0_19 = arith.constant 0 : index
    %c0_20 = arith.constant 0 : index
    %24 = vector.load %arg9[%c0_18, %c0_19, %c0_20] : memref<1x1x256xf32, #tpu.memory_space<vmem>>, vector<1x1x256xf32>
    %25 = vector.shape_cast %24 : vector<1x1x256xf32> to vector<1x256xf32>
    %26 = vector.shape_cast %23 : vector<1x256xf32> to vector<1x1x256xf32>
    tpu.vector_store %arg9[%c0_18, %c0_19, %c0_20], %26 {strides = array<i32>} : memref<1x1x256xf32, #tpu.memory_space<vmem>>, vector<1x1x256xf32>,
    return
  }
  func.func @transform_0(%arg0: i32, %arg1: i32) -> (i32, i32, i32) {
    %c0_i32 = arith.constant 0 : i32
    %c0_i32_0 = arith.constant 0 : i32
    return %arg0, %c0_i32, %arg1 : i32, i32, i32
  }
  func.func @transform_1(%arg0: i32, %arg1: i32) -> (i32, i32) {
    %c0_i32 = arith.constant 0 : i32
    %c0_i32_0 = arith.constant 0 : i32
    %c0_i32_1 = arith.constant 0 : i32
    return %c0_i32, %c0_i32_0 : i32, i32
  }
  func.func @transform_2(%arg0: i32, %arg1: i32) -> (i32, i32) {
    %c0_i32 = arith.constant 0 : i32
    %c0_i32_0 = arith.constant 0 : i32
    %c0_i32_1 = arith.constant 0 : i32
    return %c0_i32, %c0_i32_0 : i32, i32
  }
  func.func @transform_3(%arg0: i32, %arg1: i32) -> (i32, i32) {
    %c0_i32 = arith.constant 0 : i32
    %c0_i32_0 = arith.constant 0 : i32
    %c0_i32_1 = arith.constant 0 : i32
    return %c0_i32, %c0_i32_0 : i32, i32
  }
  func.func @transform_4(%arg0: i32, %arg1: i32) -> (i32, i32) {
    %c0_i32 = arith.constant 0 : i32
    %c0_i32_0 = arith.constant 0 : i32
    %c0_i32_1 = arith.constant 0 : i32
    return %c0_i32, %c0_i32_0 : i32, i32
  }
  func.func @transform_5(%arg0: i32, %arg1: i32) -> (i32, i32) {
    %c0_i32 = arith.constant 0 : i32
    %c0_i32_0 = arith.constant 0 : i32
    %c0_i32_1 = arith.constant 0 : i32
    return %c0_i32, %c0_i32_0 : i32, i32
  }
  func.func @transform_6(%arg0: i32, %arg1: i32) -> (i32, i32) {
    %c0_i32 = arith.constant 0 : i32
    %c0_i32_0 = arith.constant 0 : i32
    %c0_i32_1 = arith.constant 0 : i32
    return %c0_i32, %c0_i32_0 : i32, i32
  }
  func.func @transform_7(%arg0: i32, %arg1: i32) -> (i32, i32, i32) {
    %c0_i32 = arith.constant 0 : i32
    %c0_i32_0 = arith.constant 0 : i32
    return %arg0, %c0_i32, %arg1 : i32, i32, i32
  }
}

</mosaic_0001>

<bundles_post_ra>
// kernel: local_discriminator.1
= control target key start
LH: loop header
LB: loop body
LE: loop exit
PB: predicated region body
PF: predicated region fallthrough
CT: control target
= control target key end

     0   :  { %s13710_s26 = smov 0   ;;  %s13712_s27 = smov 0   ;;  %s17393_s0 = inlined_call_operand.vmem [shape: f32[2,2176,256], index: 0, kind: input, shape index: {}]   ;;  %s17394_s1 = inlined_call_operand.vmem [shape: bf16[512,2176], index: 1, kind: input, shape index: {}]   ;;  %s17395_s2 = inlined_call_operand.vmem [shape: f32[512,1], index: 2, kind: input, shape index: {}]   ;;  %s17396_s3 = inlined_call_operand.vmem [shape: bf16[512,512], index: 3, kind: input, shape index: {}]   ;;  %s17397_s4 = inlined_call_operand.vmem [shape: f32[512,1], index: 4, kind: input, shape index: {}]   ;;  %s17398_s5 = inlined_call_operand.vmem [shape: bf16[1,512], index: 5, kind: input, shape index: {}]   ;;  %s17399_s6 = inlined_call_operand.<no memory space> [shape: f32[1,1], index: 6, kind: input, shape index: {}]   ;;  %s17400_s7 = inlined_call_operand.vmem [shape: f32[2,1,256], index: 7, kind: output, shape index: {}]  }
   0x1   :  { %v12_v0 = vstv %s17399_s6  ;;  %s13714_s28 = smov 0  }
   0x2   :  { %13 = vst [vmem:[#allocation2] sm:$0x1] %v12_v0 }
   0x3 LB: > { %s31_s6 = sadd.s32 1, %s13659_s27  ;;  %p10496_p0 = scmp.ge.s32.totalorder %s13663_s28, 1  ;;  %s13663_s28 = sphi %s13714_s28, %s19_s28   ;;  %s13659_s27 = sphi %s13712_s27, %s17637_s27   ;;  %s13655_s26 = sphi %s13710_s26, %s17636_s26  }
   0x4   : > { %p33_p1 = scmp.ge.s32.totalorder %s31_s6, 2  ;;  %p260_p2 = scmp.lt.s32.totalorder %s13663_s28, 3 }
   0x6   : > { %s17639_s6 = smov (%p33_p1, %s31_s6), 0  ;;  %p261_p3 = pnand %p10496_p0, %p260_p2 }
   0x8   : > { %264 = sbr.rel (%p261_p3) target bundleno = 2576 (0xa10), region = 48 }
   0xf   : > { %p300_p4 = scmp.lt.s32.totalorder %s13655_s26, 1  ;;  %v12651_v1 = vld [vmem:[%s17394_s1 + $0x1c] ss:$68 sps:$4 sm:$0xff]  }
  0x10   : > { %5938 = vmatprep.mubr.bf16.mxu0 %v12651_v1 }
  0x11   : > { %s17641_s26 = smov (!%p300_p4, %s13655_s26), 1 }
  0x12   : > { %s12620_s8 = smul.u32 4352, %s17641_s26 }
  0x14   : > { %s13737_s11 = scalar_lea.vmem %s17393_s0, %s12620_s8  ;;  %s10498_s8 = sshll.u32 %s17641_s26, 1 }
  0x15   : > { %v512_v2 = vld [vmem:[%s13737_s11 + $0x608] sm:$0xff]  ;;  %v514_v3 = vld [vmem:[%s13737_s11 + $0x618] sm:$0xff]  ;;  %v511_v4 = vld [vmem:[%s13737_s11 + $0x600] sm:$0xff]  ;;  %s316_s12 = scalar_lea.vmem %s17400_s7, %s10498_s8 }
  0x16   : > { %v13742_v5 = vpack.c.bf16 %v514_v3, %v512_v2  ;;  %v513_v6 = vld [vmem:[%s13737_s11 + $0x610] sm:$0xff]  ;;  %v516_v7 = vld [vmem:[%s13737_s11 + $0x628] sm:$0xff]  ;;  %v518_v8 = vld [vmem:[%s13737_s11 + $0x638] sm:$0xff] }
  0x17   : > { %v13747_v9 = vpack.c.bf16 %v513_v6, %v511_v4  ;;  %v13749_v10 = vpack.c.bf16 %v518_v8, %v516_v7  ;;  %v515_v11 = vld [vmem:[%s13737_s11 + $0x620] sm:$0xff]  ;;  %v517_v12 = vld [vmem:[%s13737_s11 + $0x630] sm:$0xff]  ;;  %v520_v13 = vld [vmem:[%s13737_s11 + $0x648] sm:$0xff] }
  0x18   : > { %5906 = vmatprep.subr.bf16.mxu0 %v13742_v5  ;;  %v522_v14 = vld [vmem:[%s13737_s11 + $0x658] sm:$0xff]  ;;  %v13757_v15 = vpack.c.bf16 %v517_v12, %v515_v11  ;;  %v519_v17 = vld [vmem:[%s13737_s11 + $0x640] sm:$0xff]  ;;  %v521_v18 = vld [vmem:[%s13737_s11 + $0x650] sm:$0xff] }
  0x19   : > { %5907 = vmatpush1.bf16.msra.mxu0 %v13747_v9  ;;  %v13760_v16 = vpack.c.bf16 %v522_v14, %v520_v13  ;;  %v524_v19 = vld [vmem:[%s13737_s11 + $0x668] sm:$0xff]  ;;  %v526_v20 = vld [vmem:[%s13737_s11 + $0x678] sm:$0xff]  ;;  %v13767_v21 = vpack.c.bf16 %v521_v18, %v519_v17  ;;  %v523_v23 = vld [vmem:[%s13737_s11 + $0x660] sm:$0xff] }
  0x1a   : > { %5908 = vmatprep.subr.bf16.mxu0 %v13749_v10  ;;  %v13770_v22 = vpack.c.bf16 %v526_v20, %v524_v19  ;;  %v525_v24 = vld [vmem:[%s13737_s11 + $0x670] sm:$0xff]  ;;  %v528_v25 = vld [vmem:[%s13737_s11 + $0x688] sm:$0xff]  ;;  %v530_v26 = vld [vmem:[%s13737_s11 + $0x698] sm:$0xff] }
  0x1b   : > { %v13777_v27 = vpack.c.bf16 %v525_v24, %v523_v23  ;;  %v13780_v28 = vpack.c.bf16 %v530_v26, %v528_v25  ;;  %v527_v29 = vld [vmem:[%s13737_s11 + $0x680] sm:$0xff]  ;;  %v529_v30 = vld [vmem:[%s13737_s11 + $0x690] sm:$0xff]  ;;  %v532_v31 = vld [vmem:[%s13737_s11 + $0x6a8] sm:$0xff] }
  0x1c   : > { %v534_v32 = vld [vmem:[%s13737_s11 + $0x6b8] sm:$0xff]  ;;  %v13787_v33 = vpack.c.bf16 %v529_v30, %v527_v29  ;;  %v531_v35 = vld [vmem:[%s13737_s11 + $0x6a0] sm:$0xff]  ;;  %v533_v36 = vld [vmem:[%s13737_s11 + $0x6b0] sm:$0xff] }
  0x1d   : > { %5909 = vmatpush1.bf16.msra.mxu0 %v13757_v15  ;;  %v13790_v34 = vpack.c.bf16 %v534_v32, %v532_v31  ;;  %v536_v37 = vld [vmem:[%s13737_s11 + $0x6c8] sm:$0xff]  ;;  %v538_v38 = vld [vmem:[%s13737_s11 + $0x6d8] sm:$0xff]  ;;  %v13797_v39 = vpack.c.bf16 %v533_v36, %v531_v35  ;;  %v535_v40 = vld [vmem:[%s13737_s11 + $0x6c0] sm:$0xff] }
  0x1e   : > { %5910 = vmatprep.subr.bf16.mxu0 %v13760_v16  ;;  %v537_v41 = vld [vmem:[%s13737_s11 + $0x6d0] sm:$0xff]  ;;  %v540_v42 = vld [vmem:[%s13737_s11 + $0x6e8] sm:$0xff]  ;;  %v13803_v43 = vpack.c.bf16 %v538_v38, %v536_v37  ;;  %v542_v44 = vld [vmem:[%s13737_s11 + $0x6f8] sm:$0xff] }
  0x1f   : > { %v320_v45 = vld [vmem:[%s13737_s11 + $0x8] sm:$0xff]  ;;  %v322_v46 = vld [vmem:[%s13737_s11 + $0x18] sm:$0xff]  ;;  %v319_v48 = vld [vmem:[%s13737_s11] sm:$0xff]  ;;  %v13815_v55 = vpack.c.bf16 %v537_v41, %v535_v40  ;;  %v13820_v59 = vpack.c.bf16 %v542_v44, %v540_v42 }
  0x20   : > { %v864_v47 = vpack.c.bf16 %v322_v46, %v320_v45  ;;  %v321_v49 = vld [vmem:[%s13737_s11 + $0x10] sm:$0xff]  ;;  %v324_v50 = vld [vmem:[%s13737_s11 + $0x28] sm:$0xff]  ;;  %v326_v52 = vld [vmem:[%s13737_s11 + $0x38] sm:$0xff] }
  0x21   : > { %5911 = vmatpush1.bf16.msra.mxu0 %v13767_v21  ;;  %v863_v51 = vpack.c.bf16 %v321_v49, %v319_v48  ;;  %v323_v53 = vld [vmem:[%s13737_s11 + $0x20] sm:$0xff]  ;;  %v325_v54 = vld [vmem:[%s13737_s11 + $0x30] sm:$0xff]  ;;  %v866_v56 = vpack.c.bf16 %v326_v52, %v324_v50  ;;  %v328_v57 = vld [vmem:[%s13737_s11 + $0x48] sm:$0xff] }
  0x22   : > { %5912 = vmatprep.subr.bf16.mxu0 %v13770_v22  ;;  %4847 = vmatprep.subr.bf16.mxu1 %v864_v47  ;;  %v330_v58 = vld [vmem:[%s13737_s11 + $0x58] sm:$0xff]  ;;  %v539_v60 = vld [vmem:[%s13737_s11 + $0x6e0] sm:$0xff]  ;;  %v541_v61 = vld [vmem:[%s13737_s11 + $0x6f0] sm:$0xff]  ;;  %v865_v63 = vpack.c.bf16 %v325_v54, %v323_v53 }
  0x23   : > { %v544_v62 = vld [vmem:[%s13737_s11 + $0x708] sm:$0xff]  ;;  %4848 = vmatpush1.bf16.msra.mxu1 %v863_v51  ;;  %v546_v0 = vld [vmem:[%s13737_s11 + $0x718] sm:$0xff]  ;;  %v868_v1 = vpack.c.bf16 %v330_v58, %v328_v57  ;;  %v327_v2 = vld [vmem:[%s13737_s11 + $0x40] sm:$0xff]  ;;  %v13831_v7 = vpack.c.bf16 %v541_v61, %v539_v60 }
  0x24   : > { %4849 = vmatprep.subr.bf16.mxu1 %v866_v56  ;;  %v329_v3 = vld [vmem:[%s13737_s11 + $0x50] sm:$0xff]  ;;  %v332_v4 = vld [vmem:[%s13737_s11 + $0x68] sm:$0xff]  ;;  %v334_v6 = vld [vmem:[%s13737_s11 + $0x78] sm:$0xff]  ;;  %v13834_v8 = vpack.c.bf16 %v546_v0, %v544_v62 }
  0x25   : > { %5913 = vmatpush1.bf16.msra.mxu0 %v13777_v27  ;;  %v543_v11 = vld [vmem:[%s13737_s11 + $0x700] sm:$0xff]  ;;  %v545_v12 = vld [vmem:[%s13737_s11 + $0x710] sm:$0xff]  ;;  %v548_v13 = vld [vmem:[%s13737_s11 + $0x728] sm:$0xff]  ;;  %v867_v14 = vpack.c.bf16 %v329_v3, %v327_v2  ;;  %v870_v18 = vpack.c.bf16 %v334_v6, %v332_v4 }
  0x26   : > { %5914 = vmatprep.subr.bf16.mxu0 %v13780_v28  ;;  %v550_v17 = vld [vmem:[%s13737_s11 + $0x738] sm:$0xff]  ;;  %v331_v19 = vld [vmem:[%s13737_s11 + $0x60] sm:$0xff]  ;;  %v333_v20 = vld [vmem:[%s13737_s11 + $0x70] sm:$0xff]  ;;  %v13845_v25 = vpack.c.bf16 %v545_v12, %v543_v11 }
  0x27   : > { %4850 = vmatpush1.bf16.msra.mxu1 %v865_v63  ;;  %v336_v23 = vld [vmem:[%s13737_s11 + $0x88] sm:$0xff]  ;;  %v338_v24 = vld [vmem:[%s13737_s11 + $0x98] sm:$0xff]  ;;  %v547_v26 = vld [vmem:[%s13737_s11 + $0x720] sm:$0xff]  ;;  %v13849_v29 = vpack.c.bf16 %v550_v17, %v548_v13  ;;  %v869_v35 = vpack.c.bf16 %v333_v20, %v331_v19 }
  0x28   : > { %4851 = vmatprep.subr.bf16.mxu1 %v868_v1  ;;  %v549_v30 = vld [vmem:[%s13737_s11 + $0x730] sm:$0xff]  ;;  %v552_v31 = vld [vmem:[%s13737_s11 + $0x748] sm:$0xff]  ;;  %v554_v32 = vld [vmem:[%s13737_s11 + $0x758] sm:$0xff]  ;;  %v872_v36 = vpack.c.bf16 %v338_v24, %v336_v23 }
  0x29   : > { %5915 = vmatpush1.bf16.msra.mxu0 %v13787_v33  ;;  %v335_v37 = vld [vmem:[%s13737_s11 + $0x80] sm:$0xff]  ;;  %v337_v38 = vld [vmem:[%s13737_s11 + $0x90] sm:$0xff]  ;;  %v340_v40 = vld [vmem:[%s13737_s11 + $0xa8] sm:$0xff]  ;;  %v13859_v42 = vpack.c.bf16 %v549_v30, %v547_v26  ;;  %v13863_v45 = vpack.c.bf16 %v554_v32, %v552_v31 }
  0x2a   : > { %5916 = vmatprep.subr.bf16.mxu0 %v13790_v34  ;;  %v342_v41 = vld [vmem:[%s13737_s11 + $0xb8] sm:$0xff]  ;;  %v551_v44 = vld [vmem:[%s13737_s11 + $0x740] sm:$0xff]  ;;  %v553_v46 = vld [vmem:[%s13737_s11 + $0x750] sm:$0xff]  ;;  %v871_v49 = vpack.c.bf16 %v337_v38, %v335_v37 }
  0x2b   : > { %4852 = vmatpush1.bf16.msra.mxu1 %v867_v14  ;;  %v556_v47 = vld [vmem:[%s13737_s11 + $0x768] sm:$0xff]  ;;  %v558_v48 = vld [vmem:[%s13737_s11 + $0x778] sm:$0xff]  ;;  %v874_v50 = vpack.c.bf16 %v342_v41, %v340_v40  ;;  %v339_v51 = vld [vmem:[%s13737_s11 + $0xa0] sm:$0xff]  ;;  %v13873_v56 = vpack.c.bf16 %v553_v46, %v551_v44 }
  0x2c   : > { %4853 = vmatprep.subr.bf16.mxu1 %v870_v18  ;;  %v341_v52 = vld [vmem:[%s13737_s11 + $0xb0] sm:$0xff]  ;;  %v344_v53 = vld [vmem:[%s13737_s11 + $0xc8] sm:$0xff]  ;;  %v346_v54 = vld [vmem:[%s13737_s11 + $0xd8] sm:$0xff]  ;;  %v13877_v58 = vpack.c.bf16 %v558_v48, %v556_v47 }
  0x2d   : > { %5917 = vmatpush1.bf16.msra.mxu0 %v13797_v39  ;;  %v555_v57 = vld [vmem:[%s13737_s11 + $0x760] sm:$0xff]  ;;  %v557_v60 = vld [vmem:[%s13737_s11 + $0x770] sm:$0xff]  ;;  %v560_v61 = vld [vmem:[%s13737_s11 + $0x788] sm:$0xff]  ;;  %v873_v63 = vpack.c.bf16 %v341_v52, %v339_v51  ;;  %v876_v0 = vpack.c.bf16 %v346_v54, %v344_v53 }
  0x2e   : > { %5918 = vmatprep.subr.bf16.mxu0 %v13803_v43  ;;  %v562_v62 = vld [vmem:[%s13737_s11 + $0x798] sm:$0xff]  ;;  %v343_v1 = vld [vmem:[%s13737_s11 + $0xc0] sm:$0xff]  ;;  %v345_v2 = vld [vmem:[%s13737_s11 + $0xd0] sm:$0xff]  ;;  %v13887_v6 = vpack.c.bf16 %v557_v60, %v555_v57 }
  0x2f   : > { %4854 = vmatpush1.bf16.msra.mxu1 %v869_v35  ;;  %v348_v3 = vld [vmem:[%s13737_s11 + $0xe8] sm:$0xff]  ;;  %v350_v4 = vld [vmem:[%s13737_s11 + $0xf8] sm:$0xff]  ;;  %v13890_v11 = vpack.c.bf16 %v562_v62, %v560_v61  ;;  %v559_v12 = vld [vmem:[%s13737_s11 + $0x780] sm:$0xff]  ;;  %v875_v17 = vpack.c.bf16 %v345_v2, %v343_v1 }
  0x30   : > { %4855 = vmatprep.subr.bf16.mxu1 %v872_v36  ;;  %v561_v13 = vld [vmem:[%s13737_s11 + $0x790] sm:$0xff]  ;;  %v564_v14 = vld [vmem:[%s13737_s11 + $0x7a8] sm:$0xff]  ;;  %v566_v18 = vld [vmem:[%s13737_s11 + $0x7b8] sm:$0xff]  ;;  %v878_v19 = vpack.c.bf16 %v350_v4, %v348_v3 }
  0x31   : > { %5919 = vmatpush1.bf16.msra.mxu0 %v13815_v55  ;;  %v347_v20 = vld [vmem:[%s13737_s11 + $0xe0] sm:$0xff]  ;;  %v349_v23 = vld [vmem:[%s13737_s11 + $0xf0] sm:$0xff]  ;;  %v352_v26 = vld [vmem:[%s13737_s11 + $0x108] sm:$0xff]  ;;  %v13902_v31 = vpack.c.bf16 %v561_v13, %v559_v12  ;;  %v13906_v35 = vpack.c.bf16 %v566_v18, %v564_v14 }
  0x32   : > { %5920 = vmatprep.subr.bf16.mxu0 %v13820_v59  ;;  %v563_v24 = vld [vmem:[%s13737_s11 + $0x7a0] sm:$0xff]  ;;  %v354_v30 = vld [vmem:[%s13737_s11 + $0x118] sm:$0xff]  ;;  %v565_v32 = vld [vmem:[%s13737_s11 + $0x7b0] sm:$0xff]  ;;  %v877_v38 = vpack.c.bf16 %v349_v23, %v347_v20 }
  0x33   : > { %4856 = vmatpush1.bf16.msra.mxu1 %v871_v49  ;;  %v568_v36 = vld [vmem:[%s13737_s11 + $0x7c8] sm:$0xff]  ;;  %v570_v37 = vld [vmem:[%s13737_s11 + $0x7d8] sm:$0xff]  ;;  %v351_v40 = vld [vmem:[%s13737_s11 + $0x100] sm:$0xff]  ;;  %v880_v41 = vpack.c.bf16 %v354_v30, %v352_v26 }
  0x34   : > { %4857 = vmatprep.subr.bf16.mxu1 %v874_v50  ;;  %v353_v44 = vld [vmem:[%s13737_s11 + $0x110] sm:$0xff]  ;;  %v567_v46 = vld [vmem:[%s13737_s11 + $0x7c0] sm:$0xff]  ;;  %v356_v47 = vld [vmem:[%s13737_s11 + $0x128] sm:$0xff]  ;;  %v13919_v50 = vpack.c.bf16 %v565_v32, %v563_v24  ;;  %v13923_v52 = vpack.c.bf16 %v570_v37, %v568_v36 }
  0x35   : > { %5921 = vmatpush1.bf16.msra.mxu0 %v13831_v7  ;;  %v358_v48 = vld [vmem:[%s13737_s11 + $0x138] sm:$0xff]  ;;  %v12681_v49 = vld [vmem:[%s17394_s1 + $0x4] ss:$68 sps:$4 sm:$0xff]   ;;  %v569_v51 = vld [vmem:[%s13737_s11 + $0x7d0] sm:$0xff]  ;;  %v879_v57 = vpack.c.bf16 %v353_v44, %v351_v40 }
  0x36   : > { %5922 = vmatprep.subr.bf16.mxu0 %v13834_v8  ;;  %v572_v53 = vld [vmem:[%s13737_s11 + $0x7e8] sm:$0xff]  ;;  %v574_v54 = vld [vmem:[%s13737_s11 + $0x7f8] sm:$0xff]  ;;  %v355_v60 = vld [vmem:[%s13737_s11 + $0x120] sm:$0xff]  ;;  %v882_v61 = vpack.c.bf16 %v358_v48, %v356_v47  ;;  %4879 = vmatprep.mubr.bf16.mxu1 %v12681_v49  ;;  %v13932_v1 = vpack.c.bf16 %v569_v51, %v567_v46 }
  0x37   : > { %4858 = vmatpush1.bf16.msra.mxu1 %v873_v63  ;;  %v357_v62 = vld [vmem:[%s13737_s11 + $0x130] sm:$0xff]  ;;  %v360_v63 = vld [vmem:[%s13737_s11 + $0x148] sm:$0xff]  ;;  %v571_v2 = vld [vmem:[%s13737_s11 + $0x7e0] sm:$0xff]  ;;  %v13937_v4 = vpack.c.bf16 %v574_v54, %v572_v53 }
  0x38   : > { %4859 = vmatprep.subr.bf16.mxu1 %v876_v0  ;;  %v362_v0 = vld [vmem:[%s13737_s11 + $0x158] sm:$0xff]  ;;  %v573_v3 = vld [vmem:[%s13737_s11 + $0x7f0] sm:$0xff]  ;;  %v881_v12 = vpack.c.bf16 %v357_v62, %v355_v60  ;;  %v359_v13 = vld [vmem:[%s13737_s11 + $0x140] sm:$0xff] }
  0x39   : > { %5923 = vmatpush1.bf16.msra.mxu0 %v13845_v25  ;;  %v361_v14 = vld [vmem:[%s13737_s11 + $0x150] sm:$0xff]  ;;  %v884_v18 = vpack.c.bf16 %v362_v0, %v360_v63  ;;  %v364_v20 = vld [vmem:[%s13737_s11 + $0x168] sm:$0xff]  ;;  %v366_v23 = vld [vmem:[%s13737_s11 + $0x178] sm:$0xff]  ;;  %v13946_v24 = vpack.c.bf16 %v573_v3, %v571_v2 }
  0x3a   : > { %5924 = vmatprep.subr.bf16.mxu0 %v13849_v29  ;;  %v363_v26 = vld [vmem:[%s13737_s11 + $0x160] sm:$0xff]  ;;  %v12649_v32 = vld [vmem:[%s17394_s1 + $0x18] ss:$68 sps:$4 sm:$0xff]   ;;  %v883_v36 = vpack.c.bf16 %v361_v14, %v359_v13  ;;  %v365_v44 = vld [vmem:[%s13737_s11 + $0x170] sm:$0xff] }
  0x3b   : > { %4860 = vmatpush1.bf16.msra.mxu1 %v875_v17  ;;  %v576_v17 = vld [vmem:[%s13737_s11 + $0x808] sm:$0xff]  ;;  %v575_v30 = vld [vmem:[%s13737_s11 + $0x800] sm:$0xff]  ;;  %v582_v47 = vld [vmem:[%s13737_s11 + $0x838] sm:$0xff] }
  0x3c   : > { %4861 = vmatprep.subr.bf16.mxu1 %v878_v19  ;;  %v578_v19 = vld [vmem:[%s13737_s11 + $0x818] sm:$0xff]  ;;  %v12652_v40 = vld [vmem:[%s17394_s1 + $0xa4] ss:$68 sps:$4 sm:$0xff]   ;;  %v369_v63 = vld [vmem:[%s13737_s11 + $0x190] sm:$0xff] }
  0x3d   : > { %5925 = vmatpush1.bf16.msra.mxu0 %v13859_v42  ;;  %v992_v37 = vpack.c.bf16 %v578_v19, %v576_v17  ;;  %v580_v46 = vld [vmem:[%s13737_s11 + $0x828] sm:$0xff]  ;;  %v370_v49 = vld [vmem:[%s13737_s11 + $0x198] sm:$0xff]  ;;  %v367_v51 = vld [vmem:[%s13737_s11 + $0x180] sm:$0xff] }
  0x3e   : > { %5926 = vmatprep.subr.bf16.mxu0 %v13863_v45  ;;  %v368_v48 = vld [vmem:[%s13737_s11 + $0x188] sm:$0xff]  ;;  %v579_v54 = vld [vmem:[%s13737_s11 + $0x820] sm:$0xff]  ;;  %v994_v60 = vpack.c.bf16 %v582_v47, %v580_v46  ;;  %v586_v2 = vld [vmem:[%s13737_s11 + $0x858] sm:$0xff] }
  0x3f   : > { %4862 = vmatpush1.bf16.msra.mxu1 %v877_v38  ;;  %v577_v38 = vld [vmem:[%s13737_s11 + $0x810] sm:$0xff]  ;;  %v888_v62 = vpack.c.bf16 %v370_v49, %v368_v48  ;;  %v584_v0 = vld [vmem:[%s13737_s11 + $0x848] sm:$0xff]  ;;  %v371_v13 = vld [vmem:[%s13737_s11 + $0x1a0] sm:$0xff] }
  0x40   : > { %4863 = vmatprep.subr.bf16.mxu1 %v880_v41  ;;  %v886_v41 = vpack.c.bf16 %v366_v23, %v364_v20  ;;  %v991_v53 = vpack.c.bf16 %v577_v38, %v575_v30  ;;  %v372_v3 = vld [vmem:[%s13737_s11 + $0x1a8] sm:$0xff]  ;;  %v373_v14 = vld [vmem:[%s13737_s11 + $0x1b0] sm:$0xff]  ;;  %v12654_v20 = vld [vmem:[%s17394_s1 + $0xa0] ss:$68 sps:$4 sm:$0xff]   ;;  %v887_v23 = vpack.c.bf16 %v369_v63, %v367_v51 }
  0x41   : > { %5927 = vmatpush1.bf16.msra.mxu0 %v13873_v56  ;;  %v585_v19 = vld [vmem:[%s13737_s11 + $0x850] sm:$0xff]  ;;  %v588_v30 = vld [vmem:[%s13737_s11 + $0x868] sm:$0xff]  ;;  %v587_v47 = vld [vmem:[%s13737_s11 + $0x860] sm:$0xff]  ;;  %v889_v49 = vpack.c.bf16 %v373_v14, %v371_v13 }
  0x42   : > { %5928 = vmatprep.subr.bf16.mxu0 %v13877_v58  ;;  %v376_v38 = vld [vmem:[%s13737_s11 + $0x1c8] sm:$0xff]  ;;  %v589_v48 = vld [vmem:[%s13737_s11 + $0x870] sm:$0xff] }
  0x43   : > { %4864 = vmatpush1.bf16.msra.mxu1 %v879_v57  ;;  %v885_v57 = vpack.c.bf16 %v365_v44, %v363_v26  ;;  %v996_v26 = vpack.c.bf16 %v586_v2, %v584_v0  ;;  %v377_v44 = vld [vmem:[%s13737_s11 + $0x1d0] sm:$0xff]  ;;  %v997_v63 = vpack.c.bf16 %v589_v48, %v587_v47  ;;  %v591_v0 = vld [vmem:[%s13737_s11 + $0x880] sm:$0xff] }
  0x44   : > { %4865 = vmatprep.subr.bf16.mxu1 %v882_v61  ;;  %v581_v61 = vld [vmem:[%s13737_s11 + $0x830] sm:$0xff] }
  0x45   : > { %5929 = vmatpush1.bf16.msra.mxu0 %v13887_v6  ;;  %v993_v17 = vpack.c.bf16 %v581_v61, %v579_v54  ;;  %v382_v61 = vld [vmem:[%s13737_s11 + $0x1f8] sm:$0xff]  ;;  %v381_v14 = vld [vmem:[%s13737_s11 + $0x1f0] sm:$0xff] }
  0x46   : > { %5930 = vmatprep.subr.bf16.mxu0 %v13890_v11  ;;  %v601_v48 = vld [vmem:[%s13737_s11 + $0x8d0] sm:$0xff] }
  0x47   : > { %4866 = vmatpush1.bf16.msra.mxu1 %v881_v12  ;;  %v374_v12 = vld [vmem:[%s13737_s11 + $0x1b8] sm:$0xff] }
  0x48   : > { %4867 = vmatprep.subr.bf16.mxu1 %v884_v18  ;;  %v583_v18 = vld [vmem:[%s13737_s11 + $0x840] sm:$0xff] }
  0x49   : > { %5931 = vmatpush1.bf16.msra.mxu0 %v13902_v31  ;;  %v995_v46 = vpack.c.bf16 %v585_v19, %v583_v18  ;;  %v598_v18 = vld [vmem:[%s13737_s11 + $0x8b8] sm:$0xff]  ;;  %v12657_v19 = vld [vmem:[%s17394_s1 + $0x128] ss:$68 sps:$4 sm:$0xff]  }
  0x4a   : > { %5932 = vmatprep.subr.bf16.mxu0 %v13906_v35 }
  0x4b   : > { %4868 = vmatpush1.bf16.msra.mxu1 %v883_v36  ;;  %v590_v36 = vld [vmem:[%s13737_s11 + $0x878] sm:$0xff] }
  0x4c   : > { %4869 = vmatprep.subr.bf16.mxu1 %v886_v41  ;;  %v375_v41 = vld [vmem:[%s13737_s11 + $0x1c0] sm:$0xff]  ;;  %v998_v51 = vpack.c.bf16 %v590_v36, %v588_v30  ;;  %v597_v36 = vld [vmem:[%s13737_s11 + $0x8b0] sm:$0xff] }
  0x4d   : > { %5933 = vmatpush1.bf16.msra.mxu0 %v13919_v50  ;;  %v891_v2 = vpack.c.bf16 %v377_v44, %v375_v41  ;;  %v12685_v41 = vld [vmem:[%s17394_s1 + $0x8c] ss:$68 sps:$4 sm:$0xff]  }
  0x4e   : > { %5934 = vmatprep.subr.bf16.mxu0 %v13923_v52 }
  0x4f   : > { %4870 = vmatpush1.bf16.msra.mxu1 %v885_v57  ;;  %v594_v57 = vld [vmem:[%s13737_s11 + $0x898] sm:$0xff] }
  0x50   : > { %4871 = vmatprep.subr.bf16.mxu1 %v888_v62  ;;  %v379_v62 = vld [vmem:[%s13737_s11 + $0x1e0] sm:$0xff] }
  0x51   : > { %5935 = vmatpush1.bf16.msra.mxu0 %v13932_v1 }
  0x52   : > { %5936 = vmatprep.subr.bf16.mxu0 %v13937_v4 }
  0x53   : > { %4872 = vmatpush1.bf16.msra.mxu1 %v887_v23 }
  0x55   : > { %5937 = vmatpush1.bf16.msra.mxu0 %v13946_v24 }
  0x56   : > { %6259 = vmatprep.subr.bf16.mxu0 %v992_v37  ;;  %v12655_v37 = vld [vmem:[%s17394_s1 + $0x12c] ss:$68 sps:$4 sm:$0xff]  }
  0x58   : > { %5939 = vmatmul.mubr.bf16.vlgmr.msra.gmra.mrb[0].mxu0 %v12649_v32  ;;  %v890_v32 = vpack.c.bf16 %v374_v12, %v372_v3  ;;  %v593_v12 = vld [vmem:[%s13737_s11 + $0x890] sm:$0xff] }
  0x59   : > { %5948 = vmatprep.mubr.bf16.mxu0 %v12652_v40  ;;  %6260 = vmatpush1.bf16.msra.mxu0 %v991_v53  ;;  %v378_v40 = vld [vmem:[%s13737_s11 + $0x1d8] sm:$0xff]  ;;  %v592_v53 = vld [vmem:[%s13737_s11 + $0x888] sm:$0xff]  ;;  %v999_v23 = vpack.c.bf16 %v593_v12, %v591_v0 }
  0x5a   : > { %6261 = vmatprep.subr.bf16.mxu0 %v994_v60  ;;  %4873 = vmatprep.subr.bf16.mxu1 %v890_v32  ;;  %v892_v54 = vpack.c.bf16 %v378_v40, %v376_v38  ;;  %v380_v60 = vld [vmem:[%s13737_s11 + $0x1e8] sm:$0xff]  ;;  %v1000_v3 = vpack.c.bf16 %v594_v57, %v592_v53  ;;  %v595_v32 = vld [vmem:[%s13737_s11 + $0x8a0] sm:$0xff]  ;;  %v602_v38 = vld [vmem:[%s13737_s11 + $0x8d8] sm:$0xff] }
  0x5b   : > { %4874 = vmatpush1.bf16.msra.mxu1 %v889_v49  ;;  %v894_v13 = vpack.c.bf16 %v382_v61, %v380_v60  ;;  %v12679_v40 = vld [vmem:[%s17394_s1] ss:$68 sps:$4 sm:$0xff]   ;;  %v1001_v44 = vpack.c.bf16 %v597_v36, %v595_v32  ;;  %v604_v49 = vld [vmem:[%s13737_s11 + $0x8e8] sm:$0xff]  ;;  %v12660_v53 = vld [vmem:[%s17394_s1 + $0x1b0] ss:$68 sps:$4 sm:$0xff]  }
  0x5c   : > { %4875 = vmatprep.subr.bf16.mxu1 %v892_v54  ;;  %v12661_v54 = vld [vmem:[%s17394_s1 + $0x23c] ss:$68 sps:$4 sm:$0xff]   ;;  %v613_v36 = vld [vmem:[%s13737_s11 + $0x930] sm:$0xff] }
  0x5d   : > { %6262 = vmatpush1.bf16.msra.mxu0 %v993_v17  ;;  %v596_v17 = vld [vmem:[%s13737_s11 + $0x8a8] sm:$0xff]  ;;  %v603_v61 = vld [vmem:[%s13737_s11 + $0x8e0] sm:$0xff]  ;;  %v610_v0 = vld [vmem:[%s13737_s11 + $0x918] sm:$0xff] }
  0x5e   : > { %6263 = vmatprep.subr.bf16.mxu0 %v996_v26  ;;  %v893_v26 = vpack.c.bf16 %v381_v14, %v379_v62  ;;  %v1002_v30 = vpack.c.bf16 %v598_v18, %v596_v17  ;;  %v605_v62 = vld [vmem:[%s13737_s11 + $0x8f0] sm:$0xff]  ;;  %v612_v18 = vld [vmem:[%s13737_s11 + $0x928] sm:$0xff]  ;;  %v611_v32 = vld [vmem:[%s13737_s11 + $0x920] sm:$0xff] }
  0x5f   : > { %4876 = vmatpush1.bf16.msra.mxu1 %v891_v2  ;;  %v12687_v2 = vld [vmem:[%s17394_s1 + $0x88] ss:$68 sps:$4 sm:$0xff]   ;;  %v1005_v12 = vpack.c.bf16 %v605_v62, %v603_v61  ;;  %v609_v17 = vld [vmem:[%s13737_s11 + $0x910] sm:$0xff] }
  0x60   : > { %5949 = vmatmul.mubr.bf16.gmra.mrb[4].mxu0 %v12654_v20  ;;  %v12658_v20 = vld [vmem:[%s17394_s1 + $0x1b4] ss:$68 sps:$4 sm:$0xff]   ;;  %4877 = vmatprep.subr.bf16.mxu1 %v894_v13  ;;  %v607_v13 = vld [vmem:[%s13737_s11 + $0x900] sm:$0xff]  ;;  %v624_v62 = vld [vmem:[%s13737_s11 + $0x988] sm:$0xff] }
  0x61   : > { %5958 = vmatprep.mubr.bf16.mxu0 %v12655_v37  ;;  %6264 = vmatpush1.bf16.msra.mxu0 %v995_v46  ;;  %v600_v37 = vld [vmem:[%s13737_s11 + $0x8c8] sm:$0xff]  ;;  %v599_v46 = vld [vmem:[%s13737_s11 + $0x8c0] sm:$0xff] }
  0x62   : > { %6265 = vmatprep.subr.bf16.mxu0 %v998_v51  ;;  %v1004_v47 = vpack.c.bf16 %v602_v38, %v600_v37  ;;  %v606_v51 = vld [vmem:[%s13737_s11 + $0x8f8] sm:$0xff]  ;;  %v1003_v57 = vpack.c.bf16 %v601_v48, %v599_v46  ;;  %v616_v37 = vld [vmem:[%s13737_s11 + $0x948] sm:$0xff]  ;;  %v615_v46 = vld [vmem:[%s13737_s11 + $0x940] sm:$0xff] }
  0x63   : > { %4878 = vmatpush1.bf16.msra.mxu1 %v893_v26  ;;  %v1006_v60 = vpack.c.bf16 %v606_v51, %v604_v49  ;;  %v1007_v26 = vpack.c.bf16 %v609_v17, %v607_v13  ;;  %v618_v38 = vld [vmem:[%s13737_s11 + $0x958] sm:$0xff]  ;;  %v12666_v48 = vld [vmem:[%s17394_s1 + $0x2c0] ss:$68 sps:$4 sm:$0xff]   ;;  %v620_v51 = vld [vmem:[%s13737_s11 + $0x968] sm:$0xff] }
  0x64   : > { %v1012_v49 = vpack.c.bf16 %v618_v38, %v616_v37  ;;  %v625_v13 = vld [vmem:[%s13737_s11 + $0x990] sm:$0xff]  ;;  %v628_v17 = vld [vmem:[%s13737_s11 + $0x9a8] sm:$0xff]  ;;  %v634_v37 = vld [vmem:[%s13737_s11 + $0x9d8] sm:$0xff] }
  0x65   : > { %6266 = vmatpush1.bf16.msra.mxu0 %v997_v63  ;;  %v608_v63 = vld [vmem:[%s13737_s11 + $0x908] sm:$0xff] }
  0x66   : > { %6267 = vmatprep.subr.bf16.mxu0 %v1000_v3  ;;  %4880 = vmatmul.mubr.bf16.vlgmr.msra.gmra.mrb[0].mxu1 %v12679_v40  ;;  %v12691_v3 = vld [vmem:[%s17394_s1 + $0x114] ss:$68 sps:$4 sm:$0xff]   ;;  %v1008_v14 = vpack.c.bf16 %v610_v0, %v608_v63 }
  0x67   : > { %4889 = vmatprep.mubr.bf16.mxu1 %v12685_v41  ;;  %v12693_v40 = vld [vmem:[%s17394_s1 + $0x110] ss:$68 sps:$4 sm:$0xff]   ;;  %v12697_v41 = vld [vmem:[%s17394_s1 + $0x19c] ss:$68 sps:$4 sm:$0xff]  }
  0x68   : > { %5959 = vmatmul.mubr.bf16.gmra.mrb[8].mxu0 %v12657_v19  ;;  %v614_v19 = vld [vmem:[%s13737_s11 + $0x938] sm:$0xff] }
  0x69   : > { %5968 = vmatprep.mubr.bf16.mxu0 %v12658_v20  ;;  %6268 = vmatpush1.bf16.msra.mxu0 %v999_v23  ;;  %v12663_v20 = vld [vmem:[%s17394_s1 + $0x238] ss:$68 sps:$4 sm:$0xff]   ;;  %v12664_v23 = vld [vmem:[%s17394_s1 + $0x2c4] ss:$68 sps:$4 sm:$0xff]  }
  0x6a   : > { %6269 = vmatprep.subr.bf16.mxu0 %v1002_v30  ;;  %v1010_v30 = vpack.c.bf16 %v614_v19, %v612_v18  ;;  %v626_v63 = vld [vmem:[%s13737_s11 + $0x998] sm:$0xff]  ;;  %v12669_v19 = vld [vmem:[%s17394_s1 + $0x348] ss:$68 sps:$4 sm:$0xff]  }
  0x6b   : > { %v630_v18 = vld [vmem:[%s13737_s11 + $0x9b8] sm:$0xff] }
  0x6c   : > { %v1018_v38 = vpack.c.bf16 %v630_v18, %v628_v17  ;;  %v12678_v17 = vld [vmem:[%s17394_s1 + $0x4e0] ss:$68 sps:$4 sm:$0xff]   ;;  %v12682_v18 = vld [vmem:[%s17394_s1 + $0x56c] ss:$68 sps:$4 sm:$0xff]  }
  0x6d   : > { %6270 = vmatpush1.bf16.msra.mxu0 %v1001_v44  ;;  %v1009_v44 = vpack.c.bf16 %v613_v36, %v611_v32  ;;  %v632_v36 = vld [vmem:[%s13737_s11 + $0x9c8] sm:$0xff] }
  0x6e   : > { %6271 = vmatprep.subr.bf16.mxu0 %v1004_v47  ;;  %4890 = vmatmul.mubr.bf16.gmra.mrb[4].mxu1 %v12687_v2  ;;  %v617_v47 = vld [vmem:[%s13737_s11 + $0x950] sm:$0xff]  ;;  %v12699_v2 = vld [vmem:[%s17394_s1 + $0x198] ss:$68 sps:$4 sm:$0xff]  }
  0x6f   : > { %4899 = vmatprep.mubr.bf16.mxu1 %v12691_v3  ;;  %v1011_v61 = vpack.c.bf16 %v617_v47, %v615_v46  ;;  %v12703_v3 = vld [vmem:[%s17394_s1 + $0x224] ss:$68 sps:$4 sm:$0xff]   ;;  %v633_v46 = vld [vmem:[%s13737_s11 + $0x9d0] sm:$0xff] }
  0x70   : > { %5969 = vmatmul.mubr.bf16.gmra.mrb[12].mxu0 %v12660_v53  ;;  %v12667_v53 = vld [vmem:[%s17394_s1 + $0x34c] ss:$68 sps:$4 sm:$0xff]  }
  0x71   : > { %5978 = vmatprep.mubr.bf16.mxu0 %v12661_v54  ;;  %6272 = vmatpush1.bf16.msra.mxu0 %v1003_v57  ;;  %v622_v54 = vld [vmem:[%s13737_s11 + $0x978] sm:$0xff]  ;;  %v619_v57 = vld [vmem:[%s13737_s11 + $0x960] sm:$0xff] }
  0x72   : > { %6273 = vmatprep.subr.bf16.mxu0 %v1006_v60  ;;  %v621_v60 = vld [vmem:[%s13737_s11 + $0x970] sm:$0xff]  ;;  %v1014_v0 = vpack.c.bf16 %v622_v54, %v620_v51  ;;  %v12673_v54 = vld [vmem:[%s17394_s1 + $0x45c] ss:$68 sps:$4 sm:$0xff]  }
  0x73   : > { %v12672_v51 = vld [vmem:[%s17394_s1 + $0x3d0] ss:$68 sps:$4 sm:$0xff]  }
  0x75   : > { %6274 = vmatpush1.bf16.msra.mxu0 %v1005_v12  ;;  %v623_v12 = vld [vmem:[%s13737_s11 + $0x980] sm:$0xff] }
  0x76   : > { %6275 = vmatprep.subr.bf16.mxu0 %v1008_v14  ;;  %4900 = vmatmul.mubr.bf16.gmra.mrb[8].mxu1 %v12693_v40  ;;  %v1013_v14 = vpack.c.bf16 %v621_v60, %v619_v57  ;;  %v1015_v32 = vpack.c.bf16 %v625_v13, %v623_v12  ;;  %v12705_v40 = vld [vmem:[%s17394_s1 + $0x220] ss:$68 sps:$4 sm:$0xff]   ;;  %v637_v60 = vld [vmem:[%s13737_s11 + $0x9f0] sm:$0xff] }
  0x77   : > { %4909 = vmatprep.mubr.bf16.mxu1 %v12697_v41  ;;  %v12709_v41 = vld [vmem:[%s17394_s1 + $0x2ac] ss:$68 sps:$4 sm:$0xff]   ;;  %v635_v57 = vld [vmem:[%s13737_s11 + $0x9e0] sm:$0xff] }
  0x78   : > { %5979 = vmatmul.mubr.bf16.gmra.mrb[16].mxu0 %v12663_v20  ;;  %v1016_v20 = vpack.c.bf16 %v626_v63, %v624_v62  ;;  %v12711_v63 = vld [vmem:[%s17394_s1 + $0x2a8] ss:$68 sps:$4 sm:$0xff]   ;;  %v12717_v13 = vld [vmem:[%s17394_s1 + $0x330] ss:$68 sps:$4 sm:$0xff]  }
  0x79   : > { %5988 = vmatprep.mubr.bf16.mxu0 %v12664_v23  ;;  %6276 = vmatpush1.bf16.msra.mxu0 %v1007_v26  ;;  %v12670_v23 = vld [vmem:[%s17394_s1 + $0x3d4] ss:$68 sps:$4 sm:$0xff]   ;;  %v627_v26 = vld [vmem:[%s13737_s11 + $0x9a0] sm:$0xff] }
  0x7a   : > { %6277 = vmatprep.subr.bf16.mxu0 %v1010_v30  ;;  %v629_v30 = vld [vmem:[%s13737_s11 + $0x9b0] sm:$0xff]  ;;  %v12676_v12 = vld [vmem:[%s17394_s1 + $0x4e4] ss:$68 sps:$4 sm:$0xff]  }
  0x7b   : > { %v1017_v47 = vpack.c.bf16 %v629_v30, %v627_v26  ;;  %v12688_v26 = vld [vmem:[%s17394_s1 + $0x5f4] ss:$68 sps:$4 sm:$0xff]   ;;  %v12729_v30 = vld [vmem:[%s17394_s1 + $0x440] ss:$68 sps:$4 sm:$0xff]  }
  0x7d   : > { %6278 = vmatpush1.bf16.msra.mxu0 %v1009_v44  ;;  %v631_v44 = vld [vmem:[%s13737_s11 + $0x9c0] sm:$0xff] }
  0x7e   : > { %6279 = vmatprep.subr.bf16.mxu0 %v1012_v49  ;;  %4910 = vmatmul.mubr.bf16.gmra.mrb[12].mxu1 %v12699_v2  ;;  %v638_v49 = vld [vmem:[%s13737_s11 + $0x9f8] sm:$0xff]  ;;  %v1021_v2 = vpack.c.bf16 %v637_v60, %v635_v57  ;;  %v12708_v57 = vld [vmem:[%s17394_s1 + $0x788] ss:$68 sps:$4 sm:$0xff]  }
  0x7f   : > { %4919 = vmatprep.mubr.bf16.mxu1 %v12703_v3  ;;  %v12675_v3 = vld [vmem:[%s17394_s1 + $0x458] ss:$68 sps:$4 sm:$0xff]   ;;  %v12751_v60 = vld [vmem:[%s17394_s1 + $0x664] ss:$68 sps:$4 sm:$0xff]  }
  0x80   : > { %5989 = vmatmul.mubr.bf16.gmra.mrb[20].mxu0 %v12666_v48  ;;  %v636_v48 = vld [vmem:[%s13737_s11 + $0x9e8] sm:$0xff] }
  0x81   : > { %5998 = vmatprep.mubr.bf16.mxu0 %v12667_v53  ;;  %6280 = vmatpush1.bf16.msra.mxu0 %v1011_v61  ;;  %v1020_v53 = vpack.c.bf16 %v634_v37, %v632_v36  ;;  %v1019_v61 = vpack.c.bf16 %v633_v46, %v631_v44  ;;  %v1022_v62 = vpack.c.bf16 %v638_v49, %v636_v48  ;;  %v12690_v36 = vld [vmem:[%s17394_s1 + $0x5f0] ss:$68 sps:$4 sm:$0xff]   ;;  %v12694_v37 = vld [vmem:[%s17394_s1 + $0x67c] ss:$68 sps:$4 sm:$0xff]   ;;  %v12700_v44 = vld [vmem:[%s17394_s1 + $0x704] ss:$68 sps:$4 sm:$0xff]  }
  0x82   : > { %6281 = vmatprep.subr.bf16.mxu0 %v1014_v0  ;;  %v12715_v0 = vld [vmem:[%s17394_s1 + $0x334] ss:$68 sps:$4 sm:$0xff]   ;;  %v12702_v48 = vld [vmem:[%s17394_s1 + $0x700] ss:$68 sps:$4 sm:$0xff]   ;;  %v12706_v49 = vld [vmem:[%s17394_s1 + $0x78c] ss:$68 sps:$4 sm:$0xff]  }
  0x83   : > { %v12741_v46 = vld [vmem:[%s17394_s1 + $0x550] ss:$68 sps:$4 sm:$0xff]  }
  0x85   : > { %6282 = vmatpush1.bf16.msra.mxu0 %v1013_v14  ;;  %v12721_v14 = vld [vmem:[%s17394_s1 + $0x3bc] ss:$68 sps:$4 sm:$0xff]  }
  0x86   : > { %6283 = vmatprep.subr.bf16.mxu0 %v1016_v20  ;;  %4920 = vmatmul.mubr.bf16.gmra.mrb[16].mxu1 %v12705_v40  ;;  %v12727_v20 = vld [vmem:[%s17394_s1 + $0x444] ss:$68 sps:$4 sm:$0xff]   ;;  %v12739_v40 = vld [vmem:[%s17394_s1 + $0x554] ss:$68 sps:$4 sm:$0xff]  }
  0x87   : > { %4929 = vmatprep.mubr.bf16.mxu1 %v12709_v41  ;;  %v12696_v41 = vld [vmem:[%s17394_s1 + $0x678] ss:$68 sps:$4 sm:$0xff]  }
  0x88   : > { %5999 = vmatmul.mubr.bf16.gmra.mrb[24].mxu0 %v12669_v19  ;;  %v12723_v19 = vld [vmem:[%s17394_s1 + $0x3b8] ss:$68 sps:$4 sm:$0xff]  }
  0x89   : > { %6008 = vmatprep.mubr.bf16.mxu0 %v12670_v23  ;;  %6284 = vmatpush1.bf16.msra.mxu0 %v1015_v32  ;;  %v12684_v23 = vld [vmem:[%s17394_s1 + $0x568] ss:$68 sps:$4 sm:$0xff]  }
  0x8a   : > { %6285 = vmatprep.subr.bf16.mxu0 %v1018_v38  ;;  %v12733_v32 = vld [vmem:[%s17394_s1 + $0x4cc] ss:$68 sps:$4 sm:$0xff]  }
  0x8b   : > { %v12735_v38 = vld [vmem:[%s17394_s1 + $0x4c8] ss:$68 sps:$4 sm:$0xff]  }
  0x8d   : > { %6286 = vmatpush1.bf16.msra.mxu0 %v1017_v47  ;;  %v12745_v47 = vld [vmem:[%s17394_s1 + $0x5dc] ss:$68 sps:$4 sm:$0xff]  }
  0x8e   : > { %6287 = vmatprep.subr.bf16.mxu0 %v1020_v53  ;;  %4930 = vmatmul.mubr.bf16.gmra.mrb[20].mxu1 %v12711_v63  ;;  %v12747_v53 = vld [vmem:[%s17394_s1 + $0x5d8] ss:$68 sps:$4 sm:$0xff]   ;;  %v12753_v63 = vld [vmem:[%s17394_s1 + $0x660] ss:$68 sps:$4 sm:$0xff]  }
  0x8f   : > { %4939 = vmatprep.mubr.bf16.mxu1 %v12715_v0  ;;  %v12757_v0 = vld [vmem:[%s17394_s1 + $0x6ec] ss:$68 sps:$4 sm:$0xff]  }
  0x90   : > { %6009 = vmatmul.mubr.bf16.gmra.mrb[28].mxu0 %v12672_v51  ;;  %v640_v51 = vld [vmem:[%s13737_s11 + $0xa08] sm:$0xff] }
  0x91   : > { %6018 = vmatprep.mubr.bf16.mxu0 %v12673_v54  ;;  %6288 = vmatpush1.bf16.msra.mxu0 %v1019_v61  ;;  %v642_v54 = vld [vmem:[%s13737_s11 + $0xa18] sm:$0xff] }
  0x92   : > { %6289 = vmatprep.subr.bf16.mxu0 %v1022_v62  ;;  %v1024_v61 = vpack.c.bf16 %v642_v54, %v640_v51  ;;  %v12712_v62 = vld [vmem:[%s17394_s1 + $0x814] ss:$68 sps:$4 sm:$0xff]  }
  0x93   : > { %v389_v51 = vld [vmem:[%s13737_s11 + $0x230] sm:$0xff] }
  0x95   : > { %6290 = vmatpush1.bf16.msra.mxu0 %v1021_v2  ;;  %v12714_v2 = vld [vmem:[%s17394_s1 + $0x810] ss:$68 sps:$4 sm:$0xff]  }
  0x96   : > { %4940 = vmatmul.mubr.bf16.gmra.mrb[24].mxu1 %v12717_v13  ;;  %6612 = vmatprep.subr.bf16.mxu0 %v1024_v61  ;;  %v12720_v13 = vld [vmem:[%s17394_s1 + $0x898] ss:$68 sps:$4 sm:$0xff]  }
  0x97   : > { %4949 = vmatprep.mubr.bf16.mxu1 %v12721_v14  ;;  %v12763_v14 = vld [vmem:[%s17394_s1 + $0x774] ss:$68 sps:$4 sm:$0xff]  }
  0x98   : > { %6019 = vmatmul.mubr.bf16.gmra.mrb[32].mxu0 %v12675_v3  ;;  %v12718_v3 = vld [vmem:[%s17394_s1 + $0x89c] ss:$68 sps:$4 sm:$0xff]  }
  0x99   : > { %6028 = vmatprep.mubr.bf16.mxu0 %v12676_v12  ;;  %v12759_v12 = vld [vmem:[%s17394_s1 + $0x6e8] ss:$68 sps:$4 sm:$0xff]   ;;  %v394_v61 = vld [vmem:[%s13737_s11 + $0x258] sm:$0xff] }
  0x9e   : > { %4950 = vmatmul.mubr.bf16.gmra.mrb[28].mxu1 %v12723_v19  ;;  %v12769_v19 = vld [vmem:[%s17394_s1 + $0x7fc] ss:$68 sps:$4 sm:$0xff]  }
  0x9f   : > { %4959 = vmatprep.mubr.bf16.mxu1 %v12727_v20  ;;  %v12726_v20 = vld [vmem:[%s17394_s1 + $0x920] ss:$68 sps:$4 sm:$0xff]  }
  0xa0   : > { %6029 = vmatmul.mubr.bf16.gmra.mrb[36].mxu0 %v12678_v17  ;;  %v12724_v17 = vld [vmem:[%s17394_s1 + $0x924] ss:$68 sps:$4 sm:$0xff]  }
  0xa1   : > { %6038 = vmatprep.mubr.bf16.mxu0 %v12682_v18  ;;  %v12765_v18 = vld [vmem:[%s17394_s1 + $0x770] ss:$68 sps:$4 sm:$0xff]  }
  0xa6   : > { %4960 = vmatmul.mubr.bf16.gmra.mrb[32].mxu1 %v12729_v30  ;;  %v12771_v30 = vld [vmem:[%s17394_s1 + $0x7f8] ss:$68 sps:$4 sm:$0xff]  }
  0xa7   : > { %4969 = vmatprep.mubr.bf16.mxu1 %v12733_v32  ;;  %v386_v32 = vld [vmem:[%s13737_s11 + $0x218] sm:$0xff] }
  0xa8   : > { %6039 = vmatmul.mubr.bf16.gmra.mrb[40].mxu0 %v12684_v23  ;;  %v12730_v23 = vld [vmem:[%s17394_s1 + $0x9ac] ss:$68 sps:$4 sm:$0xff]  }
  0xa9   : > { %6048 = vmatprep.mubr.bf16.mxu0 %v12688_v26  ;;  %v384_v26 = vld [vmem:[%s13737_s11 + $0x208] sm:$0xff] }
  0xae   : > { %4970 = vmatmul.mubr.bf16.gmra.mrb[36].mxu1 %v12735_v38  ;;  %v383_v38 = vld [vmem:[%s13737_s11 + $0x200] sm:$0xff] }
  0xaf   : > { %4979 = vmatprep.mubr.bf16.mxu1 %v12739_v40  ;;  %v385_v40 = vld [vmem:[%s13737_s11 + $0x210] sm:$0xff] }
  0xb0   : > { %6049 = vmatmul.mubr.bf16.gmra.mrb[44].mxu0 %v12690_v36  ;;  %v12775_v36 = vld [vmem:[%s17394_s1 + $0x884] ss:$68 sps:$4 sm:$0xff]  }
  0xb1   : > { %6058 = vmatprep.mubr.bf16.mxu0 %v12694_v37  ;;  %v896_v37 = vpack.c.bf16 %v386_v32, %v384_v26  ;;  %v400_v26 = vld [vmem:[%s13737_s11 + $0x288] sm:$0xff]  ;;  %v402_v32 = vld [vmem:[%s13737_s11 + $0x298] sm:$0xff] }
  0xb3   : > { %5200 = vmatprep.subr.bf16.mxu1 %v896_v37  ;;  %v904_v37 = vpack.c.bf16 %v402_v32, %v400_v26  ;;  %v413_v32 = vld [vmem:[%s13737_s11 + $0x2f0] sm:$0xff] }
  0xb6   : > { %4980 = vmatmul.mubr.bf16.gmra.mrb[40].mxu1 %v12741_v46  ;;  %v390_v46 = vld [vmem:[%s13737_s11 + $0x238] sm:$0xff] }
  0xb7   : > { %4989 = vmatprep.mubr.bf16.mxu1 %v12745_v47  ;;  %v12732_v47 = vld [vmem:[%s17394_s1 + $0x9a8] ss:$68 sps:$4 sm:$0xff]  }
  0xb8   : > { %6059 = vmatmul.mubr.bf16.gmra.mrb[48].mxu0 %v12696_v41  ;;  %v895_v41 = vpack.c.bf16 %v385_v40, %v383_v38  ;;  %v399_v38 = vld [vmem:[%s13737_s11 + $0x280] sm:$0xff]  ;;  %v401_v40 = vld [vmem:[%s13737_s11 + $0x290] sm:$0xff] }
  0xb9   : > { %6068 = vmatprep.mubr.bf16.mxu0 %v12700_v44  ;;  %v388_v44 = vld [vmem:[%s13737_s11 + $0x228] sm:$0xff] }
  0xba   : > { %5201 = vmatpush1.bf16.msra.mxu1 %v895_v41  ;;  %v903_v41 = vpack.c.bf16 %v401_v40, %v399_v38  ;;  %v648_v40 = vld [vmem:[%s13737_s11 + $0xa48] sm:$0xff] }
  0xbe   : > { %4990 = vmatmul.mubr.bf16.gmra.mrb[44].mxu1 %v12747_v53  ;;  %v12736_v53 = vld [vmem:[%s17394_s1 + $0xa34] ss:$68 sps:$4 sm:$0xff]  }
  0xbf   : > { %4999 = vmatprep.mubr.bf16.mxu1 %v12751_v60  ;;  %v392_v60 = vld [vmem:[%s13737_s11 + $0x248] sm:$0xff] }
  0xc0   : > { %6069 = vmatmul.mubr.bf16.gmra.mrb[52].mxu0 %v12702_v48  ;;  %v898_v48 = vpack.c.bf16 %v390_v46, %v388_v44  ;;  %v404_v44 = vld [vmem:[%s13737_s11 + $0x2a8] sm:$0xff]  ;;  %v406_v46 = vld [vmem:[%s13737_s11 + $0x2b8] sm:$0xff] }
  0xc1   : > { %6078 = vmatprep.mubr.bf16.mxu0 %v12706_v49  ;;  %v387_v49 = vld [vmem:[%s13737_s11 + $0x220] sm:$0xff] }
  0xc2   : > { %v897_v54 = vpack.c.bf16 %v389_v51, %v387_v49  ;;  %5202 = vmatprep.subr.bf16.mxu1 %v898_v48  ;;  %v906_v48 = vpack.c.bf16 %v406_v46, %v404_v44  ;;  %v403_v49 = vld [vmem:[%s13737_s11 + $0x2a0] sm:$0xff]  ;;  %v405_v51 = vld [vmem:[%s13737_s11 + $0x2b0] sm:$0xff] }
  0xc4   : > { %5203 = vmatpush1.bf16.msra.mxu1 %v897_v54  ;;  %v905_v54 = vpack.c.bf16 %v405_v51, %v403_v49  ;;  %v416_v49 = vld [vmem:[%s13737_s11 + $0x308] sm:$0xff] }
  0xc6   : > { %5000 = vmatmul.mubr.bf16.gmra.mrb[48].mxu1 %v12753_v63  ;;  %v393_v63 = vld [vmem:[%s13737_s11 + $0x250] sm:$0xff] }
  0xc7   : > { %5009 = vmatprep.mubr.bf16.mxu1 %v12757_v0  ;;  %v12738_v0 = vld [vmem:[%s17394_s1 + $0xa30] ss:$68 sps:$4 sm:$0xff]  }
  0xc8   : > { %6079 = vmatmul.mubr.bf16.gmra.mrb[56].mxu0 %v12708_v57  ;;  %v12777_v57 = vld [vmem:[%s17394_s1 + $0x880] ss:$68 sps:$4 sm:$0xff]  }
  0xc9   : > { %6088 = vmatprep.mubr.bf16.mxu0 %v12712_v62  ;;  %v391_v62 = vld [vmem:[%s13737_s11 + $0x240] sm:$0xff] }
  0xce   : > { %5010 = vmatmul.mubr.bf16.gmra.mrb[52].mxu1 %v12759_v12  ;;  %v899_v12 = vpack.c.bf16 %v393_v63, %v391_v62  ;;  %v641_v62 = vld [vmem:[%s13737_s11 + $0xa10] sm:$0xff]  ;;  %v408_v63 = vld [vmem:[%s13737_s11 + $0x2c8] sm:$0xff] }
  0xcf   : > { %5019 = vmatprep.mubr.bf16.mxu1 %v12763_v14  ;;  %v398_v14 = vld [vmem:[%s13737_s11 + $0x278] sm:$0xff] }
  0xd0   : > { %6089 = vmatmul.mubr.bf16.gmra.mrb[60].mxu0 %v12714_v2  ;;  %v12781_v2 = vld [vmem:[%s17394_s1 + $0x90c] ss:$68 sps:$4 sm:$0xff]  }
  0xd1   : > { %6098 = vmatprep.mubr.bf16.mxu0 %v12718_v3  ;;  %v900_v3 = vpack.c.bf16 %v394_v61, %v392_v60  ;;  %v12793_v60 = vld [vmem:[%s17394_s1 + $0xa1c] ss:$68 sps:$4 sm:$0xff]  }
  0xd2   : > { %v639_v61 = vld [vmem:[%s13737_s11 + $0xa00] sm:$0xff] }
  0xd3   : > { %5204 = vmatprep.subr.bf16.mxu1 %v900_v3  ;;  %v409_v3 = vld [vmem:[%s13737_s11 + $0x2d0] sm:$0xff]  ;;  %v1023_v38 = vpack.c.bf16 %v641_v62, %v639_v61  ;;  %v652_v62 = vld [vmem:[%s13737_s11 + $0xa68] sm:$0xff] }
  0xd4   : > { %5205 = vmatpush1.bf16.msra.mxu1 %v899_v12  ;;  %v12748_v12 = vld [vmem:[%s17394_s1 + $0x20] ss:$68 sps:$4 sm:$0xff]  }
  0xd6   : > { %5020 = vmatmul.mubr.bf16.gmra.mrb[56].mxu1 %v12765_v18 }
  0xd7   : > { %5029 = vmatprep.mubr.bf16.mxu1 %v12769_v19  ;;  %v395_v19 = vld [vmem:[%s13737_s11 + $0x260] sm:$0xff] }
  0xd8   : > { %6099 = vmatmul.mubr.bf16.gmra.mrb[64].mxu0 %v12720_v13  ;;  %v396_v13 = vld [vmem:[%s13737_s11 + $0x268] sm:$0xff] }
  0xd9   : > { %6108 = vmatprep.mubr.bf16.mxu0 %v12724_v17  ;;  %v12742_v17 = vld [vmem:[%s17394_s1 + $0xabc] ss:$68 sps:$4 sm:$0xff]   ;;  %v902_v18 = vpack.c.bf16 %v398_v14, %v396_v13  ;;  %v644_v13 = vld [vmem:[%s13737_s11 + $0xa28] sm:$0xff] }
  0xdb   : > { %5206 = vmatprep.subr.bf16.mxu1 %v902_v18  ;;  %v412_v18 = vld [vmem:[%s13737_s11 + $0x2e8] sm:$0xff] }
  0xde   : > { %5030 = vmatmul.mubr.bf16.gmra.mrb[60].mxu1 %v12771_v30  ;;  %v12783_v30 = vld [vmem:[%s17394_s1 + $0x908] ss:$68 sps:$4 sm:$0xff]  }
  0xdf   : > { %5039 = vmatprep.mubr.bf16.mxu1 %v12775_v36  ;;  %v12787_v36 = vld [vmem:[%s17394_s1 + $0x994] ss:$68 sps:$4 sm:$0xff]  }
  0xe0   : > { %6109 = vmatmul.mubr.bf16.gmra.mrb[68].mxu0 %v12726_v20  ;;  %v397_v20 = vld [vmem:[%s13737_s11 + $0x270] sm:$0xff] }
  0xe1   : > { %6118 = vmatprep.mubr.bf16.mxu0 %v12730_v23  ;;  %v901_v23 = vpack.c.bf16 %v397_v20, %v395_v19  ;;  %v414_v19 = vld [vmem:[%s13737_s11 + $0x2f8] sm:$0xff]  ;;  %v12754_v20 = vld [vmem:[%s17394_s1 + $0xac] ss:$68 sps:$4 sm:$0xff]  }
  0xe2   : > { %v910_v26 = vpack.c.bf16 %v414_v19, %v412_v18  ;;  %v651_v18 = vld [vmem:[%s13737_s11 + $0xa60] sm:$0xff]  ;;  %v653_v19 = vld [vmem:[%s13737_s11 + $0xa70] sm:$0xff] }
  0xe3   : > { %5207 = vmatpush1.bf16.msra.mxu1 %v901_v23  ;;  %v646_v23 = vld [vmem:[%s13737_s11 + $0xa38] sm:$0xff] }
  0xe4   : > { %5208 = vmatprep.subr.bf16.mxu1 %v904_v37  ;;  %v645_v37 = vld [vmem:[%s13737_s11 + $0xa30] sm:$0xff]  ;;  %v1026_v44 = vpack.c.bf16 %v646_v23, %v644_v13  ;;  %v419_v23 = vld [vmem:[%s13737_s11 + $0x320] sm:$0xff] }
  0xe6   : > { %5040 = vmatmul.mubr.bf16.gmra.mrb[64].mxu1 %v12777_v57  ;;  %v12789_v57 = vld [vmem:[%s17394_s1 + $0x990] ss:$68 sps:$4 sm:$0xff]  }
  0xe7   : > { %5049 = vmatprep.mubr.bf16.mxu1 %v12781_v2  ;;  %5209 = vmatpush1.bf16.msra.mxu1 %v903_v41  ;;  %v407_v2 = vld [vmem:[%s13737_s11 + $0x2c0] sm:$0xff]  ;;  %v650_v41 = vld [vmem:[%s13737_s11 + $0xa58] sm:$0xff] }
  0xe8   : > { %6119 = vmatmul.mubr.bf16.gmra.mrb[72].mxu0 %v12732_v47  ;;  %v12744_v47 = vld [vmem:[%s17394_s1 + $0xab8] ss:$68 sps:$4 sm:$0xff]   ;;  %5210 = vmatprep.subr.bf16.mxu1 %v906_v48  ;;  %v12799_v48 = vld [vmem:[%s17394_s1 + $0xaa4] ss:$68 sps:$4 sm:$0xff]   ;;  %v1028_v61 = vpack.c.bf16 %v650_v41, %v648_v40  ;;  %v12805_v41 = vld [vmem:[%s17394_s1 + $0xb2c] ss:$68 sps:$4 sm:$0xff]  }
  0xe9   : > { %6128 = vmatprep.mubr.bf16.mxu0 %v12736_v53  ;;  %v12750_v53 = vld [vmem:[%s17394_s1 + $0x24] ss:$68 sps:$4 sm:$0xff]  }
  0xeb   : > { %5211 = vmatpush1.bf16.msra.mxu1 %v905_v54  ;;  %v649_v54 = vld [vmem:[%s13737_s11 + $0xa50] sm:$0xff] }
  0xee   : > { %5050 = vmatmul.mubr.bf16.gmra.mrb[68].mxu1 %v12783_v30  ;;  %v411_v30 = vld [vmem:[%s13737_s11 + $0x2e0] sm:$0xff] }
  0xef   : > { %5059 = vmatprep.mubr.bf16.mxu1 %v12787_v36  ;;  %v643_v36 = vld [vmem:[%s13737_s11 + $0xa20] sm:$0xff]  ;;  %v909_v46 = vpack.c.bf16 %v413_v32, %v411_v30  ;;  %v656_v32 = vld [vmem:[%s13737_s11 + $0xa88] sm:$0xff] }
  0xf0   : > { %6129 = vmatmul.mubr.bf16.gmra.mrb[76].mxu0 %v12738_v0  ;;  %v410_v0 = vld [vmem:[%s13737_s11 + $0x2d8] sm:$0xff]  ;;  %v1025_v51 = vpack.c.bf16 %v645_v37, %v643_v36 }
  0xf1   : > { %6138 = vmatprep.mubr.bf16.mxu0 %v12742_v17  ;;  %v908_v14 = vpack.c.bf16 %v410_v0, %v408_v63  ;;  %v907_v17 = vpack.c.bf16 %v409_v3, %v407_v2  ;;  %v415_v0 = vld [vmem:[%s13737_s11 + $0x300] sm:$0xff]  ;;  %v417_v2 = vld [vmem:[%s13737_s11 + $0x310] sm:$0xff]  ;;  %v658_v36 = vld [vmem:[%s13737_s11 + $0xa98] sm:$0xff] }
  0xf2   : > { %v12760_v3 = vld [vmem:[%s17394_s1 + $0x134] ss:$68 sps:$4 sm:$0xff]   ;;  %v911_v13 = vpack.c.bf16 %v417_v2, %v415_v0  ;;  %v427_v2 = vld [vmem:[%s13737_s11 + $0x360] sm:$0xff] }
  0xf3   : > { %5212 = vmatprep.subr.bf16.mxu1 %v908_v14  ;;  %v420_v14 = vld [vmem:[%s13737_s11 + $0x328] sm:$0xff] }
  0xf4   : > { %5213 = vmatpush1.bf16.msra.mxu1 %v907_v17  ;;  %v422_v17 = vld [vmem:[%s13737_s11 + $0x338] sm:$0xff] }
  0xf5   : > { %5214 = vmatprep.subr.bf16.mxu1 %v910_v26  ;;  %v421_v26 = vld [vmem:[%s13737_s11 + $0x330] sm:$0xff] }
  0xf6   : > { %5060 = vmatmul.mubr.bf16.gmra.mrb[72].mxu1 %v12789_v57  ;;  %v418_v57 = vld [vmem:[%s13737_s11 + $0x318] sm:$0xff]  ;;  %v913_v40 = vpack.c.bf16 %v421_v26, %v419_v23  ;;  %v660_v23 = vld [vmem:[%s13737_s11 + $0xaa8] sm:$0xff] }
  0xf7   : > { %5069 = vmatprep.mubr.bf16.mxu1 %v12793_v60  ;;  %v12756_v60 = vld [vmem:[%s17394_s1 + $0xa8] ss:$68 sps:$4 sm:$0xff]   ;;  %v912_v63 = vpack.c.bf16 %v418_v57, %v416_v49  ;;  %v423_v49 = vld [vmem:[%s13737_s11 + $0x340] sm:$0xff]  ;;  %v657_v57 = vld [vmem:[%s13737_s11 + $0xa90] sm:$0xff] }
  0xf8   : > { %6139 = vmatmul.mubr.bf16.gmra.mrb[80].mxu0 %v12744_v47  ;;  %v12795_v47 = vld [vmem:[%s17394_s1 + $0xa18] ss:$68 sps:$4 sm:$0xff]   ;;  %5215 = vmatpush1.bf16.msra.mxu1 %v909_v46  ;;  %v424_v46 = vld [vmem:[%s13737_s11 + $0x348] sm:$0xff] }
  0xf9   : > { %6291 = vmatprep.mubr.bf16.mxu0 %v12750_v53  ;;  %v647_v53 = vld [vmem:[%s13737_s11 + $0xa40] sm:$0xff]  ;;  %5216 = vmatprep.subr.bf16.mxu1 %v912_v63  ;;  %v662_v26 = vld [vmem:[%s13737_s11 + $0xab8] sm:$0xff] }
  0xfa   : > { %v1027_v30 = vpack.c.bf16 %v649_v54, %v647_v53  ;;  %v12762_v53 = vld [vmem:[%s17394_s1 + $0x130] ss:$68 sps:$4 sm:$0xff]   ;;  %v1032_v54 = vpack.c.bf16 %v658_v36, %v656_v32  ;;  %v12766_v63 = vld [vmem:[%s17394_s1 + $0x1bc] ss:$68 sps:$4 sm:$0xff]   ;;  %v1034_v32 = vpack.c.bf16 %v662_v26, %v660_v23 }
  0xfb   : > { %v431_v36 = vld [vmem:[%s13737_s11 + $0x380] sm:$0xff] }
  0xfc   : > { %5217 = vmatpush1.bf16.msra.mxu1 %v911_v13 }
  0xfe   : > { %5070 = vmatmul.mubr.bf16.gmra.mrb[76].mxu1 %v12795_v47  ;;  %v1029_v47 = vpack.c.bf16 %v653_v19, %v651_v18  ;;  %v12811_v18 = vld [vmem:[%s17394_s1 + $0xbb4] ss:$68 sps:$4 sm:$0xff]   ;;  %v432_v19 = vld [vmem:[%s13737_s11 + $0x388] sm:$0xff] }
  0xff   : > { %5079 = vmatprep.mubr.bf16.mxu1 %v12799_v48  ;;  %v426_v48 = vld [vmem:[%s13737_s11 + $0x358] sm:$0xff] }
 0x100   : > { %6292 = vmatmul.mubr.bf16.vlgmr.msra.gmra.mrb[0].mxu0 %v12748_v12  ;;  %v654_v12 = vld [vmem:[%s13737_s11 + $0xa78] sm:$0xff] }
 0x101   : > { %6301 = vmatprep.mubr.bf16.mxu0 %v12754_v20  ;;  %6613 = vmatpush1.bf16.msra.mxu0 %v1023_v38  ;;  %v914_v20 = vpack.c.bf16 %v422_v17, %v420_v14  ;;  %v1030_v37 = vpack.c.bf16 %v654_v12, %v652_v62  ;;  %v12801_v38 = vld [vmem:[%s17394_s1 + $0xaa0] ss:$68 sps:$4 sm:$0xff]   ;;  %v430_v62 = vld [vmem:[%s13737_s11 + $0x378] sm:$0xff]  ;;  %v12807_v17 = vld [vmem:[%s17394_s1 + $0xb28] ss:$68 sps:$4 sm:$0xff]  }
 0x102   : > { %6614 = vmatprep.subr.bf16.mxu0 %v1026_v44  ;;  %v655_v44 = vld [vmem:[%s13737_s11 + $0xa80] sm:$0xff] }
 0x103   : > { %5218 = vmatprep.subr.bf16.mxu1 %v914_v20  ;;  %v1031_v13 = vpack.c.bf16 %v657_v57, %v655_v44  ;;  %v434_v20 = vld [vmem:[%s13737_s11 + $0x398] sm:$0xff]  ;;  %v436_v44 = vld [vmem:[%s13737_s11 + $0x3a8] sm:$0xff] }
 0x104   : > { %5219 = vmatpush1.bf16.msra.mxu1 %v913_v40 }
 0x105   : > { %6615 = vmatpush1.bf16.msra.mxu0 %v1025_v51  ;;  %v425_v51 = vld [vmem:[%s13737_s11 + $0x350] sm:$0xff] }
 0x106   : > { %6616 = vmatprep.subr.bf16.mxu0 %v1028_v61  ;;  %v428_v61 = vld [vmem:[%s13737_s11 + $0x368] sm:$0xff]  ;;  %v915_v0 = vpack.c.bf16 %v425_v51, %v423_v49  ;;  %5080 = vmatmul.mubr.bf16.gmra.mrb[80].mxu1 %v12801_v38  ;;  %v659_v38 = vld [vmem:[%s13737_s11 + $0xaa0] sm:$0xff] }
 0x107   : > { %v918_v12 = vpack.c.bf16 %v430_v62, %v428_v61  ;;  %5089 = vmatprep.mubr.bf16.mxu1 %v12805_v41  ;;  %v661_v41 = vld [vmem:[%s13737_s11 + $0xab0] sm:$0xff]  ;;  %v435_v51 = vld [vmem:[%s13737_s11 + $0x3a0] sm:$0xff]  ;;  %v440_v61 = vld [vmem:[%s13737_s11 + $0x3c8] sm:$0xff] }
 0x108   : > { %6302 = vmatmul.mubr.bf16.gmra.mrb[4].mxu0 %v12756_v60  ;;  %v916_v60 = vpack.c.bf16 %v426_v48, %v424_v46  ;;  %v438_v46 = vld [vmem:[%s13737_s11 + $0x3b8] sm:$0xff]  ;;  %v1033_v48 = vpack.c.bf16 %v661_v41, %v659_v38  ;;  %v665_v38 = vld [vmem:[%s13737_s11 + $0xad0] sm:$0xff]  ;;  %v12823_v41 = vld [vmem:[%s17394_s1 + $0xcc4] ss:$68 sps:$4 sm:$0xff]  }
 0x109   : > { %6311 = vmatprep.mubr.bf16.mxu0 %v12760_v3  ;;  %6617 = vmatpush1.bf16.msra.mxu0 %v1027_v30  ;;  %v429_v3 = vld [vmem:[%s13737_s11 + $0x370] sm:$0xff]  ;;  %v920_v30 = vpack.c.bf16 %v434_v20, %v432_v19  ;;  %v922_v49 = vpack.c.bf16 %v438_v46, %v436_v44  ;;  %v442_v62 = vld [vmem:[%s13737_s11 + $0x3d8] sm:$0xff]  ;;  %v443_v19 = vld [vmem:[%s13737_s11 + $0x3e0] sm:$0xff] }
 0x10a   : > { %6618 = vmatprep.subr.bf16.mxu0 %v1030_v37  ;;  %5220 = vmatprep.subr.bf16.mxu1 %v916_v60  ;;  %v917_v14 = vpack.c.bf16 %v429_v3, %v427_v2  ;;  %v433_v37 = vld [vmem:[%s13737_s11 + $0x390] sm:$0xff]  ;;  %v12774_v2 = vld [vmem:[%s17394_s1 + $0x240] ss:$68 sps:$4 sm:$0xff]  }
 0x10b   : > { %5221 = vmatpush1.bf16.msra.mxu1 %v915_v0  ;;  %v919_v40 = vpack.c.bf16 %v433_v37, %v431_v36  ;;  %v12813_v60 = vld [vmem:[%s17394_s1 + $0xbb0] ss:$68 sps:$4 sm:$0xff]   ;;  %v12817_v3 = vld [vmem:[%s17394_s1 + $0xc3c] ss:$68 sps:$4 sm:$0xff]  }
 0x10c   : > { %5222 = vmatprep.subr.bf16.mxu1 %v918_v12  ;;  %v441_v0 = vld [vmem:[%s13737_s11 + $0x3d0] sm:$0xff]  ;;  %v924_v12 = vpack.c.bf16 %v442_v62, %v440_v61  ;;  %v666_v36 = vld [vmem:[%s13737_s11 + $0xad8] sm:$0xff]  ;;  %v663_v37 = vld [vmem:[%s13737_s11 + $0xac0] sm:$0xff] }
 0x10d   : > { %6619 = vmatpush1.bf16.msra.mxu0 %v1029_v47  ;;  %v12768_v47 = vld [vmem:[%s17394_s1 + $0x1b8] ss:$68 sps:$4 sm:$0xff]   ;;  %v445_v20 = vld [vmem:[%s13737_s11 + $0x3f0] sm:$0xff]  ;;  %v1035_v46 = vpack.c.bf16 %v665_v38, %v663_v37  ;;  %v667_v61 = vld [vmem:[%s13737_s11 + $0xae0] sm:$0xff] }
 0x10e   : > { %6620 = vmatprep.subr.bf16.mxu0 %v1032_v54  ;;  %v12772_v54 = vld [vmem:[%s17394_s1 + $0x244] ss:$68 sps:$4 sm:$0xff]   ;;  %5090 = vmatmul.mubr.bf16.gmra.mrb[84].mxu1 %v12807_v17  ;;  %v12778_v17 = vld [vmem:[%s17394_s1 + $0x2cc] ss:$68 sps:$4 sm:$0xff]   ;;  %v925_v26 = vpack.c.bf16 %v445_v20, %v443_v19  ;;  %v12843_v19 = vld [vmem:[%s17394_s1 + $0xe58] ss:$68 sps:$4 sm:$0xff]  }
 0x10f   : > { %5223 = vmatpush1.bf16.msra.mxu1 %v917_v14  ;;  %5099 = vmatprep.mubr.bf16.mxu1 %v12811_v18  ;;  %v446_v14 = vld [vmem:[%s13737_s11 + $0x3f8] sm:$0xff]  ;;  %v669_v62 = vld [vmem:[%s13737_s11 + $0xaf0] sm:$0xff]  ;;  %v672_v20 = vld [vmem:[%s13737_s11 + $0xb08] sm:$0xff] }
 0x110   : > { %6312 = vmatmul.mubr.bf16.gmra.mrb[8].mxu0 %v12762_v53  ;;  %5224 = vmatprep.subr.bf16.mxu1 %v920_v30  ;;  %v437_v53 = vld [vmem:[%s13737_s11 + $0x3b0] sm:$0xff]  ;;  %v12819_v30 = vld [vmem:[%s17394_s1 + $0xc38] ss:$68 sps:$4 sm:$0xff]  }
 0x111   : > { %6321 = vmatprep.mubr.bf16.mxu0 %v12766_v63  ;;  %6621 = vmatpush1.bf16.msra.mxu0 %v1031_v13  ;;  %v921_v57 = vpack.c.bf16 %v437_v53, %v435_v51  ;;  %v439_v63 = vld [vmem:[%s13737_s11 + $0x3c0] sm:$0xff]  ;;  %v444_v13 = vld [vmem:[%s13737_s11 + $0x3e8] sm:$0xff]  ;;  %v12786_v51 = vld [vmem:[%s17394_s1 + $0x350] ss:$68 sps:$4 sm:$0xff]  }
 0x112   : > { %6622 = vmatprep.subr.bf16.mxu0 %v1034_v32  ;;  %v923_v18 = vpack.c.bf16 %v441_v0, %v439_v63  ;;  %v926_v23 = vpack.c.bf16 %v446_v14, %v444_v13  ;;  %v664_v32 = vld [vmem:[%s13737_s11 + $0xac8] sm:$0xff]  ;;  %v12790_v53 = vld [vmem:[%s17394_s1 + $0x3dc] ss:$68 sps:$4 sm:$0xff]   ;;  %v12835_v0 = vld [vmem:[%s17394_s1 + $0xdd4] ss:$68 sps:$4 sm:$0xff]  }
 0x113   : > { %5225 = vmatpush1.bf16.msra.mxu1 %v919_v40  ;;  %v12780_v40 = vld [vmem:[%s17394_s1 + $0x2c8] ss:$68 sps:$4 sm:$0xff]   ;;  %v1036_v44 = vpack.c.bf16 %v666_v36, %v664_v32  ;;  %v12792_v63 = vld [vmem:[%s17394_s1 + $0x3d8] ss:$68 sps:$4 sm:$0xff]   ;;  %v12837_v13 = vld [vmem:[%s17394_s1 + $0xdd0] ss:$68 sps:$4 sm:$0xff]  }
 0x114   : > { %5226 = vmatprep.subr.bf16.mxu1 %v922_v49  ;;  %v12829_v49 = vld [vmem:[%s17394_s1 + $0xd4c] ss:$68 sps:$4 sm:$0xff]   ;;  %v12841_v14 = vld [vmem:[%s17394_s1 + $0xe5c] ss:$68 sps:$4 sm:$0xff]   ;;  %v12847_v36 = vld [vmem:[%s17394_s1 + $0xee4] ss:$68 sps:$4 sm:$0xff]  }
 0x115   : > { %6623 = vmatpush1.bf16.msra.mxu0 %v1033_v48  ;;  %v12825_v48 = vld [vmem:[%s17394_s1 + $0xcc0] ss:$68 sps:$4 sm:$0xff]   ;;  %v12804_v32 = vld [vmem:[%s17394_s1 + $0x4e8] ss:$68 sps:$4 sm:$0xff]  }
 0x116   : > { %5100 = vmatmul.mubr.bf16.gmra.mrb[88].mxu1 %v12813_v60  ;;  %6624 = vmatprep.subr.bf16.mxu0 %v1036_v44  ;;  %v670_v60 = vld [vmem:[%s13737_s11 + $0xaf8] sm:$0xff]  ;;  %v12853_v44 = vld [vmem:[%s17394_s1 + $0xf6c] ss:$68 sps:$4 sm:$0xff]  }
 0x117   : > { %5227 = vmatpush1.bf16.msra.mxu1 %v921_v57  ;;  %5109 = vmatprep.mubr.bf16.mxu1 %v12817_v3  ;;  %v668_v57 = vld [vmem:[%s13737_s11 + $0xae8] sm:$0xff]  ;;  %v1037_v3 = vpack.c.bf16 %v669_v62, %v667_v61 }
 0x118   : > { %6322 = vmatmul.mubr.bf16.gmra.mrb[12].mxu0 %v12768_v47  ;;  %5228 = vmatprep.subr.bf16.mxu1 %v924_v12  ;;  %v12784_v47 = vld [vmem:[%s17394_s1 + $0x354] ss:$68 sps:$4 sm:$0xff]   ;;  %v12796_v12 = vld [vmem:[%s17394_s1 + $0x464] ss:$68 sps:$4 sm:$0xff]  }
 0x119   : > { %6331 = vmatprep.mubr.bf16.mxu0 %v12772_v54  ;;  %6625 = vmatpush1.bf16.msra.mxu0 %v1035_v46  ;;  %v12831_v54 = vld [vmem:[%s17394_s1 + $0xd48] ss:$68 sps:$4 sm:$0xff]   ;;  %v12810_v46 = vld [vmem:[%s17394_s1 + $0x570] ss:$68 sps:$4 sm:$0xff]  }
 0x11b   : > { %5229 = vmatpush1.bf16.msra.mxu1 %v923_v18  ;;  %v12802_v18 = vld [vmem:[%s17394_s1 + $0x4ec] ss:$68 sps:$4 sm:$0xff]  }
 0x11c   : > { %5230 = vmatprep.subr.bf16.mxu1 %v926_v23  ;;  %v674_v23 = vld [vmem:[%s13737_s11 + $0xb18] sm:$0xff] }
 0x11d   : > { %v1040_v37 = vpack.c.bf16 %v674_v23, %v672_v20  ;;  %v12828_v20 = vld [vmem:[%s17394_s1 + $0x708] ss:$68 sps:$4 sm:$0xff]  }
 0x11e   : > { %5110 = vmatmul.mubr.bf16.gmra.mrb[92].mxu1 %v12819_v30  ;;  %v673_v30 = vld [vmem:[%s13737_s11 + $0xb10] sm:$0xff] }
 0x11f   : > { %5231 = vmatpush1.bf16.msra.mxu1 %v925_v26  ;;  %5119 = vmatprep.mubr.bf16.mxu1 %v12823_v41  ;;  %v671_v26 = vld [vmem:[%s13737_s11 + $0xb00] sm:$0xff]  ;;  %v12873_v23 = vld [vmem:[%s17394_s1 + $0xc] ss:$68 sps:$4 sm:$0xff]  }
 0x120   : > { %6332 = vmatmul.mubr.bf16.gmra.mrb[16].mxu0 %v12774_v2  ;;  %v1038_v2 = vpack.c.bf16 %v670_v60, %v668_v57  ;;  %v1039_v38 = vpack.c.bf16 %v673_v30, %v671_v26  ;;  %v12849_v41 = vld [vmem:[%s17394_s1 + $0xee0] ss:$68 sps:$4 sm:$0xff]   ;;  %v12816_v57 = vld [vmem:[%s17394_s1 + $0x5f8] ss:$68 sps:$4 sm:$0xff]  }
 0x121   : > { %6341 = vmatprep.mubr.bf16.mxu0 %v12778_v17  ;;  %v12798_v17 = vld [vmem:[%s17394_s1 + $0x460] ss:$68 sps:$4 sm:$0xff]   ;;  %v12859_v60 = vld [vmem:[%s17394_s1 + $0xff4] ss:$68 sps:$4 sm:$0xff]  }
 0x122   : > { %6626 = vmatprep.subr.bf16.mxu0 %v1038_v2  ;;  %v12865_v2 = vld [vmem:[%s17394_s1 + $0x107c] ss:$68 sps:$4 sm:$0xff]  }
 0x123   : > { %6627 = vmatpush1.bf16.msra.mxu0 %v1037_v3  ;;  %v12822_v3 = vld [vmem:[%s17394_s1 + $0x680] ss:$68 sps:$4 sm:$0xff]  }
 0x124   : > { %6628 = vmatprep.subr.bf16.mxu0 %v1040_v37  ;;  %v684_v37 = vld [vmem:[%s13737_s11 + $0xb68] sm:$0xff] }
 0x126   : > { %5120 = vmatmul.mubr.bf16.gmra.mrb[96].mxu1 %v12825_v48  ;;  %v12855_v48 = vld [vmem:[%s17394_s1 + $0xf68] ss:$68 sps:$4 sm:$0xff]  }
 0x127   : > { %5129 = vmatprep.mubr.bf16.mxu1 %v12829_v49  ;;  %6629 = vmatpush1.bf16.msra.mxu0 %v1039_v38  ;;  %v676_v49 = vld [vmem:[%s13737_s11 + $0xb28] sm:$0xff]  ;;  %v686_v38 = vld [vmem:[%s13737_s11 + $0xb78] sm:$0xff] }
 0x128   : > { %6342 = vmatmul.mubr.bf16.gmra.mrb[20].mxu0 %v12780_v40  ;;  %v12808_v40 = vld [vmem:[%s17394_s1 + $0x574] ss:$68 sps:$4 sm:$0xff]  }
 0x129   : > { %6351 = vmatprep.mubr.bf16.mxu0 %v12784_v47  ;;  %v12814_v47 = vld [vmem:[%s17394_s1 + $0x5fc] ss:$68 sps:$4 sm:$0xff]  }
 0x12e   : > { %5130 = vmatmul.mubr.bf16.gmra.mrb[100].mxu1 %v12831_v54  ;;  %v677_v54 = vld [vmem:[%s13737_s11 + $0xb30] sm:$0xff] }
 0x12f   : > { %5139 = vmatprep.mubr.bf16.mxu1 %v12835_v0  ;;  %v12861_v0 = vld [vmem:[%s17394_s1 + $0xff0] ss:$68 sps:$4 sm:$0xff]  }
 0x130   : > { %6352 = vmatmul.mubr.bf16.gmra.mrb[24].mxu0 %v12786_v51  ;;  %v678_v51 = vld [vmem:[%s13737_s11 + $0xb38] sm:$0xff] }
 0x131   : > { %6361 = vmatprep.mubr.bf16.mxu0 %v12790_v53  ;;  %v675_v53 = vld [vmem:[%s13737_s11 + $0xb20] sm:$0xff]  ;;  %v1042_v61 = vpack.c.bf16 %v678_v51, %v676_v49  ;;  %v688_v51 = vld [vmem:[%s13737_s11 + $0xb88] sm:$0xff] }
 0x132   : > { %v1041_v62 = vpack.c.bf16 %v677_v54, %v675_v53  ;;  %v12838_v49 = vld [vmem:[%s17394_s1 + $0x81c] ss:$68 sps:$4 sm:$0xff]  }
 0x133   : > { %6630 = vmatprep.subr.bf16.mxu0 %v1042_v61  ;;  %v690_v53 = vld [vmem:[%s13737_s11 + $0xb98] sm:$0xff] }
 0x134   : > { %6631 = vmatpush1.bf16.msra.mxu0 %v1041_v62  ;;  %v1048_v54 = vpack.c.bf16 %v690_v53, %v688_v51  ;;  %v12879_v62 = vld [vmem:[%s17394_s1 + $0x90] ss:$68 sps:$4 sm:$0xff]   ;;  %v12891_v51 = vld [vmem:[%s17394_s1 + $0x1a0] ss:$68 sps:$4 sm:$0xff]  }
 0x135   : > { %v12895_v53 = vld [vmem:[%s17394_s1 + $0x22c] ss:$68 sps:$4 sm:$0xff]  }
 0x136   : > { %5140 = vmatmul.mubr.bf16.gmra.mrb[104].mxu1 %v12837_v13  ;;  %v12867_v13 = vld [vmem:[%s17394_s1 + $0x1078] ss:$68 sps:$4 sm:$0xff]  }
 0x137   : > { %5149 = vmatprep.mubr.bf16.mxu1 %v12841_v14  ;;  %v680_v14 = vld [vmem:[%s13737_s11 + $0xb48] sm:$0xff] }
 0x138   : > { %6362 = vmatmul.mubr.bf16.gmra.mrb[28].mxu0 %v12792_v63  ;;  %v12820_v63 = vld [vmem:[%s17394_s1 + $0x684] ss:$68 sps:$4 sm:$0xff]  }
 0x139   : > { %6371 = vmatprep.mubr.bf16.mxu0 %v12796_v12  ;;  %v12826_v12 = vld [vmem:[%s17394_s1 + $0x70c] ss:$68 sps:$4 sm:$0xff]  }
 0x13e   : > { %5150 = vmatmul.mubr.bf16.gmra.mrb[108].mxu1 %v12843_v19  ;;  %v681_v19 = vld [vmem:[%s13737_s11 + $0xb50] sm:$0xff] }
 0x13f   : > { %5159 = vmatprep.mubr.bf16.mxu1 %v12847_v36  ;;  %v12871_v36 = vld [vmem:[%s17394_s1 + $0x8] ss:$68 sps:$4 sm:$0xff]  }
 0x140   : > { %6372 = vmatmul.mubr.bf16.gmra.mrb[32].mxu0 %v12798_v17  ;;  %v682_v17 = vld [vmem:[%s13737_s11 + $0xb58] sm:$0xff] }
 0x141   : > { %6381 = vmatprep.mubr.bf16.mxu0 %v12802_v18  ;;  %v679_v18 = vld [vmem:[%s13737_s11 + $0xb40] sm:$0xff]  ;;  %v1044_v26 = vpack.c.bf16 %v682_v17, %v680_v14 }
 0x142   : > { %v1043_v30 = vpack.c.bf16 %v681_v19, %v679_v18  ;;  %v12844_v18 = vld [vmem:[%s17394_s1 + $0x8a4] ss:$68 sps:$4 sm:$0xff]  }
 0x143   : > { %6632 = vmatprep.subr.bf16.mxu0 %v1044_v26  ;;  %v696_v19 = vld [vmem:[%s13737_s11 + $0xbc8] sm:$0xff]  ;;  %v695_v26 = vld [vmem:[%s13737_s11 + $0xbc0] sm:$0xff] }
 0x144   : > { %6633 = vmatpush1.bf16.msra.mxu0 %v1043_v30  ;;  %v697_v30 = vld [vmem:[%s13737_s11 + $0xbd0] sm:$0xff] }
 0x146   : > { %5160 = vmatmul.mubr.bf16.gmra.mrb[112].mxu1 %v12849_v41  ;;  %v685_v41 = vld [vmem:[%s13737_s11 + $0xb70] sm:$0xff] }
 0x147   : > { %5169 = vmatprep.mubr.bf16.mxu1 %v12853_v44  ;;  %v12834_v44 = vld [vmem:[%s17394_s1 + $0x790] ss:$68 sps:$4 sm:$0xff]  }
 0x148   : > { %6382 = vmatmul.mubr.bf16.gmra.mrb[36].mxu0 %v12804_v32  ;;  %v12832_v32 = vld [vmem:[%s17394_s1 + $0x794] ss:$68 sps:$4 sm:$0xff]  }
 0x149   : > { %6391 = vmatprep.mubr.bf16.mxu0 %v12808_v40  ;;  %v683_v40 = vld [vmem:[%s13737_s11 + $0xb60] sm:$0xff] }
 0x14e   : > { %5170 = vmatmul.mubr.bf16.gmra.mrb[116].mxu1 %v12855_v48  ;;  %v1045_v48 = vpack.c.bf16 %v685_v41, %v683_v40  ;;  %v699_v40 = vld [vmem:[%s13737_s11 + $0xbe0] sm:$0xff]  ;;  %v701_v41 = vld [vmem:[%s13737_s11 + $0xbf0] sm:$0xff] }
 0x14f   : > { %5179 = vmatprep.mubr.bf16.mxu1 %v12859_v60  ;;  %v689_v60 = vld [vmem:[%s13737_s11 + $0xb90] sm:$0xff] }
 0x150   : > { %6392 = vmatmul.mubr.bf16.gmra.mrb[40].mxu0 %v12810_v46  ;;  %v12877_v46 = vld [vmem:[%s17394_s1 + $0x94] ss:$68 sps:$4 sm:$0xff]  }
 0x151   : > { %6401 = vmatprep.mubr.bf16.mxu0 %v12814_v47  ;;  %v1046_v47 = vpack.c.bf16 %v686_v38, %v684_v37  ;;  %v700_v37 = vld [vmem:[%s13737_s11 + $0xbe8] sm:$0xff]  ;;  %v702_v38 = vld [vmem:[%s13737_s11 + $0xbf8] sm:$0xff] }
 0x153   : > { %6634 = vmatprep.subr.bf16.mxu0 %v1046_v47  ;;  %v1054_v47 = vpack.c.bf16 %v702_v38, %v700_v37  ;;  %v12886_v37 = vld [vmem:[%s17394_s1 + $0xc5c] ss:$68 sps:$4 sm:$0xff]   ;;  %v12927_v38 = vld [vmem:[%s17394_s1 + $0x4d0] ss:$68 sps:$4 sm:$0xff]  }
 0x154   : > { %6635 = vmatpush1.bf16.msra.mxu0 %v1045_v48  ;;  %v1053_v48 = vpack.c.bf16 %v701_v41, %v699_v40  ;;  %v12931_v40 = vld [vmem:[%s17394_s1 + $0x55c] ss:$68 sps:$4 sm:$0xff]  }
 0x155   : > { %6636 = vmatprep.subr.bf16.mxu0 %v1048_v54  ;;  %v12852_v54 = vld [vmem:[%s17394_s1 + $0x928] ss:$68 sps:$4 sm:$0xff]   ;;  %v12888_v41 = vld [vmem:[%s17394_s1 + $0xc58] ss:$68 sps:$4 sm:$0xff]  }
 0x156   : > { %5180 = vmatmul.mubr.bf16.gmra.mrb[120].mxu1 %v12861_v0  ;;  %v694_v0 = vld [vmem:[%s13737_s11 + $0xbb8] sm:$0xff] }
 0x157   : > { %5189 = vmatprep.mubr.bf16.mxu1 %v12865_v2  ;;  %v691_v2 = vld [vmem:[%s13737_s11 + $0xba0] sm:$0xff] }
 0x158   : > { %6402 = vmatmul.mubr.bf16.gmra.mrb[44].mxu0 %v12816_v57  ;;  %v687_v57 = vld [vmem:[%s13737_s11 + $0xb80] sm:$0xff] }
 0x159   : > { %6411 = vmatprep.mubr.bf16.mxu0 %v12820_v63  ;;  %v1047_v61 = vpack.c.bf16 %v689_v60, %v687_v57  ;;  %v692_v63 = vld [vmem:[%s13737_s11 + $0xba8] sm:$0xff]  ;;  %v12856_v57 = vld [vmem:[%s17394_s1 + $0x9b4] ss:$68 sps:$4 sm:$0xff]  }
 0x15a   : > { %v1050_v14 = vpack.c.bf16 %v694_v0, %v692_v63  ;;  %v12897_v60 = vld [vmem:[%s17394_s1 + $0x228] ss:$68 sps:$4 sm:$0xff]   ;;  %v12862_v63 = vld [vmem:[%s17394_s1 + $0xa3c] ss:$68 sps:$4 sm:$0xff]   ;;  %v12903_v0 = vld [vmem:[%s17394_s1 + $0x2b0] ss:$68 sps:$4 sm:$0xff]  }
 0x15b   : > { %6637 = vmatpush1.bf16.msra.mxu0 %v1047_v61  ;;  %v12901_v61 = vld [vmem:[%s17394_s1 + $0x2b4] ss:$68 sps:$4 sm:$0xff]  }
 0x15c   : > { %6638 = vmatprep.subr.bf16.mxu0 %v1050_v14  ;;  %v12913_v14 = vld [vmem:[%s17394_s1 + $0x3c4] ss:$68 sps:$4 sm:$0xff]  }
 0x15e   : > { %5190 = vmatmul.mubr.bf16.gmra.mrb[124].mxu1 %v12867_v13  ;;  %v12883_v13 = vld [vmem:[%s17394_s1 + $0x11c] ss:$68 sps:$4 sm:$0xff]  }
 0x15f   : > { %5232 = vmatprep.mubr.bf16.mxu1 %v12873_v23 }
 0x160   : > { %6412 = vmatmul.mubr.bf16.gmra.mrb[48].mxu0 %v12822_v3  ;;  %v693_v3 = vld [vmem:[%s13737_s11 + $0xbb0] sm:$0xff] }
 0x161   : > { %6421 = vmatprep.mubr.bf16.mxu0 %v12826_v12  ;;  %v12840_v12 = vld [vmem:[%s17394_s1 + $0x818] ss:$68 sps:$4 sm:$0xff]   ;;  %v1049_v17 = vpack.c.bf16 %v693_v3, %v691_v2 }
 0x162   : > { %v12907_v2 = vld [vmem:[%s17394_s1 + $0x33c] ss:$68 sps:$4 sm:$0xff]  }
 0x163   : > { %6639 = vmatpush1.bf16.msra.mxu0 %v1049_v17  ;;  %v12864_v3 = vld [vmem:[%s17394_s1 + $0xa38] ss:$68 sps:$4 sm:$0xff]   ;;  %v12870_v17 = vld [vmem:[%s17394_s1 + $0xac0] ss:$68 sps:$4 sm:$0xff]  }
 0x166   : > { %5233 = vmatmul.mubr.bf16.vlgmr.msra.gmra.mrb[0].mxu1 %v12871_v36  ;;  %v12885_v36 = vld [vmem:[%s17394_s1 + $0x118] ss:$68 sps:$4 sm:$0xff]  }
 0x167   : > { %5242 = vmatprep.mubr.bf16.mxu1 %v12877_v46  ;;  %v12889_v46 = vld [vmem:[%s17394_s1 + $0x1a4] ss:$68 sps:$4 sm:$0xff]  }
 0x168   : > { %6422 = vmatmul.mubr.bf16.gmra.mrb[52].mxu0 %v12828_v20  ;;  %v698_v20 = vld [vmem:[%s13737_s11 + $0xbd8] sm:$0xff] }
 0x169   : > { %6431 = vmatprep.mubr.bf16.mxu0 %v12832_v32  ;;  %v1052_v23 = vpack.c.bf16 %v698_v20, %v696_v19  ;;  %v1051_v32 = vpack.c.bf16 %v697_v30, %v695_v26  ;;  %v12915_v19 = vld [vmem:[%s17394_s1 + $0x3c0] ss:$68 sps:$4 sm:$0xff]   ;;  %v12919_v20 = vld [vmem:[%s17394_s1 + $0x44c] ss:$68 sps:$4 sm:$0xff]   ;;  %v12880_v26 = vld [vmem:[%s17394_s1 + $0xbd4] ss:$68 sps:$4 sm:$0xff]  }
 0x16a   : > { %v12921_v30 = vld [vmem:[%s17394_s1 + $0x448] ss:$68 sps:$4 sm:$0xff]  }
 0x16b   : > { %6640 = vmatprep.subr.bf16.mxu0 %v1052_v23  ;;  %v12876_v23 = vld [vmem:[%s17394_s1 + $0xb48] ss:$68 sps:$4 sm:$0xff]  }
 0x16c   : > { %6641 = vmatpush1.bf16.msra.mxu0 %v1051_v32  ;;  %v12925_v32 = vld [vmem:[%s17394_s1 + $0x4d4] ss:$68 sps:$4 sm:$0xff]  }
 0x16d   : > { %6642 = vmatprep.subr.bf16.mxu0 %v1054_v47  ;;  %v12937_v47 = vld [vmem:[%s17394_s1 + $0x5e4] ss:$68 sps:$4 sm:$0xff]  }
 0x16e   : > { %5243 = vmatmul.mubr.bf16.gmra.mrb[4].mxu1 %v12879_v62  ;;  %v12858_v62 = vld [vmem:[%s17394_s1 + $0x9b0] ss:$68 sps:$4 sm:$0xff]  }
 0x16f   : > { %5252 = vmatprep.mubr.bf16.mxu1 %v12883_v13  ;;  %v12909_v13 = vld [vmem:[%s17394_s1 + $0x338] ss:$68 sps:$4 sm:$0xff]  }
 0x170   : > { %6432 = vmatmul.mubr.bf16.gmra.mrb[56].mxu0 %v12834_v44  ;;  %v12846_v44 = vld [vmem:[%s17394_s1 + $0x8a0] ss:$68 sps:$4 sm:$0xff]  }
 0x171   : > { %6441 = vmatprep.mubr.bf16.mxu0 %v12838_v49  ;;  %v12850_v49 = vld [vmem:[%s17394_s1 + $0x92c] ss:$68 sps:$4 sm:$0xff]   ;;  %6643 = vmatpush1.bf16.msra.mxu0 %v1053_v48  ;;  %v12894_v48 = vld [vmem:[%s17394_s1 + $0xce0] ss:$68 sps:$4 sm:$0xff]  }
 0x176   : > { %5253 = vmatmul.mubr.bf16.gmra.mrb[8].mxu1 %v12885_v36  ;;  %v12882_v36 = vld [vmem:[%s17394_s1 + $0xbd0] ss:$68 sps:$4 sm:$0xff]  }
 0x177   : > { %5262 = vmatprep.mubr.bf16.mxu1 %v12889_v46  ;;  %v12933_v46 = vld [vmem:[%s17394_s1 + $0x558] ss:$68 sps:$4 sm:$0xff]  }
 0x178   : > { %6442 = vmatmul.mubr.bf16.gmra.mrb[60].mxu0 %v12840_v12  ;;  %v12868_v12 = vld [vmem:[%s17394_s1 + $0xac4] ss:$68 sps:$4 sm:$0xff]  }
 0x179   : > { %6451 = vmatprep.mubr.bf16.mxu0 %v12844_v18  ;;  %v12874_v18 = vld [vmem:[%s17394_s1 + $0xb4c] ss:$68 sps:$4 sm:$0xff]  }
 0x17e   : > { %5263 = vmatmul.mubr.bf16.gmra.mrb[12].mxu1 %v12891_v51  ;;  %v704_v51 = vld [vmem:[%s13737_s11 + $0xc08] sm:$0xff] }
 0x17f   : > { %5272 = vmatprep.mubr.bf16.mxu1 %v12895_v53  ;;  %v12939_v53 = vld [vmem:[%s17394_s1 + $0x5e0] ss:$68 sps:$4 sm:$0xff]  }
 0x180   : > { %6452 = vmatmul.mubr.bf16.gmra.mrb[64].mxu0 %v12846_v44  ;;  %v12892_v44 = vld [vmem:[%s17394_s1 + $0xce4] ss:$68 sps:$4 sm:$0xff]  }
 0x181   : > { %6461 = vmatprep.mubr.bf16.mxu0 %v12850_v49  ;;  %v12898_v49 = vld [vmem:[%s17394_s1 + $0xd6c] ss:$68 sps:$4 sm:$0xff]  }
 0x186   : > { %5273 = vmatmul.mubr.bf16.gmra.mrb[16].mxu1 %v12897_v60 }
 0x187   : > { %5282 = vmatprep.mubr.bf16.mxu1 %v12901_v61  ;;  %v12900_v61 = vld [vmem:[%s17394_s1 + $0xd68] ss:$68 sps:$4 sm:$0xff]  }
 0x188   : > { %6462 = vmatmul.mubr.bf16.gmra.mrb[68].mxu0 %v12852_v54  ;;  %v706_v54 = vld [vmem:[%s13737_s11 + $0xc18] sm:$0xff] }
 0x189   : > { %6471 = vmatprep.mubr.bf16.mxu0 %v12856_v57  ;;  %v12943_v57 = vld [vmem:[%s17394_s1 + $0x66c] ss:$68 sps:$4 sm:$0xff]   ;;  %v1056_v60 = vpack.c.bf16 %v706_v54, %v704_v51 }
 0x18a   : > { %v453_v51 = vld [vmem:[%s13737_s11 + $0x430] sm:$0xff] }
 0x18b   : > { %6965 = vmatprep.subr.bf16.mxu0 %v1056_v60  ;;  %v456_v60 = vld [vmem:[%s13737_s11 + $0x448] sm:$0xff] }
 0x18e   : > { %5283 = vmatmul.mubr.bf16.gmra.mrb[20].mxu1 %v12903_v0  ;;  %v12949_v0 = vld [vmem:[%s17394_s1 + $0x6f4] ss:$68 sps:$4 sm:$0xff]  }
 0x18f   : > { %5292 = vmatprep.mubr.bf16.mxu1 %v12907_v2  ;;  %v12906_v2 = vld [vmem:[%s17394_s1 + $0xdf0] ss:$68 sps:$4 sm:$0xff]  }
 0x190   : > { %6472 = vmatmul.mubr.bf16.gmra.mrb[72].mxu0 %v12858_v62  ;;  %v12904_v62 = vld [vmem:[%s17394_s1 + $0xdf4] ss:$68 sps:$4 sm:$0xff]  }
 0x191   : > { %6481 = vmatprep.mubr.bf16.mxu0 %v12862_v63  ;;  %v12945_v63 = vld [vmem:[%s17394_s1 + $0x668] ss:$68 sps:$4 sm:$0xff]  }
 0x196   : > { %5293 = vmatmul.mubr.bf16.gmra.mrb[24].mxu1 %v12909_v13  ;;  %v12955_v13 = vld [vmem:[%s17394_s1 + $0x77c] ss:$68 sps:$4 sm:$0xff]  }
 0x197   : > { %5302 = vmatprep.mubr.bf16.mxu1 %v12913_v14  ;;  %v12912_v14 = vld [vmem:[%s17394_s1 + $0xe78] ss:$68 sps:$4 sm:$0xff]  }
 0x198   : > { %6482 = vmatmul.mubr.bf16.gmra.mrb[76].mxu0 %v12864_v3  ;;  %v12910_v3 = vld [vmem:[%s17394_s1 + $0xe7c] ss:$68 sps:$4 sm:$0xff]  }
 0x199   : > { %6491 = vmatprep.mubr.bf16.mxu0 %v12868_v12  ;;  %v12951_v12 = vld [vmem:[%s17394_s1 + $0x6f0] ss:$68 sps:$4 sm:$0xff]  }
 0x19e   : > { %5303 = vmatmul.mubr.bf16.gmra.mrb[28].mxu1 %v12915_v19  ;;  %v12961_v19 = vld [vmem:[%s17394_s1 + $0x804] ss:$68 sps:$4 sm:$0xff]  }
 0x19f   : > { %5312 = vmatprep.mubr.bf16.mxu1 %v12919_v20  ;;  %v12918_v20 = vld [vmem:[%s17394_s1 + $0xf00] ss:$68 sps:$4 sm:$0xff]  }
 0x1a0   : > { %6492 = vmatmul.mubr.bf16.gmra.mrb[80].mxu0 %v12870_v17  ;;  %v12916_v17 = vld [vmem:[%s17394_s1 + $0xf04] ss:$68 sps:$4 sm:$0xff]  }
 0x1a1   : > { %6501 = vmatprep.mubr.bf16.mxu0 %v12874_v18  ;;  %v12957_v18 = vld [vmem:[%s17394_s1 + $0x778] ss:$68 sps:$4 sm:$0xff]  }
 0x1a6   : > { %5313 = vmatmul.mubr.bf16.gmra.mrb[32].mxu1 %v12921_v30  ;;  %v12963_v30 = vld [vmem:[%s17394_s1 + $0x800] ss:$68 sps:$4 sm:$0xff]  }
 0x1a7   : > { %5322 = vmatprep.mubr.bf16.mxu1 %v12925_v32  ;;  %v450_v32 = vld [vmem:[%s13737_s11 + $0x418] sm:$0xff] }
 0x1a8   : > { %6502 = vmatmul.mubr.bf16.gmra.mrb[84].mxu0 %v12876_v23  ;;  %v12922_v23 = vld [vmem:[%s17394_s1 + $0xf8c] ss:$68 sps:$4 sm:$0xff]  }
 0x1a9   : > { %6511 = vmatprep.mubr.bf16.mxu0 %v12880_v26  ;;  %v448_v26 = vld [vmem:[%s13737_s11 + $0x408] sm:$0xff] }
 0x1ae   : > { %5323 = vmatmul.mubr.bf16.gmra.mrb[36].mxu1 %v12927_v38  ;;  %v447_v38 = vld [vmem:[%s13737_s11 + $0x400] sm:$0xff] }
 0x1af   : > { %5332 = vmatprep.mubr.bf16.mxu1 %v12931_v40  ;;  %v449_v40 = vld [vmem:[%s13737_s11 + $0x410] sm:$0xff] }
 0x1b0   : > { %6512 = vmatmul.mubr.bf16.gmra.mrb[88].mxu0 %v12882_v36  ;;  %v12967_v36 = vld [vmem:[%s17394_s1 + $0x88c] ss:$68 sps:$4 sm:$0xff]  }
 0x1b1   : > { %6521 = vmatprep.mubr.bf16.mxu0 %v12886_v37  ;;  %v928_v37 = vpack.c.bf16 %v450_v32, %v448_v26  ;;  %v464_v26 = vld [vmem:[%s13737_s11 + $0x488] sm:$0xff]  ;;  %v466_v32 = vld [vmem:[%s13737_s11 + $0x498] sm:$0xff] }
 0x1b3   : > { %5553 = vmatprep.subr.bf16.mxu1 %v928_v37  ;;  %v936_v37 = vpack.c.bf16 %v466_v32, %v464_v26  ;;  %v477_v26 = vld [vmem:[%s13737_s11 + $0x4f0] sm:$0xff] }
 0x1b4   : > { %v12946_v32 = vld [vmem:[%s17394_s1 + $0xb4] ss:$68 sps:$4 sm:$0xff]  }
 0x1b6   : > { %5333 = vmatmul.mubr.bf16.gmra.mrb[40].mxu1 %v12933_v46  ;;  %v454_v46 = vld [vmem:[%s13737_s11 + $0x438] sm:$0xff] }
 0x1b7   : > { %5342 = vmatprep.mubr.bf16.mxu1 %v12937_v47  ;;  %v12924_v47 = vld [vmem:[%s17394_s1 + $0xf88] ss:$68 sps:$4 sm:$0xff]  }
 0x1b8   : > { %6522 = vmatmul.mubr.bf16.gmra.mrb[92].mxu0 %v12888_v41  ;;  %v927_v41 = vpack.c.bf16 %v449_v40, %v447_v38  ;;  %v463_v38 = vld [vmem:[%s13737_s11 + $0x480] sm:$0xff]  ;;  %v465_v40 = vld [vmem:[%s13737_s11 + $0x490] sm:$0xff] }
 0x1b9   : > { %6531 = vmatprep.mubr.bf16.mxu0 %v12892_v44  ;;  %v452_v44 = vld [vmem:[%s13737_s11 + $0x428] sm:$0xff] }
 0x1ba   : > { %5554 = vmatpush1.bf16.msra.mxu1 %v927_v41  ;;  %v935_v41 = vpack.c.bf16 %v465_v40, %v463_v38  ;;  %v707_v38 = vld [vmem:[%s13737_s11 + $0xc20] sm:$0xff]  ;;  %v709_v40 = vld [vmem:[%s13737_s11 + $0xc30] sm:$0xff] }
 0x1be   : > { %5343 = vmatmul.mubr.bf16.gmra.mrb[44].mxu1 %v12939_v53  ;;  %v12928_v53 = vld [vmem:[%s17394_s1 + $0x1014] ss:$68 sps:$4 sm:$0xff]  }
 0x1bf   : > { %5352 = vmatprep.mubr.bf16.mxu1 %v12943_v57  ;;  %v12969_v57 = vld [vmem:[%s17394_s1 + $0x888] ss:$68 sps:$4 sm:$0xff]  }
 0x1c0   : > { %6532 = vmatmul.mubr.bf16.gmra.mrb[96].mxu0 %v12894_v48  ;;  %v930_v48 = vpack.c.bf16 %v454_v46, %v452_v44  ;;  %v468_v44 = vld [vmem:[%s13737_s11 + $0x4a8] sm:$0xff]  ;;  %v470_v46 = vld [vmem:[%s13737_s11 + $0x4b8] sm:$0xff] }
 0x1c1   : > { %6541 = vmatprep.mubr.bf16.mxu0 %v12898_v49  ;;  %v451_v49 = vld [vmem:[%s13737_s11 + $0x420] sm:$0xff] }
 0x1c2   : > { %v929_v54 = vpack.c.bf16 %v453_v51, %v451_v49  ;;  %5555 = vmatprep.subr.bf16.mxu1 %v930_v48  ;;  %v938_v48 = vpack.c.bf16 %v470_v46, %v468_v44  ;;  %v467_v49 = vld [vmem:[%s13737_s11 + $0x4a0] sm:$0xff]  ;;  %v469_v51 = vld [vmem:[%s13737_s11 + $0x4b0] sm:$0xff]  ;;  %v712_v44 = vld [vmem:[%s13737_s11 + $0xc48] sm:$0xff] }
 0x1c3   : > { %v714_v46 = vld [vmem:[%s13737_s11 + $0xc58] sm:$0xff] }
 0x1c4   : > { %5556 = vmatpush1.bf16.msra.mxu1 %v929_v54  ;;  %v937_v54 = vpack.c.bf16 %v469_v51, %v467_v49  ;;  %v480_v49 = vld [vmem:[%s13737_s11 + $0x508] sm:$0xff]  ;;  %v1057_v51 = vpack.c.bf16 %v709_v40, %v707_v38  ;;  %v722_v38 = vld [vmem:[%s13737_s11 + $0xc98] sm:$0xff] }
 0x1c6   : > { %5353 = vmatmul.mubr.bf16.gmra.mrb[48].mxu1 %v12945_v63  ;;  %v457_v63 = vld [vmem:[%s13737_s11 + $0x450] sm:$0xff] }
 0x1c7   : > { %5362 = vmatprep.mubr.bf16.mxu1 %v12949_v0  ;;  %v12973_v0 = vld [vmem:[%s17394_s1 + $0x914] ss:$68 sps:$4 sm:$0xff]  }
 0x1c8   : > { %6542 = vmatmul.mubr.bf16.gmra.mrb[100].mxu0 %v12900_v61  ;;  %v458_v61 = vld [vmem:[%s13737_s11 + $0x458] sm:$0xff] }
 0x1c9   : > { %6551 = vmatprep.mubr.bf16.mxu0 %v12904_v62  ;;  %v455_v62 = vld [vmem:[%s13737_s11 + $0x440] sm:$0xff] }
 0x1ce   : > { %5363 = vmatmul.mubr.bf16.gmra.mrb[52].mxu1 %v12951_v12  ;;  %v460_v12 = vld [vmem:[%s13737_s11 + $0x468] sm:$0xff] }
 0x1cf   : > { %5372 = vmatprep.mubr.bf16.mxu1 %v12955_v13  ;;  %v462_v13 = vld [vmem:[%s13737_s11 + $0x478] sm:$0xff] }
 0x1d0   : > { %6552 = vmatmul.mubr.bf16.gmra.mrb[104].mxu0 %v12906_v2  ;;  %v932_v2 = vpack.c.bf16 %v458_v61, %v456_v60  ;;  %v12985_v60 = vld [vmem:[%s17394_s1 + $0xa24] ss:$68 sps:$4 sm:$0xff]  }
 0x1d1   : > { %6561 = vmatprep.mubr.bf16.mxu0 %v12910_v3  ;;  %v931_v3 = vpack.c.bf16 %v457_v63, %v455_v62  ;;  %v703_v61 = vld [vmem:[%s13737_s11 + $0xc00] sm:$0xff]  ;;  %v705_v62 = vld [vmem:[%s13737_s11 + $0xc10] sm:$0xff]  ;;  %v472_v63 = vld [vmem:[%s13737_s11 + $0x4c8] sm:$0xff] }
 0x1d2   : > { %5557 = vmatprep.subr.bf16.mxu1 %v932_v2  ;;  %v471_v2 = vld [vmem:[%s13737_s11 + $0x4c0] sm:$0xff] }
 0x1d3   : > { %5558 = vmatpush1.bf16.msra.mxu1 %v931_v3  ;;  %v473_v3 = vld [vmem:[%s13737_s11 + $0x4d0] sm:$0xff] }
 0x1d6   : > { %5373 = vmatmul.mubr.bf16.gmra.mrb[56].mxu1 %v12957_v18  ;;  %v461_v18 = vld [vmem:[%s13737_s11 + $0x470] sm:$0xff] }
 0x1d7   : > { %5382 = vmatprep.mubr.bf16.mxu1 %v12961_v19  ;;  %v12930_v19 = vld [vmem:[%s17394_s1 + $0x1010] ss:$68 sps:$4 sm:$0xff]  }
 0x1d8   : > { %6562 = vmatmul.mubr.bf16.gmra.mrb[108].mxu0 %v12912_v14  ;;  %v934_v14 = vpack.c.bf16 %v462_v13, %v460_v12  ;;  %v708_v12 = vld [vmem:[%s13737_s11 + $0xc28] sm:$0xff] }
 0x1d9   : > { %6571 = vmatprep.mubr.bf16.mxu0 %v12916_v17  ;;  %v459_v17 = vld [vmem:[%s13737_s11 + $0x460] sm:$0xff] }
 0x1da   : > { %5559 = vmatprep.subr.bf16.mxu1 %v934_v14  ;;  %v939_v14 = vpack.c.bf16 %v473_v3, %v471_v2  ;;  %v718_v2 = vld [vmem:[%s13737_s11 + $0xc78] sm:$0xff] }
 0x1de   : > { %5383 = vmatmul.mubr.bf16.gmra.mrb[60].mxu1 %v12963_v30  ;;  %v12975_v30 = vld [vmem:[%s17394_s1 + $0x910] ss:$68 sps:$4 sm:$0xff]  }
 0x1df   : > { %5392 = vmatprep.mubr.bf16.mxu1 %v12967_v36  ;;  %v12979_v36 = vld [vmem:[%s17394_s1 + $0x99c] ss:$68 sps:$4 sm:$0xff]  }
 0x1e0   : > { %6572 = vmatmul.mubr.bf16.gmra.mrb[112].mxu0 %v12918_v20  ;;  %v12934_v20 = vld [vmem:[%s17394_s1 + $0x109c] ss:$68 sps:$4 sm:$0xff]  }
 0x1e1   : > { %6581 = vmatprep.mubr.bf16.mxu0 %v12922_v23  ;;  %v933_v23 = vpack.c.bf16 %v461_v18, %v459_v17  ;;  %v476_v17 = vld [vmem:[%s13737_s11 + $0x4e8] sm:$0xff]  ;;  %v478_v18 = vld [vmem:[%s13737_s11 + $0x4f8] sm:$0xff] }
 0x1e3   : > { %5560 = vmatpush1.bf16.msra.mxu1 %v933_v23  ;;  %v475_v23 = vld [vmem:[%s13737_s11 + $0x4e0] sm:$0xff] }
 0x1e4   : > { %5561 = vmatprep.subr.bf16.mxu1 %v936_v37 }
 0x1e6   : > { %5393 = vmatmul.mubr.bf16.gmra.mrb[64].mxu1 %v12969_v57  ;;  %v12981_v57 = vld [vmem:[%s17394_s1 + $0x998] ss:$68 sps:$4 sm:$0xff]  }
 0x1e7   : > { %5402 = vmatprep.mubr.bf16.mxu1 %v12973_v0  ;;  %5562 = vmatpush1.bf16.msra.mxu1 %v935_v41  ;;  %v474_v0 = vld [vmem:[%s13737_s11 + $0x4d8] sm:$0xff]  ;;  %v941_v41 = vpack.c.bf16 %v477_v26, %v475_v23 }
 0x1e8   : > { %6582 = vmatmul.mubr.bf16.gmra.mrb[116].mxu0 %v12924_v47  ;;  %v12936_v47 = vld [vmem:[%s17394_s1 + $0x1098] ss:$68 sps:$4 sm:$0xff]   ;;  %5563 = vmatprep.subr.bf16.mxu1 %v938_v48  ;;  %v940_v13 = vpack.c.bf16 %v474_v0, %v472_v63  ;;  %v12991_v48 = vld [vmem:[%s17394_s1 + $0xaac] ss:$68 sps:$4 sm:$0xff]   ;;  %v479_v63 = vld [vmem:[%s13737_s11 + $0x500] sm:$0xff] }
 0x1e9   : > { %6591 = vmatprep.mubr.bf16.mxu0 %v12928_v53  ;;  %v12942_v53 = vld [vmem:[%s17394_s1 + $0x2c] ss:$68 sps:$4 sm:$0xff]  }
 0x1ea   : > { %v481_v0 = vld [vmem:[%s13737_s11 + $0x510] sm:$0xff] }
 0x1eb   : > { %5564 = vmatpush1.bf16.msra.mxu1 %v937_v54  ;;  %v713_v54 = vld [vmem:[%s13737_s11 + $0xc50] sm:$0xff]  ;;  %v943_v3 = vpack.c.bf16 %v481_v0, %v479_v63  ;;  %v12954_v63 = vld [vmem:[%s17394_s1 + $0x138] ss:$68 sps:$4 sm:$0xff]  }
 0x1ec   : > { %5565 = vmatprep.subr.bf16.mxu1 %v940_v13  ;;  %v486_v13 = vld [vmem:[%s13737_s11 + $0x538] sm:$0xff] }
 0x1ee   : > { %5403 = vmatmul.mubr.bf16.gmra.mrb[68].mxu1 %v12975_v30  ;;  %v12940_v30 = vld [vmem:[%s17394_s1 + $0x28] ss:$68 sps:$4 sm:$0xff]  }
 0x1ef   : > { %5412 = vmatprep.mubr.bf16.mxu1 %v12979_v36  ;;  %v1055_v36 = vpack.c.bf16 %v705_v62, %v703_v61  ;;  %5566 = vmatpush1.bf16.msra.mxu1 %v939_v14  ;;  %v716_v61 = vld [vmem:[%s13737_s11 + $0xc68] sm:$0xff]  ;;  %v12948_v14 = vld [vmem:[%s17394_s1 + $0xb0] ss:$68 sps:$4 sm:$0xff]  }
 0x1f0   : > { %6592 = vmatmul.mubr.bf16.gmra.mrb[120].mxu0 %v12930_v19  ;;  %v710_v19 = vld [vmem:[%s13737_s11 + $0xc38] sm:$0xff]  ;;  %v1062_v26 = vpack.c.bf16 %v718_v2, %v716_v61  ;;  %v491_v2 = vld [vmem:[%s13737_s11 + $0x560] sm:$0xff] }
 0x1f1   : > { %6601 = vmatprep.mubr.bf16.mxu0 %v12934_v20  ;;  %v942_v20 = vpack.c.bf16 %v478_v18, %v476_v17  ;;  %v1058_v37 = vpack.c.bf16 %v710_v19, %v708_v12  ;;  %v484_v12 = vld [vmem:[%s13737_s11 + $0x528] sm:$0xff]  ;;  %v483_v18 = vld [vmem:[%s13737_s11 + $0x520] sm:$0xff]  ;;  %v485_v19 = vld [vmem:[%s13737_s11 + $0x530] sm:$0xff] }
 0x1f2   : > { %v946_v17 = vpack.c.bf16 %v486_v13, %v484_v12  ;;  %v945_v40 = vpack.c.bf16 %v485_v19, %v483_v18  ;;  %v494_v61 = vld [vmem:[%s13737_s11 + $0x578] sm:$0xff]  ;;  %v12958_v12 = vld [vmem:[%s17394_s1 + $0x1c4] ss:$68 sps:$4 sm:$0xff]  }
 0x1f3   : > { %5567 = vmatprep.subr.bf16.mxu1 %v942_v20  ;;  %v12952_v20 = vld [vmem:[%s17394_s1 + $0x13c] ss:$68 sps:$4 sm:$0xff]   ;;  %v496_v19 = vld [vmem:[%s13737_s11 + $0x588] sm:$0xff] }
 0x1f4   : > { %5568 = vmatpush1.bf16.msra.mxu1 %v941_v41  ;;  %v12997_v41 = vld [vmem:[%s17394_s1 + $0xb34] ss:$68 sps:$4 sm:$0xff]   ;;  %v13003_v18 = vld [vmem:[%s17394_s1 + $0xbbc] ss:$68 sps:$4 sm:$0xff]  }
 0x1f6   : > { %5413 = vmatmul.mubr.bf16.gmra.mrb[72].mxu1 %v12981_v57  ;;  %v482_v57 = vld [vmem:[%s13737_s11 + $0x518] sm:$0xff] }
 0x1f7   : > { %5422 = vmatprep.mubr.bf16.mxu1 %v12985_v60  ;;  %v1060_v60 = vpack.c.bf16 %v714_v46, %v712_v44  ;;  %v944_v62 = vpack.c.bf16 %v482_v57, %v480_v49  ;;  %v719_v44 = vld [vmem:[%s13737_s11 + $0xc80] sm:$0xff]  ;;  %v488_v46 = vld [vmem:[%s13737_s11 + $0x548] sm:$0xff] }
 0x1f8   : > { %6602 = vmatmul.mubr.bf16.gmra.mrb[124].mxu0 %v12936_v47  ;;  %v12987_v47 = vld [vmem:[%s17394_s1 + $0xa20] ss:$68 sps:$4 sm:$0xff]  }
 0x1f9   : > { %6644 = vmatprep.mubr.bf16.mxu0 %v12942_v53  ;;  %v711_v53 = vld [vmem:[%s13737_s11 + $0xc40] sm:$0xff]  ;;  %5569 = vmatprep.subr.bf16.mxu1 %v944_v62 }
 0x1fa   : > { %v1059_v23 = vpack.c.bf16 %v713_v54, %v711_v53  ;;  %5570 = vmatpush1.bf16.msra.mxu1 %v943_v3  ;;  %v487_v49 = vld [vmem:[%s13737_s11 + $0x540] sm:$0xff]  ;;  %v721_v54 = vld [vmem:[%s13737_s11 + $0xc90] sm:$0xff] }
 0x1fb   : > { %5571 = vmatprep.subr.bf16.mxu1 %v946_v17  ;;  %v493_v3 = vld [vmem:[%s13737_s11 + $0x570] sm:$0xff]  ;;  %v1063_v13 = vpack.c.bf16 %v721_v54, %v719_v44  ;;  %v500_v44 = vld [vmem:[%s13737_s11 + $0x5a8] sm:$0xff] }
 0x1fc   : > { %v12999_v17 = vld [vmem:[%s17394_s1 + $0xb30] ss:$68 sps:$4 sm:$0xff]  }
 0x1fd   : > { %v12964_v54 = vld [vmem:[%s17394_s1 + $0x24c] ss:$68 sps:$4 sm:$0xff]  }
 0x1fe   : > { %5423 = vmatmul.mubr.bf16.gmra.mrb[76].mxu1 %v12987_v47 }
 0x1ff   : > { %5432 = vmatprep.mubr.bf16.mxu1 %v12991_v48  ;;  %v490_v48 = vld [vmem:[%s13737_s11 + $0x558] sm:$0xff]  ;;  %5572 = vmatpush1.bf16.msra.mxu1 %v945_v40 }
 0x200   : > { %6645 = vmatmul.mubr.bf16.vlgmr.msra.gmra.mrb[0].mxu0 %v12940_v30  ;;  %v715_v30 = vld [vmem:[%s13737_s11 + $0xc60] sm:$0xff]  ;;  %v948_v57 = vpack.c.bf16 %v490_v48, %v488_v46  ;;  %v502_v46 = vld [vmem:[%s13737_s11 + $0x5b8] sm:$0xff] }
 0x201   : > { %6654 = vmatprep.mubr.bf16.mxu0 %v12946_v32  ;;  %6966 = vmatpush1.bf16.msra.mxu0 %v1055_v36  ;;  %v717_v32 = vld [vmem:[%s13737_s11 + $0xc70] sm:$0xff]  ;;  %v12993_v36 = vld [vmem:[%s17394_s1 + $0xaa8] ss:$68 sps:$4 sm:$0xff]  }
 0x202   : > { %6967 = vmatprep.subr.bf16.mxu0 %v1058_v37  ;;  %v720_v37 = vld [vmem:[%s13737_s11 + $0xc88] sm:$0xff]  ;;  %v1061_v47 = vpack.c.bf16 %v717_v32, %v715_v30  ;;  %5573 = vmatprep.subr.bf16.mxu1 %v948_v57 }
 0x203   : > { %v1064_v53 = vpack.c.bf16 %v722_v38, %v720_v37  ;;  %v497_v37 = vld [vmem:[%s13737_s11 + $0x590] sm:$0xff]  ;;  %v723_v38 = vld [vmem:[%s13737_s11 + $0xca0] sm:$0xff] }
 0x205   : > { %6968 = vmatpush1.bf16.msra.mxu0 %v1057_v51  ;;  %v489_v51 = vld [vmem:[%s13737_s11 + $0x550] sm:$0xff] }
 0x206   : > { %6969 = vmatprep.subr.bf16.mxu0 %v1060_v60  ;;  %v492_v60 = vld [vmem:[%s13737_s11 + $0x568] sm:$0xff]  ;;  %v947_v62 = vpack.c.bf16 %v489_v51, %v487_v49  ;;  %5433 = vmatmul.mubr.bf16.gmra.mrb[80].mxu1 %v12993_v36  ;;  %v495_v36 = vld [vmem:[%s13737_s11 + $0x580] sm:$0xff]  ;;  %v954_v49 = vpack.c.bf16 %v502_v46, %v500_v44  ;;  %v12972_v46 = vld [vmem:[%s17394_s1 + $0x2d0] ss:$68 sps:$4 sm:$0xff]  }
 0x207   : > { %v950_v0 = vpack.c.bf16 %v494_v61, %v492_v60  ;;  %5442 = vmatprep.mubr.bf16.mxu1 %v12997_v41  ;;  %v951_v40 = vpack.c.bf16 %v497_v37, %v495_v36  ;;  %v725_v41 = vld [vmem:[%s13737_s11 + $0xcb0] sm:$0xff]  ;;  %v499_v51 = vld [vmem:[%s13737_s11 + $0x5a0] sm:$0xff]  ;;  %v13005_v60 = vld [vmem:[%s17394_s1 + $0xbb8] ss:$68 sps:$4 sm:$0xff]  }
 0x208   : > { %6655 = vmatmul.mubr.bf16.gmra.mrb[4].mxu0 %v12948_v14  ;;  %5574 = vmatpush1.bf16.msra.mxu1 %v947_v62  ;;  %v949_v14 = vpack.c.bf16 %v493_v3, %v491_v2  ;;  %v1065_v48 = vpack.c.bf16 %v725_v41, %v723_v38  ;;  %v504_v61 = vld [vmem:[%s13737_s11 + $0x5c8] sm:$0xff]  ;;  %v506_v62 = vld [vmem:[%s13737_s11 + $0x5d8] sm:$0xff]  ;;  %v727_v37 = vld [vmem:[%s13737_s11 + $0xcc0] sm:$0xff] }
 0x209   : > { %6664 = vmatprep.mubr.bf16.mxu0 %v12952_v20  ;;  %6970 = vmatpush1.bf16.msra.mxu0 %v1059_v23  ;;  %v498_v20 = vld [vmem:[%s13737_s11 + $0x598] sm:$0xff]  ;;  %v724_v23 = vld [vmem:[%s13737_s11 + $0xca8] sm:$0xff]  ;;  %v956_v3 = vpack.c.bf16 %v506_v62, %v504_v61  ;;  %v729_v38 = vld [vmem:[%s13737_s11 + $0xcd0] sm:$0xff] }
 0x20a   : > { %6971 = vmatprep.subr.bf16.mxu0 %v1062_v26  ;;  %5575 = vmatprep.subr.bf16.mxu1 %v950_v0  ;;  %v726_v26 = vld [vmem:[%s13737_s11 + $0xcb8] sm:$0xff]  ;;  %v952_v30 = vpack.c.bf16 %v498_v20, %v496_v19  ;;  %v505_v0 = vld [vmem:[%s13737_s11 + $0x5d0] sm:$0xff]  ;;  %v13009_v2 = vld [vmem:[%s17394_s1 + $0xc44] ss:$68 sps:$4 sm:$0xff]   ;;  %v1067_v44 = vpack.c.bf16 %v729_v38, %v727_v37 }
 0x20b   : > { %v1066_v32 = vpack.c.bf16 %v726_v26, %v724_v23  ;;  %v507_v19 = vld [vmem:[%s13737_s11 + $0x5e0] sm:$0xff]  ;;  %v509_v20 = vld [vmem:[%s13737_s11 + $0x5f0] sm:$0xff]  ;;  %v730_v36 = vld [vmem:[%s13737_s11 + $0xcd8] sm:$0xff] }
 0x20c   : > { %5576 = vmatpush1.bf16.msra.mxu1 %v949_v14  ;;  %v12970_v23 = vld [vmem:[%s17394_s1 + $0x2d4] ss:$68 sps:$4 sm:$0xff]   ;;  %v957_v26 = vpack.c.bf16 %v509_v20, %v507_v19  ;;  %v13027_v62 = vld [vmem:[%s17394_s1 + $0xddc] ss:$68 sps:$4 sm:$0xff]   ;;  %v736_v19 = vld [vmem:[%s13737_s11 + $0xd08] sm:$0xff] }
 0x20d   : > { %6972 = vmatpush1.bf16.msra.mxu0 %v1061_v47  ;;  %v12960_v47 = vld [vmem:[%s17394_s1 + $0x1c0] ss:$68 sps:$4 sm:$0xff]   ;;  %5577 = vmatprep.subr.bf16.mxu1 %v952_v30  ;;  %v733_v61 = vld [vmem:[%s13737_s11 + $0xcf0] sm:$0xff]  ;;  %v738_v20 = vld [vmem:[%s13737_s11 + $0xd18] sm:$0xff] }
 0x20e   : > { %6973 = vmatprep.subr.bf16.mxu0 %v1064_v53  ;;  %v501_v53 = vld [vmem:[%s13737_s11 + $0x5b0] sm:$0xff]  ;;  %5443 = vmatmul.mubr.bf16.gmra.mrb[84].mxu1 %v12999_v17  ;;  %v12966_v17 = vld [vmem:[%s17394_s1 + $0x248] ss:$68 sps:$4 sm:$0xff]   ;;  %v13011_v30 = vld [vmem:[%s17394_s1 + $0xc40] ss:$68 sps:$4 sm:$0xff]  }
 0x20f   : > { %5452 = vmatprep.mubr.bf16.mxu1 %v13003_v18  ;;  %v953_v57 = vpack.c.bf16 %v501_v53, %v499_v51  ;;  %v12982_v51 = vld [vmem:[%s17394_s1 + $0x3e4] ss:$68 sps:$4 sm:$0xff]   ;;  %v13023_v53 = vld [vmem:[%s17394_s1 + $0xd50] ss:$68 sps:$4 sm:$0xff]   ;;  %v13000_v38 = vld [vmem:[%s17394_s1 + $0x57c] ss:$68 sps:$4 sm:$0xff]  }
 0x210   : > { %6665 = vmatmul.mubr.bf16.gmra.mrb[8].mxu0 %v12954_v63  ;;  %5578 = vmatpush1.bf16.msra.mxu1 %v951_v40  ;;  %v503_v63 = vld [vmem:[%s13737_s11 + $0x5c0] sm:$0xff]  ;;  %v13015_v40 = vld [vmem:[%s17394_s1 + $0xccc] ss:$68 sps:$4 sm:$0xff]  }
 0x211   : > { %6674 = vmatprep.mubr.bf16.mxu0 %v12958_v12  ;;  %6974 = vmatpush1.bf16.msra.mxu0 %v1063_v13  ;;  %v508_v12 = vld [vmem:[%s13737_s11 + $0x5e8] sm:$0xff]  ;;  %v510_v13 = vld [vmem:[%s13737_s11 + $0x5f8] sm:$0xff]  ;;  %v955_v14 = vpack.c.bf16 %v505_v0, %v503_v63  ;;  %v12996_v37 = vld [vmem:[%s17394_s1 + $0x4f0] ss:$68 sps:$4 sm:$0xff]  }
 0x212   : > { %6975 = vmatprep.subr.bf16.mxu0 %v1066_v32  ;;  %5579 = vmatprep.subr.bf16.mxu1 %v954_v49  ;;  %v958_v18 = vpack.c.bf16 %v510_v13, %v508_v12  ;;  %v728_v32 = vld [vmem:[%s13737_s11 + $0xcc8] sm:$0xff]  ;;  %v12978_v49 = vld [vmem:[%s17394_s1 + $0x358] ss:$68 sps:$4 sm:$0xff]  }
 0x213   : > { %v1068_v41 = vpack.c.bf16 %v730_v36, %v728_v32  ;;  %v13029_v12 = vld [vmem:[%s17394_s1 + $0xdd8] ss:$68 sps:$4 sm:$0xff]   ;;  %v13033_v13 = vld [vmem:[%s17394_s1 + $0xe64] ss:$68 sps:$4 sm:$0xff]   ;;  %v1072_v32 = vpack.c.bf16 %v738_v20, %v736_v19 }
 0x214   : > { %5580 = vmatpush1.bf16.msra.mxu1 %v953_v57  ;;  %v734_v57 = vld [vmem:[%s13737_s11 + $0xcf8] sm:$0xff] }
 0x215   : > { %6976 = vmatpush1.bf16.msra.mxu0 %v1065_v48  ;;  %5581 = vmatprep.subr.bf16.mxu1 %v956_v3  ;;  %v13017_v48 = vld [vmem:[%s17394_s1 + $0xcc8] ss:$68 sps:$4 sm:$0xff]  }
 0x216   : > { %5453 = vmatmul.mubr.bf16.gmra.mrb[88].mxu1 %v13005_v60  ;;  %6977 = vmatprep.subr.bf16.mxu0 %v1068_v41  ;;  %v731_v60 = vld [vmem:[%s13737_s11 + $0xce0] sm:$0xff]  ;;  %v12988_v3 = vld [vmem:[%s17394_s1 + $0x46c] ss:$68 sps:$4 sm:$0xff]   ;;  %v13045_v41 = vld [vmem:[%s17394_s1 + $0xf74] ss:$68 sps:$4 sm:$0xff]  }
 0x217   : > { %5462 = vmatprep.mubr.bf16.mxu1 %v13009_v2  ;;  %v1069_v0 = vpack.c.bf16 %v733_v61, %v731_v60  ;;  %v12984_v2 = vld [vmem:[%s17394_s1 + $0x3e0] ss:$68 sps:$4 sm:$0xff]   ;;  %v13012_v61 = vld [vmem:[%s17394_s1 + $0x68c] ss:$68 sps:$4 sm:$0xff]  }
 0x218   : > { %6675 = vmatmul.mubr.bf16.gmra.mrb[12].mxu0 %v12960_v47  ;;  %5582 = vmatpush1.bf16.msra.mxu1 %v955_v14  ;;  %v12976_v47 = vld [vmem:[%s17394_s1 + $0x35c] ss:$68 sps:$4 sm:$0xff]   ;;  %v12990_v14 = vld [vmem:[%s17394_s1 + $0x468] ss:$68 sps:$4 sm:$0xff]  }
 0x219   : > { %6684 = vmatprep.mubr.bf16.mxu0 %v12964_v54  ;;  %5583 = vmatprep.subr.bf16.mxu1 %v958_v18  ;;  %v732_v54 = vld [vmem:[%s13737_s11 + $0xce8] sm:$0xff]  ;;  %v13035_v18 = vld [vmem:[%s17394_s1 + $0xe60] ss:$68 sps:$4 sm:$0xff]  }
 0x21a   : > { %6978 = vmatpush1.bf16.msra.mxu0 %v1067_v44  ;;  %v1070_v63 = vpack.c.bf16 %v734_v57, %v732_v54  ;;  %v13002_v44 = vld [vmem:[%s17394_s1 + $0x578] ss:$68 sps:$4 sm:$0xff]   ;;  %v13008_v60 = vld [vmem:[%s17394_s1 + $0x600] ss:$68 sps:$4 sm:$0xff]  }
 0x21c   : > { %5584 = vmatpush1.bf16.msra.mxu1 %v957_v26  ;;  %6979 = vmatprep.subr.bf16.mxu0 %v1070_v63  ;;  %v737_v26 = vld [vmem:[%s13737_s11 + $0xd10] sm:$0xff]  ;;  %v13057_v63 = vld [vmem:[%s17394_s1 + $0x1084] ss:$68 sps:$4 sm:$0xff]  }
 0x21d   : > { %11174 = vmatprep.subr.bf16.mxu1 %v13742_v5  ;;  %v13021_v5 = vld [vmem:[%s17394_s1 + $0xd54] ss:$68 sps:$4 sm:$0xff]  }
 0x21e   : > { %5463 = vmatmul.mubr.bf16.gmra.mrb[92].mxu1 %v13011_v30  ;;  %6980 = vmatpush1.bf16.msra.mxu0 %v1069_v0  ;;  %v13039_v30 = vld [vmem:[%s17394_s1 + $0xeec] ss:$68 sps:$4 sm:$0xff]  }
 0x21f   : > { %5472 = vmatprep.mubr.bf16.mxu1 %v13015_v40  ;;  %6981 = vmatprep.subr.bf16.mxu0 %v1072_v32  ;;  %v13041_v40 = vld [vmem:[%s17394_s1 + $0xee8] ss:$68 sps:$4 sm:$0xff]  }
 0x220   : > { %6685 = vmatmul.mubr.bf16.gmra.mrb[16].mxu0 %v12966_v17  ;;  %v12994_v17 = vld [vmem:[%s17394_s1 + $0x4f4] ss:$68 sps:$4 sm:$0xff]   ;;  %v13014_v0 = vld [vmem:[%s17394_s1 + $0x688] ss:$68 sps:$4 sm:$0xff]  }
 0x221   : > { %6694 = vmatprep.mubr.bf16.mxu0 %v12970_v23  ;;  %v735_v23 = vld [vmem:[%s13737_s11 + $0xd00] sm:$0xff]  ;;  %v748_v32 = vld [vmem:[%s13737_s11 + $0xd68] sm:$0xff] }
 0x222   : > { %v1071_v36 = vpack.c.bf16 %v737_v26, %v735_v23  ;;  %v13020_v23 = vld [vmem:[%s17394_s1 + $0x710] ss:$68 sps:$4 sm:$0xff]   ;;  %v13024_v26 = vld [vmem:[%s17394_s1 + $0x79c] ss:$68 sps:$4 sm:$0xff]  }
 0x224   : > { %6982 = vmatpush1.bf16.msra.mxu0 %v1071_v36  ;;  %v750_v36 = vld [vmem:[%s13737_s11 + $0xd78] sm:$0xff] }
 0x226   : > { %5473 = vmatmul.mubr.bf16.gmra.mrb[96].mxu1 %v13017_v48  ;;  %v740_v48 = vld [vmem:[%s13737_s11 + $0xd28] sm:$0xff] }
 0x227   : > { %5482 = vmatprep.mubr.bf16.mxu1 %v13021_v5  ;;  %v742_v5 = vld [vmem:[%s13737_s11 + $0xd38] sm:$0xff] }
 0x228   : > { %6695 = vmatmul.mubr.bf16.gmra.mrb[20].mxu0 %v12972_v46  ;;  %v13006_v46 = vld [vmem:[%s17394_s1 + $0x604] ss:$68 sps:$4 sm:$0xff]   ;;  %v1074_v54 = vpack.c.bf16 %v742_v5, %v740_v48  ;;  %v754_v5 = vld [vmem:[%s13737_s11 + $0xd98] sm:$0xff] }
 0x229   : > { %6704 = vmatprep.mubr.bf16.mxu0 %v12976_v47  ;;  %v13047_v47 = vld [vmem:[%s17394_s1 + $0xf70] ss:$68 sps:$4 sm:$0xff]   ;;  %v752_v48 = vld [vmem:[%s13737_s11 + $0xd88] sm:$0xff] }
 0x22a   : > { %6983 = vmatprep.subr.bf16.mxu0 %v1074_v54 }
 0x22e   : > { %5483 = vmatmul.mubr.bf16.gmra.mrb[100].mxu1 %v13023_v53  ;;  %v13051_v53 = vld [vmem:[%s17394_s1 + $0xffc] ss:$68 sps:$4 sm:$0xff]  }
 0x22f   : > { %5492 = vmatprep.mubr.bf16.mxu1 %v13027_v62  ;;  %v13053_v62 = vld [vmem:[%s17394_s1 + $0xff8] ss:$68 sps:$4 sm:$0xff]  }
 0x230   : > { %6705 = vmatmul.mubr.bf16.gmra.mrb[24].mxu0 %v12978_v49  ;;  %v739_v49 = vld [vmem:[%s13737_s11 + $0xd20] sm:$0xff] }
 0x231   : > { %6714 = vmatprep.mubr.bf16.mxu0 %v12982_v51  ;;  %v741_v51 = vld [vmem:[%s13737_s11 + $0xd30] sm:$0xff] }
 0x232   : > { %v1073_v57 = vpack.c.bf16 %v741_v51, %v739_v49  ;;  %v1080_v49 = vpack.c.bf16 %v754_v5, %v752_v48  ;;  %v751_v51 = vld [vmem:[%s13737_s11 + $0xd80] sm:$0xff]  ;;  %v768_v48 = vld [vmem:[%s13737_s11 + $0xe08] sm:$0xff] }
 0x233   : > { %v13131_v5 = vld [vmem:[%s17394_s1 + $0x5e8] ss:$68 sps:$4 sm:$0xff]  }
 0x234   : > { %6984 = vmatpush1.bf16.msra.mxu0 %v1073_v57  ;;  %v13071_v57 = vld [vmem:[%s17394_s1 + $0x98] ss:$68 sps:$4 sm:$0xff]  }
 0x236   : > { %5493 = vmatmul.mubr.bf16.gmra.mrb[104].mxu1 %v13029_v12  ;;  %v744_v12 = vld [vmem:[%s13737_s11 + $0xd48] sm:$0xff] }
 0x237   : > { %5502 = vmatprep.mubr.bf16.mxu1 %v13033_v13  ;;  %v746_v13 = vld [vmem:[%s13737_s11 + $0xd58] sm:$0xff] }
 0x238   : > { %6715 = vmatmul.mubr.bf16.gmra.mrb[28].mxu0 %v12984_v2  ;;  %v13018_v2 = vld [vmem:[%s17394_s1 + $0x714] ss:$68 sps:$4 sm:$0xff]   ;;  %v1076_v19 = vpack.c.bf16 %v746_v13, %v744_v12  ;;  %v760_v12 = vld [vmem:[%s13737_s11 + $0xdc8] sm:$0xff] }
 0x239   : > { %6724 = vmatprep.mubr.bf16.mxu0 %v12988_v3  ;;  %v13059_v3 = vld [vmem:[%s17394_s1 + $0x1080] ss:$68 sps:$4 sm:$0xff]   ;;  %v762_v13 = vld [vmem:[%s13737_s11 + $0xdd8] sm:$0xff] }
 0x23a   : > { %6985 = vmatprep.subr.bf16.mxu0 %v1076_v19  ;;  %v764_v19 = vld [vmem:[%s13737_s11 + $0xde8] sm:$0xff] }
 0x23e   : > { %5503 = vmatmul.mubr.bf16.gmra.mrb[108].mxu1 %v13035_v18  ;;  %v13065_v18 = vld [vmem:[%s17394_s1 + $0x14] ss:$68 sps:$4 sm:$0xff]  }
 0x23f   : > { %5512 = vmatprep.mubr.bf16.mxu1 %v13039_v30  ;;  %v13063_v30 = vld [vmem:[%s17394_s1 + $0x10] ss:$68 sps:$4 sm:$0xff]  }
 0x240   : > { %6725 = vmatmul.mubr.bf16.gmra.mrb[32].mxu0 %v12990_v14  ;;  %v743_v14 = vld [vmem:[%s13737_s11 + $0xd40] sm:$0xff] }
 0x241   : > { %6734 = vmatprep.mubr.bf16.mxu0 %v12994_v17  ;;  %v745_v17 = vld [vmem:[%s13737_s11 + $0xd50] sm:$0xff] }
 0x242   : > { %v1075_v20 = vpack.c.bf16 %v745_v17, %v743_v14  ;;  %v761_v14 = vld [vmem:[%s13737_s11 + $0xdd0] sm:$0xff] }
 0x244   : > { %6986 = vmatpush1.bf16.msra.mxu0 %v1075_v20  ;;  %v766_v20 = vld [vmem:[%s13737_s11 + $0xdf8] sm:$0xff] }
 0x246   : > { %5513 = vmatmul.mubr.bf16.gmra.mrb[112].mxu1 %v13041_v40  ;;  %v13069_v40 = vld [vmem:[%s17394_s1 + $0x9c] ss:$68 sps:$4 sm:$0xff]  }
 0x247   : > { %5522 = vmatprep.mubr.bf16.mxu1 %v13045_v41  ;;  %v1078_v41 = vpack.c.bf16 %v750_v36, %v748_v32  ;;  %v13042_v36 = vld [vmem:[%s17394_s1 + $0x934] ss:$68 sps:$4 sm:$0xff]  }
 0x248   : > { %6735 = vmatmul.mubr.bf16.gmra.mrb[36].mxu0 %v12996_v37  ;;  %v747_v37 = vld [vmem:[%s13737_s11 + $0xd60] sm:$0xff] }
 0x249   : > { %6744 = vmatprep.mubr.bf16.mxu0 %v13000_v38  ;;  %v749_v38 = vld [vmem:[%s13737_s11 + $0xd70] sm:$0xff]  ;;  %6987 = vmatprep.subr.bf16.mxu0 %v1078_v41  ;;  %v13125_v41 = vld [vmem:[%s17394_s1 + $0x560] ss:$68 sps:$4 sm:$0xff]  }
 0x24e   : > { %5523 = vmatmul.mubr.bf16.gmra.mrb[116].mxu1 %v13047_v47  ;;  %v13030_v47 = vld [vmem:[%s17394_s1 + $0x824] ss:$68 sps:$4 sm:$0xff]  }
 0x24f   : > { %5532 = vmatprep.mubr.bf16.mxu1 %v13051_v53  ;;  %v753_v53 = vld [vmem:[%s13737_s11 + $0xd90] sm:$0xff] }
 0x250   : > { %6745 = vmatmul.mubr.bf16.gmra.mrb[40].mxu0 %v13002_v44  ;;  %v1077_v44 = vpack.c.bf16 %v749_v38, %v747_v37  ;;  %v1079_v54 = vpack.c.bf16 %v753_v53, %v751_v51  ;;  %v13074_v37 = vld [vmem:[%s17394_s1 + $0xbd8] ss:$68 sps:$4 sm:$0xff]   ;;  %v13080_v38 = vld [vmem:[%s17394_s1 + $0xc60] ss:$68 sps:$4 sm:$0xff]  }
 0x251   : > { %6754 = vmatprep.mubr.bf16.mxu0 %v13006_v46  ;;  %v13026_v46 = vld [vmem:[%s17394_s1 + $0x798] ss:$68 sps:$4 sm:$0xff]  }
 0x252   : > { %6988 = vmatpush1.bf16.msra.mxu0 %v1077_v44  ;;  %v13129_v44 = vld [vmem:[%s17394_s1 + $0x5ec] ss:$68 sps:$4 sm:$0xff]   ;;  %v13135_v51 = vld [vmem:[%s17394_s1 + $0x674] ss:$68 sps:$4 sm:$0xff]  }
 0x253   : > { %6989 = vmatprep.subr.bf16.mxu0 %v1080_v49  ;;  %v770_v49 = vld [vmem:[%s13737_s11 + $0xe18] sm:$0xff] }
 0x254   : > { %v1088_v53 = vpack.c.bf16 %v770_v49, %v768_v48  ;;  %v775_v48 = vld [vmem:[%s13737_s11 + $0xe40] sm:$0xff]  ;;  %v780_v49 = vld [vmem:[%s13737_s11 + $0xe68] sm:$0xff] }
 0x256   : > { %5533 = vmatmul.mubr.bf16.gmra.mrb[120].mxu1 %v13053_v62  ;;  %6990 = vmatpush1.bf16.msra.mxu0 %v1079_v54  ;;  %v755_v62 = vld [vmem:[%s13737_s11 + $0xda0] sm:$0xff]  ;;  %v13092_v54 = vld [vmem:[%s17394_s1 + $0xd70] ss:$68 sps:$4 sm:$0xff]  }
 0x257   : > { %5542 = vmatprep.mubr.bf16.mxu1 %v13057_v63  ;;  %v757_v63 = vld [vmem:[%s13737_s11 + $0xdb0] sm:$0xff] }
 0x258   : > { %6755 = vmatmul.mubr.bf16.gmra.mrb[44].mxu0 %v13008_v60  ;;  %v756_v60 = vld [vmem:[%s13737_s11 + $0xda8] sm:$0xff] }
 0x259   : > { %6764 = vmatprep.mubr.bf16.mxu0 %v13012_v61  ;;  %v758_v61 = vld [vmem:[%s13737_s11 + $0xdb8] sm:$0xff] }
 0x25e   : > { %5543 = vmatmul.mubr.bf16.gmra.mrb[124].mxu1 %v13059_v3  ;;  %v13036_v3 = vld [vmem:[%s17394_s1 + $0x8ac] ss:$68 sps:$4 sm:$0xff]  }
 0x25f   : > { %5585 = vmatprep.mubr.bf16.mxu1 %v13065_v18  ;;  %v13077_v18 = vld [vmem:[%s17394_s1 + $0x120] ss:$68 sps:$4 sm:$0xff]  }
 0x260   : > { %6765 = vmatmul.mubr.bf16.gmra.mrb[48].mxu0 %v13014_v0  ;;  %v1081_v0 = vpack.c.bf16 %v757_v63, %v755_v62  ;;  %v17401_v62 = vmov 0   ;;  %v13141_v63 = vld [vmem:[%s17394_s1 + $0x6fc] ss:$68 sps:$4 sm:$0xff]  }
 0x261   : > { %6774 = vmatprep.mubr.bf16.mxu0 %v13018_v2  ;;  %v13032_v2 = vld [vmem:[%s17394_s1 + $0x820] ss:$68 sps:$4 sm:$0xff]   ;;  %12647 = vset.pattern.permute.xlu0 %v17401_v62 }
 0x262   : > { %12648 = vset.pattern.permute.xlu1 %v17401_v62  ;;  %v13278_v62 = vld [vmem:[%s17394_s1 + $0xcf0] ss:$68 sps:$4 sm:$0xff]  }
 0x266   : > { %5586 = vmatmul.mubr.bf16.vlgmr.msra.gmra.mrb[0].mxu1 %v13063_v30  ;;  %v13081_v30 = vld [vmem:[%s17394_s1 + $0x1ac] ss:$68 sps:$4 sm:$0xff]  }
 0x267   : > { %5595 = vmatprep.mubr.bf16.mxu1 %v13069_v40  ;;  %11190 = vmatpush1.bf16.msra.mxu1 %v13747_v9  ;;  %v13075_v9 = vld [vmem:[%s17394_s1 + $0x124] ss:$68 sps:$4 sm:$0xff]   ;;  %v13084_v40 = vld [vmem:[%s17394_s1 + $0xcec] ss:$68 sps:$4 sm:$0xff]  }
 0x268   : > { %6775 = vmatmul.mubr.bf16.gmra.mrb[52].mxu0 %v13020_v23  ;;  %11175 = vmatprep.subr.bf16.mxu1 %v13749_v10  ;;  %v1082_v10 = vpack.c.bf16 %v758_v61, %v756_v60  ;;  %v763_v23 = vld [vmem:[%s13737_s11 + $0xde0] sm:$0xff]  ;;  %v13137_v61 = vld [vmem:[%s17394_s1 + $0x670] ss:$68 sps:$4 sm:$0xff]  }
 0x269   : > { %6784 = vmatprep.mubr.bf16.mxu0 %v13024_v26  ;;  %v765_v26 = vld [vmem:[%s13737_s11 + $0xdf0] sm:$0xff]  ;;  %v1711_v60 = vld [vmem:[%s17395_s2] sm:$0xff] }
 0x26a   : > { %6991 = vmatprep.subr.bf16.mxu0 %v1082_v10  ;;  %v1085_v32 = vpack.c.bf16 %v765_v26, %v763_v23  ;;  %1777 = vperm.xlu0 %12647, %v1711_v60   ;;  %v13102_v10 = vld [vmem:[%s17394_s1 + $0xe84] ss:$68 sps:$4 sm:$0xff]  }
 0x26b   : > { %11191 = vmatpush1.bf16.msra.mxu1 %v13757_v15  ;;  %6992 = vmatpush1.bf16.msra.mxu0 %v1081_v0  ;;  %v1084_v15 = vpack.c.bf16 %v762_v13, %v760_v12  ;;  %v1712_v0 = vld [vmem:[%s17395_s2 + $0x8] sm:$0xff]  ;;  %v1713_v12 = vld [vmem:[%s17395_s2 + $0x10] sm:$0xff]  ;;  %v13104_v13 = vld [vmem:[%s17394_s1 + $0xe80] ss:$68 sps:$4 sm:$0xff]  }
 0x26c   : > { %11176 = vmatprep.subr.bf16.mxu1 %v13760_v16  ;;  %v759_v16 = vld [vmem:[%s13737_s11 + $0xdc0] sm:$0xff]  ;;  %1787 = vperm.xlu1 %12648, %v1713_v12   ;;  %v13155_v26 = vld [vmem:[%s17394_s1 + $0x808] ss:$68 sps:$4 sm:$0xff]  }
 0x26d   : > { %v1083_v17 = vpack.c.bf16 %v761_v14, %v759_v16  ;;  %6993 = vmatprep.subr.bf16.mxu0 %v1084_v15  ;;  %v13108_v15 = vld [vmem:[%s17394_s1 + $0xf0c] ss:$68 sps:$4 sm:$0xff]   ;;  %v1714_v16 = vld [vmem:[%s17395_s2 + $0x18] sm:$0xff]  ;;  %v13149_v14 = vld [vmem:[%s17394_s1 + $0x780] ss:$68 sps:$4 sm:$0xff]  }
 0x26e   : > { %5596 = vmatmul.mubr.bf16.gmra.mrb[4].mxu1 %v13071_v57  ;;  %v13096_v57 = vld [vmem:[%s17394_s1 + $0xdfc] ss:$68 sps:$4 sm:$0xff]   ;;  %1782 = vperm.xlu0 %12647, %v1712_v0  }
 0x26f   : > { %5605 = vmatprep.mubr.bf16.mxu1 %v13075_v9  ;;  %11192 = vmatpush1.bf16.msra.mxu1 %v13767_v21  ;;  %v1086_v21 = vpack.c.bf16 %v766_v20, %v764_v19  ;;  %v13098_v9 = vld [vmem:[%s17394_s1 + $0xdf8] ss:$68 sps:$4 sm:$0xff]   ;;  %v1716_v20 = vld [vmem:[%s17395_s2 + $0x28] sm:$0xff]  ;;  %v1715_v23 = vld [vmem:[%s17395_s2 + $0x20] sm:$0xff] }
 0x270   : > { %6785 = vmatmul.mubr.bf16.gmra.mrb[56].mxu0 %v13026_v46  ;;  %11177 = vmatprep.subr.bf16.mxu1 %v13770_v22  ;;  %v13038_v22 = vld [vmem:[%s17394_s1 + $0x8a8] ss:$68 sps:$4 sm:$0xff]   ;;  %v13114_v19 = vld [vmem:[%s17394_s1 + $0xf94] ss:$68 sps:$4 sm:$0xff]  }
 0x271   : > { %6794 = vmatprep.mubr.bf16.mxu0 %v13030_v47  ;;  %6994 = vmatpush1.bf16.msra.mxu0 %v1083_v17  ;;  %v13086_v46 = vld [vmem:[%s17394_s1 + $0xce8] ss:$68 sps:$4 sm:$0xff]   ;;  %v13090_v47 = vld [vmem:[%s17394_s1 + $0xd74] ss:$68 sps:$4 sm:$0xff]  }
 0x272   : > { %6995 = vmatprep.subr.bf16.mxu0 %v1086_v21  ;;  %1792 = vperm.xlu1 %12648, %v1714_v16   ;;  %v13153_v17 = vld [vmem:[%s17394_s1 + $0x80c] ss:$68 sps:$4 sm:$0xff]   ;;  %v1726_v0 = vld [vmem:[%s17395_s2 + $0x78] sm:$0xff]  ;;  %v783_v16 = vld [vmem:[%s13737_s11 + $0xe80] sm:$0xff] }
 0x273   : > { %11193 = vmatpush1.bf16.msra.mxu1 %v13777_v27  ;;  %v13083_v27 = vld [vmem:[%s17394_s1 + $0x1a8] ss:$68 sps:$4 sm:$0xff]   ;;  %1797 = vperm.xlu0 %12647, %v1715_v23   ;;  %v13116_v21 = vld [vmem:[%s17394_s1 + $0xf90] ss:$68 sps:$4 sm:$0xff]   ;;  %v1727_v23 = vld [vmem:[%s17395_s2 + $0x80] sm:$0xff] }
 0x274   : > { %11178 = vmatprep.subr.bf16.mxu1 %v13780_v28  ;;  %v13087_v28 = vld [vmem:[%s17394_s1 + $0x234] ss:$68 sps:$4 sm:$0xff]  }
 0x275   : > { %6996 = vmatpush1.bf16.msra.mxu0 %v1085_v32  ;;  %v13120_v32 = vld [vmem:[%s17394_s1 + $0x101c] ss:$68 sps:$4 sm:$0xff]  }
 0x276   : > { %5606 = vmatmul.mubr.bf16.gmra.mrb[8].mxu1 %v13077_v18  ;;  %7318 = vmatprep.subr.bf16.mxu0 %v1088_v53  ;;  %v13110_v18 = vld [vmem:[%s17394_s1 + $0xf08] ss:$68 sps:$4 sm:$0xff]   ;;  %v13140_v53 = vld [vmem:[%s17394_s1 + $0xb8] ss:$68 sps:$4 sm:$0xff]  }
 0x277   : > { %5615 = vmatprep.mubr.bf16.mxu1 %v13081_v30  ;;  %11194 = vmatpush1.bf16.msra.mxu1 %v13787_v33  ;;  %v13044_v33 = vld [vmem:[%s17394_s1 + $0x930] ss:$68 sps:$4 sm:$0xff]  }
 0x278   : > { %6795 = vmatmul.mubr.bf16.gmra.mrb[60].mxu0 %v13032_v2  ;;  %11179 = vmatprep.subr.bf16.mxu1 %v13790_v34  ;;  %v13048_v34 = vld [vmem:[%s17394_s1 + $0x9bc] ss:$68 sps:$4 sm:$0xff]   ;;  %v13159_v30 = vld [vmem:[%s17394_s1 + $0x894] ss:$68 sps:$4 sm:$0xff]  }
 0x279   : > { %6804 = vmatprep.mubr.bf16.mxu0 %v13036_v3  ;;  %v13143_v2 = vld [vmem:[%s17394_s1 + $0x6f8] ss:$68 sps:$4 sm:$0xff]   ;;  %v13147_v3 = vld [vmem:[%s17394_s1 + $0x784] ss:$68 sps:$4 sm:$0xff]   ;;  %1802 = vperm.xlu1 %12648, %v1716_v20  }
 0x27a   : > { %v1728_v20 = vld [vmem:[%s17395_s2 + $0x88] sm:$0xff] }
 0x27b   : > { %11195 = vmatpush1.bf16.msra.mxu1 %v13797_v39  ;;  %v13089_v39 = vld [vmem:[%s17394_s1 + $0x230] ss:$68 sps:$4 sm:$0xff]  }
 0x27c   : > { %11180 = vmatprep.subr.bf16.mxu1 %v13803_v43  ;;  %v13093_v43 = vld [vmem:[%s17394_s1 + $0x2bc] ss:$68 sps:$4 sm:$0xff]  }
 0x27e   : > { %5616 = vmatmul.mubr.bf16.gmra.mrb[12].mxu1 %v13083_v27  ;;  %v13161_v27 = vld [vmem:[%s17394_s1 + $0x890] ss:$68 sps:$4 sm:$0xff]  }
 0x27f   : > { %5625 = vmatprep.mubr.bf16.mxu1 %v13087_v28  ;;  %11196 = vmatpush1.bf16.msra.mxu1 %v13815_v55  ;;  %v13050_v55 = vld [vmem:[%s17394_s1 + $0x9b8] ss:$68 sps:$4 sm:$0xff]  }
 0x280   : > { %6805 = vmatmul.mubr.bf16.gmra.mrb[64].mxu0 %v13038_v22  ;;  %11181 = vmatprep.subr.bf16.mxu1 %v13820_v59  ;;  %v13054_v59 = vld [vmem:[%s17394_s1 + $0xa44] ss:$68 sps:$4 sm:$0xff]   ;;  %v1718_v22 = vld [vmem:[%s17395_s2 + $0x38] sm:$0xff] }
 0x281   : > { %6814 = vmatprep.mubr.bf16.mxu0 %v13042_v36  ;;  %v1717_v36 = vld [vmem:[%s17395_s2 + $0x30] sm:$0xff]  ;;  %1812 = vperm.xlu1 %12648, %v1718_v22   ;;  %v13165_v28 = vld [vmem:[%s17394_s1 + $0x91c] ss:$68 sps:$4 sm:$0xff]  }
 0x282   : > { %1807 = vperm.xlu0 %12647, %v1717_v36   ;;  %v787_v36 = vld [vmem:[%s13737_s11 + $0xea0] sm:$0xff] }
 0x283   : > { %11197 = vmatpush1.bf16.msra.mxu1 %v13831_v7  ;;  %v13095_v7 = vld [vmem:[%s17394_s1 + $0x2b8] ss:$68 sps:$4 sm:$0xff]  }
 0x284   : > { %11182 = vmatprep.subr.bf16.mxu1 %v13834_v8  ;;  %v13099_v8 = vld [vmem:[%s17394_s1 + $0x344] ss:$68 sps:$4 sm:$0xff]  }
 0x286   : > { %5626 = vmatmul.mubr.bf16.gmra.mrb[16].mxu1 %v13089_v39  ;;  %v1720_v39 = vld [vmem:[%s17395_s2 + $0x48] sm:$0xff] }
 0x287   : > { %5635 = vmatprep.mubr.bf16.mxu1 %v13093_v43  ;;  %11198 = vmatpush1.bf16.msra.mxu1 %v13845_v25  ;;  %v13056_v25 = vld [vmem:[%s17394_s1 + $0xa40] ss:$68 sps:$4 sm:$0xff]  }
 0x288   : > { %6815 = vmatmul.mubr.bf16.gmra.mrb[68].mxu0 %v13044_v33  ;;  %11183 = vmatprep.subr.bf16.mxu1 %v13849_v29  ;;  %v13060_v29 = vld [vmem:[%s17394_s1 + $0xacc] ss:$68 sps:$4 sm:$0xff]   ;;  %v13122_v33 = vld [vmem:[%s17394_s1 + $0x1018] ss:$68 sps:$4 sm:$0xff]   ;;  %v1719_v43 = vld [vmem:[%s17395_s2 + $0x40] sm:$0xff] }
 0x289   : > { %6824 = vmatprep.mubr.bf16.mxu0 %v13048_v34  ;;  %v13126_v34 = vld [vmem:[%s17394_s1 + $0x10a4] ss:$68 sps:$4 sm:$0xff]   ;;  %1822 = vperm.xlu1 %12648, %v1720_v39   ;;  %v1730_v39 = vld [vmem:[%s17395_s2 + $0x98] sm:$0xff] }
 0x28a   : > { %1817 = vperm.xlu0 %12647, %v1719_v43   ;;  %v1729_v43 = vld [vmem:[%s17395_s2 + $0x90] sm:$0xff] }
 0x28b   : > { %11199 = vmatpush1.bf16.msra.mxu1 %v13859_v42  ;;  %v13101_v42 = vld [vmem:[%s17394_s1 + $0x340] ss:$68 sps:$4 sm:$0xff]  }
 0x28c   : > { %11184 = vmatprep.subr.bf16.mxu1 %v13863_v45  ;;  %v13105_v45 = vld [vmem:[%s17394_s1 + $0x3cc] ss:$68 sps:$4 sm:$0xff]  }
 0x28e   : > { %5636 = vmatmul.mubr.bf16.gmra.mrb[20].mxu1 %v13095_v7  ;;  %v13128_v7 = vld [vmem:[%s17394_s1 + $0x10a0] ss:$68 sps:$4 sm:$0xff]  }
 0x28f   : > { %5645 = vmatprep.mubr.bf16.mxu1 %v13099_v8  ;;  %11200 = vmatpush1.bf16.msra.mxu1 %v13873_v56  ;;  %v13062_v56 = vld [vmem:[%s17394_s1 + $0xac8] ss:$68 sps:$4 sm:$0xff]   ;;  %v13134_v8 = vld [vmem:[%s17394_s1 + $0x34] ss:$68 sps:$4 sm:$0xff]  }
 0x290   : > { %6825 = vmatmul.mubr.bf16.gmra.mrb[72].mxu0 %v13050_v55  ;;  %11185 = vmatprep.subr.bf16.mxu1 %v13877_v58  ;;  %v13066_v58 = vld [vmem:[%s17394_s1 + $0xb54] ss:$68 sps:$4 sm:$0xff]  }
 0x291   : > { %6834 = vmatprep.mubr.bf16.mxu0 %v13054_v59  ;;  %v13167_v55 = vld [vmem:[%s17394_s1 + $0x918] ss:$68 sps:$4 sm:$0xff]   ;;  %v13171_v59 = vld [vmem:[%s17394_s1 + $0x9a4] ss:$68 sps:$4 sm:$0xff]  }
 0x293   : > { %11201 = vmatpush1.bf16.msra.mxu1 %v13887_v6  ;;  %v13107_v6 = vld [vmem:[%s17394_s1 + $0x3c8] ss:$68 sps:$4 sm:$0xff]  }
 0x294   : > { %11186 = vmatprep.subr.bf16.mxu1 %v13890_v11  ;;  %v13111_v11 = vld [vmem:[%s17394_s1 + $0x454] ss:$68 sps:$4 sm:$0xff]  }
 0x296   : > { %5646 = vmatmul.mubr.bf16.gmra.mrb[24].mxu1 %v13101_v42  ;;  %v13173_v42 = vld [vmem:[%s17394_s1 + $0x9a0] ss:$68 sps:$4 sm:$0xff]  }
 0x297   : > { %5655 = vmatprep.mubr.bf16.mxu1 %v13105_v45  ;;  %11202 = vmatpush1.bf16.msra.mxu1 %v13902_v31  ;;  %v13068_v31 = vld [vmem:[%s17394_s1 + $0xb50] ss:$68 sps:$4 sm:$0xff]  }
 0x298   : > { %6835 = vmatmul.mubr.bf16.gmra.mrb[76].mxu0 %v13056_v25  ;;  %11187 = vmatprep.subr.bf16.mxu1 %v13906_v35  ;;  %v13072_v35 = vld [vmem:[%s17394_s1 + $0xbdc] ss:$68 sps:$4 sm:$0xff]   ;;  %v13177_v45 = vld [vmem:[%s17394_s1 + $0xa2c] ss:$68 sps:$4 sm:$0xff]  }
 0x299   : > { %6844 = vmatprep.mubr.bf16.mxu0 %v13060_v29  ;;  %v1722_v25 = vld [vmem:[%s17395_s2 + $0x58] sm:$0xff]  ;;  %v1721_v29 = vld [vmem:[%s17395_s2 + $0x50] sm:$0xff] }
 0x29a   : > { %1832 = vperm.xlu1 %12648, %v1722_v25   ;;  %1827 = vperm.xlu0 %12647, %v1721_v29   ;;  %v1732_v25 = vld [vmem:[%s17395_s2 + $0xa8] sm:$0xff]  ;;  %v1731_v29 = vld [vmem:[%s17395_s2 + $0xa0] sm:$0xff] }
 0x29b   : > { %11203 = vmatpush1.bf16.msra.mxu1 %v13919_v50  ;;  %v13113_v50 = vld [vmem:[%s17394_s1 + $0x450] ss:$68 sps:$4 sm:$0xff]  }
 0x29c   : > { %11188 = vmatprep.subr.bf16.mxu1 %v13923_v52  ;;  %v13117_v52 = vld [vmem:[%s17394_s1 + $0x4dc] ss:$68 sps:$4 sm:$0xff]  }
 0x29e   : > { %5656 = vmatmul.mubr.bf16.gmra.mrb[28].mxu1 %v13107_v6  ;;  %v772_v6 = vld [vmem:[%s13737_s11 + $0xe28] sm:$0xff] }
 0x29f   : > { %5665 = vmatprep.mubr.bf16.mxu1 %v13111_v11  ;;  %11204 = vmatpush1.bf16.msra.mxu1 %v13932_v1  ;;  %v13078_v1 = vld [vmem:[%s17394_s1 + $0xc64] ss:$68 sps:$4 sm:$0xff]   ;;  %v774_v11 = vld [vmem:[%s13737_s11 + $0xe38] sm:$0xff] }
 0x2a0   : > { %6845 = vmatmul.mubr.bf16.gmra.mrb[80].mxu0 %v13062_v56  ;;  %11189 = vmatprep.subr.bf16.mxu1 %v13937_v4  ;;  %v13119_v4 = vld [vmem:[%s17394_s1 + $0x4d8] ss:$68 sps:$4 sm:$0xff]   ;;  %v767_v56 = vld [vmem:[%s13737_s11 + $0xe00] sm:$0xff] }
 0x2a1   : > { %6854 = vmatprep.mubr.bf16.mxu0 %v13066_v58  ;;  %v769_v58 = vld [vmem:[%s13737_s11 + $0xe10] sm:$0xff] }
 0x2a3   : > { %11205 = vmatpush1.bf16.msra.mxu1 %v13946_v24  ;;  %v13123_v24 = vld [vmem:[%s17394_s1 + $0x564] ss:$68 sps:$4 sm:$0xff]  }
 0x2a6   : > { %5666 = vmatmul.mubr.bf16.gmra.mrb[32].mxu1 %v13113_v50  ;;  %v1087_v50 = vpack.c.bf16 %v769_v58, %v767_v56  ;;  %v794_v56 = vld [vmem:[%s13737_s11 + $0xed8] sm:$0xff] }
 0x2a7   : > { %5675 = vmatprep.mubr.bf16.mxu1 %v13117_v52  ;;  %v1090_v52 = vpack.c.bf16 %v774_v11, %v772_v6  ;;  %v13207_v58 = vld [vmem:[%s17394_s1 + $0xcd4] ss:$68 sps:$4 sm:$0xff]   ;;  %v791_v11 = vld [vmem:[%s13737_s11 + $0xec0] sm:$0xff] }
 0x2a8   : > { %6855 = vmatmul.mubr.bf16.gmra.mrb[84].mxu0 %v13068_v31  ;;  %v13132_v31 = vld [vmem:[%s17394_s1 + $0x30] ss:$68 sps:$4 sm:$0xff]  }
 0x2a9   : > { %6864 = vmatprep.mubr.bf16.mxu0 %v13072_v35  ;;  %v13138_v35 = vld [vmem:[%s17394_s1 + $0xbc] ss:$68 sps:$4 sm:$0xff]  }
 0x2ae   : > { %5676 = vmatmul.mubr.bf16.gmra.mrb[36].mxu1 %v13119_v4  ;;  %v776_v4 = vld [vmem:[%s13737_s11 + $0xe48] sm:$0xff] }
 0x2af   : > { %5685 = vmatprep.mubr.bf16.mxu1 %v13123_v24  ;;  %v778_v24 = vld [vmem:[%s13737_s11 + $0xe58] sm:$0xff] }
 0x2b0   : > { %6865 = vmatmul.mubr.bf16.gmra.mrb[88].mxu0 %v13074_v37  ;;  %v771_v37 = vld [vmem:[%s13737_s11 + $0xe20] sm:$0xff] }
 0x2b1   : > { %6874 = vmatprep.mubr.bf16.mxu0 %v13078_v1  ;;  %v773_v1 = vld [vmem:[%s13737_s11 + $0xe30] sm:$0xff] }
 0x2b6   : > { %5686 = vmatmul.mubr.bf16.gmra.mrb[40].mxu1 %v13125_v41  ;;  %v13179_v41 = vld [vmem:[%s17394_s1 + $0xa28] ss:$68 sps:$4 sm:$0xff]  }
 0x2b7   : > { %5695 = vmatprep.mubr.bf16.mxu1 %v13129_v44  ;;  %v1089_v44 = vpack.c.bf16 %v773_v1, %v771_v37  ;;  %v1734_v37 = vld [vmem:[%s17395_s2 + $0xb8] sm:$0xff]  ;;  %v1733_v1 = vld [vmem:[%s17395_s2 + $0xb0] sm:$0xff] }
 0x2b8   : > { %6875 = vmatmul.mubr.bf16.gmra.mrb[92].mxu0 %v13080_v38  ;;  %v1724_v38 = vld [vmem:[%s17395_s2 + $0x68] sm:$0xff] }
 0x2b9   : > { %6884 = vmatprep.mubr.bf16.mxu0 %v13084_v40  ;;  %v1723_v40 = vld [vmem:[%s17395_s2 + $0x60] sm:$0xff]  ;;  %1842 = vperm.xlu1 %12648, %v1724_v38  }
 0x2ba   : > { %1837 = vperm.xlu0 %12647, %v1723_v40   ;;  %v13170_v38 = vld [vmem:[%s17394_s1 + $0x360] ss:$68 sps:$4 sm:$0xff]   ;;  %v13174_v40 = vld [vmem:[%s17394_s1 + $0x3ec] ss:$68 sps:$4 sm:$0xff]  }
 0x2bd   : > { %1852 = vperm.xlu1 %12648, %v1726_v0   ;;  %v13182_v0 = vld [vmem:[%s17394_s1 + $0x470] ss:$68 sps:$4 sm:$0xff]  }
 0x2be   : > { %5696 = vmatmul.mubr.bf16.gmra.mrb[44].mxu1 %v13131_v5  ;;  %v777_v5 = vld [vmem:[%s13737_s11 + $0xe50] sm:$0xff] }
 0x2bf   : > { %5705 = vmatprep.mubr.bf16.mxu1 %v13135_v51  ;;  %v782_v51 = vld [vmem:[%s13737_s11 + $0xe78] sm:$0xff] }
 0x2c0   : > { %6885 = vmatmul.mubr.bf16.gmra.mrb[96].mxu0 %v13086_v46  ;;  %v13183_v46 = vld [vmem:[%s17394_s1 + $0xab4] ss:$68 sps:$4 sm:$0xff]   ;;  %v1094_v60 = vpack.c.bf16 %v782_v51, %v780_v49  ;;  %v795_v51 = vld [vmem:[%s13737_s11 + $0xee0] sm:$0xff] }
 0x2c1   : > { %6894 = vmatprep.mubr.bf16.mxu0 %v13090_v47  ;;  %v1092_v47 = vpack.c.bf16 %v778_v24, %v776_v4  ;;  %1862 = vperm.xlu1 %12648, %v1728_v20   ;;  %v13209_v4 = vld [vmem:[%s17394_s1 + $0xcd0] ss:$68 sps:$4 sm:$0xff]   ;;  %v13213_v24 = vld [vmem:[%s17394_s1 + $0xd5c] ss:$68 sps:$4 sm:$0xff]  }
 0x2c5   : > { %1872 = vperm.xlu1 %12648, %v1730_v39  }
 0x2c6   : > { %5706 = vmatmul.mubr.bf16.gmra.mrb[48].mxu1 %v13137_v61  ;;  %v779_v61 = vld [vmem:[%s13737_s11 + $0xe60] sm:$0xff] }
 0x2c7   : > { %5715 = vmatprep.mubr.bf16.mxu1 %v13141_v63  ;;  %v781_v63 = vld [vmem:[%s13737_s11 + $0xe70] sm:$0xff] }
 0x2c8   : > { %6895 = vmatmul.mubr.bf16.gmra.mrb[100].mxu0 %v13092_v54  ;;  %v13144_v54 = vld [vmem:[%s17394_s1 + $0x144] ss:$68 sps:$4 sm:$0xff]   ;;  %v1093_v12 = vpack.c.bf16 %v781_v63, %v779_v61  ;;  %v1738_v61 = vld [vmem:[%s17395_s2 + $0xd8] sm:$0xff]  ;;  %v1737_v63 = vld [vmem:[%s17395_s2 + $0xd0] sm:$0xff] }
 0x2c9   : > { %6904 = vmatprep.mubr.bf16.mxu0 %v13096_v57  ;;  %v1091_v57 = vpack.c.bf16 %v777_v5, %v775_v48  ;;  %1882 = vperm.xlu1 %12648, %v1732_v25   ;;  %v798_v48 = vld [vmem:[%s13737_s11 + $0xef8] sm:$0xff]  ;;  %v13219_v5 = vld [vmem:[%s17394_s1 + $0xde4] ss:$68 sps:$4 sm:$0xff]  }
 0x2cd   : > { %1892 = vperm.xlu1 %12648, %v1734_v37   ;;  %v1745_v37 = vld [vmem:[%s17395_s2 + $0x110] sm:$0xff] }
 0x2ce   : > { %5716 = vmatmul.mubr.bf16.gmra.mrb[52].mxu1 %v13143_v2  ;;  %v1725_v2 = vld [vmem:[%s17395_s2 + $0x70] sm:$0xff] }
 0x2cf   : > { %5725 = vmatprep.mubr.bf16.mxu1 %v13147_v3  ;;  %v13185_v3 = vld [vmem:[%s17394_s1 + $0xab0] ss:$68 sps:$4 sm:$0xff]   ;;  %1847 = vperm.xlu0 %12647, %v1725_v2   ;;  %v13186_v2 = vld [vmem:[%s17394_s1 + $0x4fc] ss:$68 sps:$4 sm:$0xff]  }
 0x2d0   : > { %6905 = vmatmul.mubr.bf16.gmra.mrb[104].mxu0 %v13098_v9  ;;  %v784_v9 = vld [vmem:[%s13737_s11 + $0xe88] sm:$0xff] }
 0x2d1   : > { %6914 = vmatprep.mubr.bf16.mxu0 %v13102_v10  ;;  %v786_v10 = vld [vmem:[%s13737_s11 + $0xe98] sm:$0xff] }
 0x2d3   : > { %1857 = vperm.xlu0 %12647, %v1727_v23   ;;  %v13188_v23 = vld [vmem:[%s17394_s1 + $0x4f8] ss:$68 sps:$4 sm:$0xff]  }
 0x2d6   : > { %5726 = vmatmul.mubr.bf16.gmra.mrb[56].mxu1 %v13149_v14  ;;  %v785_v14 = vld [vmem:[%s13737_s11 + $0xe90] sm:$0xff] }
 0x2d7   : > { %5735 = vmatprep.mubr.bf16.mxu1 %v13153_v17  ;;  %v13146_v17 = vld [vmem:[%s17394_s1 + $0x140] ss:$68 sps:$4 sm:$0xff]   ;;  %1867 = vperm.xlu0 %12647, %v1729_v43   ;;  %v1744_v43 = vld [vmem:[%s17395_s2 + $0x108] sm:$0xff] }
 0x2d8   : > { %6915 = vmatmul.mubr.bf16.gmra.mrb[108].mxu0 %v13104_v13  ;;  %v13189_v13 = vld [vmem:[%s17394_s1 + $0xb3c] ss:$68 sps:$4 sm:$0xff]  }
 0x2d9   : > { %6924 = vmatprep.mubr.bf16.mxu0 %v13108_v15  ;;  %v1096_v15 = vpack.c.bf16 %v786_v10, %v784_v9  ;;  %v13221_v9 = vld [vmem:[%s17394_s1 + $0xde0] ss:$68 sps:$4 sm:$0xff]   ;;  %v13225_v10 = vld [vmem:[%s17394_s1 + $0xe6c] ss:$68 sps:$4 sm:$0xff]  }
 0x2db   : > { %1877 = vperm.xlu0 %12647, %v1731_v29   ;;  %v13243_v29 = vld [vmem:[%s17394_s1 + $0x1004] ss:$68 sps:$4 sm:$0xff]  }
 0x2de   : > { %5736 = vmatmul.mubr.bf16.gmra.mrb[60].mxu1 %v13155_v26  ;;  %v13191_v26 = vld [vmem:[%s17394_s1 + $0xb38] ss:$68 sps:$4 sm:$0xff]  }
 0x2df   : > { %5745 = vmatprep.mubr.bf16.mxu1 %v13159_v30  ;;  %v788_v30 = vld [vmem:[%s13737_s11 + $0xea8] sm:$0xff]  ;;  %1887 = vperm.xlu0 %12647, %v1733_v1   ;;  %v13245_v1 = vld [vmem:[%s17394_s1 + $0x1000] ss:$68 sps:$4 sm:$0xff]  }
 0x2e0   : > { %6925 = vmatmul.mubr.bf16.gmra.mrb[112].mxu0 %v13110_v18  ;;  %v13150_v18 = vld [vmem:[%s17394_s1 + $0x1cc] ss:$68 sps:$4 sm:$0xff]  }
 0x2e1   : > { %6934 = vmatprep.mubr.bf16.mxu0 %v13114_v19  ;;  %v1095_v19 = vpack.c.bf16 %v785_v14, %v783_v16  ;;  %v802_v16 = vld [vmem:[%s13737_s11 + $0xf18] sm:$0xff] }
 0x2e2   : > { %v13231_v14 = vld [vmem:[%s17394_s1 + $0xef4] ss:$68 sps:$4 sm:$0xff]  }
 0x2e6   : > { %5746 = vmatmul.mubr.bf16.gmra.mrb[64].mxu1 %v13161_v27  ;;  %v789_v27 = vld [vmem:[%s13737_s11 + $0xeb0] sm:$0xff] }
 0x2e7   : > { %5755 = vmatprep.mubr.bf16.mxu1 %v13165_v28  ;;  %v1097_v28 = vpack.c.bf16 %v789_v27, %v787_v36  ;;  %v13237_v27 = vld [vmem:[%s17394_s1 + $0xf7c] ss:$68 sps:$4 sm:$0xff]  }
 0x2e8   : > { %6935 = vmatmul.mubr.bf16.gmra.mrb[116].mxu0 %v13116_v21  ;;  %v790_v21 = vld [vmem:[%s13737_s11 + $0xeb8] sm:$0xff] }
 0x2e9   : > { %6944 = vmatprep.mubr.bf16.mxu0 %v13120_v32  ;;  %v13195_v32 = vld [vmem:[%s17394_s1 + $0xbc4] ss:$68 sps:$4 sm:$0xff]   ;;  %v1098_v22 = vpack.c.bf16 %v790_v21, %v788_v30  ;;  %v1742_v30 = vld [vmem:[%s17395_s2 + $0xf8] sm:$0xff]  ;;  %v1741_v21 = vld [vmem:[%s17395_s2 + $0xf0] sm:$0xff] }
 0x2ee   : > { %5756 = vmatmul.mubr.bf16.gmra.mrb[68].mxu1 %v13167_v55  ;;  %v13197_v55 = vld [vmem:[%s17394_s1 + $0xbc0] ss:$68 sps:$4 sm:$0xff]  }
 0x2ef   : > { %5765 = vmatprep.mubr.bf16.mxu1 %v13171_v59  ;;  %v13201_v59 = vld [vmem:[%s17394_s1 + $0xc4c] ss:$68 sps:$4 sm:$0xff]  }
 0x2f0   : > { %6945 = vmatmul.mubr.bf16.gmra.mrb[120].mxu0 %v13122_v33  ;;  %v13152_v33 = vld [vmem:[%s17394_s1 + $0x1c8] ss:$68 sps:$4 sm:$0xff]  }
 0x2f1   : > { %6954 = vmatprep.mubr.bf16.mxu0 %v13126_v34  ;;  %v13156_v34 = vld [vmem:[%s17394_s1 + $0x254] ss:$68 sps:$4 sm:$0xff]  }
 0x2f6   : > { %5766 = vmatmul.mubr.bf16.gmra.mrb[72].mxu1 %v13173_v42  ;;  %v13203_v42 = vld [vmem:[%s17394_s1 + $0xc48] ss:$68 sps:$4 sm:$0xff]  }
 0x2f7   : > { %5775 = vmatprep.mubr.bf16.mxu1 %v13177_v45  ;;  %v792_v45 = vld [vmem:[%s13737_s11 + $0xec8] sm:$0xff] }
 0x2f8   : > { %6955 = vmatmul.mubr.bf16.gmra.mrb[124].mxu0 %v13128_v7  ;;  %v13158_v7 = vld [vmem:[%s17394_s1 + $0x250] ss:$68 sps:$4 sm:$0xff]   ;;  %v1100_v6 = vpack.c.bf16 %v794_v56, %v792_v45  ;;  %v803_v45 = vld [vmem:[%s13737_s11 + $0xf20] sm:$0xff] }
 0x2f9   : > { %6997 = vmatprep.mubr.bf16.mxu0 %v13134_v8  ;;  %v13162_v8 = vld [vmem:[%s17394_s1 + $0x2dc] ss:$68 sps:$4 sm:$0xff]   ;;  %v805_v56 = vld [vmem:[%s13737_s11 + $0xf30] sm:$0xff] }
 0x2fe   : > { %5776 = vmatmul.mubr.bf16.gmra.mrb[76].mxu1 %v13179_v41  ;;  %v1736_v41 = vld [vmem:[%s17395_s2 + $0xc8] sm:$0xff] }
 0x2ff   : > { %5785 = vmatprep.mubr.bf16.mxu1 %v13183_v46  ;;  %v13215_v46 = vld [vmem:[%s17394_s1 + $0xd58] ss:$68 sps:$4 sm:$0xff]   ;;  %1902 = vperm.xlu1 %12648, %v1736_v41   ;;  %v13206_v41 = vld [vmem:[%s17394_s1 + $0x690] ss:$68 sps:$4 sm:$0xff]  }
 0x300   : > { %6998 = vmatmul.mubr.bf16.vlgmr.msra.gmra.mrb[0].mxu0 %v13132_v31  ;;  %v793_v31 = vld [vmem:[%s13737_s11 + $0xed0] sm:$0xff] }
 0x301   : > { %7007 = vmatprep.mubr.bf16.mxu0 %v13138_v35  ;;  %7319 = vmatpush1.bf16.msra.mxu0 %v1087_v50  ;;  %v1099_v35 = vpack.c.bf16 %v793_v31, %v791_v11  ;;  %v13164_v50 = vld [vmem:[%s17394_s1 + $0x2d8] ss:$68 sps:$4 sm:$0xff]   ;;  %v13200_v31 = vld [vmem:[%s17394_s1 + $0x608] ss:$68 sps:$4 sm:$0xff]  }
 0x302   : > { %7320 = vmatprep.subr.bf16.mxu0 %v1090_v52  ;;  %v13168_v52 = vld [vmem:[%s17394_s1 + $0x364] ss:$68 sps:$4 sm:$0xff]  }
 0x303   : > { %1912 = vperm.xlu1 %12648, %v1738_v61   ;;  %v809_v61 = vld [vmem:[%s13737_s11 + $0xf50] sm:$0xff] }
 0x305   : > { %7321 = vmatpush1.bf16.msra.mxu0 %v1089_v44  ;;  %v1735_v44 = vld [vmem:[%s17395_s2 + $0xc0] sm:$0xff] }
 0x306   : > { %7322 = vmatprep.subr.bf16.mxu0 %v1092_v47  ;;  %5786 = vmatmul.mubr.bf16.gmra.mrb[80].mxu1 %v13185_v3  ;;  %v796_v47 = vld [vmem:[%s13737_s11 + $0xee8] sm:$0xff] }
 0x307   : > { %5795 = vmatprep.mubr.bf16.mxu1 %v13189_v13  ;;  %1897 = vperm.xlu0 %12647, %v1735_v44   ;;  %v1102_v49 = vpack.c.bf16 %v798_v48, %v796_v47  ;;  %v1740_v3 = vld [vmem:[%s17395_s2 + $0xe8] sm:$0xff]  ;;  %v13210_v44 = vld [vmem:[%s17394_s1 + $0x71c] ss:$68 sps:$4 sm:$0xff]  }
 0x308   : > { %7008 = vmatmul.mubr.bf16.gmra.mrb[4].mxu0 %v13140_v53  ;;  %v797_v53 = vld [vmem:[%s13737_s11 + $0xef0] sm:$0xff]  ;;  %v13227_v13 = vld [vmem:[%s17394_s1 + $0xe68] ss:$68 sps:$4 sm:$0xff]   ;;  %1922 = vperm.xlu1 %12648, %v1740_v3   ;;  %v1747_v48 = vld [vmem:[%s17395_s2 + $0x120] sm:$0xff] }
 0x309   : > { %7017 = vmatprep.mubr.bf16.mxu0 %v13144_v54  ;;  %7323 = vmatpush1.bf16.msra.mxu0 %v1091_v57  ;;  %v1101_v54 = vpack.c.bf16 %v797_v53, %v795_v51  ;;  %v13176_v57 = vld [vmem:[%s17394_s1 + $0x3e8] ss:$68 sps:$4 sm:$0xff]   ;;  %v810_v51 = vld [vmem:[%s13737_s11 + $0xf58] sm:$0xff] }
 0x30a   : > { %7324 = vmatprep.subr.bf16.mxu0 %v1094_v60  ;;  %v13180_v60 = vld [vmem:[%s17394_s1 + $0x474] ss:$68 sps:$4 sm:$0xff]   ;;  %v1748_v47 = vld [vmem:[%s17395_s2 + $0x128] sm:$0xff] }
 0x30b   : > { %1907 = vperm.xlu0 %12647, %v1737_v63  }
 0x30c   : > { %1932 = vperm.xlu1 %12648, %v1742_v30  }
 0x30d   : > { %7325 = vmatpush1.bf16.msra.mxu0 %v1093_v12  ;;  %v1739_v12 = vld [vmem:[%s17395_s2 + $0xe0] sm:$0xff] }
 0x30e   : > { %7326 = vmatprep.subr.bf16.mxu0 %v1096_v15  ;;  %5796 = vmatmul.mubr.bf16.gmra.mrb[84].mxu1 %v13191_v26  ;;  %v800_v15 = vld [vmem:[%s13737_s11 + $0xf08] sm:$0xff] }
 0x30f   : > { %5805 = vmatprep.mubr.bf16.mxu1 %v13195_v32  ;;  %1917 = vperm.xlu0 %12647, %v1739_v12   ;;  %v13192_v26 = vld [vmem:[%s17394_s1 + $0x584] ss:$68 sps:$4 sm:$0xff]   ;;  %v1750_v12 = vld [vmem:[%s17395_s2 + $0x138] sm:$0xff] }
 0x310   : > { %7018 = vmatmul.mubr.bf16.gmra.mrb[8].mxu0 %v13146_v17  ;;  %v1104_v17 = vpack.c.bf16 %v802_v16, %v800_v15  ;;  %1942 = vperm.xlu1 %12648, %v1744_v43   ;;  %v13255_v15 = vld [vmem:[%s17394_s1 + $0xb40] ss:$68 sps:$4 sm:$0xff]   ;;  %v812_v16 = vld [vmem:[%s13737_s11 + $0xf68] sm:$0xff] }
 0x311   : > { %7027 = vmatprep.mubr.bf16.mxu0 %v13150_v18  ;;  %7327 = vmatpush1.bf16.msra.mxu0 %v1095_v19  ;;  %v799_v18 = vld [vmem:[%s13737_s11 + $0xf00] sm:$0xff]  ;;  %v801_v19 = vld [vmem:[%s13737_s11 + $0xf10] sm:$0xff] }
 0x312   : > { %7328 = vmatprep.subr.bf16.mxu0 %v1098_v22  ;;  %v1103_v20 = vpack.c.bf16 %v801_v19, %v799_v18  ;;  %v13233_v22 = vld [vmem:[%s17394_s1 + $0xef0] ss:$68 sps:$4 sm:$0xff]  }
 0x313   : > { %1927 = vperm.xlu0 %12647, %v1741_v21   ;;  %v13261_v18 = vld [vmem:[%s17394_s1 + $0xbcc] ss:$68 sps:$4 sm:$0xff]  }
 0x315   : > { %7329 = vmatpush1.bf16.msra.mxu0 %v1097_v28 }
 0x316   : > { %5806 = vmatmul.mubr.bf16.gmra.mrb[88].mxu1 %v13197_v55  ;;  %7330 = vmatprep.subr.bf16.mxu0 %v1100_v6  ;;  %v1743_v55 = vld [vmem:[%s17395_s2 + $0x100] sm:$0xff]  ;;  %v1105_v6 = vpack.c.bf16 %v805_v56, %v803_v45  ;;  %v13263_v45 = vld [vmem:[%s17394_s1 + $0xbc8] ss:$68 sps:$4 sm:$0xff]  }
 0x317   : > { %5815 = vmatprep.mubr.bf16.mxu1 %v13201_v59  ;;  %v13239_v59 = vld [vmem:[%s17394_s1 + $0xf78] ss:$68 sps:$4 sm:$0xff]   ;;  %1937 = vperm.xlu0 %12647, %v1743_v55   ;;  %v815_v55 = vld [vmem:[%s13737_s11 + $0xf80] sm:$0xff]  ;;  %v820_v56 = vld [vmem:[%s13737_s11 + $0xfa8] sm:$0xff] }
 0x318   : > { %7028 = vmatmul.mubr.bf16.gmra.mrb[12].mxu0 %v13152_v33  ;;  %v13194_v33 = vld [vmem:[%s17394_s1 + $0x580] ss:$68 sps:$4 sm:$0xff]  }
 0x319   : > { %7037 = vmatprep.mubr.bf16.mxu0 %v13156_v34  ;;  %7331 = vmatpush1.bf16.msra.mxu0 %v1099_v35  ;;  %v13198_v34 = vld [vmem:[%s17394_s1 + $0x60c] ss:$68 sps:$4 sm:$0xff]   ;;  %v13204_v35 = vld [vmem:[%s17394_s1 + $0x694] ss:$68 sps:$4 sm:$0xff]  }
 0x31a   : > { %7332 = vmatprep.subr.bf16.mxu0 %v1102_v49  ;;  %v808_v49 = vld [vmem:[%s13737_s11 + $0xf48] sm:$0xff] }
 0x31b   : > { %1947 = vperm.xlu0 %12647, %v1745_v37   ;;  %v819_v37 = vld [vmem:[%s13737_s11 + $0xfa0] sm:$0xff] }
 0x31d   : > { %7333 = vmatpush1.bf16.msra.mxu0 %v1101_v54  ;;  %v13257_v54 = vld [vmem:[%s17394_s1 + $0xb44] ss:$68 sps:$4 sm:$0xff]  }
 0x31e   : > { %5816 = vmatmul.mubr.bf16.gmra.mrb[92].mxu1 %v13203_v42  ;;  %7334 = vmatprep.subr.bf16.mxu0 %v1104_v17 }
 0x31f   : > { %5825 = vmatprep.mubr.bf16.mxu1 %v13207_v58  ;;  %1957 = vperm.xlu0 %12647, %v1747_v48   ;;  %v13228_v48 = vld [vmem:[%s17394_s1 + $0x8b4] ss:$68 sps:$4 sm:$0xff]  }
 0x320   : > { %7038 = vmatmul.mubr.bf16.gmra.mrb[16].mxu0 %v13158_v7  ;;  %v804_v7 = vld [vmem:[%s13737_s11 + $0xf28] sm:$0xff] }
 0x321   : > { %7047 = vmatprep.mubr.bf16.mxu0 %v13162_v8  ;;  %7335 = vmatpush1.bf16.msra.mxu0 %v1103_v20  ;;  %v806_v8 = vld [vmem:[%s13737_s11 + $0xf38] sm:$0xff]  ;;  %v811_v20 = vld [vmem:[%s13737_s11 + $0xf60] sm:$0xff] }
 0x322   : > { %v1106_v42 = vpack.c.bf16 %v806_v8, %v804_v7 }
 0x324   : > { %7336 = vmatprep.subr.bf16.mxu0 %v1106_v42  ;;  %v1751_v42 = vld [vmem:[%s17395_s2 + $0x140] sm:$0xff] }
 0x325   : > { %7337 = vmatpush1.bf16.msra.mxu0 %v1105_v6  ;;  %v822_v6 = vld [vmem:[%s13737_s11 + $0xfb8] sm:$0xff] }
 0x326   : > { %5826 = vmatmul.mubr.bf16.gmra.mrb[96].mxu1 %v13209_v4 }
 0x327   : > { %5835 = vmatprep.mubr.bf16.mxu1 %v13213_v24  ;;  %v13249_v24 = vld [vmem:[%s17394_s1 + $0x108c] ss:$68 sps:$4 sm:$0xff]  }
 0x328   : > { %7048 = vmatmul.mubr.bf16.gmra.mrb[20].mxu0 %v13164_v50 }
 0x329   : > { %7057 = vmatprep.mubr.bf16.mxu0 %v13168_v52  ;;  %v1746_v52 = vld [vmem:[%s17395_s2 + $0x118] sm:$0xff] }
 0x32a   : > { %1952 = vperm.xlu1 %12648, %v1746_v52   ;;  %v1114_v52 = vpack.c.bf16 %v822_v6, %v820_v56  ;;  %v13240_v56 = vld [vmem:[%s17394_s1 + $0x9c4] ss:$68 sps:$4 sm:$0xff]  }
 0x32e   : > { %5836 = vmatmul.mubr.bf16.gmra.mrb[100].mxu1 %v13215_v46  ;;  %1962 = vperm.xlu1 %12648, %v1748_v47   ;;  %v13224_v47 = vld [vmem:[%s17394_s1 + $0x828] ss:$68 sps:$4 sm:$0xff]  }
 0x32f   : > { %5845 = vmatprep.mubr.bf16.mxu1 %v13219_v5  ;;  %v13251_v5 = vld [vmem:[%s17394_s1 + $0x1088] ss:$68 sps:$4 sm:$0xff]  }
 0x330   : > { %7058 = vmatmul.mubr.bf16.gmra.mrb[24].mxu0 %v13170_v38 }
 0x331   : > { %7067 = vmatprep.mubr.bf16.mxu0 %v13174_v40 }
 0x332   : > { %1972 = vperm.xlu1 %12648, %v1750_v12   ;;  %v828_v12 = vld [vmem:[%s13737_s11 + $0xfe8] sm:$0xff] }
 0x336   : > { %5846 = vmatmul.mubr.bf16.gmra.mrb[104].mxu1 %v13221_v9 }
 0x337   : > { %5855 = vmatprep.mubr.bf16.mxu1 %v13225_v10 }
 0x338   : > { %7068 = vmatmul.mubr.bf16.gmra.mrb[28].mxu0 %v13176_v57  ;;  %v1108_v57 = vpack.c.bf16 %v810_v51, %v808_v49  ;;  %v826_v49 = vld [vmem:[%s13737_s11 + $0xfd8] sm:$0xff] }
 0x339   : > { %7077 = vmatprep.mubr.bf16.mxu0 %v13180_v60  ;;  %v15574_v32 = vpop.f32.mrb[0].mxu1  ;;  %v807_v60 = vld [vmem:[%s13737_s11 + $0xf40] sm:$0xff] }
 0x33a   : > { %v15579_v36 = vpop.f32.mrb[1].mxu1  ;;  %v1107_v9 = vpack.c.bf16 %v809_v61, %v807_v60  ;;  %7338 = vmatprep.subr.bf16.mxu0 %v1108_v57  ;;  %v825_v57 = vld [vmem:[%s13737_s11 + $0xfd0] sm:$0xff] }
 0x33b   : > { %v15584_v28 = vpop.f32.mrb[2].mxu1  ;;  %v13269_v60 = vld [vmem:[%s17394_s1 + $0xc50] ss:$68 sps:$4 sm:$0xff]  }
 0x33c   : > { %v15592_v39 = vpop.f32.mrb[3].mxu1  ;;  %7339 = vmatpush1.bf16.msra.mxu0 %v1107_v9 }
 0x33e   : > { %5856 = vmatmul.mubr.bf16.gmra.mrb[108].mxu1 %v13227_v13  ;;  %v1749_v13 = vld [vmem:[%s17395_s2 + $0x130] sm:$0xff] }
 0x33f   : > { %5865 = vmatprep.mubr.bf16.mxu1 %v13231_v14  ;;  %v814_v14 = vld [vmem:[%s13737_s11 + $0xf78] sm:$0xff]  ;;  %1967 = vperm.xlu0 %12647, %v1749_v13  }
 0x340   : > { %7078 = vmatmul.mubr.bf16.gmra.mrb[32].mxu0 %v13182_v0  ;;  %v13212_v0 = vld [vmem:[%s17394_s1 + $0x718] ss:$68 sps:$4 sm:$0xff]   ;;  %v1110_v19 = vpack.c.bf16 %v814_v14, %v812_v16  ;;  %v829_v16 = vld [vmem:[%s13737_s11 + $0xff0] sm:$0xff] }
 0x341   : > { %7087 = vmatprep.mubr.bf16.mxu0 %v13186_v2  ;;  %v15605_v25 = vpop.f32.mrb[4].mxu1  ;;  %v13216_v2 = vld [vmem:[%s17394_s1 + $0x7a4] ss:$68 sps:$4 sm:$0xff]   ;;  %v830_v13 = vld [vmem:[%s13737_s11 + $0xff8] sm:$0xff] }
 0x342   : > { %v15612_v58 = vpop.f32.mrb[5].mxu1  ;;  %7340 = vmatprep.subr.bf16.mxu0 %v1110_v19  ;;  %v1118_v19 = vpack.c.bf16 %v830_v13, %v828_v12  ;;  %v13248_v12 = vld [vmem:[%s17394_s1 + $0xa48] ss:$68 sps:$4 sm:$0xff]  }
 0x343   : > { %v15614_v11 = vpop.f32.mrb[6].mxu1  ;;  %1977 = vperm.xlu0 %12647, %v1751_v42  }
 0x344   : > { %v15622_v50 = vpop.f32.mrb[7].mxu1 }
 0x346   : > { %5866 = vmatmul.mubr.bf16.gmra.mrb[112].mxu1 %v13233_v22  ;;  %v13218_v22 = vld [vmem:[%s17394_s1 + $0x7a0] ss:$68 sps:$4 sm:$0xff]  }
 0x347   : > { %5875 = vmatprep.mubr.bf16.mxu1 %v13237_v27  ;;  %v13222_v27 = vld [vmem:[%s17394_s1 + $0x82c] ss:$68 sps:$4 sm:$0xff]  }
 0x348   : > { %7088 = vmatmul.mubr.bf16.gmra.mrb[36].mxu0 %v13188_v23  ;;  %v813_v23 = vld [vmem:[%s13737_s11 + $0xf70] sm:$0xff] }
 0x349   : > { %7097 = vmatprep.mubr.bf16.mxu0 %v13192_v26  ;;  %v15633_v4 = vpop.f32.mrb[8].mxu1  ;;  %v1109_v30 = vpack.c.bf16 %v813_v23, %v811_v20 }
 0x34a   : > { %v15638_v38 = vpop.f32.mrb[9].mxu1 }
 0x34b   : > { %v15640_v40 = vpop.f32.mrb[10].mxu1  ;;  %7341 = vmatpush1.bf16.msra.mxu0 %v1109_v30 }
 0x34c   : > { %v15648_v46 = vpop.f32.mrb[11].mxu1 }
 0x34e   : > { %5876 = vmatmul.mubr.bf16.gmra.mrb[116].mxu1 %v13239_v59  ;;  %v817_v59 = vld [vmem:[%s13737_s11 + $0xf90] sm:$0xff] }
 0x34f   : > { %5885 = vmatprep.mubr.bf16.mxu1 %v13243_v29  ;;  %v1111_v7 = vpack.c.bf16 %v817_v59, %v815_v55  ;;  %v1752_v29 = vld [vmem:[%s17395_s2 + $0x148] sm:$0xff]  ;;  %v13275_v55 = vld [vmem:[%s17394_s1 + $0xcd8] ss:$68 sps:$4 sm:$0xff]  }
 0x350   : > { %7098 = vmatmul.mubr.bf16.gmra.mrb[40].mxu0 %v13194_v33  ;;  %v816_v33 = vld [vmem:[%s13737_s11 + $0xf88] sm:$0xff]  ;;  %1982 = vperm.xlu1 %12648, %v1752_v29  }
 0x351   : > { %7107 = vmatprep.mubr.bf16.mxu0 %v13198_v34  ;;  %v15661_v53 = vpop.f32.mrb[12].mxu1  ;;  %v818_v34 = vld [vmem:[%s13737_s11 + $0xf98] sm:$0xff] }
 0x352   : > { %v15668_v63 = vpop.f32.mrb[13].mxu1  ;;  %v1112_v43 = vpack.c.bf16 %v818_v34, %v816_v33  ;;  %v1756_v34 = vld [vmem:[%s17395_s2 + $0x168] sm:$0xff] }
 0x353   : > { %v15670_v10 = vpop.f32.mrb[14].mxu1 }
 0x354   : > { %v15678_v3 = vpop.f32.mrb[15].mxu1  ;;  %7342 = vmatprep.subr.bf16.mxu0 %v1112_v43  ;;  %v1755_v43 = vld [vmem:[%s17395_s2 + $0x160] sm:$0xff] }
 0x355   : > { %7343 = vmatpush1.bf16.msra.mxu0 %v1111_v7  ;;  %v13279_v7 = vld [vmem:[%s17394_s1 + $0xd64] ss:$68 sps:$4 sm:$0xff]  }
 0x356   : > { %5886 = vmatmul.mubr.bf16.gmra.mrb[120].mxu1 %v13245_v1  ;;  %v821_v1 = vld [vmem:[%s13737_s11 + $0xfb0] sm:$0xff]  ;;  %7344 = vmatprep.subr.bf16.mxu0 %v1114_v52 }
 0x357   : > { %5895 = vmatprep.mubr.bf16.mxu1 %v13249_v24  ;;  %v1757_v52 = vld [vmem:[%s17395_s2 + $0x170] sm:$0xff] }
 0x358   : > { %7108 = vmatmul.mubr.bf16.gmra.mrb[44].mxu0 %v13200_v31 }
 0x359   : > { %7117 = vmatprep.mubr.bf16.mxu0 %v13204_v35  ;;  %v15691_v17 = vpop.f32.mrb[16].mxu1  ;;  %v13267_v35 = vld [vmem:[%s17394_s1 + $0xc54] ss:$68 sps:$4 sm:$0xff]  }
 0x35a   : > { %v15698_v26 = vpop.f32.mrb[17].mxu1 }
 0x35b   : > { %v15700_v21 = vpop.f32.mrb[18].mxu1 }
 0x35c   : > { %v15712_v8 = vpop.f32.mrb[19].mxu1 }
 0x35e   : > { %5896 = vmatmul.mubr.bf16.gmra.mrb[124].mxu1 %v13251_v5  ;;  %v824_v5 = vld [vmem:[%s13737_s11 + $0xfc8] sm:$0xff] }
 0x35f   : > { %6148 = vmatprep.mubr.bf16.mxu1 %v13257_v54  ;;  %v1116_v51 = vpack.c.bf16 %v826_v49, %v824_v5  ;;  %v823_v54 = vld [vmem:[%s13737_s11 + $0xfc0] sm:$0xff]  ;;  %v13246_v49 = vld [vmem:[%s17394_s1 + $0xa4c] ss:$68 sps:$4 sm:$0xff]  }
 0x360   : > { %7118 = vmatmul.mubr.bf16.gmra.mrb[48].mxu0 %v13206_v41  ;;  %v1113_v41 = vpack.c.bf16 %v821_v1, %v819_v37  ;;  %v1115_v61 = vpack.c.bf16 %v825_v57, %v823_v54  ;;  %v13281_v37 = vld [vmem:[%s17394_s1 + $0xd60] ss:$68 sps:$4 sm:$0xff]   ;;  %v1760_v54 = vld [vmem:[%s17395_s2 + $0x188] sm:$0xff] }
 0x361   : > { %7127 = vmatprep.mubr.bf16.mxu0 %v13210_v44  ;;  %v15725_v31 = vpop.f32.mrb[20].mxu1  ;;  %v13242_v5 = vld [vmem:[%s17394_s1 + $0x9c0] ss:$68 sps:$4 sm:$0xff]  }
 0x362   : > { %v15732_v24 = vpop.f32.mrb[21].mxu1  ;;  %7345 = vmatpush1.bf16.msra.mxu0 %v1113_v41  ;;  %v13285_v41 = vld [vmem:[%s17394_s1 + $0xdec] ss:$68 sps:$4 sm:$0xff]   ;;  %v1759_v57 = vld [vmem:[%s17395_s2 + $0x180] sm:$0xff] }
 0x363   : > { %v15734_v44 = vpop.f32.mrb[22].mxu1  ;;  %7346 = vmatprep.subr.bf16.mxu0 %v1116_v51 }
 0x364   : > { %v15749_v9 = vpop.f32.mrb[23].mxu1 }
 0x366   : > { %6149 = vmatmul.mubr.bf16.vlgmr.msra.gmra.mrb[84].mxu1 %v13255_v15  ;;  %7347 = vmatpush1.bf16.msra.mxu0 %v1115_v61  ;;  %v827_v15 = vld [vmem:[%s13737_s11 + $0xfe0] sm:$0xff]  ;;  %v13291_v61 = vld [vmem:[%s17394_s1 + $0xe74] ss:$68 sps:$4 sm:$0xff]  }
 0x367   : > { %6158 = vmatprep.mubr.bf16.mxu1 %v13261_v18  ;;  %v13273_v18 = vld [vmem:[%s17394_s1 + $0xcdc] ss:$68 sps:$4 sm:$0xff]   ;;  %v1117_v20 = vpack.c.bf16 %v829_v16, %v827_v15  ;;  %7348 = vmatprep.subr.bf16.mxu0 %v1118_v19  ;;  %v13252_v15 = vld [vmem:[%s17394_s1 + $0xad4] ss:$68 sps:$4 sm:$0xff]  }
 0x368   : > { %7128 = vmatmul.mubr.bf16.gmra.mrb[52].mxu0 %v13212_v0  ;;  %v1754_v0 = vld [vmem:[%s17395_s2 + $0x158] sm:$0xff]  ;;  %v1761_v19 = vld [vmem:[%s17395_s2 + $0x190] sm:$0xff] }
 0x369   : > { %7137 = vmatprep.mubr.bf16.mxu0 %v13216_v2  ;;  %v1753_v2 = vld [vmem:[%s17395_s2 + $0x150] sm:$0xff]  ;;  %v15761_v14 = vpop.f32.mrb[24].mxu1  ;;  %1992 = vperm.xlu1 %12648, %v1754_v0  }
 0x36a   : > { %1987 = vperm.xlu0 %12647, %v1753_v2   ;;  %v15766_v23 = vpop.f32.mrb[25].mxu1  ;;  %7349 = vmatpush1.bf16.msra.mxu0 %v1117_v20  ;;  %v13293_v20 = vld [vmem:[%s17394_s1 + $0xe70] ss:$68 sps:$4 sm:$0xff]  }
 0x36b   : > { %v15768_v30 = vpop.f32.mrb[26].mxu1 }
 0x36c   : > { %v15776_v33 = vpop.f32.mrb[27].mxu1 }
 0x36d   : > { %2002 = vperm.xlu1 %12648, %v1756_v34  }
 0x36e   : > { %6159 = vmatmul.mubr.bf16.gmra.mrb[88].mxu1 %v13263_v45  ;;  %1997 = vperm.xlu0 %12647, %v1755_v43   ;;  %v13236_v45 = vld [vmem:[%s17394_s1 + $0x938] ss:$68 sps:$4 sm:$0xff]  }
 0x36f   : > { %6168 = vmatprep.mubr.bf16.mxu1 %v13267_v35  ;;  %v1758_v35 = vld [vmem:[%s17395_s2 + $0x178] sm:$0xff] }
 0x370   : > { %7138 = vmatmul.mubr.bf16.gmra.mrb[56].mxu0 %v13218_v22  ;;  %v13230_v22 = vld [vmem:[%s17394_s1 + $0x8b0] ss:$68 sps:$4 sm:$0xff]  }
 0x371   : > { %7147 = vmatprep.mubr.bf16.mxu0 %v13222_v27  ;;  %v13234_v27 = vld [vmem:[%s17394_s1 + $0x93c] ss:$68 sps:$4 sm:$0xff]   ;;  %v15787_v59 = vpop.f32.mrb[28].mxu1  ;;  %2012 = vperm.xlu1 %12648, %v1758_v35  }
 0x372   : > { %v15792_v29 = vpop.f32.mrb[29].mxu1  ;;  %2007 = vperm.xlu0 %12647, %v1757_v52   ;;  %v1763_v35 = vld [vmem:[%s17395_s2 + $0x1a0] sm:$0xff]  ;;  %v13299_v52 = vld [vmem:[%s17394_s1 + $0xef8] ss:$68 sps:$4 sm:$0xff]  }
 0x373   : > { %v15794_v42 = vpop.f32.mrb[30].mxu1 }
 0x374   : > { %v15802_v6 = vpop.f32.mrb[31].mxu1 }
 0x375   : > { %2022 = vperm.xlu1 %12648, %v1760_v54   ;;  %v13260_v54 = vld [vmem:[%s17394_s1 + $0xb58] ss:$68 sps:$4 sm:$0xff]  }
 0x376   : > { %6169 = vmatmul.mubr.bf16.gmra.mrb[92].mxu1 %v13269_v60  ;;  %v13287_v60 = vld [vmem:[%s17394_s1 + $0xde8] ss:$68 sps:$4 sm:$0xff]   ;;  %2017 = vperm.xlu0 %12647, %v1759_v57  }
 0x377   : > { %6178 = vmatprep.mubr.bf16.mxu1 %v13273_v18  ;;  %v1762_v18 = vld [vmem:[%s17395_s2 + $0x198] sm:$0xff]  ;;  %v13264_v57 = vld [vmem:[%s17394_s1 + $0xbe4] ss:$68 sps:$4 sm:$0xff]  }
 0x378   : > { %7148 = vmatmul.mubr.bf16.gmra.mrb[60].mxu0 %v13224_v47 }
 0x379   : > { %7157 = vmatprep.mubr.bf16.mxu0 %v13228_v48  ;;  %v15813_v1 = vpop.f32.mrb[32].mxu1  ;;  %2032 = vperm.xlu1 %12648, %v1762_v18  }
 0x37a   : > { %v15818_v47 = vpop.f32.mrb[33].mxu1  ;;  %2027 = vperm.xlu0 %12647, %v1761_v19   ;;  %v13309_v19 = vld [vmem:[%s17394_s1 + $0x100c] ss:$68 sps:$4 sm:$0xff]  }
 0x37b   : > { %17417 = vst [vmem:[#allocation3_spill] sm:$0xff] %v15818_v47  ;;  %v15820_v48 = vpop.f32.mrb[34].mxu1 }
 0x37c   : > { %17418 = vst [vmem:[#allocation4_spill] sm:$0xff] %v15820_v48  ;;  %v15828_v51 = vpop.f32.mrb[35].mxu1 }
 0x37d   : > { %17419 = vst [vmem:[#allocation5_spill] sm:$0xff] %v15828_v51 }
 0x37e   : > { %6179 = vmatmul.mubr.bf16.gmra.mrb[96].mxu1 %v13275_v55  ;;  %v13254_v55 = vld [vmem:[%s17394_s1 + $0xad0] ss:$68 sps:$4 sm:$0xff]   ;;  %2037 = vperm.xlu0 %12647, %v1763_v35   ;;  %v1768_v35 = vld [vmem:[%s17395_s2 + $0x1c8] sm:$0xff] }
 0x37f   : > { %6188 = vmatprep.mubr.bf16.mxu1 %v13279_v7  ;;  %v13258_v7 = vld [vmem:[%s17394_s1 + $0xb5c] ss:$68 sps:$4 sm:$0xff]  }
 0x380   : > { %7158 = vmatmul.mubr.bf16.gmra.mrb[64].mxu0 %v13230_v22 }
 0x381   : > { %7167 = vmatprep.mubr.bf16.mxu0 %v13234_v27  ;;  %v15842_v0 = vpop.f32.mrb[36].mxu1  ;;  %v13297_v27 = vld [vmem:[%s17394_s1 + $0xefc] ss:$68 sps:$4 sm:$0xff]  }
 0x382   : > { %17420 = vst [vmem:[#allocation6_spill] sm:$0xff] %v15842_v0  ;;  %v15844_v2 = vpop.f32.mrb[37].mxu1 }
 0x383   : > { %17421 = vst [vmem:[#allocation7_spill] sm:$0xff] %v15844_v2  ;;  %v15849_v13 = vpop.f32.mrb[38].mxu1 }
 0x384   : > { %17422 = vst [vmem:[#allocation8_spill] sm:$0xff] %v15849_v13  ;;  %v15854_v16 = vpop.f32.mrb[39].mxu1 }
 0x385   : > { %17423 = vst [vmem:[#allocation9_spill] sm:$0xff] %v15854_v16  ;;  %v17514_v16 = vmov 0  }
 0x386   : > { %6189 = vmatmul.mubr.bf16.gmra.mrb[100].mxu1 %v13281_v37 }
 0x387   : > { %6198 = vmatprep.mubr.bf16.mxu1 %v13285_v41  ;;  %v13303_v41 = vld [vmem:[%s17394_s1 + $0xf84] ss:$68 sps:$4 sm:$0xff]  }
 0x388   : > { %7168 = vmatmul.mubr.bf16.gmra.mrb[68].mxu0 %v13236_v45 }
 0x389   : > { %7177 = vmatprep.mubr.bf16.mxu0 %v13240_v56  ;;  %v15865_v22 = vpop.f32.mrb[40].mxu1  ;;  %v1764_v56 = vld [vmem:[%s17395_s2 + $0x1a8] sm:$0xff] }
 0x38a   : > { %17424 = vst [vmem:[#allocation10_spill] sm:$0xff] %v15865_v22  ;;  %v15870_v34 = vpop.f32.mrb[41].mxu1  ;;  %2042 = vperm.xlu1 %12648, %v1764_v56  }
 0x38b   : > { %17425 = vst [vmem:[#allocation11_spill] sm:$0xff] %v15870_v34  ;;  %v15872_v43 = vpop.f32.mrb[42].mxu1 }
 0x38c   : > { %17426 = vst [vmem:[#allocation12_spill] sm:$0xff] %v15872_v43  ;;  %v15880_v45 = vpop.f32.mrb[43].mxu1 }
 0x38d   : > { %17427 = vst [vmem:[#allocation13_spill] sm:$0xff] %v15880_v45 }
 0x38e   : > { %6199 = vmatmul.mubr.bf16.gmra.mrb[104].mxu1 %v13287_v60 }
 0x38f   : > { %6208 = vmatprep.mubr.bf16.mxu1 %v13291_v61  ;;  %v1766_v61 = vld [vmem:[%s17395_s2 + $0x1b8] sm:$0xff] }
 0x390   : > { %7178 = vmatmul.mubr.bf16.gmra.mrb[72].mxu0 %v13242_v5  ;;  %2052 = vperm.xlu1 %12648, %v1766_v61  }
 0x391   : > { %7187 = vmatprep.mubr.bf16.mxu0 %v13246_v49  ;;  %v15891_v37 = vpop.f32.mrb[44].mxu1 }
 0x392   : > { %17428 = vst [vmem:[#allocation14_spill] sm:$0xff] %v15891_v37  ;;  %v15896_v5 = vpop.f32.mrb[45].mxu1  ;;  %v8394_v37 = vld [vmem:[%s17397_s4 + $0x190] sm:$0xff] }
 0x393   : > { %17429 = vst [vmem:[#allocation15_spill] sm:$0xff] %v15896_v5  ;;  %v15898_v49 = vpop.f32.mrb[46].mxu1 }
 0x394   : > { %17430 = vst [vmem:[#allocation16_spill] sm:$0xff] %v15898_v49  ;;  %v15906_v60 = vpop.f32.mrb[47].mxu1  ;;  %2062 = vperm.xlu1 %12648, %v1768_v35   ;;  %v1769_v35 = vld [vmem:[%s17395_s2 + $0x1d0] sm:$0xff] }
 0x395   : > { %17431 = vst [vmem:[#allocation17_spill] sm:$0xff] %v15906_v60  ;;  %v13326_v60 = vld [vmem:[%s17394_s1 + $0xc0] ss:$68 sps:$4 sm:$0xff]  }
 0x396   : > { %6209 = vmatmul.mubr.bf16.gmra.mrb[108].mxu1 %v13293_v20 }
 0x397   : > { %6218 = vmatprep.mubr.bf16.mxu1 %v13297_v27 }
 0x398   : > { %7188 = vmatmul.mubr.bf16.gmra.mrb[76].mxu0 %v13248_v12  ;;  %v1765_v12 = vld [vmem:[%s17395_s2 + $0x1b0] sm:$0xff] }
 0x399   : > { %7197 = vmatprep.mubr.bf16.mxu0 %v13252_v15  ;;  %v13305_v15 = vld [vmem:[%s17394_s1 + $0xf80] ss:$68 sps:$4 sm:$0xff]   ;;  %v15917_v18 = vpop.f32.mrb[48].mxu1  ;;  %2047 = vperm.xlu0 %12647, %v1765_v12  }
 0x39a   : > { %17432 = vst [vmem:[#allocation18_spill] sm:$0xff] %v15917_v18  ;;  %v15922_v20 = vpop.f32.mrb[49].mxu1  ;;  %v841_v18 = vld [vmem:[%s13737_s11 + $0x1050] sm:$0xff] }
 0x39b   : > { %17433 = vst [vmem:[#allocation19_spill] sm:$0xff] %v15922_v20  ;;  %v15924_v27 = vpop.f32.mrb[50].mxu1  ;;  %v839_v20 = vld [vmem:[%s13737_s11 + $0x1040] sm:$0xff] }
 0x39c   : > { %17434 = vst [vmem:[#allocation20_spill] sm:$0xff] %v15924_v27  ;;  %v15932_v56 = vpop.f32.mrb[51].mxu1 }
 0x39d   : > { %17435 = vst [vmem:[#allocation21_spill] sm:$0xff] %v15932_v56 }
 0x39e   : > { %6219 = vmatmul.mubr.bf16.gmra.mrb[112].mxu1 %v13299_v52  ;;  %v1767_v52 = vld [vmem:[%s17395_s2 + $0x1c0] sm:$0xff] }
 0x39f   : > { %6228 = vmatprep.mubr.bf16.mxu1 %v13303_v41  ;;  %v13311_v41 = vld [vmem:[%s17394_s1 + $0x1008] ss:$68 sps:$4 sm:$0xff]   ;;  %2057 = vperm.xlu0 %12647, %v1767_v52   ;;  %v13317_v52 = vld [vmem:[%s17394_s1 + $0x1090] ss:$68 sps:$4 sm:$0xff]  }
 0x3a0   : > { %7198 = vmatmul.mubr.bf16.gmra.mrb[80].mxu0 %v13254_v55  ;;  %v13266_v55 = vld [vmem:[%s17394_s1 + $0xbe0] ss:$68 sps:$4 sm:$0xff]  }
 0x3a1   : > { %7207 = vmatprep.mubr.bf16.mxu0 %v13258_v7  ;;  %v13270_v7 = vld [vmem:[%s17394_s1 + $0xc6c] ss:$68 sps:$4 sm:$0xff]  }
 0x3a3   : > { %2067 = vperm.xlu0 %12647, %v1769_v35   ;;  %v1771_v35 = vld [vmem:[%s17395_s2 + $0x1e0] sm:$0xff] }
 0x3a6   : > { %6229 = vmatmul.mubr.bf16.gmra.mrb[116].mxu1 %v13305_v15  ;;  %v13272_v15 = vld [vmem:[%s17394_s1 + $0xc68] ss:$68 sps:$4 sm:$0xff]  }
 0x3a7   : > { %6238 = vmatprep.mubr.bf16.mxu1 %v13309_v19  ;;  %v13276_v19 = vld [vmem:[%s17394_s1 + $0xcf4] ss:$68 sps:$4 sm:$0xff]   ;;  %2077 = vperm.xlu0 %12647, %v1771_v35  }
 0x3a8   : > { %7208 = vmatmul.mubr.bf16.gmra.mrb[84].mxu0 %v13260_v54  ;;  %v15943_v54 = vpop.f32.mrb[52].mxu1 }
 0x3a9   : > { %7217 = vmatprep.mubr.bf16.mxu0 %v13264_v57  ;;  %17436 = vst [vmem:[#allocation22_spill] sm:$0xff] %v15943_v54  ;;  %v13315_v57 = vld [vmem:[%s17394_s1 + $0x1094] ss:$68 sps:$4 sm:$0xff]   ;;  %v15948_v61 = vpop.f32.mrb[53].mxu1 }
 0x3aa   : > { %17437 = vst [vmem:[#allocation23_spill] sm:$0xff] %v15948_v61  ;;  %v15950_v12 = vpop.f32.mrb[54].mxu1  ;;  %v13288_v61 = vld [vmem:[%s17394_s1 + $0xe04] ss:$68 sps:$4 sm:$0xff]   ;;  %v837_v54 = vld [vmem:[%s13737_s11 + $0x1030] sm:$0xff] }
 0x3ab   : > { %17438 = vst [vmem:[#allocation24_spill] sm:$0xff] %v15950_v12 }
 0x3ae   : > { %6239 = vmatmul.mubr.bf16.gmra.mrb[120].mxu1 %v13311_v41 }
 0x3af   : > { %6248 = vmatprep.mubr.bf16.mxu1 %v13315_v57 }
 0x3b0   : > { %7218 = vmatmul.mubr.bf16.gmra.mrb[88].mxu0 %v13266_v55  ;;  %v15958_v55 = vpop.f32.mrb[55].mxu1 }
 0x3b1   : > { %7227 = vmatprep.mubr.bf16.mxu0 %v13270_v7  ;;  %17439 = vst [vmem:[#allocation25_spill] sm:$0xff] %v15958_v55  ;;  %v1770_v7 = vld [vmem:[%s17395_s2 + $0x1d8] sm:$0xff]  ;;  %v15969_v41 = vpop.f32.mrb[56].mxu1 }
 0x3b2   : > { %2072 = vperm.xlu1 %12648, %v1770_v7   ;;  %17440 = vst [vmem:[#allocation26_spill] sm:$0xff] %v15969_v41  ;;  %v15971_v57 = vpop.f32.mrb[57].mxu1  ;;  %v1772_v7 = vld [vmem:[%s17395_s2 + $0x1e8] sm:$0xff] }
 0x3b3   : > { %17441 = vst [vmem:[#allocation27_spill] sm:$0xff] %v15971_v57  ;;  %v834_v57 = vld [vmem:[%s13737_s11 + $0x1018] sm:$0xff] }
 0x3b6   : > { %6249 = vmatmul.mubr.bf16.gmra.mrb[124].mxu1 %v13317_v52  ;;  %2082 = vperm.xlu1 %12648, %v1772_v7  }
 0x3b8   : > { %7228 = vmatmul.mubr.bf16.gmra.mrb[92].mxu0 %v13272_v15  ;;  %v15973_v15 = vpop.f32.mrb[58].mxu1 }
 0x3b9   : > { %7237 = vmatprep.mubr.bf16.mxu0 %v13276_v19  ;;  %17442 = vst [vmem:[#allocation28_spill] sm:$0xff] %v15973_v15  ;;  %v13282_v19 = vld [vmem:[%s17394_s1 + $0xd7c] ss:$68 sps:$4 sm:$0xff]   ;;  %v15981_v55 = vpop.f32.mrb[59].mxu1  ;;  %v832_v15 = vld [vmem:[%s13737_s11 + $0x1008] sm:$0xff] }
 0x3ba   : > { %17443 = vst [vmem:[#allocation29_spill] sm:$0xff] %v15981_v55  ;;  %v15991_v41 = vpop.f32.mrb[60].mxu1  ;;  %v1120_v12 = vpack.c.bf16 %v834_v57, %v832_v15  ;;  %v13284_v55 = vld [vmem:[%s17394_s1 + $0xd78] ss:$68 sps:$4 sm:$0xff]   ;;  %v1773_v15 = vld [vmem:[%s17395_s2 + $0x1f0] sm:$0xff] }
 0x3bb   : > { %17444 = vst [vmem:[#allocation30_spill] sm:$0xff] %v15991_v41  ;;  %v15993_v52 = vpop.f32.mrb[61].mxu1  ;;  %v1774_v57 = vld [vmem:[%s17395_s2 + $0x1f8] sm:$0xff]  ;;  %2087 = vperm.xlu0 %12647, %v1773_v15   ;;  %v835_v41 = vld [vmem:[%s13737_s11 + $0x1020] sm:$0xff] }
 0x3bc   : > { %17445 = vst [vmem:[#allocation31_spill] sm:$0xff] %v15993_v52  ;;  %7671 = vmatprep.subr.bf16.mxu0 %v1120_v12  ;;  %2092 = vperm.xlu1 %12648, %v1774_v57   ;;  %v1121_v56 = vpack.c.bf16 %v837_v54, %v835_v41  ;;  %v13329_v54 = vld [vmem:[%s17394_s1 + $0x148] ss:$68 sps:$4 sm:$0xff]   ;;  %v13330_v41 = vld [vmem:[%s17394_s1 + $0x1d4] ss:$68 sps:$4 sm:$0xff]  }
 0x3c0   : > { %7238 = vmatmul.mubr.bf16.gmra.mrb[96].mxu0 %v13278_v62  ;;  %v15995_v62 = vpop.f32.mrb[62].mxu1 }
 0x3c1   : > { %7247 = vmatprep.mubr.bf16.mxu0 %v13282_v19  ;;  %17446 = vst [vmem:[#allocation32_spill] sm:$0xff] %v15995_v62  ;;  %v16003_v19 = vpop.f32.mrb[63].mxu1 }
 0x3c2   : > { %17447 = vst [vmem:[#allocation33_spill] sm:$0xff] %v16003_v19  ;;  %v16011_v7 = vpop.f32.mrb[64].mxu1  ;;  %v13294_v19 = vld [vmem:[%s17394_s1 + $0xe8c] ss:$68 sps:$4 sm:$0xff]  }
 0x3c3   : > { %17448 = vst [vmem:[#allocation34_spill] sm:$0xff] %v16011_v7  ;;  %v16013_v12 = vpop.f32.mrb[65].mxu1 }
 0x3c4   : > { %17449 = vst [vmem:[#allocation35_spill] sm:$0xff] %v16013_v12  ;;  %v16015_v35 = vpop.f32.mrb[66].mxu1  ;;  %v13300_v12 = vld [vmem:[%s17394_s1 + $0xf14] ss:$68 sps:$4 sm:$0xff]  }
 0x3c5   : > { %17450 = vst [vmem:[#allocation36_spill] sm:$0xff] %v16015_v35  ;;  %v16023_v62 = vpop.f32.mrb[67].mxu1  ;;  %v13296_v35 = vld [vmem:[%s17394_s1 + $0xe88] ss:$68 sps:$4 sm:$0xff]  }
 0x3c6   : > { %17451 = vst [vmem:[#allocation37_spill] sm:$0xff] %v16023_v62 }
 0x3c8   : > { %7248 = vmatmul.mubr.bf16.gmra.mrb[100].mxu0 %v13284_v55  ;;  %v13290_v55 = vld [vmem:[%s17394_s1 + $0xe00] ss:$68 sps:$4 sm:$0xff]  }
 0x3c9   : > { %7257 = vmatprep.mubr.bf16.mxu0 %v13288_v61  ;;  %v16025_v61 = vpop.f32.mrb[68].mxu1 }
 0x3ca   : > { %17452 = vst [vmem:[#allocation38_spill] sm:$0xff] %v16025_v61  ;;  %v16027_v57 = vpop.f32.mrb[69].mxu1 }
 0x3cb   : > { %17453 = vst [vmem:[#allocation39_spill] sm:$0xff] %v16027_v57  ;;  %v16029_v15 = vpop.f32.mrb[70].mxu1  ;;  %v13306_v57 = vld [vmem:[%s17394_s1 + $0xf9c] ss:$68 sps:$4 sm:$0xff]  }
 0x3cc   : > { %17454 = vst [vmem:[#allocation40_spill] sm:$0xff] %v16029_v15  ;;  %v16037_v7 = vpop.f32.mrb[71].mxu1  ;;  %v13302_v15 = vld [vmem:[%s17394_s1 + $0xf10] ss:$68 sps:$4 sm:$0xff]  }
 0x3cd   : > { %17455 = vst [vmem:[#allocation41_spill] sm:$0xff] %v16037_v7 }
 0x3d0   : > { %7258 = vmatmul.mubr.bf16.gmra.mrb[104].mxu0 %v13290_v55  ;;  %v16039_v55 = vpop.f32.mrb[72].mxu1 }
 0x3d1   : > { %7267 = vmatprep.mubr.bf16.mxu0 %v13294_v19  ;;  %17456 = vst [vmem:[#allocation42_spill] sm:$0xff] %v16039_v55  ;;  %v16041_v19 = vpop.f32.mrb[73].mxu1 }
 0x3d2   : > { %17457 = vst [vmem:[#allocation43_spill] sm:$0xff] %v16041_v19  ;;  %v16043_v61 = vpop.f32.mrb[74].mxu1  ;;  %v13312_v19 = vld [vmem:[%s17394_s1 + $0x1024] ss:$68 sps:$4 sm:$0xff]  }
 0x3d3   : > { %17458 = vst [vmem:[#allocation44_spill] sm:$0xff] %v16043_v61  ;;  %v16051_v62 = vpop.f32.mrb[75].mxu1  ;;  %v13308_v61 = vld [vmem:[%s17394_s1 + $0xf98] ss:$68 sps:$4 sm:$0xff]  }
 0x3d4   : > { %17459 = vst [vmem:[#allocation45_spill] sm:$0xff] %v16051_v62  ;;  %v836_v62 = vld [vmem:[%s13737_s11 + $0x1028] sm:$0xff] }
 0x3d8   : > { %7268 = vmatmul.mubr.bf16.gmra.mrb[108].mxu0 %v13296_v35  ;;  %v16053_v35 = vpop.f32.mrb[76].mxu1 }
 0x3d9   : > { %7277 = vmatprep.mubr.bf16.mxu0 %v13300_v12  ;;  %17460 = vst [vmem:[#allocation46_spill] sm:$0xff] %v16053_v35  ;;  %v16055_v12 = vpop.f32.mrb[77].mxu1  ;;  %v13314_v35 = vld [vmem:[%s17394_s1 + $0x1020] ss:$68 sps:$4 sm:$0xff]  }
 0x3da   : > { %17461 = vst [vmem:[#allocation47_spill] sm:$0xff] %v16055_v12  ;;  %v16057_v55 = vpop.f32.mrb[78].mxu1 }
 0x3db   : > { %17462 = vst [vmem:[#allocation48_spill] sm:$0xff] %v16057_v55 }
 0x3e0   : > { %7278 = vmatmul.mubr.bf16.gmra.mrb[112].mxu0 %v13302_v15  ;;  %v16065_v15 = vpop.f32.mrb[79].mxu1 }
 0x3e1   : > { %7287 = vmatprep.mubr.bf16.mxu0 %v13306_v57  ;;  %17463 = vst [vmem:[#allocation49_spill] sm:$0xff] %v16065_v15  ;;  %v16067_v57 = vpop.f32.mrb[80].mxu1 }
 0x3e2   : > { %17464 = vst [vmem:[#allocation50_spill] sm:$0xff] %v16067_v57  ;;  %v16069_v12 = vpop.f32.mrb[81].mxu1  ;;  %v833_v57 = vld [vmem:[%s13737_s11 + $0x1010] sm:$0xff] }
 0x3e3   : > { %17465 = vst [vmem:[#allocation51_spill] sm:$0xff] %v16069_v12  ;;  %v16071_v55 = vpop.f32.mrb[82].mxu1  ;;  %v831_v12 = vld [vmem:[%s13737_s11 + $0x1000] sm:$0xff] }
 0x3e4   : > { %17466 = vst [vmem:[#allocation52_spill] sm:$0xff] %v16071_v55  ;;  %v16079_v15 = vpop.f32.mrb[83].mxu1  ;;  %v13323_v55 = vld [vmem:[%s17394_s1 + $0x3c] ss:$68 sps:$4 sm:$0xff]   ;;  %v1119_v7 = vpack.c.bf16 %v833_v57, %v831_v12  ;;  %v1123_v12 = vpack.c.bf16 %v841_v18, %v839_v20  ;;  %v13332_v18 = vld [vmem:[%s17394_s1 + $0x1d0] ss:$68 sps:$4 sm:$0xff]  }
 0x3e5   : > { %17467 = vst [vmem:[#allocation53_spill] sm:$0xff] %v16079_v15  ;;  %v13324_v15 = vld [vmem:[%s17394_s1 + $0xc4] ss:$68 sps:$4 sm:$0xff]   ;;  %v13335_v20 = vld [vmem:[%s17394_s1 + $0x258] ss:$68 sps:$4 sm:$0xff]   ;;  %v845_v57 = vld [vmem:[%s13737_s11 + $0x1070] sm:$0xff] }
 0x3e8   : > { %7288 = vmatmul.mubr.bf16.gmra.mrb[116].mxu0 %v13308_v61  ;;  %v13318_v61 = vld [vmem:[%s17394_s1 + $0x10ac] ss:$68 sps:$4 sm:$0xff]  }
 0x3e9   : > { %7297 = vmatprep.mubr.bf16.mxu0 %v13312_v19  ;;  %v13320_v19 = vld [vmem:[%s17394_s1 + $0x10a8] ss:$68 sps:$4 sm:$0xff]  }
 0x3f0   : > { %7298 = vmatmul.mubr.bf16.gmra.mrb[120].mxu0 %v13314_v35  ;;  %v838_v35 = vld [vmem:[%s13737_s11 + $0x1038] sm:$0xff] }
 0x3f1   : > { %7307 = vmatprep.mubr.bf16.mxu0 %v13318_v61  ;;  %v13321_v61 = vld [vmem:[%s17394_s1 + $0x38] ss:$68 sps:$4 sm:$0xff]   ;;  %v1122_v52 = vpack.c.bf16 %v838_v35, %v836_v62  ;;  %v13327_v62 = vld [vmem:[%s17394_s1 + $0x14c] ss:$68 sps:$4 sm:$0xff]  }
 0x3f8   : > { %7308 = vmatmul.mubr.bf16.gmra.mrb[124].mxu0 %v13320_v19  ;;  %v842_v19 = vld [vmem:[%s13737_s11 + $0x1058] sm:$0xff] }
 0x3f9   : > { %7350 = vmatprep.mubr.bf16.mxu0 %v13323_v55  ;;  %v840_v55 = vld [vmem:[%s13737_s11 + $0x1048] sm:$0xff] }
 0x3fa   : > { %v1124_v27 = vpack.c.bf16 %v842_v19, %v840_v55  ;;  %v13339_v55 = vld [vmem:[%s17394_s1 + $0x36c] ss:$68 sps:$4 sm:$0xff]  }
 0x3fb   : > { %v13341_v19 = vld [vmem:[%s17394_s1 + $0x368] ss:$68 sps:$4 sm:$0xff]  }
 0x400   : > { %7351 = vmatmul.mubr.bf16.vlgmr.msra.gmra.mrb[0].mxu0 %v13321_v61  ;;  %v13338_v61 = vld [vmem:[%s17394_s1 + $0x2e0] ss:$68 sps:$4 sm:$0xff]  }
 0x401   : > { %7360 = vmatprep.mubr.bf16.mxu0 %v13324_v15  ;;  %7672 = vmatpush1.bf16.msra.mxu0 %v1119_v7  ;;  %v843_v7 = vld [vmem:[%s13737_s11 + $0x1060] sm:$0xff] }
 0x402   : > { %7673 = vmatprep.subr.bf16.mxu0 %v1122_v52  ;;  %v846_v52 = vld [vmem:[%s13737_s11 + $0x1078] sm:$0xff]  ;;  %v1125_v35 = vpack.c.bf16 %v845_v57, %v843_v7 }
 0x405   : > { %7674 = vmatpush1.bf16.msra.mxu0 %v1121_v56  ;;  %v844_v56 = vld [vmem:[%s13737_s11 + $0x1068] sm:$0xff] }
 0x406   : > { %7675 = vmatprep.subr.bf16.mxu0 %v1124_v27  ;;  %v13336_v27 = vld [vmem:[%s17394_s1 + $0x2e4] ss:$68 sps:$4 sm:$0xff]   ;;  %v1126_v15 = vpack.c.bf16 %v846_v52, %v844_v56 }
 0x407   : > { %v847_v56 = vld [vmem:[%s13737_s11 + $0x1080] sm:$0xff] }
 0x408   : > { %7361 = vmatmul.mubr.bf16.gmra.mrb[4].mxu0 %v13326_v60  ;;  %v13333_v60 = vld [vmem:[%s17394_s1 + $0x25c] ss:$68 sps:$4 sm:$0xff]  }
 0x409   : > { %7370 = vmatprep.mubr.bf16.mxu0 %v13327_v62  ;;  %7676 = vmatpush1.bf16.msra.mxu0 %v1123_v12  ;;  %v13342_v62 = vld [vmem:[%s17394_s1 + $0x3f4] ss:$68 sps:$4 sm:$0xff]  }
 0x40a   : > { %7677 = vmatprep.subr.bf16.mxu0 %v1126_v15  ;;  %v13344_v12 = vld [vmem:[%s17394_s1 + $0x3f0] ss:$68 sps:$4 sm:$0xff]  }
 0x40b   : > { %v849_v15 = vld [vmem:[%s13737_s11 + $0x1090] sm:$0xff] }
 0x40d   : > { %7678 = vmatpush1.bf16.msra.mxu0 %v1125_v35  ;;  %v1127_v35 = vpack.c.bf16 %v849_v15, %v847_v56 }
 0x410   : > { %7371 = vmatmul.mubr.bf16.gmra.mrb[8].mxu0 %v13329_v54  ;;  %v13345_v54 = vld [vmem:[%s17394_s1 + $0x47c] ss:$68 sps:$4 sm:$0xff]  }
 0x411   : > { %7380 = vmatprep.mubr.bf16.mxu0 %v13330_v41  ;;  %v13347_v41 = vld [vmem:[%s17394_s1 + $0x478] ss:$68 sps:$4 sm:$0xff]  }
 0x418   : > { %7381 = vmatmul.mubr.bf16.gmra.mrb[12].mxu0 %v13332_v18  ;;  %v13348_v18 = vld [vmem:[%s17394_s1 + $0x504] ss:$68 sps:$4 sm:$0xff]  }
 0x419   : > { %7390 = vmatprep.mubr.bf16.mxu0 %v13333_v60 }
 0x420   : > { %7391 = vmatmul.mubr.bf16.gmra.mrb[16].mxu0 %v13335_v20  ;;  %v848_v20 = vld [vmem:[%s13737_s11 + $0x1088] sm:$0xff] }
 0x421   : > { %7400 = vmatprep.mubr.bf16.mxu0 %v13336_v27  ;;  %v850_v27 = vld [vmem:[%s13737_s11 + $0x1098] sm:$0xff] }
 0x422   : > { %v1128_v7 = vpack.c.bf16 %v850_v27, %v848_v20  ;;  %v13354_v20 = vld [vmem:[%s17394_s1 + $0x614] ss:$68 sps:$4 sm:$0xff]  }
 0x424   : > { %7679 = vmatprep.subr.bf16.mxu0 %v1128_v7 }
 0x425   : > { %7680 = vmatpush1.bf16.msra.mxu0 %v1127_v35  ;;  %v13356_v35 = vld [vmem:[%s17394_s1 + $0x610] ss:$68 sps:$4 sm:$0xff]  }
 0x428   : > { %7401 = vmatmul.mubr.bf16.gmra.mrb[20].mxu0 %v13338_v61 }
 0x429   : > { %7410 = vmatprep.mubr.bf16.mxu0 %v13339_v55  ;;  %v13350_v55 = vld [vmem:[%s17394_s1 + $0x500] ss:$68 sps:$4 sm:$0xff]  }
 0x430   : > { %7411 = vmatmul.mubr.bf16.gmra.mrb[24].mxu0 %v13341_v19  ;;  %v13351_v19 = vld [vmem:[%s17394_s1 + $0x58c] ss:$68 sps:$4 sm:$0xff]  }
 0x431   : > { %7420 = vmatprep.mubr.bf16.mxu0 %v13342_v62 }
 0x438   : > { %7421 = vmatmul.mubr.bf16.gmra.mrb[28].mxu0 %v13344_v12 }
 0x439   : > { %7430 = vmatprep.mubr.bf16.mxu0 %v13345_v54  ;;  %v16155_v60 = vpop.f32.mrb[84].mxu1 }
 0x43a   : > { %17468 = vst [vmem:[#allocation54_spill] sm:$0xff] %v16155_v60  ;;  %v16160_v52 = vpop.f32.mrb[85].mxu1 }
 0x43b   : > { %17469 = vst [vmem:[#allocation55_spill] sm:$0xff] %v16160_v52  ;;  %v16163_v57 = vpop.f32.mrb[86].mxu1 }
 0x43c   : > { %17470 = vst [vmem:[#allocation56_spill] sm:$0xff] %v16163_v57  ;;  %v16165_v61 = vpop.f32.mrb[87].mxu1  ;;  %v861_v57 = vld [vmem:[%s13737_s11 + $0x10f0] sm:$0xff] }
 0x43d   : > { %17471 = vst [vmem:[#allocation57_spill] sm:$0xff] %v16165_v61 }
 0x440   : > { %7431 = vmatmul.mubr.bf16.gmra.mrb[32].mxu0 %v13347_v41 }
 0x441   : > { %7440 = vmatprep.mubr.bf16.mxu0 %v13348_v18  ;;  %v16173_v62 = vpop.f32.mrb[88].mxu1  ;;  %v13353_v18 = vld [vmem:[%s17394_s1 + $0x588] ss:$68 sps:$4 sm:$0xff]  }
 0x442   : > { %17472 = vst [vmem:[#allocation58_spill] sm:$0xff] %v16173_v62  ;;  %v16175_v12 = vpop.f32.mrb[89].mxu1 }
 0x443   : > { %17473 = vst [vmem:[#allocation59_spill] sm:$0xff] %v16175_v12  ;;  %v16177_v54 = vpop.f32.mrb[90].mxu1 }
 0x444   : > { %17474 = vst [vmem:[#allocation60_spill] sm:$0xff] %v16177_v54  ;;  %v16179_v41 = vpop.f32.mrb[91].mxu1 }
 0x445   : > { %17475 = vst [vmem:[#allocation61_spill] sm:$0xff] %v16179_v41  ;;  %v853_v41 = vld [vmem:[%s13737_s11 + $0x10b0] sm:$0xff] }
 0x448   : > { %7441 = vmatmul.mubr.bf16.gmra.mrb[36].mxu0 %v13350_v55  ;;  %v13357_v55 = vld [vmem:[%s17394_s1 + $0x69c] ss:$68 sps:$4 sm:$0xff]  }
 0x449   : > { %7450 = vmatprep.mubr.bf16.mxu0 %v13351_v19  ;;  %v16187_v27 = vpop.f32.mrb[92].mxu1 }
 0x44a   : > { %17476 = vst [vmem:[#allocation62_spill] sm:$0xff] %v16187_v27  ;;  %v16189_v56 = vpop.f32.mrb[93].mxu1  ;;  %v852_v27 = vld [vmem:[%s13737_s11 + $0x10a8] sm:$0xff] }
 0x44b   : > { %17477 = vst [vmem:[#allocation63_spill] sm:$0xff] %v16189_v56  ;;  %v16191_v7 = vpop.f32.mrb[94].mxu1  ;;  %v13360_v56 = vld [vmem:[%s17394_s1 + $0x724] ss:$68 sps:$4 sm:$0xff]  }
 0x44c   : > { %17478 = vst [vmem:[#allocation64_spill] sm:$0xff] %v16191_v7  ;;  %v16193_v15 = vpop.f32.mrb[95].mxu1 }
 0x44d   : > { %17479 = vst [vmem:[#allocation65_spill] sm:$0xff] %v16193_v15  ;;  %v13359_v15 = vld [vmem:[%s17394_s1 + $0x698] ss:$68 sps:$4 sm:$0xff]  }
 0x450   : > { %7451 = vmatmul.mubr.bf16.gmra.mrb[40].mxu0 %v13353_v18 }
 0x451   : > { %7460 = vmatprep.mubr.bf16.mxu0 %v13354_v20  ;;  %v16201_v19 = vpop.f32.mrb[96].mxu1 }
 0x452   : > { %17480 = vst [vmem:[#allocation66_spill] sm:$0xff] %v16201_v19  ;;  %v16203_v18 = vpop.f32.mrb[97].mxu1  ;;  %v854_v19 = vld [vmem:[%s13737_s11 + $0x10b8] sm:$0xff] }
 0x453   : > { %17481 = vst [vmem:[#allocation67_spill] sm:$0xff] %v16203_v18  ;;  %v16205_v20 = vpop.f32.mrb[98].mxu1 }
 0x454   : > { %17482 = vst [vmem:[#allocation68_spill] sm:$0xff] %v16205_v20  ;;  %v16207_v7 = vpop.f32.mrb[99].mxu1  ;;  %v1130_v20 = vpack.c.bf16 %v854_v19, %v852_v27 }
 0x455   : > { %17483 = vst [vmem:[#allocation69_spill] sm:$0xff] %v16207_v7 }
 0x456   : > { %7681 = vmatprep.subr.bf16.mxu0 %v1130_v20  ;;  %v13366_v20 = vld [vmem:[%s17394_s1 + $0x834] ss:$68 sps:$4 sm:$0xff]  }
 0x458   : > { %7461 = vmatmul.mubr.bf16.gmra.mrb[44].mxu0 %v13356_v35 }
 0x459   : > { %7470 = vmatprep.mubr.bf16.mxu0 %v13357_v55  ;;  %v16215_v35 = vpop.f32.mrb[100].mxu1  ;;  %v851_v55 = vld [vmem:[%s13737_s11 + $0x10a0] sm:$0xff] }
 0x45a   : > { %17484 = vst [vmem:[#allocation70_spill] sm:$0xff] %v16215_v35  ;;  %v16220_v18 = vpop.f32.mrb[101].mxu1  ;;  %v1129_v54 = vpack.c.bf16 %v853_v41, %v851_v55  ;;  %v13363_v35 = vld [vmem:[%s17394_s1 + $0x7ac] ss:$68 sps:$4 sm:$0xff]  }
 0x45b   : > { %17485 = vst [vmem:[#allocation71_spill] sm:$0xff] %v16220_v18  ;;  %v16223_v7 = vpop.f32.mrb[102].mxu1  ;;  %v859_v18 = vld [vmem:[%s13737_s11 + $0x10e0] sm:$0xff] }
 0x45c   : > { %17486 = vst [vmem:[#allocation72_spill] sm:$0xff] %v16223_v7  ;;  %v16225_v12 = vpop.f32.mrb[103].mxu1  ;;  %7682 = vmatpush1.bf16.msra.mxu0 %v1129_v54  ;;  %v13365_v54 = vld [vmem:[%s17394_s1 + $0x7a8] ss:$68 sps:$4 sm:$0xff]   ;;  %v1133_v60 = vpack.c.bf16 %v861_v57, %v859_v18 }
 0x45d   : > { %17487 = vst [vmem:[#allocation73_spill] sm:$0xff] %v16225_v12  ;;  %v857_v12 = vld [vmem:[%s13737_s11 + $0x10d0] sm:$0xff] }
 0x45e   : > { %v13375_v18 = vld [vmem:[%s17394_s1 + $0x9cc] ss:$68 sps:$4 sm:$0xff]  }
 0x460   : > { %7471 = vmatmul.mubr.bf16.gmra.mrb[48].mxu0 %v13359_v15  ;;  %v13362_v15 = vld [vmem:[%s17394_s1 + $0x720] ss:$68 sps:$4 sm:$0xff]  }
 0x461   : > { %7480 = vmatprep.mubr.bf16.mxu0 %v13360_v56  ;;  %v16233_v56 = vpop.f32.mrb[104].mxu1 }
 0x462   : > { %17488 = vst [vmem:[#allocation74_spill] sm:$0xff] %v16233_v56  ;;  %v16235_v27 = vpop.f32.mrb[105].mxu1  ;;  %v855_v56 = vld [vmem:[%s13737_s11 + $0x10c0] sm:$0xff] }
 0x463   : > { %17489 = vst [vmem:[#allocation75_spill] sm:$0xff] %v16235_v27  ;;  %v16237_v41 = vpop.f32.mrb[106].mxu1  ;;  %v856_v27 = vld [vmem:[%s13737_s11 + $0x10c8] sm:$0xff] }
 0x464   : > { %17490 = vst [vmem:[#allocation76_spill] sm:$0xff] %v16237_v41  ;;  %v16239_v19 = vpop.f32.mrb[107].mxu1  ;;  %v13368_v41 = vld [vmem:[%s17394_s1 + $0x830] ss:$68 sps:$4 sm:$0xff]  }
 0x465   : > { %17491 = vst [vmem:[#allocation77_spill] sm:$0xff] %v16239_v19 }
 0x468   : > { %7481 = vmatmul.mubr.bf16.gmra.mrb[52].mxu0 %v13362_v15 }
 0x469   : > { %7490 = vmatprep.mubr.bf16.mxu0 %v13363_v35  ;;  %v16247_v55 = vpop.f32.mrb[108].mxu1 }
 0x46a   : > { %17492 = vst [vmem:[#allocation78_spill] sm:$0xff] %v16247_v55  ;;  %v16249_v35 = vpop.f32.mrb[109].mxu1  ;;  %v858_v55 = vld [vmem:[%s13737_s11 + $0x10d8] sm:$0xff] }
 0x46b   : > { %17493 = vst [vmem:[#allocation79_spill] sm:$0xff] %v16249_v35  ;;  %v16251_v15 = vpop.f32.mrb[110].mxu1  ;;  %v1131_v35 = vpack.c.bf16 %v857_v12, %v855_v56  ;;  %v13371_v12 = vld [vmem:[%s17394_s1 + $0x8b8] ss:$68 sps:$4 sm:$0xff]   ;;  %v13372_v56 = vld [vmem:[%s17394_s1 + $0x944] ss:$68 sps:$4 sm:$0xff]  }
 0x46c   : > { %17494 = vst [vmem:[#allocation80_spill] sm:$0xff] %v16251_v15  ;;  %v16253_v19 = vpop.f32.mrb[111].mxu1  ;;  %v862_v15 = vld [vmem:[%s13737_s11 + $0x10f8] sm:$0xff] }
 0x46d   : > { %17495 = vst [vmem:[#allocation81_spill] sm:$0xff] %v16253_v19  ;;  %v860_v19 = vld [vmem:[%s13737_s11 + $0x10e8] sm:$0xff] }
 0x46e   : > { %v1134_v61 = vpack.c.bf16 %v862_v15, %v860_v19 }
 0x470   : > { %7491 = vmatmul.mubr.bf16.gmra.mrb[56].mxu0 %v13365_v54  ;;  %v13369_v54 = vld [vmem:[%s17394_s1 + $0x8bc] ss:$68 sps:$4 sm:$0xff]  }
 0x471   : > { %7500 = vmatprep.mubr.bf16.mxu0 %v13366_v20  ;;  %v1132_v20 = vpack.c.bf16 %v858_v55, %v856_v27  ;;  %v16265_v7 = vpop.f32.mrb[112].mxu1 }
 0x472   : > { %17496 = vst [vmem:[#allocation82_spill] sm:$0xff] %v16265_v7  ;;  %v16270_v62 = vpop.f32.mrb[113].mxu1 }
 0x473   : > { %7683 = vmatprep.subr.bf16.mxu0 %v1132_v20  ;;  %17497 = vst [vmem:[#allocation83_spill] sm:$0xff] %v16270_v62  ;;  %v16273_v52 = vpop.f32.mrb[114].mxu1  ;;  %v8390_v62 = vld [vmem:[%s17397_s4 + $0x170] sm:$0xff] }
 0x474   : > { %7684 = vmatpush1.bf16.msra.mxu0 %v1131_v35  ;;  %17498 = vst [vmem:[#allocation84_spill] sm:$0xff] %v16273_v52  ;;  %v16275_v27 = vpop.f32.mrb[115].mxu1  ;;  %v8344_v35 = vld [vmem:[%s17397_s4] sm:$0xff] }
 0x475   : > { %17499 = vst [vmem:[#allocation85_spill] sm:$0xff] %v16275_v27  ;;  %7685 = vmatprep.subr.bf16.mxu0 %v1134_v61  ;;  %v13374_v61 = vld [vmem:[%s17394_s1 + $0x940] ss:$68 sps:$4 sm:$0xff]   ;;  %8410 = vperm.xlu0 %12647, %v8344_v35   ;;  %v8345_v35 = vld [vmem:[%s17397_s4 + $0x8] sm:$0xff] }
 0x476   : > { %8415 = vperm.xlu1 %12648, %v8345_v35   ;;  %v8350_v35 = vld [vmem:[%s17397_s4 + $0x30] sm:$0xff] }
 0x478   : > { %7501 = vmatmul.mubr.bf16.gmra.mrb[60].mxu0 %v13368_v41 }
 0x479   : > { %7510 = vmatprep.mubr.bf16.mxu0 %v13369_v54  ;;  %7686 = vmatpush1.bf16.msra.mxu0 %v1133_v60  ;;  %v16283_v41 = vpop.f32.mrb[116].mxu1 }
 0x47a   : > { %17500 = vst [vmem:[#allocation86_spill] sm:$0xff] %v16283_v41  ;;  %v16285_v19 = vpop.f32.mrb[117].mxu1 }
 0x47b   : > { %17501 = vst [vmem:[#allocation87_spill] sm:$0xff] %v16285_v19  ;;  %v16287_v55 = vpop.f32.mrb[118].mxu1  ;;  %v8386_v19 = vld [vmem:[%s17397_s4 + $0x150] sm:$0xff] }
 0x47c   : > { %17502 = vst [vmem:[#allocation88_spill] sm:$0xff] %v16287_v55  ;;  %v16289_v57 = vpop.f32.mrb[119].mxu1 }
 0x47d   : > { %17503 = vst [vmem:[#allocation89_spill] sm:$0xff] %v16289_v57 }
 0x480   : > { %7511 = vmatmul.mubr.bf16.gmra.mrb[64].mxu0 %v13371_v12  ;;  %v13377_v12 = vld [vmem:[%s17394_s1 + $0x9c8] ss:$68 sps:$4 sm:$0xff]  }
 0x481   : > { %7520 = vmatprep.mubr.bf16.mxu0 %v13372_v56  ;;  %v16297_v60 = vpop.f32.mrb[120].mxu1  ;;  %v13378_v56 = vld [vmem:[%s17394_s1 + $0xa54] ss:$68 sps:$4 sm:$0xff]  }
 0x482   : > { %17504 = vst [vmem:[#allocation90_spill] sm:$0xff] %v16297_v60  ;;  %v16302_v15 = vpop.f32.mrb[121].mxu1  ;;  %v8382_v60 = vld [vmem:[%s17397_s4 + $0x130] sm:$0xff] }
 0x483   : > { %17505 = vst [vmem:[#allocation91_spill] sm:$0xff] %v16302_v15  ;;  %v16304_v54 = vpop.f32.mrb[122].mxu1  ;;  %v13380_v15 = vld [vmem:[%s17394_s1 + $0xa50] ss:$68 sps:$4 sm:$0xff]  }
 0x484   : > { %17506 = vst [vmem:[#allocation92_spill] sm:$0xff] %v16304_v54  ;;  %v16306_v20 = vpop.f32.mrb[123].mxu1 }
 0x485   : > { %17507 = vst [vmem:[#allocation93_spill] sm:$0xff] %v16306_v20 }
 0x488   : > { %7521 = vmatmul.mubr.bf16.gmra.mrb[68].mxu0 %v13374_v61 }
 0x489   : > { %7530 = vmatprep.mubr.bf16.mxu0 %v13375_v18  ;;  %v16314_v61 = vpop.f32.mrb[124].mxu1  ;;  %v8346_v18 = vld [vmem:[%s17397_s4 + $0x10] sm:$0xff] }
 0x48a   : > { %17508 = vst [vmem:[#allocation94_spill] sm:$0xff] %v16314_v61  ;;  %v16322_v20 = vpop.f32.mrb[125].mxu1  ;;  %8420 = vperm.xlu0 %12647, %v8346_v18   ;;  %v8347_v18 = vld [vmem:[%s17397_s4 + $0x18] sm:$0xff] }
 0x48b   : > { %17509 = vst [vmem:[#allocation95_spill] sm:$0xff] %v16322_v20  ;;  %v16324_v54 = vpop.f32.mrb[126].mxu1  ;;  %8425 = vperm.xlu1 %12648, %v8347_v18   ;;  %v8354_v18 = vld [vmem:[%s17397_s4 + $0x50] sm:$0xff]  ;;  %v8377_v20 = vld [vmem:[%s17397_s4 + $0x108] sm:$0xff] }
 0x48c   : > { %17510 = vst [vmem:[#allocation96_spill] sm:$0xff] %v16324_v54  ;;  %v16329_v61 = vpop.f32.mrb[127].mxu1  ;;  %v13384_v54 = vld [vmem:[%s17394_s1 + $0xb64] ss:$68 sps:$4 sm:$0xff]  }
 0x48d   : > { %17511 = vst [vmem:[#allocation97_spill] sm:$0xff] %v16329_v61  ;;  %v8349_v61 = vld [vmem:[%s17397_s4 + $0x28] sm:$0xff] }
 0x48f   : > { %8435 = vperm.xlu1 %12648, %v8349_v61   ;;  %v8356_v61 = vld [vmem:[%s17397_s4 + $0x60] sm:$0xff] }
 0x490   : > { %7531 = vmatmul.mubr.bf16.gmra.mrb[72].mxu0 %v13377_v12  ;;  %v8348_v12 = vld [vmem:[%s17397_s4 + $0x20] sm:$0xff] }
 0x491   : > { %7540 = vmatprep.mubr.bf16.mxu0 %v13378_v56  ;;  %v13381_v56 = vld [vmem:[%s17394_s1 + $0xadc] ss:$68 sps:$4 sm:$0xff]   ;;  %8430 = vperm.xlu0 %12647, %v8348_v12  }
 0x492   : > { %v8352_v12 = vld [vmem:[%s17397_s4 + $0x40] sm:$0xff] }
 0x495   : > { %8440 = vperm.xlu0 %12647, %v8350_v35   ;;  %v8353_v35 = vld [vmem:[%s17397_s4 + $0x48] sm:$0xff] }
 0x498   : > { %7541 = vmatmul.mubr.bf16.gmra.mrb[76].mxu0 %v13380_v15  ;;  %v13383_v15 = vld [vmem:[%s17394_s1 + $0xad8] ss:$68 sps:$4 sm:$0xff]  }
 0x499   : > { %7550 = vmatprep.mubr.bf16.mxu0 %v13381_v56  ;;  %8450 = vperm.xlu0 %12647, %v8352_v12   ;;  %v8351_v56 = vld [vmem:[%s17397_s4 + $0x38] sm:$0xff]  ;;  %v13386_v12 = vld [vmem:[%s17394_s1 + $0xb60] ss:$68 sps:$4 sm:$0xff]  }
 0x49a   : > { %8445 = vperm.xlu1 %12648, %v8351_v56   ;;  %v8358_v56 = vld [vmem:[%s17397_s4 + $0x70] sm:$0xff] }
 0x49d   : > { %8460 = vperm.xlu0 %12647, %v8354_v18   ;;  %v8357_v18 = vld [vmem:[%s17397_s4 + $0x68] sm:$0xff] }
 0x49e   : > { %8455 = vperm.xlu1 %12648, %v8353_v35   ;;  %v8360_v35 = vld [vmem:[%s17397_s4 + $0x80] sm:$0xff] }
 0x4a0   : > { %7551 = vmatmul.mubr.bf16.gmra.mrb[80].mxu0 %v13383_v15  ;;  %v13387_v15 = vld [vmem:[%s17394_s1 + $0xbec] ss:$68 sps:$4 sm:$0xff]  }
 0x4a1   : > { %7560 = vmatprep.mubr.bf16.mxu0 %v13384_v54  ;;  %8470 = vperm.xlu0 %12647, %v8356_v61   ;;  %v8355_v54 = vld [vmem:[%s17397_s4 + $0x58] sm:$0xff]  ;;  %v13389_v61 = vld [vmem:[%s17394_s1 + $0xbe8] ss:$68 sps:$4 sm:$0xff]  }
 0x4a2   : > { %8465 = vperm.xlu1 %12648, %v8355_v54   ;;  %v8362_v54 = vld [vmem:[%s17397_s4 + $0x90] sm:$0xff] }
 0x4a5   : > { %8480 = vperm.xlu0 %12647, %v8358_v56   ;;  %v8361_v56 = vld [vmem:[%s17397_s4 + $0x88] sm:$0xff] }
 0x4a6   : > { %8475 = vperm.xlu1 %12648, %v8357_v18   ;;  %v8364_v18 = vld [vmem:[%s17397_s4 + $0xa0] sm:$0xff] }
 0x4a8   : > { %7561 = vmatmul.mubr.bf16.gmra.mrb[84].mxu0 %v13386_v12  ;;  %v13390_v12 = vld [vmem:[%s17394_s1 + $0xc74] ss:$68 sps:$4 sm:$0xff]  }
 0x4a9   : > { %7570 = vmatprep.mubr.bf16.mxu0 %v13387_v15  ;;  %8490 = vperm.xlu0 %12647, %v8360_v35   ;;  %v8359_v15 = vld [vmem:[%s17397_s4 + $0x78] sm:$0xff]  ;;  %v13392_v35 = vld [vmem:[%s17394_s1 + $0xc70] ss:$68 sps:$4 sm:$0xff]  }
 0x4aa   : > { %8485 = vperm.xlu1 %12648, %v8359_v15   ;;  %v8366_v15 = vld [vmem:[%s17397_s4 + $0xb0] sm:$0xff] }
 0x4ad   : > { %8500 = vperm.xlu0 %12647, %v8362_v54   ;;  %v8365_v54 = vld [vmem:[%s17397_s4 + $0xa8] sm:$0xff] }
 0x4ae   : > { %8495 = vperm.xlu1 %12648, %v8361_v56   ;;  %v8368_v56 = vld [vmem:[%s17397_s4 + $0xc0] sm:$0xff] }
 0x4b0   : > { %7571 = vmatmul.mubr.bf16.gmra.mrb[88].mxu0 %v13389_v61  ;;  %v13393_v61 = vld [vmem:[%s17394_s1 + $0xcfc] ss:$68 sps:$4 sm:$0xff]  }
 0x4b1   : > { %7580 = vmatprep.mubr.bf16.mxu0 %v13390_v12  ;;  %8510 = vperm.xlu0 %12647, %v8364_v18   ;;  %v8363_v12 = vld [vmem:[%s17397_s4 + $0x98] sm:$0xff] }
 0x4b2   : > { %8505 = vperm.xlu1 %12648, %v8363_v12   ;;  %v13395_v18 = vld [vmem:[%s17394_s1 + $0xcf8] ss:$68 sps:$4 sm:$0xff]   ;;  %v8370_v12 = vld [vmem:[%s17397_s4 + $0xd0] sm:$0xff] }
 0x4b5   : > { %8520 = vperm.xlu0 %12647, %v8366_v15   ;;  %v8369_v15 = vld [vmem:[%s17397_s4 + $0xc8] sm:$0xff] }
 0x4b6   : > { %8515 = vperm.xlu1 %12648, %v8365_v54   ;;  %v8372_v54 = vld [vmem:[%s17397_s4 + $0xe0] sm:$0xff] }
 0x4b8   : > { %7581 = vmatmul.mubr.bf16.gmra.mrb[92].mxu0 %v13392_v35  ;;  %v13396_v35 = vld [vmem:[%s17394_s1 + $0xd84] ss:$68 sps:$4 sm:$0xff]  }
 0x4b9   : > { %7590 = vmatprep.mubr.bf16.mxu0 %v13393_v61  ;;  %8530 = vperm.xlu0 %12647, %v8368_v56   ;;  %v8367_v61 = vld [vmem:[%s17397_s4 + $0xb8] sm:$0xff]  ;;  %v13398_v56 = vld [vmem:[%s17394_s1 + $0xd80] ss:$68 sps:$4 sm:$0xff]  }
 0x4ba   : > { %8525 = vperm.xlu1 %12648, %v8367_v61   ;;  %v8374_v61 = vld [vmem:[%s17397_s4 + $0xf0] sm:$0xff] }
 0x4bd   : > { %8540 = vperm.xlu0 %12647, %v8370_v12   ;;  %v8373_v12 = vld [vmem:[%s17397_s4 + $0xe8] sm:$0xff] }
 0x4be   : > { %8535 = vperm.xlu1 %12648, %v8369_v15   ;;  %v8376_v15 = vld [vmem:[%s17397_s4 + $0x100] sm:$0xff] }
 0x4c0   : > { %7591 = vmatmul.mubr.bf16.gmra.mrb[96].mxu0 %v13395_v18  ;;  %v13399_v18 = vld [vmem:[%s17394_s1 + $0xe0c] ss:$68 sps:$4 sm:$0xff]  }
 0x4c1   : > { %7600 = vmatprep.mubr.bf16.mxu0 %v13396_v35  ;;  %8550 = vperm.xlu0 %12647, %v8372_v54   ;;  %v8371_v35 = vld [vmem:[%s17397_s4 + $0xd8] sm:$0xff]  ;;  %v13401_v54 = vld [vmem:[%s17394_s1 + $0xe08] ss:$68 sps:$4 sm:$0xff]  }
 0x4c2   : > { %8545 = vperm.xlu1 %12648, %v8371_v35   ;;  %v8375_v35 = vld [vmem:[%s17397_s4 + $0xf8] sm:$0xff] }
 0x4c5   : > { %8560 = vperm.xlu0 %12647, %v8374_v61   ;;  %v8378_v61 = vld [vmem:[%s17397_s4 + $0x110] sm:$0xff] }
 0x4c6   : > { %8555 = vperm.xlu1 %12648, %v8373_v12   ;;  %v8380_v12 = vld [vmem:[%s17397_s4 + $0x120] sm:$0xff] }
 0x4c8   : > { %7601 = vmatmul.mubr.bf16.gmra.mrb[100].mxu0 %v13398_v56  ;;  %v13402_v56 = vld [vmem:[%s17394_s1 + $0xe94] ss:$68 sps:$4 sm:$0xff]  }
 0x4c9   : > { %7610 = vmatprep.mubr.bf16.mxu0 %v13399_v18  ;;  %8570 = vperm.xlu0 %12647, %v8376_v15   ;;  %v16463_v18 = vpop.permute.xlu0 %1777  ;;  %v13404_v15 = vld [vmem:[%s17394_s1 + $0xe90] ss:$68 sps:$4 sm:$0xff]  }
 0x4ca   : > { %8565 = vperm.xlu1 %12648, %v8375_v35   ;;  %v16485_v35 = vpop.permute.xlu1 %1787 }
 0x4cd   : > { %8580 = vperm.xlu0 %12647, %v8378_v61   ;;  %v8379_v61 = vld [vmem:[%s17397_s4 + $0x118] sm:$0xff] }
 0x4ce   : > { %8575 = vperm.xlu1 %12648, %v8377_v20   ;;  %v8381_v20 = vld [vmem:[%s17397_s4 + $0x128] sm:$0xff]  ;;  %v16504_v55 = vpop.permute.xlu1 %1792 }
 0x4d0   : > { %7611 = vmatmul.mubr.bf16.gmra.mrb[104].mxu0 %v13401_v54  ;;  %v13405_v54 = vld [vmem:[%s17394_s1 + $0xf1c] ss:$68 sps:$4 sm:$0xff]  }
 0x4d1   : > { %7620 = vmatprep.mubr.bf16.mxu0 %v13402_v56  ;;  %v16483_v56 = vpop.permute.xlu0 %1782  ;;  %8590 = vperm.xlu0 %12647, %v8380_v12   ;;  %v8384_v12 = vld [vmem:[%s17397_s4 + $0x140] sm:$0xff] }
 0x4d2   : > { %8585 = vperm.xlu1 %12648, %v8379_v61   ;;  %v8383_v61 = vld [vmem:[%s17397_s4 + $0x138] sm:$0xff]  ;;  %v16517_v41 = vpop.permute.xlu1 %1802  ;;  %v11212_v51 = vadd.f32 %v15592_v39, %v16483_v56  ;;  %v11216_v39 = vadd.f32 %v15612_v58, %v16485_v35 }
 0x4d5   : > { %v16493_v57 = vpop.permute.xlu0 %1797  ;;  %8600 = vperm.xlu0 %12647, %v8382_v60  }
 0x4d6   : > { %8595 = vperm.xlu1 %12648, %v8381_v20   ;;  %v8385_v20 = vld [vmem:[%s17397_s4 + $0x148] sm:$0xff]  ;;  %v16530_v52 = vpop.permute.xlu1 %1812 }
 0x4d8   : > { %7621 = vmatmul.mubr.bf16.gmra.mrb[108].mxu0 %v13404_v15  ;;  %v13407_v15 = vld [vmem:[%s17394_s1 + $0xf18] ss:$68 sps:$4 sm:$0xff]  }
 0x4d9   : > { %7630 = vmatprep.mubr.bf16.mxu0 %v13405_v54  ;;  %v13408_v54 = vld [vmem:[%s17394_s1 + $0xfa4] ss:$68 sps:$4 sm:$0xff]   ;;  %v16509_v60 = vpop.permute.xlu0 %1807  ;;  %8610 = vperm.xlu0 %12647, %v8384_v12  }
 0x4da   : > { %8605 = vperm.xlu1 %12648, %v8383_v61   ;;  %v8388_v12 = vld [vmem:[%s17397_s4 + $0x160] sm:$0xff]  ;;  %v8387_v61 = vld [vmem:[%s17397_s4 + $0x158] sm:$0xff]  ;;  %v16543_v7 = vpop.permute.xlu1 %1822 }
 0x4dd   : > { %v16519_v27 = vpop.permute.xlu0 %1817  ;;  %8620 = vperm.xlu0 %12647, %v8386_v19  }
 0x4de   : > { %8615 = vperm.xlu1 %12648, %v8385_v20   ;;  %v8389_v20 = vld [vmem:[%s17397_s4 + $0x168] sm:$0xff]  ;;  %v16556_v5 = vpop.permute.xlu1 %1832 }
 0x4e0   : > { %7631 = vmatmul.mubr.bf16.gmra.mrb[112].mxu0 %v13407_v15  ;;  %v13410_v15 = vld [vmem:[%s17394_s1 + $0xfa0] ss:$68 sps:$4 sm:$0xff]  }
 0x4e1   : > { %7640 = vmatprep.mubr.bf16.mxu0 %v13408_v54  ;;  %v13411_v54 = vld [vmem:[%s17394_s1 + $0x102c] ss:$68 sps:$4 sm:$0xff]   ;;  %v16535_v19 = vpop.permute.xlu0 %1827  ;;  %8630 = vperm.xlu0 %12647, %v8388_v12   ;;  %v8392_v12 = vld [vmem:[%s17397_s4 + $0x180] sm:$0xff] }
 0x4e2   : > { %8625 = vperm.xlu1 %12648, %v8387_v61   ;;  %v8391_v61 = vld [vmem:[%s17397_s4 + $0x178] sm:$0xff]  ;;  %v16569_v45 = vpop.permute.xlu1 %1842 }
 0x4e5   : > { %v16545_v49 = vpop.permute.xlu0 %1837  ;;  %8640 = vperm.xlu0 %12647, %v8390_v62  }
 0x4e6   : > { %8635 = vperm.xlu1 %12648, %v8389_v20   ;;  %v8393_v20 = vld [vmem:[%s17397_s4 + $0x188] sm:$0xff]  ;;  %v16582_v34 = vpop.permute.xlu1 %1852 }
 0x4e8   : > { %7641 = vmatmul.mubr.bf16.gmra.mrb[116].mxu0 %v13410_v15  ;;  %v13413_v15 = vld [vmem:[%s17394_s1 + $0x1028] ss:$68 sps:$4 sm:$0xff]  }
 0x4e9   : > { %7650 = vmatprep.mubr.bf16.mxu0 %v13411_v54  ;;  %v13414_v54 = vld [vmem:[%s17394_s1 + $0x10b4] ss:$68 sps:$4 sm:$0xff]   ;;  %v16561_v62 = vpop.permute.xlu0 %1847  ;;  %8650 = vperm.xlu0 %12647, %v8392_v12   ;;  %v8396_v12 = vld [vmem:[%s17397_s4 + $0x1a0] sm:$0xff] }
 0x4ea   : > { %8645 = vperm.xlu1 %12648, %v8391_v61   ;;  %v8398_v61 = vld [vmem:[%s17397_s4 + $0x1b0] sm:$0xff]  ;;  %v16592_v22 = vpop.permute.xlu1 %1862 }
 0x4eb   : > { %17513 = vst [vmem:[#allocation99_spill] sm:$0xff] %v16592_v22 }
 0x4ed   : > { %v16571_v43 = vpop.permute.xlu0 %1857  ;;  %8660 = vperm.xlu0 %12647, %v8394_v37   ;;  %v8395_v37 = vld [vmem:[%s17397_s4 + $0x198] sm:$0xff] }
 0x4ee   : > { %8655 = vperm.xlu1 %12648, %v8393_v20   ;;  %v8397_v20 = vld [vmem:[%s17397_s4 + $0x1a8] sm:$0xff]  ;;  %v16606_v2 = vpop.permute.xlu1 %1872 }
 0x4ef   : > { %17516 = vst [vmem:[#allocation101_spill] sm:$0xff] %v16606_v2 }
 0x4f0   : > { %7651 = vmatmul.mubr.bf16.gmra.mrb[120].mxu0 %v13413_v15  ;;  %v13416_v15 = vld [vmem:[%s17394_s1 + $0x10b0] ss:$68 sps:$4 sm:$0xff]  }
 0x4f1   : > { %7660 = vmatprep.mubr.bf16.mxu0 %v13414_v54  ;;  %v16584_v54 = vpop.permute.xlu0 %1867  ;;  %8670 = vperm.xlu0 %12647, %v8396_v12   ;;  %v8400_v12 = vld [vmem:[%s17397_s4 + $0x1c0] sm:$0xff] }
 0x4f2   : > { %17512 = vst [vmem:[#allocation98_spill] sm:$0xff] %v16584_v54  ;;  %8665 = vperm.xlu1 %12648, %v8395_v37   ;;  %v8399_v37 = vld [vmem:[%s17397_s4 + $0x1b8] sm:$0xff] }
 0x4f5   : > { %v16595_v13 = vpop.permute.xlu0 %1877  ;;  %8680 = vperm.xlu0 %12647, %v8398_v61   ;;  %v8402_v61 = vld [vmem:[%s17397_s4 + $0x1d0] sm:$0xff] }
 0x4f6   : > { %17515 = vst [vmem:[#allocation100_spill] sm:$0xff] %v16595_v13  ;;  %8675 = vperm.xlu1 %12648, %v8397_v20   ;;  %v16616_v13 = vpop.permute.xlu1 %1882  ;;  %v8401_v20 = vld [vmem:[%s17397_s4 + $0x1c8] sm:$0xff] }
 0x4f7   : > { %17518 = vst [vmem:[#allocation103_spill] sm:$0xff] %v16616_v13 }
 0x4f8   : > { %7661 = vmatmul.mubr.bf16.gmra.mrb[124].mxu0 %v13416_v15  ;;  %v13417_v15 = vld [vmem:[%s17394_s1 + $0x40] ss:$68 sps:$4 sm:$0xff]  }
 0x4f9   : > { %7703 = vmatprep.mubr.bf16.mxu0 %v17514_v16  ;;  %v16608_v0 = vpop.permute.xlu0 %1887  ;;  %8690 = vperm.xlu0 %12647, %v8400_v12   ;;  %v8404_v12 = vld [vmem:[%s17397_s4 + $0x1e0] sm:$0xff] }
 0x4fa   : > { %17517 = vst [vmem:[#allocation102_spill] sm:$0xff] %v16608_v0  ;;  %8685 = vperm.xlu1 %12648, %v8399_v37   ;;  %v16630_v0 = vpop.permute.xlu1 %1892  ;;  %v8403_v37 = vld [vmem:[%s17397_s4 + $0x1d8] sm:$0xff] }
 0x4fb   : > { %17520 = vst [vmem:[#allocation105_spill] sm:$0xff] %v16630_v0 }
 0x4fd   : > { %v16619_v54 = vpop.permute.xlu0 %1897  ;;  %8700 = vperm.xlu0 %12647, %v8402_v61   ;;  %v8406_v61 = vld [vmem:[%s17397_s4 + $0x1f0] sm:$0xff] }
 0x4fe   : > { %17519 = vst [vmem:[#allocation104_spill] sm:$0xff] %v16619_v54  ;;  %8695 = vperm.xlu1 %12648, %v8401_v20   ;;  %v16640_v54 = vpop.permute.xlu1 %1902  ;;  %v8405_v20 = vld [vmem:[%s17397_s4 + $0x1e8] sm:$0xff] }
 0x4ff   : > { %17522 = vst [vmem:[#allocation107_spill] sm:$0xff] %v16640_v54 }
 0x500   : > { %7704 = vmatmul.mubr.bf16.vlgmr.msra.gmra.mrb[0].mxu0 %v13417_v15  ;;  %v13418_v15 = vld [vmem:[%s17394_s1 + $0xc8] ss:$68 sps:$4 sm:$0xff]  }
 0x501   : > { %7713 = vmatprep.mubr.bf16.mxu0 %v17514_v16  ;;  %v16632_v13 = vpop.permute.xlu0 %1907  ;;  %8710 = vperm.xlu0 %12647, %v8404_v12   ;;  %v10267_v12 = vld [vmem:[#allocation2] sm:$0x1] }
 0x502   : > { %17521 = vst [vmem:[#allocation106_spill] sm:$0xff] %v16632_v13  ;;  %8705 = vperm.xlu1 %12648, %v8403_v37   ;;  %v16651_v13 = vpop.permute.xlu1 %1912  ;;  %v8407_v37 = vld [vmem:[%s17397_s4 + $0x1f8] sm:$0xff] }
 0x503   : > { %17524 = vst [vmem:[#allocation109_spill] sm:$0xff] %v16651_v13  ;;  %v13444_v13 = vld [vmem:[%s17394_s1 + $0xe98] ss:$68 sps:$4 sm:$0xff]  }
 0x505   : > { %v16643_v2 = vpop.permute.xlu0 %1917  ;;  %8720 = vperm.xlu0 %12647, %v8406_v61  }
 0x506   : > { %17523 = vst [vmem:[#allocation108_spill] sm:$0xff] %v16643_v2  ;;  %8715 = vperm.xlu1 %12648, %v8405_v20   ;;  %v16658_v61 = vpop.permute.xlu1 %1922  ;;  %v13420_v2 = vld [vmem:[%s17394_s1 + $0x1d8] ss:$68 sps:$4 sm:$0xff]   ;;  %v13421_v20 = vld [vmem:[%s17394_s1 + $0x260] ss:$68 sps:$4 sm:$0xff]  }
 0x507   : > { %17526 = vst [vmem:[#allocation111_spill] sm:$0xff] %v16658_v61 }
 0x508   : > { %7714 = vmatmul.mubr.bf16.gmra.mrb[4].mxu0 %v13418_v15  ;;  %v13419_v15 = vld [vmem:[%s17394_s1 + $0x150] ss:$68 sps:$4 sm:$0xff]  }
 0x509   : > { %7723 = vmatprep.mubr.bf16.mxu0 %v17514_v16  ;;  %v16653_v0 = vpop.permute.xlu0 %1927  ;;  %10270 = vperm.xlu0 %12647, %v10267_v12   ;;  %v13422_v12 = vld [vmem:[%s17394_s1 + $0x2e8] ss:$68 sps:$4 sm:$0xff]  }
 0x50a   : > { %17525 = vst [vmem:[#allocation110_spill] sm:$0xff] %v16653_v0  ;;  %8725 = vperm.xlu1 %12648, %v8407_v37   ;;  %v13425_v37 = vld [vmem:[%s17394_s1 + $0x480] ss:$68 sps:$4 sm:$0xff]  }
 0x510   : > { %7724 = vmatmul.mubr.bf16.gmra.mrb[8].mxu0 %v13419_v15  ;;  %v13424_v15 = vld [vmem:[%s17394_s1 + $0x3f8] ss:$68 sps:$4 sm:$0xff]  }
 0x511   : > { %7733 = vmatprep.mubr.bf16.mxu0 %v17514_v16 }
 0x518   : > { %7734 = vmatmul.mubr.bf16.gmra.mrb[12].mxu0 %v13420_v2  ;;  %v13423_v2 = vld [vmem:[%s17394_s1 + $0x370] ss:$68 sps:$4 sm:$0xff]  }
 0x519   : > { %7743 = vmatprep.mubr.bf16.mxu0 %v17514_v16 }
 0x520   : > { %7744 = vmatmul.mubr.bf16.gmra.mrb[16].mxu0 %v13421_v20  ;;  %v13426_v20 = vld [vmem:[%s17394_s1 + $0x508] ss:$68 sps:$4 sm:$0xff]  }
 0x521   : > { %7753 = vmatprep.mubr.bf16.mxu0 %v17514_v16 }
 0x528   : > { %7754 = vmatmul.mubr.bf16.gmra.mrb[20].mxu0 %v13422_v12  ;;  %v13427_v12 = vld [vmem:[%s17394_s1 + $0x590] ss:$68 sps:$4 sm:$0xff]  }
 0x529   : > { %7763 = vmatprep.mubr.bf16.mxu0 %v17514_v16 }
 0x530   : > { %7764 = vmatmul.mubr.bf16.gmra.mrb[24].mxu0 %v13423_v2  ;;  %v13428_v2 = vld [vmem:[%s17394_s1 + $0x618] ss:$68 sps:$4 sm:$0xff]  }
 0x531   : > { %7773 = vmatprep.mubr.bf16.mxu0 %v17514_v16 }
 0x538   : > { %7774 = vmatmul.mubr.bf16.gmra.mrb[28].mxu0 %v13424_v15  ;;  %v13429_v15 = vld [vmem:[%s17394_s1 + $0x6a0] ss:$68 sps:$4 sm:$0xff]  }
 0x539   : > { %7783 = vmatprep.mubr.bf16.mxu0 %v17514_v16 }
 0x540   : > { %7784 = vmatmul.mubr.bf16.gmra.mrb[32].mxu0 %v13425_v37  ;;  %v13430_v37 = vld [vmem:[%s17394_s1 + $0x728] ss:$68 sps:$4 sm:$0xff]  }
 0x541   : > { %7793 = vmatprep.mubr.bf16.mxu0 %v17514_v16 }
 0x548   : > { %7794 = vmatmul.mubr.bf16.gmra.mrb[36].mxu0 %v13426_v20  ;;  %v13431_v20 = vld [vmem:[%s17394_s1 + $0x7b0] ss:$68 sps:$4 sm:$0xff]  }
 0x549   : > { %7803 = vmatprep.mubr.bf16.mxu0 %v17514_v16 }
 0x550   : > { %7804 = vmatmul.mubr.bf16.gmra.mrb[40].mxu0 %v13427_v12  ;;  %v13432_v12 = vld [vmem:[%s17394_s1 + $0x838] ss:$68 sps:$4 sm:$0xff]  }
 0x551   : > { %7813 = vmatprep.mubr.bf16.mxu0 %v17514_v16 }
 0x558   : > { %7814 = vmatmul.mubr.bf16.gmra.mrb[44].mxu0 %v13428_v2  ;;  %v13433_v2 = vld [vmem:[%s17394_s1 + $0x8c0] ss:$68 sps:$4 sm:$0xff]  }
 0x559   : > { %7823 = vmatprep.mubr.bf16.mxu0 %v17514_v16 }
 0x560   : > { %7824 = vmatmul.mubr.bf16.gmra.mrb[48].mxu0 %v13429_v15  ;;  %v13434_v15 = vld [vmem:[%s17394_s1 + $0x948] ss:$68 sps:$4 sm:$0xff]  }
 0x561   : > { %7833 = vmatprep.mubr.bf16.mxu0 %v17514_v16 }
 0x568   : > { %7834 = vmatmul.mubr.bf16.gmra.mrb[52].mxu0 %v13430_v37  ;;  %v13435_v37 = vld [vmem:[%s17394_s1 + $0x9d0] ss:$68 sps:$4 sm:$0xff]  }
 0x569   : > { %7843 = vmatprep.mubr.bf16.mxu0 %v17514_v16 }
 0x570   : > { %7844 = vmatmul.mubr.bf16.gmra.mrb[56].mxu0 %v13431_v20  ;;  %v13436_v20 = vld [vmem:[%s17394_s1 + $0xa58] ss:$68 sps:$4 sm:$0xff]  }
 0x571   : > { %7853 = vmatprep.mubr.bf16.mxu0 %v17514_v16 }
 0x578   : > { %7854 = vmatmul.mubr.bf16.gmra.mrb[60].mxu0 %v13432_v12  ;;  %v13437_v12 = vld [vmem:[%s17394_s1 + $0xae0] ss:$68 sps:$4 sm:$0xff]  }
 0x579   : > { %7863 = vmatprep.mubr.bf16.mxu0 %v17514_v16 }
 0x580   : > { %7864 = vmatmul.mubr.bf16.gmra.mrb[64].mxu0 %v13433_v2  ;;  %v13438_v2 = vld [vmem:[%s17394_s1 + $0xb68] ss:$68 sps:$4 sm:$0xff]  }
 0x581   : > { %7873 = vmatprep.mubr.bf16.mxu0 %v17514_v16 }
 0x588   : > { %7874 = vmatmul.mubr.bf16.gmra.mrb[68].mxu0 %v13434_v15  ;;  %v13439_v15 = vld [vmem:[%s17394_s1 + $0xbf0] ss:$68 sps:$4 sm:$0xff]  }
 0x589   : > { %7883 = vmatprep.mubr.bf16.mxu0 %v17514_v16 }
 0x590   : > { %7884 = vmatmul.mubr.bf16.gmra.mrb[72].mxu0 %v13435_v37  ;;  %v13440_v37 = vld [vmem:[%s17394_s1 + $0xc78] ss:$68 sps:$4 sm:$0xff]  }
 0x591   : > { %7893 = vmatprep.mubr.bf16.mxu0 %v17514_v16 }
 0x598   : > { %7894 = vmatmul.mubr.bf16.gmra.mrb[76].mxu0 %v13436_v20  ;;  %v13441_v20 = vld [vmem:[%s17394_s1 + $0xd00] ss:$68 sps:$4 sm:$0xff]  }
 0x599   : > { %7903 = vmatprep.mubr.bf16.mxu0 %v17514_v16 }
 0x5a0   : > { %7904 = vmatmul.mubr.bf16.gmra.mrb[80].mxu0 %v13437_v12  ;;  %v13442_v12 = vld [vmem:[%s17394_s1 + $0xd88] ss:$68 sps:$4 sm:$0xff]  }
 0x5a1   : > { %7913 = vmatprep.mubr.bf16.mxu0 %v17514_v16 }
 0x5a8   : > { %7914 = vmatmul.mubr.bf16.gmra.mrb[84].mxu0 %v13438_v2  ;;  %v13443_v2 = vld [vmem:[%s17394_s1 + $0xe10] ss:$68 sps:$4 sm:$0xff]  }
 0x5a9   : > { %7923 = vmatprep.mubr.bf16.mxu0 %v17514_v16 }
 0x5b0   : > { %7924 = vmatmul.mubr.bf16.gmra.mrb[88].mxu0 %v13439_v15  ;;  %v11206_v15 = vadd.f32 %v15574_v32, %v16463_v18 }
 0x5b1   : > { %7933 = vmatprep.mubr.bf16.mxu0 %v17514_v16 }
 0x5b8   : > { %7934 = vmatmul.mubr.bf16.gmra.mrb[92].mxu0 %v13440_v37 }
 0x5b9   : > { %7943 = vmatprep.mubr.bf16.mxu0 %v17514_v16 }
 0x5c0   : > { %7944 = vmatmul.mubr.bf16.gmra.mrb[96].mxu0 %v13441_v20  ;;  %v11208_v20 = vadd.f32 %v15579_v36, %v16463_v18  ;;  %v13451_v36 = vld [vmem:[%s17396_s3 + $0x4] ss:$16 sps:$4 sm:$0xff]  }
 0x5c1   : > { %7953 = vmatprep.mubr.bf16.mxu0 %v17514_v16  ;;  %9400 = vmatprep.mubr.bf16.mxu1 %v13451_v36 }
 0x5c8   : > { %7954 = vmatmul.mubr.bf16.gmra.mrb[100].mxu0 %v13442_v12  ;;  %v11210_v12 = vadd.f32 %v15584_v28, %v16483_v56 }
 0x5c9   : > { %7963 = vmatprep.mubr.bf16.mxu0 %v17514_v16 }
 0x5d0   : > { %7964 = vmatmul.mubr.bf16.gmra.mrb[104].mxu0 %v13443_v2 }
 0x5d1   : > { %7973 = vmatprep.mubr.bf16.mxu0 %v17514_v16 }
 0x5d3   : > { %v7705_v37 = vpop.f32.mrb[0].mxu0 }
 0x5d4   : > { %v11207_v0 = vadd.f32 %v11206_v15, %v7705_v37  ;;  %v7707_v61 = vpop.f32.mrb[1].mxu0 }
 0x5d5   : > { %v11209_v54 = vadd.f32 %v11208_v20, %v7707_v61  ;;  %v7709_v2 = vpop.f32.mrb[2].mxu0  ;;  %v11214_v61 = vadd.f32 %v15605_v25, %v16485_v35 }
 0x5d6   : > { %v11211_v48 = vadd.f32 %v11210_v12, %v7709_v2  ;;  %v7711_v32 = vpop.f32.mrb[3].mxu0  ;;  %v8024_v15 = vmax.f32 %v11207_v0, 0.0  ;;  %v11220_v0 = vadd.f32 %v15622_v50, %v16504_v55 }
 0x5d7   : > { %v11213_v18 = vadd.f32 %v11212_v51, %v7711_v32  ;;  %v8025_v28 = vmax.f32 %v11209_v54, 0.0  ;;  %v13445_v51 = vld [vmem:[%s17394_s1 + $0xf20] ss:$68 sps:$4 sm:$0xff]  }
 0x5d8   : > { %v8026_v37 = vmax.f32 %v11211_v48, 0.0  ;;  %7974 = vmatmul.mubr.bf16.gmra.mrb[108].mxu0 %v13444_v13  ;;  %v11218_v48 = vadd.f32 %v15614_v11, %v16504_v55 }
 0x5d9   : > { %v8027_v22 = vmax.f32 %v11213_v18, 0.0  ;;  %7983 = vmatprep.mubr.bf16.mxu0 %v17514_v16 }
 0x5da   : > { %v8280_v20 = vpack.c.bf16 %v8026_v37, %v8024_v15  ;;  %v11222_v15 = vadd.f32 %v15633_v4, %v16493_v57 }
 0x5db   : > { %v8281_v56 = vpack.c.bf16 %v8027_v22, %v8025_v28  ;;  %v7715_v12 = vpop.f32.mrb[4].mxu0 }
 0x5dc   : > { %v11215_v2 = vadd.f32 %v11214_v61, %v7715_v12  ;;  %v7717_v47 = vpop.f32.mrb[5].mxu0  ;;  %v11226_v61 = vadd.f32 %v15640_v40, %v16517_v41 }
 0x5dd   : > { %v11217_v13 = vadd.f32 %v11216_v39, %v7717_v47  ;;  %v7719_v25 = vpop.f32.mrb[6].mxu0  ;;  %9368 = vmatprep.subr.bf16.mxu1 %v8281_v56  ;;  %v11224_v47 = vadd.f32 %v15638_v38, %v16493_v57  ;;  %v11228_v39 = vadd.f32 %v15648_v46, %v16517_v41  ;;  %v11232_v41 = vadd.f32 %v15668_v63, %v16509_v60 }
 0x5de   : > { %v11219_v54 = vadd.f32 %v11218_v48, %v7719_v25  ;;  %v7721_v32 = vpop.f32.mrb[7].mxu0  ;;  %9369 = vmatpush1.bf16.msra.mxu1 %v8280_v20  ;;  %v8028_v22 = vmax.f32 %v11215_v2, 0.0  ;;  %v13446_v20 = vld [vmem:[%s17394_s1 + $0xfa8] ss:$68 sps:$4 sm:$0xff]  }
 0x5df   : > { %v11221_v58 = vadd.f32 %v11220_v0, %v7721_v32  ;;  %v8029_v36 = vmax.f32 %v11217_v13, 0.0  ;;  %v11230_v13 = vadd.f32 %v15661_v53, %v16509_v60 }
 0x5e0   : > { %v8030_v35 = vmax.f32 %v11219_v54, 0.0  ;;  %7984 = vmatmul.mubr.bf16.gmra.mrb[112].mxu0 %v13445_v51 }
 0x5e1   : > { %v8031_v18 = vmax.f32 %v11221_v58, 0.0  ;;  %7993 = vmatprep.mubr.bf16.mxu0 %v17514_v16  ;;  %v11234_v58 = vadd.f32 %v15670_v10, %v16530_v52 }
 0x5e2   : > { %v8282_v11 = vpack.c.bf16 %v8030_v35, %v8028_v22  ;;  %v13447_v22 = vld [vmem:[%s17394_s1 + $0x1030] ss:$68 sps:$4 sm:$0xff]   ;;  %v11236_v35 = vadd.f32 %v15678_v3, %v16530_v52  ;;  %v11240_v52 = vadd.f32 %v15698_v26, %v16519_v27 }
 0x5e3   : > { %v8283_v37 = vpack.c.bf16 %v8031_v18, %v8029_v36  ;;  %v7725_v50 = vpop.f32.mrb[8].mxu0 }
 0x5e4   : > { %v11223_v55 = vadd.f32 %v11222_v15, %v7725_v50  ;;  %v7727_v28 = vpop.f32.mrb[9].mxu0 }
 0x5e5   : > { %v11225_v56 = vadd.f32 %v11224_v47, %v7727_v28  ;;  %v7729_v12 = vpop.f32.mrb[10].mxu0  ;;  %9370 = vmatprep.subr.bf16.mxu1 %v8283_v37  ;;  %v11238_v47 = vadd.f32 %v15691_v17, %v16519_v27 }
 0x5e6   : > { %v11227_v4 = vadd.f32 %v11226_v61, %v7729_v12  ;;  %v7731_v2 = vpop.f32.mrb[11].mxu0  ;;  %9371 = vmatpush1.bf16.msra.mxu1 %v8282_v11  ;;  %v8032_v38 = vmax.f32 %v11223_v55, 0.0 }
 0x5e7   : > { %v11229_v48 = vadd.f32 %v11228_v39, %v7731_v2  ;;  %v8033_v51 = vmax.f32 %v11225_v56, 0.0  ;;  %v13448_v39 = vld [vmem:[%s17394_s1 + $0x10b8] ss:$68 sps:$4 sm:$0xff]  }
 0x5e8   : > { %v8034_v57 = vmax.f32 %v11227_v4, 0.0  ;;  %7994 = vmatmul.mubr.bf16.gmra.mrb[116].mxu0 %v13446_v20  ;;  %v11242_v20 = vadd.f32 %v15700_v21, %v16543_v7 }
 0x5e9   : > { %v8035_v0 = vmax.f32 %v11229_v48, 0.0  ;;  %8003 = vmatprep.mubr.bf16.mxu0 %v17514_v16 }
 0x5ea   : > { %v8284_v40 = vpack.c.bf16 %v8034_v57, %v8032_v38  ;;  %v11246_v57 = vadd.f32 %v15725_v31, %v16535_v19 }
 0x5eb   : > { %v8285_v25 = vpack.c.bf16 %v8035_v0, %v8033_v51  ;;  %v7735_v46 = vpop.f32.mrb[12].mxu0 }
 0x5ec   : > { %v11231_v54 = vadd.f32 %v11230_v13, %v7735_v46  ;;  %v7737_v32 = vpop.f32.mrb[13].mxu0  ;;  %v11250_v13 = vadd.f32 %v15734_v44, %v16556_v5 }
 0x5ed   : > { %v11233_v36 = vadd.f32 %v11232_v41, %v7737_v32  ;;  %v7739_v18 = vpop.f32.mrb[14].mxu0  ;;  %9372 = vmatprep.subr.bf16.mxu1 %v8285_v25  ;;  %v11252_v25 = vadd.f32 %v15749_v9, %v16556_v5  ;;  %v11256_v9 = vadd.f32 %v15766_v23, %v16545_v49 }
 0x5ee   : > { %v11235_v53 = vadd.f32 %v11234_v58, %v7739_v18  ;;  %v7741_v11 = vpop.f32.mrb[15].mxu0  ;;  %9373 = vmatpush1.bf16.msra.mxu1 %v8284_v40  ;;  %v8036_v63 = vmax.f32 %v11231_v54, 0.0 }
 0x5ef   : > { %v11237_v15 = vadd.f32 %v11236_v35, %v7741_v11  ;;  %v8037_v37 = vmax.f32 %v11233_v36, 0.0  ;;  %v11258_v11 = vadd.f32 %v15768_v30, %v16569_v45 }
 0x5f0   : > { %v8038_v60 = vmax.f32 %v11235_v53, 0.0  ;;  %8004 = vmatmul.mubr.bf16.gmra.mrb[120].mxu0 %v13447_v22 }
 0x5f1   : > { %v8039_v50 = vmax.f32 %v11237_v15, 0.0  ;;  %8013 = vmatprep.mubr.bf16.mxu0 %v17514_v16  ;;  %v11244_v16 = vadd.f32 %v15712_v8, %v16543_v7  ;;  %v11248_v8 = vadd.f32 %v15732_v24, %v16535_v19  ;;  %v11254_v19 = vadd.f32 %v15761_v14, %v16545_v49 }
 0x5f2   : > { %v8286_v10 = vpack.c.bf16 %v8038_v60, %v8036_v63  ;;  %v11260_v15 = vadd.f32 %v15776_v33, %v16569_v45  ;;  %v11262_v49 = vadd.f32 %v15787_v59, %v16561_v62  ;;  %v11264_v33 = vadd.f32 %v15792_v29, %v16561_v62 }
 0x5f3   : > { %v8287_v55 = vpack.c.bf16 %v8039_v50, %v8037_v37  ;;  %v7745_v3 = vpop.f32.mrb[16].mxu0  ;;  %v11270_v62 = vadd.f32 %v15813_v1, %v16571_v43 }
 0x5f4   : > { %v11239_v28 = vadd.f32 %v11238_v47, %v7745_v3  ;;  %v7747_v61 = vpop.f32.mrb[17].mxu0 }
 0x5f5   : > { %v11241_v56 = vadd.f32 %v11240_v52, %v7747_v61  ;;  %v7749_v12 = vpop.f32.mrb[18].mxu0  ;;  %9374 = vmatprep.subr.bf16.mxu1 %v8287_v55  ;;  %v11266_v61 = vadd.f32 %v15794_v42, %v16582_v34 }
 0x5f6   : > { %v11243_v17 = vadd.f32 %v11242_v20, %v7749_v12  ;;  %v7751_v4 = vpop.f32.mrb[19].mxu0  ;;  %9375 = vmatpush1.bf16.msra.mxu1 %v8286_v10  ;;  %v8040_v26 = vmax.f32 %v11239_v28, 0.0  ;;  %v11268_v20 = vadd.f32 %v15802_v6, %v16582_v34 }
 0x5f7   : > { %v11245_v2 = vadd.f32 %v11244_v16, %v7751_v4  ;;  %v8041_v48 = vmax.f32 %v11241_v56, 0.0 }
 0x5f8   : > { %v8042_v27 = vmax.f32 %v11243_v17, 0.0  ;;  %8014 = vmatmul.mubr.bf16.gmra.mrb[124].mxu0 %v13448_v39 }
 0x5f9   : > { %v8043_v38 = vmax.f32 %v11245_v2, 0.0 }
 0x5fa   : > { %v8288_v21 = vpack.c.bf16 %v8042_v27, %v8040_v26 }
 0x5fb   : > { %v8289_v51 = vpack.c.bf16 %v8043_v38, %v8041_v48  ;;  %v7755_v0 = vpop.f32.mrb[20].mxu0  ;;  %v17527_v48 = vld [vmem:[#allocation3_spill] sm:$0xff] }
 0x5fc   : > { %v11247_v7 = vadd.f32 %v11246_v57, %v7755_v0  ;;  %v7757_v40 = vpop.f32.mrb[21].mxu0  ;;  %v11272_v6 = vadd.f32 %v17527_v48, %v16571_v43  ;;  %v17529_v57 = vld [vmem:[#allocation4_spill] sm:$0xff]  ;;  %v17530_v0 = vld [vmem:[#allocation5_spill] sm:$0xff] }
 0x5fd   : > { %v11249_v46 = vadd.f32 %v11248_v8, %v7757_v40  ;;  %v7759_v41 = vpop.f32.mrb[22].mxu0  ;;  %9376 = vmatprep.subr.bf16.mxu1 %v8289_v51 }
 0x5fe   : > { %v11251_v54 = vadd.f32 %v11250_v13, %v7759_v41  ;;  %v7761_v32 = vpop.f32.mrb[23].mxu0  ;;  %9377 = vmatpush1.bf16.msra.mxu1 %v8288_v21  ;;  %v8044_v58 = vmax.f32 %v11247_v7, 0.0  ;;  %v17528_v21 = vld [vmem:[#allocation99_spill] sm:$0xff] }
 0x5ff   : > { %v11253_v31 = vadd.f32 %v11252_v25, %v7761_v32  ;;  %v8045_v35 = vmax.f32 %v11249_v46, 0.0  ;;  %v11274_v51 = vadd.f32 %v17529_v57, %v17528_v21  ;;  %v11276_v8 = vadd.f32 %v17530_v0, %v17528_v21  ;;  %v17544_v21 = vld [vmem:[#allocation14_spill] sm:$0xff] }
 0x600   : > { %v8046_v22 = vmax.f32 %v11251_v54, 0.0 }
 0x601   : > { %v8047_v36 = vmax.f32 %v11253_v31, 0.0  ;;  %v17531_v31 = vld [vmem:[#allocation98_spill] sm:$0xff] }
 0x602   : > { %v8290_v24 = vpack.c.bf16 %v8046_v22, %v8044_v58  ;;  %v17532_v58 = vld [vmem:[#allocation6_spill] sm:$0xff] }
 0x603   : > { %v8291_v18 = vpack.c.bf16 %v8047_v36, %v8045_v35  ;;  %v7765_v44 = vpop.f32.mrb[24].mxu0  ;;  %v11278_v22 = vadd.f32 %v17532_v58, %v17531_v31 }
 0x604   : > { %v11255_v5 = vadd.f32 %v11254_v19, %v7765_v44  ;;  %v7767_v53 = vpop.f32.mrb[25].mxu0 }
 0x605   : > { %v11257_v63 = vadd.f32 %v11256_v9, %v7767_v53  ;;  %v7769_v60 = vpop.f32.mrb[26].mxu0  ;;  %9378 = vmatprep.subr.bf16.mxu1 %v8291_v18  ;;  %v17534_v9 = vld [vmem:[#allocation101_spill] sm:$0xff] }
 0x606   : > { %v11259_v37 = vadd.f32 %v11258_v11, %v7769_v60  ;;  %v7771_v50 = vpop.f32.mrb[27].mxu0  ;;  %9379 = vmatpush1.bf16.msra.mxu1 %v8290_v24  ;;  %v8048_v10 = vmax.f32 %v11255_v5, 0.0  ;;  %v17533_v24 = vld [vmem:[#allocation7_spill] sm:$0xff]  ;;  %v17535_v5 = vld [vmem:[#allocation8_spill] sm:$0xff]  ;;  %v17536_v11 = vld [vmem:[#allocation9_spill] sm:$0xff] }
 0x607   : > { %v11261_v14 = vadd.f32 %v11260_v15, %v7771_v50  ;;  %v8049_v55 = vmax.f32 %v11257_v63, 0.0  ;;  %v11280_v19 = vadd.f32 %v17533_v24, %v17531_v31  ;;  %v11282_v53 = vadd.f32 %v17535_v5, %v17534_v9 }
 0x608   : > { %v8050_v47 = vmax.f32 %v11259_v37, 0.0  ;;  %v11284_v15 = vadd.f32 %v17536_v11, %v17534_v9  ;;  %v17550_v9 = vld [vmem:[#allocation18_spill] sm:$0xff] }
 0x609   : > { %v8051_v3 = vmax.f32 %v11261_v14, 0.0 }
 0x60a   : > { %v8292_v23 = vpack.c.bf16 %v8050_v47, %v8048_v10 }
 0x60b   : > { %v8293_v52 = vpack.c.bf16 %v8051_v3, %v8049_v55  ;;  %v7775_v30 = vpop.f32.mrb[28].mxu0 }
 0x60c   : > { %v11263_v45 = vadd.f32 %v11262_v49, %v7775_v30  ;;  %v7777_v28 = vpop.f32.mrb[29].mxu0  ;;  %v17537_v49 = vld [vmem:[#allocation100_spill] sm:$0xff] }
 0x60d   : > { %v11265_v39 = vadd.f32 %v11264_v33, %v7777_v28  ;;  %v7779_v16 = vpop.f32.mrb[30].mxu0  ;;  %9380 = vmatprep.subr.bf16.mxu1 %v8293_v52  ;;  %v17538_v52 = vld [vmem:[#allocation10_spill] sm:$0xff]  ;;  %v17539_v28 = vld [vmem:[#allocation11_spill] sm:$0xff] }
 0x60e   : > { %v11267_v56 = vadd.f32 %v11266_v61, %v7779_v16  ;;  %v7781_v12 = vpop.f32.mrb[31].mxu0  ;;  %9381 = vmatpush1.bf16.msra.mxu1 %v8292_v23  ;;  %v8052_v17 = vmax.f32 %v11263_v45, 0.0  ;;  %v11286_v30 = vadd.f32 %v17538_v52, %v17537_v49  ;;  %v11288_v61 = vadd.f32 %v17539_v28, %v17537_v49  ;;  %v17540_v16 = vld [vmem:[#allocation103_spill] sm:$0xff] }
 0x60f   : > { %v11269_v59 = vadd.f32 %v11268_v20, %v7781_v12  ;;  %v8053_v2 = vmax.f32 %v11265_v39, 0.0 }
 0x610   : > { %v8054_v4 = vmax.f32 %v11267_v56, 0.0  ;;  %v17541_v56 = vld [vmem:[#allocation12_spill] sm:$0xff] }
 0x611   : > { %v8055_v26 = vmax.f32 %v11269_v59, 0.0  ;;  %v11290_v12 = vadd.f32 %v17541_v56, %v17540_v16  ;;  %v17542_v59 = vld [vmem:[#allocation13_spill] sm:$0xff] }
 0x612   : > { %v8294_v29 = vpack.c.bf16 %v8054_v4, %v8052_v17  ;;  %v11292_v17 = vadd.f32 %v17542_v59, %v17540_v16  ;;  %v17556_v16 = vld [vmem:[#allocation22_spill] sm:$0xff] }
 0x613   : > { %v8295_v27 = vpack.c.bf16 %v8055_v26, %v8053_v2  ;;  %v7785_v42 = vpop.f32.mrb[32].mxu0 }
 0x614   : > { %v11271_v34 = vadd.f32 %v11270_v62, %v7785_v42  ;;  %v7787_v38 = vpop.f32.mrb[33].mxu0 }
 0x615   : > { %v11273_v7 = vadd.f32 %v11272_v6, %v7787_v38  ;;  %v7789_v40 = vpop.f32.mrb[34].mxu0  ;;  %9382 = vmatprep.subr.bf16.mxu1 %v8295_v27  ;;  %v17543_v38 = vld [vmem:[#allocation102_spill] sm:$0xff] }
 0x616   : > { %v11275_v13 = vadd.f32 %v11274_v51, %v7789_v40  ;;  %v7791_v25 = vpop.f32.mrb[35].mxu0  ;;  %9383 = vmatpush1.bf16.msra.mxu1 %v8294_v29  ;;  %v8056_v46 = vmax.f32 %v11271_v34, 0.0  ;;  %v11294_v57 = vadd.f32 %v17544_v21, %v17543_v38 }
 0x617   : > { %v11277_v1 = vadd.f32 %v11276_v8, %v7791_v25  ;;  %v8057_v54 = vmax.f32 %v11273_v7, 0.0  ;;  %v17545_v8 = vld [vmem:[#allocation15_spill] sm:$0xff]  ;;  %v17546_v25 = vld [vmem:[#allocation105_spill] sm:$0xff] }
 0x618   : > { %v8058_v41 = vmax.f32 %v11275_v13, 0.0  ;;  %v11296_v7 = vadd.f32 %v17545_v8, %v17543_v38 }
 0x619   : > { %v8059_v32 = vmax.f32 %v11277_v1, 0.0  ;;  %v17547_v1 = vld [vmem:[#allocation16_spill] sm:$0xff] }
 0x61a   : > { %v8296_v43 = vpack.c.bf16 %v8058_v41, %v8056_v46  ;;  %v11298_v46 = vadd.f32 %v17547_v1, %v17546_v25  ;;  %v17548_v41 = vld [vmem:[#allocation17_spill] sm:$0xff] }
 0x61b   : > { %v8297_v35 = vpack.c.bf16 %v8059_v32, %v8057_v54  ;;  %v7795_v36 = vpop.f32.mrb[36].mxu0  ;;  %v11300_v54 = vadd.f32 %v17548_v41, %v17546_v25  ;;  %v17562_v25 = vld [vmem:[#allocation26_spill] sm:$0xff] }
 0x61c   : > { %v11279_v18 = vadd.f32 %v11278_v22, %v7795_v36  ;;  %v7797_v44 = vpop.f32.mrb[37].mxu0 }
 0x61d   : > { %v11281_v63 = vadd.f32 %v11280_v19, %v7797_v44  ;;  %v7799_v60 = vpop.f32.mrb[38].mxu0  ;;  %9384 = vmatprep.subr.bf16.mxu1 %v8297_v35  ;;  %v17549_v44 = vld [vmem:[#allocation104_spill] sm:$0xff] }
 0x61e   : > { %v11283_v37 = vadd.f32 %v11282_v53, %v7799_v60  ;;  %v7801_v50 = vpop.f32.mrb[39].mxu0  ;;  %9385 = vmatpush1.bf16.msra.mxu1 %v8296_v43  ;;  %v8060_v10 = vmax.f32 %v11279_v18, 0.0  ;;  %v11302_v5 = vadd.f32 %v17550_v9, %v17549_v44 }
 0x61f   : > { %v11285_v14 = vadd.f32 %v11284_v15, %v7801_v50  ;;  %v8061_v55 = vmax.f32 %v11281_v63, 0.0  ;;  %v17551_v15 = vld [vmem:[#allocation19_spill] sm:$0xff] }
 0x620   : > { %v8062_v47 = vmax.f32 %v11283_v37, 0.0  ;;  %v11304_v63 = vadd.f32 %v17551_v15, %v17549_v44  ;;  %v17552_v50 = vld [vmem:[#allocation107_spill] sm:$0xff]  ;;  %v1933_v15 = vpop.permute.xlu1 %1932 }
 0x621   : > { %v8063_v3 = vmax.f32 %v11285_v14, 0.0  ;;  %v17553_v14 = vld [vmem:[#allocation20_spill] sm:$0xff] }
 0x622   : > { %v8298_v23 = vpack.c.bf16 %v8062_v47, %v8060_v10  ;;  %v11306_v10 = vadd.f32 %v17553_v14, %v17552_v50  ;;  %v17554_v47 = vld [vmem:[#allocation21_spill] sm:$0xff]  ;;  %v17568_v14 = vld [vmem:[#allocation30_spill] sm:$0xff] }
 0x623   : > { %v8299_v33 = vpack.c.bf16 %v8063_v3, %v8061_v55  ;;  %v7805_v45 = vpop.f32.mrb[40].mxu0  ;;  %v11308_v55 = vadd.f32 %v17554_v47, %v17552_v50  ;;  %v17567_v50 = vld [vmem:[#allocation110_spill] sm:$0xff] }
 0x624   : > { %v11287_v20 = vadd.f32 %v11286_v30, %v7805_v45  ;;  %v7807_v39 = vpop.f32.mrb[41].mxu0 }
 0x625   : > { %v11289_v4 = vadd.f32 %v11288_v61, %v7807_v39  ;;  %v7809_v2 = vpop.f32.mrb[42].mxu0  ;;  %9386 = vmatprep.subr.bf16.mxu1 %v8299_v33  ;;  %v17555_v39 = vld [vmem:[#allocation106_spill] sm:$0xff] }
 0x626   : > { %v11291_v26 = vadd.f32 %v11290_v12, %v7809_v2  ;;  %v7811_v29 = vpop.f32.mrb[43].mxu0  ;;  %9387 = vmatpush1.bf16.msra.mxu1 %v8298_v23  ;;  %v8064_v27 = vmax.f32 %v11287_v20, 0.0  ;;  %v11310_v56 = vadd.f32 %v17556_v16, %v17555_v39 }
 0x627   : > { %v11293_v62 = vadd.f32 %v11292_v17, %v7811_v29  ;;  %v8065_v48 = vmax.f32 %v11289_v4, 0.0  ;;  %v17557_v17 = vld [vmem:[#allocation23_spill] sm:$0xff]  ;;  %v17558_v29 = vld [vmem:[#allocation109_spill] sm:$0xff] }
 0x628   : > { %v8066_v42 = vmax.f32 %v11291_v26, 0.0  ;;  %v11312_v4 = vadd.f32 %v17557_v17, %v17555_v39 }
 0x629   : > { %v8067_v6 = vmax.f32 %v11293_v62, 0.0  ;;  %v17559_v62 = vld [vmem:[#allocation24_spill] sm:$0xff] }
 0x62a   : > { %v8300_v34 = vpack.c.bf16 %v8066_v42, %v8064_v27  ;;  %v11314_v27 = vadd.f32 %v17559_v62, %v17558_v29  ;;  %v17560_v42 = vld [vmem:[#allocation25_spill] sm:$0xff] }
 0x62b   : > { %v8301_v51 = vpack.c.bf16 %v8067_v6, %v8065_v48  ;;  %v7815_v0 = vpop.f32.mrb[44].mxu0  ;;  %v11316_v48 = vadd.f32 %v17560_v42, %v17558_v29  ;;  %v17572_v29 = vld [vmem:[#allocation34_spill] sm:$0xff]  ;;  %v17573_v42 = vld [vmem:[#allocation35_spill] sm:$0xff] }
 0x62c   : > { %v11295_v40 = vadd.f32 %v11294_v57, %v7815_v0  ;;  %v7817_v13 = vpop.f32.mrb[45].mxu0 }
 0x62d   : > { %v11297_v32 = vadd.f32 %v11296_v7, %v7817_v13  ;;  %v7819_v43 = vpop.f32.mrb[46].mxu0  ;;  %9388 = vmatprep.subr.bf16.mxu1 %v8301_v51  ;;  %v17561_v13 = vld [vmem:[#allocation108_spill] sm:$0xff] }
 0x62e   : > { %v11299_v31 = vadd.f32 %v11298_v46, %v7819_v43  ;;  %v7821_v58 = vpop.f32.mrb[47].mxu0  ;;  %9389 = vmatpush1.bf16.msra.mxu1 %v8300_v34  ;;  %v8068_v35 = vmax.f32 %v11295_v40, 0.0  ;;  %v11318_v1 = vadd.f32 %v17562_v25, %v17561_v13 }
 0x62f   : > { %v11301_v22 = vadd.f32 %v11300_v54, %v7821_v58  ;;  %v8069_v24 = vmax.f32 %v11297_v32, 0.0  ;;  %v17563_v54 = vld [vmem:[#allocation27_spill] sm:$0xff] }
 0x630   : > { %v8070_v36 = vmax.f32 %v11299_v31, 0.0  ;;  %v11320_v32 = vadd.f32 %v17563_v54, %v17561_v13  ;;  %v17564_v58 = vld [vmem:[#allocation111_spill] sm:$0xff] }
 0x631   : > { %v8071_v19 = vmax.f32 %v11301_v22, 0.0  ;;  %v17565_v22 = vld [vmem:[#allocation28_spill] sm:$0xff] }
 0x632   : > { %v8302_v18 = vpack.c.bf16 %v8070_v36, %v8068_v35  ;;  %v11322_v35 = vadd.f32 %v17565_v22, %v17564_v58  ;;  %v17566_v36 = vld [vmem:[#allocation29_spill] sm:$0xff] }
 0x633   : > { %v8303_v53 = vpack.c.bf16 %v8071_v19, %v8069_v24  ;;  %v7825_v11 = vpop.f32.mrb[48].mxu0  ;;  %v11324_v24 = vadd.f32 %v17566_v36, %v17564_v58  ;;  %v13449_v13 = vld [vmem:[%s17396_s3] ss:$16 sps:$4 sm:$0xff]  }
 0x634   : > { %v11303_v60 = vadd.f32 %v11302_v5, %v7825_v11  ;;  %v7827_v37 = vpop.f32.mrb[49].mxu0 }
 0x635   : > { %v11305_v3 = vadd.f32 %v11304_v63, %v7827_v37  ;;  %v7829_v23 = vpop.f32.mrb[50].mxu0  ;;  %9390 = vmatprep.subr.bf16.mxu1 %v8303_v53 }
 0x636   : > { %v11307_v49 = vadd.f32 %v11306_v10, %v7829_v23  ;;  %v7831_v52 = vpop.f32.mrb[51].mxu0  ;;  %9391 = vmatpush1.bf16.msra.mxu1 %v8302_v18  ;;  %v8072_v33 = vmax.f32 %v11303_v60, 0.0  ;;  %v11326_v10 = vadd.f32 %v17568_v14, %v17567_v50  ;;  %v13454_v14 = vld [vmem:[%s17396_s3 + $0x20] ss:$16 sps:$4 sm:$0xff]  }
 0x637   : > { %v11309_v30 = vadd.f32 %v11308_v55, %v7831_v52  ;;  %v8073_v28 = vmax.f32 %v11305_v3, 0.0  ;;  %v17569_v3 = vld [vmem:[#allocation31_spill] sm:$0xff] }
 0x638   : > { %v8074_v45 = vmax.f32 %v11307_v49, 0.0  ;;  %v11328_v23 = vadd.f32 %v17569_v3, %v17567_v50  ;;  %v17570_v49 = vld [vmem:[#allocation32_spill] sm:$0xff] }
 0x639   : > { %v8075_v61 = vmax.f32 %v11309_v30, 0.0  ;;  %v11330_v52 = vadd.f32 %v17570_v49, %v1933_v15 }
 0x63a   : > { %v8304_v20 = vpack.c.bf16 %v8074_v45, %v8072_v33  ;;  %v17571_v45 = vld [vmem:[#allocation33_spill] sm:$0xff] }
 0x63b   : > { %v8305_v12 = vpack.c.bf16 %v8075_v61, %v8073_v28  ;;  %v7835_v59 = vpop.f32.mrb[52].mxu0  ;;  %v11332_v28 = vadd.f32 %v17571_v45, %v1933_v15 }
 0x63c   : > { %v11311_v2 = vadd.f32 %v11310_v56, %v7835_v59  ;;  %v7837_v26 = vpop.f32.mrb[53].mxu0  ;;  %v1938_v56 = vpop.permute.xlu0 %1937 }
 0x63d   : > { %v11313_v6 = vadd.f32 %v11312_v4, %v7837_v26  ;;  %v7839_v34 = vpop.f32.mrb[54].mxu0  ;;  %9392 = vmatprep.subr.bf16.mxu1 %v8305_v12  ;;  %v1943_v4 = vpop.permute.xlu1 %1942  ;;  %v11334_v62 = vadd.f32 %v17572_v29, %v1938_v56 }
 0x63e   : > { %v11315_v38 = vadd.f32 %v11314_v27, %v7839_v34  ;;  %v7841_v21 = vpop.f32.mrb[55].mxu0  ;;  %9393 = vmatpush1.bf16.msra.mxu1 %v8304_v20  ;;  %v8076_v51 = vmax.f32 %v11311_v2, 0.0 }
 0x63f   : > { %v11317_v57 = vadd.f32 %v11316_v48, %v7841_v21  ;;  %v8077_v8 = vmax.f32 %v11313_v6, 0.0  ;;  %v11336_v48 = vadd.f32 %v17573_v42, %v1938_v56  ;;  %v13457_v42 = vld [vmem:[%s17396_s3 + $0x40] ss:$16 sps:$4 sm:$0xff]  }
 0x640   : > { %v8078_v0 = vmax.f32 %v11315_v38, 0.0  ;;  %v17574_v38 = vld [vmem:[#allocation36_spill] sm:$0xff] }
 0x641   : > { %v8079_v7 = vmax.f32 %v11317_v57, 0.0  ;;  %v11338_v21 = vadd.f32 %v17574_v38, %v1943_v4 }
 0x642   : > { %v8306_v40 = vpack.c.bf16 %v8078_v0, %v8076_v51  ;;  %v17575_v0 = vld [vmem:[#allocation37_spill] sm:$0xff] }
 0x643   : > { %v8307_v46 = vpack.c.bf16 %v8079_v7, %v8077_v8  ;;  %v7845_v41 = vpop.f32.mrb[56].mxu0  ;;  %v11340_v8 = vadd.f32 %v17575_v0, %v1943_v4 }
 0x644   : > { %v11319_v43 = vadd.f32 %v11318_v1, %v7845_v41  ;;  %v7847_v31 = vpop.f32.mrb[57].mxu0  ;;  %v1948_v41 = vpop.permute.xlu0 %1947 }
 0x645   : > { %v11321_v19 = vadd.f32 %v11320_v32, %v7847_v31  ;;  %v7849_v18 = vpop.f32.mrb[58].mxu0  ;;  %9394 = vmatprep.subr.bf16.mxu1 %v8307_v46  ;;  %v13452_v46 = vld [vmem:[%s17396_s3 + $0x24] ss:$16 sps:$4 sm:$0xff]   ;;  %v1953_v31 = vpop.permute.xlu1 %1952 }
 0x646   : > { %v11323_v44 = vadd.f32 %v11322_v35, %v7849_v18  ;;  %v7851_v9 = vpop.f32.mrb[59].mxu0  ;;  %9395 = vmatpush1.bf16.msra.mxu1 %v8306_v40  ;;  %v8080_v53 = vmax.f32 %v11319_v43, 0.0  ;;  %v17576_v35 = vld [vmem:[#allocation38_spill] sm:$0xff] }
 0x647   : > { %v11325_v5 = vadd.f32 %v11324_v24, %v7851_v9  ;;  %v8081_v63 = vmax.f32 %v11321_v19, 0.0  ;;  %v11342_v36 = vadd.f32 %v17576_v35, %v1948_v41  ;;  %v17577_v19 = vld [vmem:[#allocation39_spill] sm:$0xff] }
 0x648   : > { %v8082_v11 = vmax.f32 %v11323_v44, 0.0  ;;  %v11344_v18 = vadd.f32 %v17577_v19, %v1948_v41  ;;  %v1958_v3 = vpop.permute.xlu0 %1957  ;;  %v13460_v19 = vld [vmem:[%s17396_s3 + $0x60] ss:$16 sps:$4 sm:$0xff]  }
 0x649   : > { %v8083_v60 = vmax.f32 %v11325_v5, 0.0  ;;  %v17578_v5 = vld [vmem:[#allocation40_spill] sm:$0xff] }
 0x64a   : > { %v8308_v37 = vpack.c.bf16 %v8082_v11, %v8080_v53  ;;  %v11346_v53 = vadd.f32 %v17578_v5, %v1953_v31 }
 0x64b   : > { %v8309_v47 = vpack.c.bf16 %v8083_v60, %v8081_v63  ;;  %v7855_v55 = vpop.f32.mrb[60].mxu0  ;;  %v17579_v63 = vld [vmem:[#allocation41_spill] sm:$0xff] }
 0x64c   : > { %v11327_v30 = vadd.f32 %v11326_v10, %v7855_v55  ;;  %v7857_v33 = vpop.f32.mrb[61].mxu0  ;;  %v11348_v60 = vadd.f32 %v17579_v63, %v1953_v31  ;;  %v13455_v55 = vld [vmem:[%s17396_s3 + $0x44] ss:$16 sps:$4 sm:$0xff]   ;;  %v1968_v38 = vpop.permute.xlu0 %1967 }
 0x64d   : > { %v11329_v61 = vadd.f32 %v11328_v23, %v7857_v33  ;;  %v7859_v20 = vpop.f32.mrb[62].mxu0  ;;  %9396 = vmatprep.subr.bf16.mxu1 %v8309_v47 }
 0x64e   : > { %v11331_v39 = vadd.f32 %v11330_v52, %v7859_v20  ;;  %v7861_v16 = vpop.f32.mrb[63].mxu0  ;;  %9397 = vmatpush1.bf16.msra.mxu1 %v8308_v37  ;;  %v8084_v59 = vmax.f32 %v11327_v30, 0.0  ;;  %v1963_v30 = vpop.permute.xlu1 %1962 }
 0x64f   : > { %v11333_v12 = vadd.f32 %v11332_v28, %v7861_v16  ;;  %v8085_v2 = vmax.f32 %v11329_v61, 0.0  ;;  %v17580_v28 = vld [vmem:[#allocation42_spill] sm:$0xff] }
 0x650   : > { %v8086_v17 = vmax.f32 %v11331_v39, 0.0  ;;  %v11350_v61 = vadd.f32 %v17580_v28, %v1958_v3  ;;  %v17581_v39 = vld [vmem:[#allocation43_spill] sm:$0xff]  ;;  %v1978_v5 = vpop.permute.xlu0 %1977 }
 0x651   : > { %v8087_v26 = vmax.f32 %v11333_v12, 0.0  ;;  %v11352_v16 = vadd.f32 %v17581_v39, %v1958_v3  ;;  %v13463_v39 = vld [vmem:[%s17396_s3 + $0x80] ss:$16 sps:$4 sm:$0xff]  }
 0x652   : > { %v8310_v27 = vpack.c.bf16 %v8086_v17, %v8084_v59  ;;  %v17582_v59 = vld [vmem:[#allocation44_spill] sm:$0xff]  ;;  %v1973_v0 = vpop.permute.xlu1 %1972 }
 0x653   : > { %v8311_v6 = vpack.c.bf16 %v8087_v26, %v8085_v2  ;;  %v7865_v34 = vpop.f32.mrb[64].mxu0  ;;  %v11354_v17 = vadd.f32 %v17582_v59, %v1963_v30  ;;  %v17583_v26 = vld [vmem:[#allocation45_spill] sm:$0xff] }
 0x654   : > { %v11335_v57 = vadd.f32 %v11334_v62, %v7865_v34  ;;  %v7867_v51 = vpop.f32.mrb[65].mxu0  ;;  %v11356_v29 = vadd.f32 %v17583_v26, %v1963_v30  ;;  %v13458_v34 = vld [vmem:[%s17396_s3 + $0x64] ss:$16 sps:$4 sm:$0xff]   ;;  %v1988_v59 = vpop.permute.xlu0 %1987 }
 0x655   : > { %v11337_v7 = vadd.f32 %v11336_v48, %v7867_v51  ;;  %v7869_v40 = vpop.f32.mrb[66].mxu0  ;;  %9398 = vmatprep.subr.bf16.mxu1 %v8311_v6 }
 0x656   : > { %v11339_v25 = vadd.f32 %v11338_v21, %v7869_v40  ;;  %v7871_v1 = vpop.f32.mrb[67].mxu0  ;;  %9399 = vmatpush1.bf16.msra.mxu1 %v8310_v27  ;;  %v8088_v32 = vmax.f32 %v11335_v57, 0.0  ;;  %v17584_v40 = vld [vmem:[#allocation46_spill] sm:$0xff]  ;;  %v1983_v63 = vpop.permute.xlu1 %1982 }
 0x657   : > { %v11341_v54 = vadd.f32 %v11340_v8, %v7871_v1  ;;  %v8089_v58 = vmax.f32 %v11337_v7, 0.0  ;;  %v17585_v1 = vld [vmem:[#allocation47_spill] sm:$0xff] }
 0x658   : > { %v8090_v43 = vmax.f32 %v11339_v25, 0.0 }
 0x659   : > { %v8091_v22 = vmax.f32 %v11341_v54, 0.0  ;;  %9401 = vmatmul.mubr.bf16.vlgmr.msra.gmra.mrb[128].mxu1 %v13449_v13  ;;  %v11358_v13 = vadd.f32 %v17584_v40, %v1968_v38 }
 0x65a   : > { %v8312_v24 = vpack.c.bf16 %v8090_v43, %v8088_v32  ;;  %9410 = vmatprep.mubr.bf16.mxu1 %v13452_v46  ;;  %v11360_v46 = vadd.f32 %v17585_v1, %v1968_v38  ;;  %v17586_v32 = vld [vmem:[#allocation48_spill] sm:$0xff]  ;;  %v1993_v26 = vpop.permute.xlu1 %1992 }
 0x65b   : > { %v8313_v44 = vpack.c.bf16 %v8091_v22, %v8089_v58  ;;  %v7875_v9 = vpop.f32.mrb[68].mxu0  ;;  %v11362_v43 = vadd.f32 %v17586_v32, %v1973_v0  ;;  %v17587_v22 = vld [vmem:[#allocation49_spill] sm:$0xff]  ;;  %v1998_v32 = vpop.permute.xlu0 %1997 }
 0x65c   : > { %v11343_v11 = vadd.f32 %v11342_v36, %v7875_v9  ;;  %v7877_v15 = vpop.f32.mrb[69].mxu0  ;;  %v11364_v35 = vadd.f32 %v17587_v22, %v1973_v0  ;;  %v13461_v9 = vld [vmem:[%s17396_s3 + $0x84] ss:$16 sps:$4 sm:$0xff]   ;;  %v13466_v1 = vld [vmem:[%s17396_s3 + $0xa0] ss:$16 sps:$4 sm:$0xff]  }
 0x65d   : > { %v11345_v37 = vadd.f32 %v11344_v18, %v7877_v15  ;;  %v7879_v50 = vpop.f32.mrb[70].mxu0  ;;  %9721 = vmatprep.subr.bf16.mxu1 %v8313_v44 }
 0x65e   : > { %v11347_v10 = vadd.f32 %v11346_v53, %v7879_v50  ;;  %v7881_v47 = vpop.f32.mrb[71].mxu0  ;;  %9722 = vmatpush1.bf16.msra.mxu1 %v8312_v24  ;;  %v8092_v49 = vmax.f32 %v11343_v11, 0.0  ;;  %v17588_v50 = vld [vmem:[#allocation50_spill] sm:$0xff]  ;;  %v2003_v22 = vpop.permute.xlu1 %2002 }
 0x65f   : > { %v11349_v23 = vadd.f32 %v11348_v60, %v7881_v47  ;;  %v8093_v33 = vmax.f32 %v11345_v37, 0.0  ;;  %v17589_v47 = vld [vmem:[#allocation51_spill] sm:$0xff] }
 0x660   : > { %v8094_v52 = vmax.f32 %v11347_v10, 0.0 }
 0x661   : > { %v8095_v45 = vmax.f32 %v11349_v23, 0.0  ;;  %9411 = vmatmul.mubr.bf16.gmra.mrb[132].mxu1 %v13454_v14  ;;  %v11366_v14 = vadd.f32 %v17588_v50, %v1978_v5 }
 0x662   : > { %v8314_v20 = vpack.c.bf16 %v8094_v52, %v8092_v49  ;;  %9420 = vmatprep.mubr.bf16.mxu1 %v13455_v55  ;;  %v11368_v55 = vadd.f32 %v17589_v47, %v1978_v5  ;;  %v17590_v49 = vld [vmem:[#allocation52_spill] sm:$0xff] }
 0x663   : > { %v8315_v56 = vpack.c.bf16 %v8095_v45, %v8093_v33  ;;  %v7885_v12 = vpop.f32.mrb[72].mxu0  ;;  %v11370_v52 = vadd.f32 %v17590_v49, %v1983_v63  ;;  %v17591_v45 = vld [vmem:[#allocation53_spill] sm:$0xff]  ;;  %v2008_v49 = vpop.permute.xlu0 %2007 }
 0x664   : > { %v11351_v4 = vadd.f32 %v11350_v61, %v7885_v12  ;;  %v7887_v2 = vpop.f32.mrb[73].mxu0  ;;  %v11372_v28 = vadd.f32 %v17591_v45, %v1983_v63  ;;  %v13464_v12 = vld [vmem:[%s17396_s3 + $0xa4] ss:$16 sps:$4 sm:$0xff]   ;;  %v13469_v47 = vld [vmem:[%s17396_s3 + $0xc0] ss:$16 sps:$4 sm:$0xff]   ;;  %v2013_v45 = vpop.permute.xlu1 %2012 }
 0x665   : > { %v11353_v62 = vadd.f32 %v11352_v16, %v7887_v2  ;;  %v7889_v27 = vpop.f32.mrb[74].mxu0  ;;  %9723 = vmatprep.subr.bf16.mxu1 %v8315_v56 }
 0x666   : > { %v11355_v48 = vadd.f32 %v11354_v17, %v7889_v27  ;;  %v7891_v6 = vpop.f32.mrb[75].mxu0  ;;  %9724 = vmatpush1.bf16.msra.mxu1 %v8314_v20  ;;  %v8096_v57 = vmax.f32 %v11351_v4, 0.0  ;;  %v17592_v27 = vld [vmem:[#allocation54_spill] sm:$0xff] }
 0x667   : > { %v11357_v21 = vadd.f32 %v11356_v29, %v7891_v6  ;;  %v8097_v8 = vmax.f32 %v11353_v62, 0.0  ;;  %v17593_v6 = vld [vmem:[#allocation55_spill] sm:$0xff] }
 0x668   : > { %v8098_v51 = vmax.f32 %v11355_v48, 0.0 }
 0x669   : > { %v8099_v7 = vmax.f32 %v11357_v21, 0.0  ;;  %9421 = vmatmul.mubr.bf16.gmra.mrb[136].mxu1 %v13457_v42  ;;  %v11374_v42 = vadd.f32 %v17592_v27, %v1988_v59 }
 0x66a   : > { %v8316_v25 = vpack.c.bf16 %v8098_v51, %v8096_v57  ;;  %9430 = vmatprep.mubr.bf16.mxu1 %v13458_v34  ;;  %v11376_v34 = vadd.f32 %v17593_v6, %v1988_v59  ;;  %v17594_v57 = vld [vmem:[#allocation56_spill] sm:$0xff] }
 0x66b   : > { %v8317_v41 = vpack.c.bf16 %v8099_v7, %v8097_v8  ;;  %v7895_v54 = vpop.f32.mrb[76].mxu0  ;;  %v11378_v51 = vadd.f32 %v17594_v57, %v1993_v26  ;;  %v17595_v7 = vld [vmem:[#allocation57_spill] sm:$0xff]  ;;  %v2018_v57 = vpop.permute.xlu0 %2017 }
 0x66c   : > { %v11359_v31 = vadd.f32 %v11358_v13, %v7895_v54  ;;  %v7897_v58 = vpop.f32.mrb[77].mxu0  ;;  %v11380_v40 = vadd.f32 %v17595_v7, %v1993_v26  ;;  %v13467_v54 = vld [vmem:[%s17396_s3 + $0xc4] ss:$16 sps:$4 sm:$0xff]   ;;  %v13472_v6 = vld [vmem:[%s17396_s3 + $0xe0] ss:$16 sps:$4 sm:$0xff]   ;;  %v2023_v7 = vpop.permute.xlu1 %2022 }
 0x66d   : > { %v11361_v36 = vadd.f32 %v11360_v46, %v7897_v58  ;;  %v7899_v24 = vpop.f32.mrb[78].mxu0  ;;  %9725 = vmatprep.subr.bf16.mxu1 %v8317_v41 }
 0x66e   : > { %v11363_v18 = vadd.f32 %v11362_v43, %v7899_v24  ;;  %v7901_v44 = vpop.f32.mrb[79].mxu0  ;;  %9726 = vmatpush1.bf16.msra.mxu1 %v8316_v25  ;;  %v8100_v11 = vmax.f32 %v11359_v31, 0.0  ;;  %v17596_v24 = vld [vmem:[#allocation58_spill] sm:$0xff] }
 0x66f   : > { %v11365_v53 = vadd.f32 %v11364_v35, %v7901_v44  ;;  %v8101_v60 = vmax.f32 %v11361_v36, 0.0  ;;  %v17597_v44 = vld [vmem:[#allocation59_spill] sm:$0xff] }
 0x670   : > { %v8102_v15 = vmax.f32 %v11363_v18, 0.0 }
 0x671   : > { %v8103_v37 = vmax.f32 %v11365_v53, 0.0  ;;  %9431 = vmatmul.mubr.bf16.gmra.mrb[140].mxu1 %v13460_v19  ;;  %v11382_v19 = vadd.f32 %v17596_v24, %v1998_v32 }
 0x672   : > { %v8318_v10 = vpack.c.bf16 %v8102_v15, %v8100_v11  ;;  %9440 = vmatprep.mubr.bf16.mxu1 %v13461_v9  ;;  %v11384_v9 = vadd.f32 %v17597_v44, %v1998_v32  ;;  %v17598_v11 = vld [vmem:[#allocation60_spill] sm:$0xff] }
 0x673   : > { %v8319_v3 = vpack.c.bf16 %v8103_v37, %v8101_v60  ;;  %v7905_v23 = vpop.f32.mrb[80].mxu0  ;;  %v11386_v15 = vadd.f32 %v17598_v11, %v2003_v22  ;;  %v17599_v37 = vld [vmem:[#allocation61_spill] sm:$0xff]  ;;  %v2028_v11 = vpop.permute.xlu0 %2027 }
 0x674   : > { %v11367_v30 = vadd.f32 %v11366_v14, %v7905_v23  ;;  %v7907_v33 = vpop.f32.mrb[81].mxu0  ;;  %v11388_v50 = vadd.f32 %v17599_v37, %v2003_v22  ;;  %v13470_v23 = vld [vmem:[%s17396_s3 + $0xe4] ss:$16 sps:$4 sm:$0xff]   ;;  %v13475_v44 = vld [vmem:[%s17396_s3 + $0x100] ss:$16 sps:$4 sm:$0xff]   ;;  %v2033_v37 = vpop.permute.xlu1 %2032 }
 0x675   : > { %v11369_v61 = vadd.f32 %v11368_v55, %v7907_v33  ;;  %v7909_v20 = vpop.f32.mrb[82].mxu0  ;;  %9727 = vmatprep.subr.bf16.mxu1 %v8319_v3 }
 0x676   : > { %v11371_v16 = vadd.f32 %v11370_v52, %v7909_v20  ;;  %v7911_v56 = vpop.f32.mrb[83].mxu0  ;;  %9728 = vmatpush1.bf16.msra.mxu1 %v8318_v10  ;;  %v8104_v4 = vmax.f32 %v11367_v30, 0.0  ;;  %v17600_v20 = vld [vmem:[#allocation62_spill] sm:$0xff] }
 0x677   : > { %v11373_v17 = vadd.f32 %v11372_v28, %v7911_v56  ;;  %v8105_v29 = vmax.f32 %v11369_v61, 0.0  ;;  %v17601_v56 = vld [vmem:[#allocation63_spill] sm:$0xff] }
 0x678   : > { %v8106_v2 = vmax.f32 %v11371_v16, 0.0 }
 0x679   : > { %v8107_v62 = vmax.f32 %v11373_v17, 0.0  ;;  %9441 = vmatmul.mubr.bf16.gmra.mrb[144].mxu1 %v13463_v39  ;;  %v11390_v39 = vadd.f32 %v17600_v20, %v2008_v49 }
 0x67a   : > { %v8320_v48 = vpack.c.bf16 %v8106_v2, %v8104_v4  ;;  %9450 = vmatprep.mubr.bf16.mxu1 %v13464_v12  ;;  %v11392_v12 = vadd.f32 %v17601_v56, %v2008_v49  ;;  %v17602_v4 = vld [vmem:[#allocation64_spill] sm:$0xff] }
 0x67b   : > { %v8321_v38 = vpack.c.bf16 %v8107_v62, %v8105_v29  ;;  %v7915_v21 = vpop.f32.mrb[84].mxu0  ;;  %v11394_v2 = vadd.f32 %v17602_v4, %v2013_v45  ;;  %v17603_v62 = vld [vmem:[#allocation65_spill] sm:$0xff]  ;;  %v2038_v4 = vpop.permute.xlu0 %2037 }
 0x67c   : > { %v11375_v0 = vadd.f32 %v11374_v42, %v7915_v21  ;;  %v7917_v8 = vpop.f32.mrb[85].mxu0  ;;  %v11396_v27 = vadd.f32 %v17603_v62, %v2013_v45  ;;  %v13473_v21 = vld [vmem:[%s17396_s3 + $0x104] ss:$16 sps:$4 sm:$0xff]   ;;  %v13478_v56 = vld [vmem:[%s17396_s3 + $0x120] ss:$16 sps:$4 sm:$0xff]   ;;  %v2043_v62 = vpop.permute.xlu1 %2042 }
 0x67d   : > { %v11377_v13 = vadd.f32 %v11376_v34, %v7917_v8  ;;  %v7919_v25 = vpop.f32.mrb[86].mxu0  ;;  %9729 = vmatprep.subr.bf16.mxu1 %v8321_v38 }
 0x67e   : > { %v11379_v46 = vadd.f32 %v11378_v51, %v7919_v25  ;;  %v7921_v41 = vpop.f32.mrb[87].mxu0  ;;  %9730 = vmatpush1.bf16.msra.mxu1 %v8320_v48  ;;  %v8108_v31 = vmax.f32 %v11375_v0, 0.0  ;;  %v17604_v25 = vld [vmem:[#allocation66_spill] sm:$0xff] }
 0x67f   : > { %v11381_v43 = vadd.f32 %v11380_v40, %v7921_v41  ;;  %v8109_v35 = vmax.f32 %v11377_v13, 0.0  ;;  %v17605_v41 = vld [vmem:[#allocation67_spill] sm:$0xff] }
 0x680   : > { %v8110_v58 = vmax.f32 %v11379_v46, 0.0 }
 0x681   : > { %v8111_v36 = vmax.f32 %v11381_v43, 0.0  ;;  %9451 = vmatmul.mubr.bf16.gmra.mrb[148].mxu1 %v13466_v1  ;;  %v11398_v1 = vadd.f32 %v17604_v25, %v2018_v57 }
 0x682   : > { %v8322_v18 = vpack.c.bf16 %v8110_v58, %v8108_v31  ;;  %9460 = vmatprep.mubr.bf16.mxu1 %v13467_v54  ;;  %v11400_v54 = vadd.f32 %v17605_v41, %v2018_v57  ;;  %v17606_v31 = vld [vmem:[#allocation68_spill] sm:$0xff] }
 0x683   : > { %v8323_v5 = vpack.c.bf16 %v8111_v36, %v8109_v35  ;;  %v7925_v53 = vpop.f32.mrb[88].mxu0  ;;  %v11402_v58 = vadd.f32 %v17606_v31, %v2023_v7  ;;  %v17607_v36 = vld [vmem:[#allocation69_spill] sm:$0xff]  ;;  %v2048_v31 = vpop.permute.xlu0 %2047 }
 0x684   : > { %v11383_v63 = vadd.f32 %v11382_v19, %v7925_v53  ;;  %v7927_v60 = vpop.f32.mrb[89].mxu0  ;;  %v11404_v24 = vadd.f32 %v17607_v36, %v2023_v7  ;;  %v13476_v53 = vld [vmem:[%s17396_s3 + $0x124] ss:$16 sps:$4 sm:$0xff]   ;;  %v13481_v41 = vld [vmem:[%s17396_s3 + $0x140] ss:$16 sps:$4 sm:$0xff]   ;;  %v2053_v36 = vpop.permute.xlu1 %2052 }
 0x685   : > { %v11385_v14 = vadd.f32 %v11384_v9, %v7927_v60  ;;  %v7929_v10 = vpop.f32.mrb[90].mxu0  ;;  %9731 = vmatprep.subr.bf16.mxu1 %v8323_v5 }
 0x686   : > { %v11387_v55 = vadd.f32 %v11386_v15, %v7929_v10  ;;  %v7931_v3 = vpop.f32.mrb[91].mxu0  ;;  %9732 = vmatpush1.bf16.msra.mxu1 %v8322_v18  ;;  %v8112_v30 = vmax.f32 %v11383_v63, 0.0  ;;  %v17608_v10 = vld [vmem:[#allocation70_spill] sm:$0xff] }
 0x687   : > { %v11389_v52 = vadd.f32 %v11388_v50, %v7931_v3  ;;  %v8113_v28 = vmax.f32 %v11385_v14, 0.0  ;;  %v17609_v3 = vld [vmem:[#allocation71_spill] sm:$0xff] }
 0x688   : > { %v8114_v33 = vmax.f32 %v11387_v55, 0.0 }
 0x689   : > { %v8115_v61 = vmax.f32 %v11389_v52, 0.0  ;;  %9461 = vmatmul.mubr.bf16.gmra.mrb[152].mxu1 %v13469_v47  ;;  %v11406_v47 = vadd.f32 %v17608_v10, %v2028_v11 }
 0x68a   : > { %v8324_v16 = vpack.c.bf16 %v8114_v33, %v8112_v30  ;;  %9470 = vmatprep.mubr.bf16.mxu1 %v13470_v23  ;;  %v11408_v23 = vadd.f32 %v17609_v3, %v2028_v11  ;;  %v17610_v30 = vld [vmem:[#allocation72_spill] sm:$0xff] }
 0x68b   : > { %v8325_v59 = vpack.c.bf16 %v8115_v61, %v8113_v28  ;;  %v7935_v17 = vpop.f32.mrb[92].mxu0  ;;  %v11410_v33 = vadd.f32 %v17610_v30, %v2033_v37  ;;  %v17611_v61 = vld [vmem:[#allocation73_spill] sm:$0xff]  ;;  %v2058_v30 = vpop.permute.xlu0 %2057 }
 0x68c   : > { %v11391_v26 = vadd.f32 %v11390_v39, %v7935_v17  ;;  %v7937_v29 = vpop.f32.mrb[93].mxu0  ;;  %v11412_v20 = vadd.f32 %v17611_v61, %v2033_v37  ;;  %v13479_v17 = vld [vmem:[%s17396_s3 + $0x144] ss:$16 sps:$4 sm:$0xff]   ;;  %v13484_v3 = vld [vmem:[%s17396_s3 + $0x160] ss:$16 sps:$4 sm:$0xff]   ;;  %v2063_v61 = vpop.permute.xlu1 %2062 }
 0x68d   : > { %v11393_v42 = vadd.f32 %v11392_v12, %v7937_v29  ;;  %v7939_v48 = vpop.f32.mrb[94].mxu0  ;;  %9733 = vmatprep.subr.bf16.mxu1 %v8325_v59 }
 0x68e   : > { %v11395_v34 = vadd.f32 %v11394_v2, %v7939_v48  ;;  %v7941_v38 = vpop.f32.mrb[95].mxu0  ;;  %9734 = vmatpush1.bf16.msra.mxu1 %v8324_v16  ;;  %v8116_v0 = vmax.f32 %v11391_v26, 0.0  ;;  %v17612_v48 = vld [vmem:[#allocation74_spill] sm:$0xff] }
 0x68f   : > { %v11397_v51 = vadd.f32 %v11396_v27, %v7941_v38  ;;  %v8117_v40 = vmax.f32 %v11393_v42, 0.0  ;;  %v17613_v38 = vld [vmem:[#allocation75_spill] sm:$0xff] }
 0x690   : > { %v8118_v8 = vmax.f32 %v11395_v34, 0.0 }
 0x691   : > { %v8119_v13 = vmax.f32 %v11397_v51, 0.0  ;;  %9471 = vmatmul.mubr.bf16.gmra.mrb[156].mxu1 %v13472_v6  ;;  %v11414_v6 = vadd.f32 %v17612_v48, %v2038_v4 }
 0x692   : > { %v8326_v46 = vpack.c.bf16 %v8118_v8, %v8116_v0  ;;  %9480 = vmatprep.mubr.bf16.mxu1 %v13473_v21  ;;  %v11416_v21 = vadd.f32 %v17613_v38, %v2038_v4  ;;  %v17614_v0 = vld [vmem:[#allocation76_spill] sm:$0xff] }
 0x693   : > { %v8327_v32 = vpack.c.bf16 %v8119_v13, %v8117_v40  ;;  %v7945_v43 = vpop.f32.mrb[96].mxu0  ;;  %v11418_v8 = vadd.f32 %v17614_v0, %v2043_v62  ;;  %v17615_v13 = vld [vmem:[#allocation77_spill] sm:$0xff]  ;;  %v2068_v0 = vpop.permute.xlu0 %2067 }
 0x694   : > { %v11399_v22 = vadd.f32 %v11398_v1, %v7945_v43  ;;  %v7947_v35 = vpop.f32.mrb[97].mxu0  ;;  %v11420_v25 = vadd.f32 %v17615_v13, %v2043_v62  ;;  %v13482_v43 = vld [vmem:[%s17396_s3 + $0x164] ss:$16 sps:$4 sm:$0xff]   ;;  %v13487_v38 = vld [vmem:[%s17396_s3 + $0x180] ss:$16 sps:$4 sm:$0xff]   ;;  %v2073_v13 = vpop.permute.xlu1 %2072 }
 0x695   : > { %v11401_v19 = vadd.f32 %v11400_v54, %v7947_v35  ;;  %v7949_v18 = vpop.f32.mrb[98].mxu0  ;;  %9735 = vmatprep.subr.bf16.mxu1 %v8327_v32 }
 0x696   : > { %v11403_v9 = vadd.f32 %v11402_v58, %v7949_v18  ;;  %v7951_v5 = vpop.f32.mrb[99].mxu0  ;;  %9736 = vmatpush1.bf16.msra.mxu1 %v8326_v46  ;;  %v8120_v63 = vmax.f32 %v11399_v22, 0.0  ;;  %v17616_v18 = vld [vmem:[#allocation78_spill] sm:$0xff] }
 0x697   : > { %v11405_v15 = vadd.f32 %v11404_v24, %v7951_v5  ;;  %v8121_v50 = vmax.f32 %v11401_v19, 0.0  ;;  %v17617_v5 = vld [vmem:[#allocation79_spill] sm:$0xff] }
 0x698   : > { %v8122_v60 = vmax.f32 %v11403_v9, 0.0 }
 0x699   : > { %v8123_v14 = vmax.f32 %v11405_v15, 0.0  ;;  %9481 = vmatmul.mubr.bf16.gmra.mrb[160].mxu1 %v13475_v44  ;;  %v11422_v44 = vadd.f32 %v17616_v18, %v2048_v31 }
 0x69a   : > { %v8328_v55 = vpack.c.bf16 %v8122_v60, %v8120_v63  ;;  %9490 = vmatprep.mubr.bf16.mxu1 %v13476_v53  ;;  %v11424_v53 = vadd.f32 %v17617_v5, %v2048_v31  ;;  %v17618_v63 = vld [vmem:[#allocation80_spill] sm:$0xff] }
 0x69b   : > { %v8329_v49 = vpack.c.bf16 %v8123_v14, %v8121_v50  ;;  %v7955_v52 = vpop.f32.mrb[100].mxu0  ;;  %v11426_v60 = vadd.f32 %v17618_v63, %v2053_v36  ;;  %v17619_v14 = vld [vmem:[#allocation81_spill] sm:$0xff]  ;;  %v2078_v63 = vpop.permute.xlu0 %2077 }
 0x69c   : > { %v11407_v45 = vadd.f32 %v11406_v47, %v7955_v52  ;;  %v7957_v28 = vpop.f32.mrb[101].mxu0  ;;  %v11428_v10 = vadd.f32 %v17619_v14, %v2053_v36  ;;  %v13485_v52 = vld [vmem:[%s17396_s3 + $0x184] ss:$16 sps:$4 sm:$0xff]   ;;  %v13490_v5 = vld [vmem:[%s17396_s3 + $0x1a0] ss:$16 sps:$4 sm:$0xff]   ;;  %v2083_v14 = vpop.permute.xlu1 %2082 }
 0x69d   : > { %v11409_v39 = vadd.f32 %v11408_v23, %v7957_v28  ;;  %v7959_v16 = vpop.f32.mrb[102].mxu0  ;;  %9737 = vmatprep.subr.bf16.mxu1 %v8329_v49 }
 0x69e   : > { %v11411_v12 = vadd.f32 %v11410_v33, %v7959_v16  ;;  %v7961_v59 = vpop.f32.mrb[103].mxu0  ;;  %9738 = vmatpush1.bf16.msra.mxu1 %v8328_v55  ;;  %v8124_v26 = vmax.f32 %v11407_v45, 0.0  ;;  %v17620_v16 = vld [vmem:[#allocation82_spill] sm:$0xff] }
 0x69f   : > { %v11413_v2 = vadd.f32 %v11412_v20, %v7961_v59  ;;  %v8125_v27 = vmax.f32 %v11409_v39, 0.0  ;;  %v17621_v59 = vld [vmem:[#allocation83_spill] sm:$0xff] }
 0x6a0   : > { %v8126_v29 = vmax.f32 %v11411_v12, 0.0 }
 0x6a1   : > { %v8127_v42 = vmax.f32 %v11413_v2, 0.0  ;;  %9491 = vmatmul.mubr.bf16.gmra.mrb[164].mxu1 %v13478_v56  ;;  %v11430_v56 = vadd.f32 %v17620_v16, %v2058_v30 }
 0x6a2   : > { %v8330_v34 = vpack.c.bf16 %v8126_v29, %v8124_v26  ;;  %9500 = vmatprep.mubr.bf16.mxu1 %v13479_v17  ;;  %v11432_v17 = vadd.f32 %v17621_v59, %v2058_v30  ;;  %v17622_v26 = vld [vmem:[#allocation84_spill] sm:$0xff] }
 0x6a3   : > { %v8331_v57 = vpack.c.bf16 %v8127_v42, %v8125_v27  ;;  %v7965_v51 = vpop.f32.mrb[104].mxu0  ;;  %v11434_v29 = vadd.f32 %v17622_v26, %v2063_v61  ;;  %v17623_v42 = vld [vmem:[#allocation85_spill] sm:$0xff]  ;;  %v2088_v26 = vpop.permute.xlu0 %2087 }
 0x6a4   : > { %v11415_v7 = vadd.f32 %v11414_v6, %v7965_v51  ;;  %v7967_v40 = vpop.f32.mrb[105].mxu0  ;;  %v11436_v48 = vadd.f32 %v17623_v42, %v2063_v61  ;;  %v13488_v51 = vld [vmem:[%s17396_s3 + $0x1a4] ss:$16 sps:$4 sm:$0xff]   ;;  %v13493_v59 = vld [vmem:[%s17396_s3 + $0x1c0] ss:$16 sps:$4 sm:$0xff]   ;;  %v2093_v42 = vpop.permute.xlu1 %2092 }
 0x6a5   : > { %v11417_v1 = vadd.f32 %v11416_v21, %v7967_v40  ;;  %v7969_v46 = vpop.f32.mrb[106].mxu0  ;;  %9739 = vmatprep.subr.bf16.mxu1 %v8331_v57 }
 0x6a6   : > { %v11419_v54 = vadd.f32 %v11418_v8, %v7969_v46  ;;  %v7971_v32 = vpop.f32.mrb[107].mxu0  ;;  %9740 = vmatpush1.bf16.msra.mxu1 %v8330_v34  ;;  %v8128_v22 = vmax.f32 %v11415_v7, 0.0  ;;  %v17624_v46 = vld [vmem:[#allocation86_spill] sm:$0xff] }
 0x6a7   : > { %v11421_v58 = vadd.f32 %v11420_v25, %v7971_v32  ;;  %v8129_v24 = vmax.f32 %v11417_v1, 0.0  ;;  %v17625_v32 = vld [vmem:[#allocation87_spill] sm:$0xff] }
 0x6a8   : > { %v8130_v35 = vmax.f32 %v11419_v54, 0.0 }
 0x6a9   : > { %v8131_v19 = vmax.f32 %v11421_v58, 0.0  ;;  %9501 = vmatmul.mubr.bf16.gmra.mrb[168].mxu1 %v13481_v41  ;;  %v11438_v41 = vadd.f32 %v17624_v46, %v2068_v0 }
 0x6aa   : > { %v8332_v9 = vpack.c.bf16 %v8130_v35, %v8128_v22  ;;  %9510 = vmatprep.mubr.bf16.mxu1 %v13482_v43  ;;  %v11440_v43 = vadd.f32 %v17625_v32, %v2068_v0  ;;  %v17626_v22 = vld [vmem:[#allocation88_spill] sm:$0xff] }
 0x6ab   : > { %v8333_v11 = vpack.c.bf16 %v8131_v19, %v8129_v24  ;;  %v7975_v15 = vpop.f32.mrb[108].mxu0  ;;  %v11442_v35 = vadd.f32 %v17626_v22, %v2073_v13  ;;  %v17627_v19 = vld [vmem:[#allocation89_spill] sm:$0xff] }
 0x6ac   : > { %v11423_v37 = vadd.f32 %v11422_v44, %v7975_v15  ;;  %v7977_v50 = vpop.f32.mrb[109].mxu0  ;;  %v11444_v18 = vadd.f32 %v17627_v19, %v2073_v13  ;;  %v13491_v15 = vld [vmem:[%s17396_s3 + $0x1c4] ss:$16 sps:$4 sm:$0xff]   ;;  %v13496_v32 = vld [vmem:[%s17396_s3 + $0x1e0] ss:$16 sps:$4 sm:$0xff]  }
 0x6ad   : > { %v11425_v47 = vadd.f32 %v11424_v53, %v7977_v50  ;;  %v7979_v55 = vpop.f32.mrb[110].mxu0  ;;  %9741 = vmatprep.subr.bf16.mxu1 %v8333_v11 }
 0x6ae   : > { %v11427_v23 = vadd.f32 %v11426_v60, %v7979_v55  ;;  %v7981_v49 = vpop.f32.mrb[111].mxu0  ;;  %9742 = vmatpush1.bf16.msra.mxu1 %v8332_v9  ;;  %v8132_v45 = vmax.f32 %v11423_v37, 0.0  ;;  %v17628_v55 = vld [vmem:[#allocation90_spill] sm:$0xff] }
 0x6af   : > { %v11429_v33 = vadd.f32 %v11428_v10, %v7981_v49  ;;  %v8133_v20 = vmax.f32 %v11425_v47, 0.0  ;;  %v17629_v49 = vld [vmem:[#allocation91_spill] sm:$0xff] }
 0x6b0   : > { %v8134_v28 = vmax.f32 %v11427_v23, 0.0 }
 0x6b1   : > { %v8135_v39 = vmax.f32 %v11429_v33, 0.0  ;;  %9511 = vmatmul.mubr.bf16.gmra.mrb[172].mxu1 %v13484_v3  ;;  %v11446_v3 = vadd.f32 %v17628_v55, %v2078_v63  ;;  %v13517_v55 = vld [vmem:[%s17396_s3 + $0x2c0] ss:$16 sps:$4 sm:$0xff]  }
 0x6b2   : > { %v8334_v12 = vpack.c.bf16 %v8134_v28, %v8132_v45  ;;  %9520 = vmatprep.mubr.bf16.mxu1 %v13485_v52  ;;  %v11448_v52 = vadd.f32 %v17629_v49, %v2078_v63  ;;  %v17630_v45 = vld [vmem:[#allocation92_spill] sm:$0xff]  ;;  %v13506_v63 = vld [vmem:[%s17396_s3 + $0x264] ss:$16 sps:$4 sm:$0xff]  }
 0x6b3   : > { %v8335_v4 = vpack.c.bf16 %v8135_v39, %v8133_v20  ;;  %v7985_v2 = vpop.f32.mrb[112].mxu0  ;;  %v11450_v28 = vadd.f32 %v17630_v45, %v2083_v14  ;;  %v17631_v39 = vld [vmem:[#allocation93_spill] sm:$0xff] }
 0x6b4   : > { %v11431_v62 = vadd.f32 %v11430_v56, %v7985_v2  ;;  %v7987_v27 = vpop.f32.mrb[113].mxu0  ;;  %v11452_v16 = vadd.f32 %v17631_v39, %v2083_v14  ;;  %v13494_v2 = vld [vmem:[%s17396_s3 + $0x1e4] ss:$16 sps:$4 sm:$0xff]  }
 0x6b5   : > { %v11433_v6 = vadd.f32 %v11432_v17, %v7987_v27  ;;  %v7989_v34 = vpop.f32.mrb[114].mxu0  ;;  %9743 = vmatprep.subr.bf16.mxu1 %v8335_v4  ;;  %v13512_v14 = vld [vmem:[%s17396_s3 + $0x2a4] ss:$16 sps:$4 sm:$0xff]  }
 0x6b6   : > { %v11435_v21 = vadd.f32 %v11434_v29, %v7989_v34  ;;  %v7991_v57 = vpop.f32.mrb[115].mxu0  ;;  %9744 = vmatpush1.bf16.msra.mxu1 %v8334_v12  ;;  %v8136_v7 = vmax.f32 %v11431_v62, 0.0  ;;  %v17632_v34 = vld [vmem:[#allocation94_spill] sm:$0xff]  ;;  %v13521_v49 = vld [vmem:[%s17396_s3 + $0x304] ss:$16 sps:$4 sm:$0xff]  }
 0x6b7   : > { %v11437_v8 = vadd.f32 %v11436_v48, %v7991_v57  ;;  %v8137_v25 = vmax.f32 %v11433_v6, 0.0  ;;  %v17633_v57 = vld [vmem:[#allocation95_spill] sm:$0xff] }
 0x6b8   : > { %v8138_v40 = vmax.f32 %v11435_v21, 0.0  ;;  %v13527_v45 = vld [vmem:[%s17396_s3 + $0x344] ss:$16 sps:$4 sm:$0xff]  }
 0x6b9   : > { %v8139_v1 = vmax.f32 %v11437_v8, 0.0  ;;  %9521 = vmatmul.mubr.bf16.gmra.mrb[176].mxu1 %v13487_v38  ;;  %v11454_v38 = vadd.f32 %v17632_v34, %v2088_v26  ;;  %v13533_v39 = vld [vmem:[%s17396_s3 + $0x384] ss:$16 sps:$4 sm:$0xff]   ;;  %v13556_v34 = vld [vmem:[%s17396_s3 + $0x68] ss:$16 sps:$4 sm:$0xff]  }
 0x6ba   : > { %v8336_v54 = vpack.c.bf16 %v8138_v40, %v8136_v7  ;;  %9530 = vmatprep.mubr.bf16.mxu1 %v13488_v51  ;;  %v11456_v51 = vadd.f32 %v17633_v57, %v2088_v26  ;;  %v17634_v7 = vld [vmem:[#allocation96_spill] sm:$0xff] }
 0x6bb   : > { %v8337_v31 = vpack.c.bf16 %v8139_v1, %v8137_v25  ;;  %v7995_v58 = vpop.f32.mrb[116].mxu0  ;;  %v11458_v40 = vadd.f32 %v17634_v7, %v2093_v42  ;;  %v17635_v1 = vld [vmem:[#allocation97_spill] sm:$0xff]  ;;  %v13547_v26 = vld [vmem:[%s17396_s3 + $0xc] ss:$16 sps:$4 sm:$0xff]  }
 0x6bc   : > { %v11439_v36 = vadd.f32 %v11438_v41, %v7995_v58  ;;  %v7997_v24 = vpop.f32.mrb[117].mxu0  ;;  %v11460_v46 = vadd.f32 %v17635_v1, %v2093_v42  ;;  %v13497_v58 = vld [vmem:[%s17396_s3 + $0x204] ss:$16 sps:$4 sm:$0xff]   ;;  %v13551_v42 = vld [vmem:[%s17396_s3 + $0x4c] ss:$16 sps:$4 sm:$0xff]  }
 0x6bd   : > { %v11441_v44 = vadd.f32 %v11440_v43, %v7997_v24  ;;  %v7999_v9 = vpop.f32.mrb[118].mxu0  ;;  %9745 = vmatprep.subr.bf16.mxu1 %v8337_v31  ;;  %v13560_v57 = vld [vmem:[%s17396_s3 + $0xac] ss:$16 sps:$4 sm:$0xff]  }
 0x6be   : > { %v11443_v53 = vadd.f32 %v11442_v35, %v7999_v9  ;;  %v8001_v11 = vpop.f32.mrb[119].mxu0  ;;  %9746 = vmatpush1.bf16.msra.mxu1 %v8336_v54  ;;  %v8140_v37 = vmax.f32 %v11439_v36, 0.0  ;;  %v13499_v9 = vld [vmem:[%s17396_s3 + $0x200] ss:$16 sps:$4 sm:$0xff]   ;;  %v13566_v7 = vld [vmem:[%s17396_s3 + $0xec] ss:$16 sps:$4 sm:$0xff]  }
 0x6bf   : > { %v11445_v60 = vadd.f32 %v11444_v18, %v8001_v11  ;;  %v8141_v10 = vmax.f32 %v11441_v44, 0.0  ;;  %v13503_v11 = vld [vmem:[%s17396_s3 + $0x244] ss:$16 sps:$4 sm:$0xff]   ;;  %v13572_v1 = vld [vmem:[%s17396_s3 + $0x12c] ss:$16 sps:$4 sm:$0xff]  }
 0x6c0   : > { %v8142_v50 = vmax.f32 %v11443_v53, 0.0  ;;  %v13502_v53 = vld [vmem:[%s17396_s3 + $0x220] ss:$16 sps:$4 sm:$0xff]  }
 0x6c1   : > { %v8143_v47 = vmax.f32 %v11445_v60, 0.0  ;;  %9531 = vmatmul.mubr.bf16.gmra.mrb[180].mxu1 %v13490_v5  ;;  %v13500_v5 = vld [vmem:[%s17396_s3 + $0x224] ss:$16 sps:$4 sm:$0xff]   ;;  %v13508_v60 = vld [vmem:[%s17396_s3 + $0x260] ss:$16 sps:$4 sm:$0xff]  }
 0x6c2   : > { %v8338_v23 = vpack.c.bf16 %v8142_v50, %v8140_v37  ;;  %9540 = vmatprep.mubr.bf16.mxu1 %v13491_v15  ;;  %v13505_v15 = vld [vmem:[%s17396_s3 + $0x240] ss:$16 sps:$4 sm:$0xff]   ;;  %v13509_v37 = vld [vmem:[%s17396_s3 + $0x284] ss:$16 sps:$4 sm:$0xff]  }
 0x6c3   : > { %v8339_v30 = vpack.c.bf16 %v8143_v47, %v8141_v10  ;;  %v8005_v33 = vpop.f32.mrb[120].mxu0  ;;  %v13511_v50 = vld [vmem:[%s17396_s3 + $0x280] ss:$16 sps:$4 sm:$0xff]   ;;  %v13515_v47 = vld [vmem:[%s17396_s3 + $0x2c4] ss:$16 sps:$4 sm:$0xff]  }
 0x6c4   : > { %v11447_v61 = vadd.f32 %v11446_v3, %v8005_v33  ;;  %v8007_v20 = vpop.f32.mrb[121].mxu0  ;;  %v13514_v10 = vld [vmem:[%s17396_s3 + $0x2a0] ss:$16 sps:$4 sm:$0xff]   ;;  %v13518_v3 = vld [vmem:[%s17396_s3 + $0x2e4] ss:$16 sps:$4 sm:$0xff]  }
 0x6c5   : > { %v11449_v56 = vadd.f32 %v11448_v52, %v8007_v20  ;;  %v8009_v12 = vpop.f32.mrb[122].mxu0  ;;  %9747 = vmatprep.subr.bf16.mxu1 %v8339_v30  ;;  %v13523_v52 = vld [vmem:[%s17396_s3 + $0x300] ss:$16 sps:$4 sm:$0xff]   ;;  %v13524_v30 = vld [vmem:[%s17396_s3 + $0x324] ss:$16 sps:$4 sm:$0xff]  }
 0x6c6   : > { %v11451_v17 = vadd.f32 %v11450_v28, %v8009_v12  ;;  %v8011_v4 = vpop.f32.mrb[123].mxu0  ;;  %9748 = vmatpush1.bf16.msra.mxu1 %v8338_v23  ;;  %v8144_v62 = vmax.f32 %v11447_v61, 0.0  ;;  %v13520_v23 = vld [vmem:[%s17396_s3 + $0x2e0] ss:$16 sps:$4 sm:$0xff]   ;;  %v13530_v61 = vld [vmem:[%s17396_s3 + $0x364] ss:$16 sps:$4 sm:$0xff]  }
 0x6c7   : > { %v11453_v29 = vadd.f32 %v11452_v16, %v8011_v4  ;;  %v8145_v48 = vmax.f32 %v11449_v56, 0.0  ;;  %v13526_v33 = vld [vmem:[%s17396_s3 + $0x320] ss:$16 sps:$4 sm:$0xff]   ;;  %v13536_v56 = vld [vmem:[%s17396_s3 + $0x3a4] ss:$16 sps:$4 sm:$0xff]  }
 0x6c8   : > { %v8146_v27 = vmax.f32 %v11451_v17, 0.0  ;;  %v13529_v28 = vld [vmem:[%s17396_s3 + $0x340] ss:$16 sps:$4 sm:$0xff]   ;;  %v13542_v4 = vld [vmem:[%s17396_s3 + $0x3e4] ss:$16 sps:$4 sm:$0xff]  }
 0x6c9   : > { %v8147_v6 = vmax.f32 %v11453_v29, 0.0  ;;  %9541 = vmatmul.mubr.bf16.gmra.mrb[184].mxu1 %v13493_v59  ;;  %v13532_v20 = vld [vmem:[%s17396_s3 + $0x360] ss:$16 sps:$4 sm:$0xff]   ;;  %v13539_v59 = vld [vmem:[%s17396_s3 + $0x3c4] ss:$16 sps:$4 sm:$0xff]  }
 0x6ca   : > { %v8340_v21 = vpack.c.bf16 %v8146_v27, %v8144_v62  ;;  %9550 = vmatprep.mubr.bf16.mxu1 %v13494_v2  ;;  %v13535_v16 = vld [vmem:[%s17396_s3 + $0x380] ss:$16 sps:$4 sm:$0xff]   ;;  %v13545_v29 = vld [vmem:[%s17396_s3 + $0x8] ss:$16 sps:$4 sm:$0xff]   ;;  %v13548_v62 = vld [vmem:[%s17396_s3 + $0x2c] ss:$16 sps:$4 sm:$0xff]  }
 0x6cb   : > { %v8341_v0 = vpack.c.bf16 %v8147_v6, %v8145_v48  ;;  %v8015_v8 = vpop.f32.mrb[124].mxu0  ;;  %v13538_v12 = vld [vmem:[%s17396_s3 + $0x3a0] ss:$16 sps:$4 sm:$0xff]   ;;  %v13550_v27 = vld [vmem:[%s17396_s3 + $0x28] ss:$16 sps:$4 sm:$0xff]  }
 0x6cc   : > { %v11455_v13 = vadd.f32 %v11454_v38, %v8015_v8  ;;  %v8017_v25 = vpop.f32.mrb[125].mxu0  ;;  %v13541_v17 = vld [vmem:[%s17396_s3 + $0x3c0] ss:$16 sps:$4 sm:$0xff]   ;;  %v13553_v48 = vld [vmem:[%s17396_s3 + $0x48] ss:$16 sps:$4 sm:$0xff]  }
 0x6cd   : > { %v11457_v41 = vadd.f32 %v11456_v51, %v8017_v25  ;;  %v8019_v54 = vpop.f32.mrb[126].mxu0  ;;  %9749 = vmatprep.subr.bf16.mxu1 %v8341_v0  ;;  %v13544_v2 = vld [vmem:[%s17396_s3 + $0x3e0] ss:$16 sps:$4 sm:$0xff]   ;;  %v13554_v6 = vld [vmem:[%s17396_s3 + $0x6c] ss:$16 sps:$4 sm:$0xff]  }
 0x6ce   : > { %v11459_v43 = vadd.f32 %v11458_v40, %v8019_v54  ;;  %v8021_v31 = vpop.f32.mrb[127].mxu0  ;;  %9750 = vmatpush1.bf16.msra.mxu1 %v8340_v21  ;;  %v8148_v35 = vmax.f32 %v11455_v13, 0.0  ;;  %v13557_v38 = vld [vmem:[%s17396_s3 + $0x8c] ss:$16 sps:$4 sm:$0xff]   ;;  %v13559_v21 = vld [vmem:[%s17396_s3 + $0x88] ss:$16 sps:$4 sm:$0xff]  }
 0x6cf   : > { %v11461_v22 = vadd.f32 %v11460_v46, %v8021_v31  ;;  %v8149_v24 = vmax.f32 %v11457_v41, 0.0  ;;  %v13562_v51 = vld [vmem:[%s17396_s3 + $0xa8] ss:$16 sps:$4 sm:$0xff]   ;;  %v13563_v0 = vld [vmem:[%s17396_s3 + $0xcc] ss:$16 sps:$4 sm:$0xff]  }
 0x6d0   : > { %v8150_v36 = vmax.f32 %v11459_v43, 0.0  ;;  %v13565_v8 = vld [vmem:[%s17396_s3 + $0xc8] ss:$16 sps:$4 sm:$0xff]   ;;  %v13569_v13 = vld [vmem:[%s17396_s3 + $0x10c] ss:$16 sps:$4 sm:$0xff]  }
 0x6d1   : > { %v8151_v19 = vmax.f32 %v11461_v22, 0.0  ;;  %9551 = vmatmul.mubr.bf16.gmra.mrb[188].mxu1 %v13496_v32  ;;  %v13568_v40 = vld [vmem:[%s17396_s3 + $0xe8] ss:$16 sps:$4 sm:$0xff]   ;;  %v13575_v41 = vld [vmem:[%s17396_s3 + $0x14c] ss:$16 sps:$4 sm:$0xff]  }
 0x6d2   : > { %v8342_v18 = vpack.c.bf16 %v8150_v36, %v8148_v35  ;;  %9560 = vmatprep.mubr.bf16.mxu1 %v13497_v58  ;;  %v13571_v25 = vld [vmem:[%s17396_s3 + $0x108] ss:$16 sps:$4 sm:$0xff]   ;;  %v13578_v32 = vld [vmem:[%s17396_s3 + $0x16c] ss:$16 sps:$4 sm:$0xff]  }
 0x6d3   : > { %v8343_v44 = vpack.c.bf16 %v8151_v19, %v8149_v24  ;;  %v13574_v46 = vld [vmem:[%s17396_s3 + $0x128] ss:$16 sps:$4 sm:$0xff]   ;;  %v13581_v31 = vld [vmem:[%s17396_s3 + $0x18c] ss:$16 sps:$4 sm:$0xff]  }
 0x6d4   : > { %v13577_v54 = vld [vmem:[%s17396_s3 + $0x148] ss:$16 sps:$4 sm:$0xff]   ;;  %v13584_v22 = vld [vmem:[%s17396_s3 + $0x1ac] ss:$16 sps:$4 sm:$0xff]  }
 0x6d5   : > { %9751 = vmatprep.subr.bf16.mxu1 %v8343_v44  ;;  %v13580_v43 = vld [vmem:[%s17396_s3 + $0x168] ss:$16 sps:$4 sm:$0xff]   ;;  %v13587_v36 = vld [vmem:[%s17396_s3 + $0x1cc] ss:$16 sps:$4 sm:$0xff]  }
 0x6d6   : > { %9752 = vmatpush1.bf16.msra.mxu1 %v8342_v18  ;;  %v13583_v58 = vld [vmem:[%s17396_s3 + $0x188] ss:$16 sps:$4 sm:$0xff]   ;;  %v13590_v19 = vld [vmem:[%s17396_s3 + $0x1ec] ss:$16 sps:$4 sm:$0xff]  }
 0x6d7   : > { %v13586_v35 = vld [vmem:[%s17396_s3 + $0x1a8] ss:$16 sps:$4 sm:$0xff]   ;;  %v13593_v44 = vld [vmem:[%s17396_s3 + $0x20c] ss:$16 sps:$4 sm:$0xff]  }
 0x6d8   : > { %v13589_v24 = vld [vmem:[%s17396_s3 + $0x1c8] ss:$16 sps:$4 sm:$0xff]  }
 0x6d9   : > { %9561 = vmatmul.mubr.bf16.gmra.mrb[192].mxu1 %v13499_v9  ;;  %v13592_v18 = vld [vmem:[%s17396_s3 + $0x1e8] ss:$16 sps:$4 sm:$0xff]  }
 0x6da   : > { %9570 = vmatprep.mubr.bf16.mxu1 %v13500_v5  ;;  %v13595_v9 = vld [vmem:[%s17396_s3 + $0x208] ss:$16 sps:$4 sm:$0xff]   ;;  %v13596_v5 = vld [vmem:[%s17396_s3 + $0x22c] ss:$16 sps:$4 sm:$0xff]  }
 0x6e1   : > { %9571 = vmatmul.mubr.bf16.gmra.mrb[196].mxu1 %v13502_v53  ;;  %v13598_v53 = vld [vmem:[%s17396_s3 + $0x228] ss:$16 sps:$4 sm:$0xff]  }
 0x6e2   : > { %9580 = vmatprep.mubr.bf16.mxu1 %v13503_v11  ;;  %v13599_v11 = vld [vmem:[%s17396_s3 + $0x24c] ss:$16 sps:$4 sm:$0xff]  }
 0x6e9   : > { %9581 = vmatmul.mubr.bf16.gmra.mrb[200].mxu1 %v13505_v15  ;;  %v13601_v15 = vld [vmem:[%s17396_s3 + $0x248] ss:$16 sps:$4 sm:$0xff]  }
 0x6ea   : > { %9590 = vmatprep.mubr.bf16.mxu1 %v13506_v63  ;;  %v13602_v63 = vld [vmem:[%s17396_s3 + $0x26c] ss:$16 sps:$4 sm:$0xff]  }
 0x6f1   : > { %9591 = vmatmul.mubr.bf16.gmra.mrb[204].mxu1 %v13508_v60  ;;  %v13604_v60 = vld [vmem:[%s17396_s3 + $0x268] ss:$16 sps:$4 sm:$0xff]  }
 0x6f2   : > { %9600 = vmatprep.mubr.bf16.mxu1 %v13509_v37  ;;  %v13605_v37 = vld [vmem:[%s17396_s3 + $0x28c] ss:$16 sps:$4 sm:$0xff]  }
 0x6f9   : > { %9601 = vmatmul.mubr.bf16.gmra.mrb[208].mxu1 %v13511_v50  ;;  %v13607_v50 = vld [vmem:[%s17396_s3 + $0x288] ss:$16 sps:$4 sm:$0xff]  }
 0x6fa   : > { %9610 = vmatprep.mubr.bf16.mxu1 %v13512_v14  ;;  %v13608_v14 = vld [vmem:[%s17396_s3 + $0x2ac] ss:$16 sps:$4 sm:$0xff]  }
 0x701   : > { %9611 = vmatmul.mubr.bf16.gmra.mrb[212].mxu1 %v13514_v10  ;;  %v13610_v10 = vld [vmem:[%s17396_s3 + $0x2a8] ss:$16 sps:$4 sm:$0xff]  }
 0x702   : > { %9620 = vmatprep.mubr.bf16.mxu1 %v13515_v47  ;;  %v13611_v47 = vld [vmem:[%s17396_s3 + $0x2cc] ss:$16 sps:$4 sm:$0xff]  }
 0x709   : > { %9621 = vmatmul.mubr.bf16.gmra.mrb[216].mxu1 %v13517_v55  ;;  %v13613_v55 = vld [vmem:[%s17396_s3 + $0x2c8] ss:$16 sps:$4 sm:$0xff]  }
 0x70a   : > { %9630 = vmatprep.mubr.bf16.mxu1 %v13518_v3  ;;  %v13614_v3 = vld [vmem:[%s17396_s3 + $0x2ec] ss:$16 sps:$4 sm:$0xff]  }
 0x711   : > { %9631 = vmatmul.mubr.bf16.gmra.mrb[220].mxu1 %v13520_v23  ;;  %v13616_v23 = vld [vmem:[%s17396_s3 + $0x2e8] ss:$16 sps:$4 sm:$0xff]  }
 0x712   : > { %9640 = vmatprep.mubr.bf16.mxu1 %v13521_v49  ;;  %v13617_v49 = vld [vmem:[%s17396_s3 + $0x30c] ss:$16 sps:$4 sm:$0xff]  }
 0x719   : > { %9641 = vmatmul.mubr.bf16.gmra.mrb[224].mxu1 %v13523_v52  ;;  %v13619_v52 = vld [vmem:[%s17396_s3 + $0x308] ss:$16 sps:$4 sm:$0xff]  }
 0x71a   : > { %9650 = vmatprep.mubr.bf16.mxu1 %v13524_v30  ;;  %v13620_v30 = vld [vmem:[%s17396_s3 + $0x32c] ss:$16 sps:$4 sm:$0xff]  }
 0x721   : > { %9651 = vmatmul.mubr.bf16.gmra.mrb[228].mxu1 %v13526_v33  ;;  %v13622_v33 = vld [vmem:[%s17396_s3 + $0x328] ss:$16 sps:$4 sm:$0xff]  }
 0x722   : > { %9660 = vmatprep.mubr.bf16.mxu1 %v13527_v45  ;;  %v13623_v45 = vld [vmem:[%s17396_s3 + $0x34c] ss:$16 sps:$4 sm:$0xff]  }
 0x729   : > { %9661 = vmatmul.mubr.bf16.gmra.mrb[232].mxu1 %v13529_v28  ;;  %v13625_v28 = vld [vmem:[%s17396_s3 + $0x348] ss:$16 sps:$4 sm:$0xff]  }
 0x72a   : > { %9670 = vmatprep.mubr.bf16.mxu1 %v13530_v61  ;;  %v13626_v61 = vld [vmem:[%s17396_s3 + $0x36c] ss:$16 sps:$4 sm:$0xff]  }
 0x731   : > { %9671 = vmatmul.mubr.bf16.gmra.mrb[236].mxu1 %v13532_v20  ;;  %v8411_v20 = vpop.permute.xlu0 %8410 }
 0x732   : > { %9680 = vmatprep.mubr.bf16.mxu1 %v13533_v39 }
 0x739   : > { %9681 = vmatmul.mubr.bf16.gmra.mrb[240].mxu1 %v13535_v16 }
 0x73a   : > { %9690 = vmatprep.mubr.bf16.mxu1 %v13536_v56 }
 0x741   : > { %9691 = vmatmul.mubr.bf16.gmra.mrb[244].mxu1 %v13538_v12  ;;  %v13628_v12 = vld [vmem:[%s17396_s3 + $0x368] ss:$16 sps:$4 sm:$0xff]  }
 0x742   : > { %9700 = vmatprep.mubr.bf16.mxu1 %v13539_v59  ;;  %v8416_v59 = vpop.permute.xlu1 %8415 }
 0x749   : > { %9701 = vmatmul.mubr.bf16.gmra.mrb[248].mxu1 %v13541_v17 }
 0x74a   : > { %9710 = vmatprep.mubr.bf16.mxu1 %v13542_v4 }
 0x751   : > { %9711 = vmatmul.mubr.bf16.gmra.mrb[252].mxu1 %v13544_v2  ;;  %v13629_v2 = vld [vmem:[%s17396_s3 + $0x38c] ss:$16 sps:$4 sm:$0xff]  }
 0x752   : > { %9753 = vmatprep.mubr.bf16.mxu1 %v13547_v26 }
 0x759   : > { %9754 = vmatmul.mubr.bf16.vlgmr.msra.gmra.mrb[128].mxu1 %v13545_v29 }
 0x75a   : > { %9763 = vmatprep.mubr.bf16.mxu1 %v13548_v62 }
 0x761   : > { %9764 = vmatmul.mubr.bf16.gmra.mrb[132].mxu1 %v13550_v27 }
 0x762   : > { %9773 = vmatprep.mubr.bf16.mxu1 %v13551_v42 }
 0x769   : > { %9774 = vmatmul.mubr.bf16.gmra.mrb[136].mxu1 %v13553_v48 }
 0x76a   : > { %9783 = vmatprep.mubr.bf16.mxu1 %v13554_v6 }
 0x771   : > { %9784 = vmatmul.mubr.bf16.gmra.mrb[140].mxu1 %v13556_v34 }
 0x772   : > { %9793 = vmatprep.mubr.bf16.mxu1 %v13557_v38  ;;  %v8421_v38 = vpop.permute.xlu0 %8420 }
 0x779   : > { %9794 = vmatmul.mubr.bf16.gmra.mrb[144].mxu1 %v13559_v21 }
 0x77a   : > { %9803 = vmatprep.mubr.bf16.mxu1 %v13560_v57 }
 0x781   : > { %9804 = vmatmul.mubr.bf16.gmra.mrb[148].mxu1 %v13562_v51 }
 0x782   : > { %9813 = vmatprep.mubr.bf16.mxu1 %v13563_v0 }
 0x789   : > { %9814 = vmatmul.mubr.bf16.gmra.mrb[152].mxu1 %v13565_v8  ;;  %v13631_v8 = vld [vmem:[%s17396_s3 + $0x388] ss:$16 sps:$4 sm:$0xff]  }
 0x78a   : > { %9823 = vmatprep.mubr.bf16.mxu1 %v13566_v7  ;;  %v8426_v7 = vpop.permute.xlu1 %8425 }
 0x791   : > { %9824 = vmatmul.mubr.bf16.gmra.mrb[156].mxu1 %v13568_v40 }
 0x792   : > { %9833 = vmatprep.mubr.bf16.mxu1 %v13569_v13 }
 0x799   : > { %9834 = vmatmul.mubr.bf16.gmra.mrb[160].mxu1 %v13571_v25  ;;  %v13632_v25 = vld [vmem:[%s17396_s3 + $0x3ac] ss:$16 sps:$4 sm:$0xff]  }
 0x79a   : > { %9843 = vmatprep.mubr.bf16.mxu1 %v13572_v1 }
 0x7a1   : > { %9844 = vmatmul.mubr.bf16.gmra.mrb[164].mxu1 %v13574_v46 }
 0x7a2   : > { %9853 = vmatprep.mubr.bf16.mxu1 %v13575_v41 }
 0x7a9   : > { %9854 = vmatmul.mubr.bf16.gmra.mrb[168].mxu1 %v13577_v54 }
 0x7aa   : > { %9863 = vmatprep.mubr.bf16.mxu1 %v13578_v32 }
 0x7b1   : > { %9864 = vmatmul.mubr.bf16.gmra.mrb[172].mxu1 %v13580_v43 }
 0x7b2   : > { %9873 = vmatprep.mubr.bf16.mxu1 %v13581_v31 }
 0x7b9   : > { %9874 = vmatmul.mubr.bf16.gmra.mrb[176].mxu1 %v13583_v58 }
 0x7ba   : > { %9883 = vmatprep.mubr.bf16.mxu1 %v13584_v22  ;;  %v8431_v22 = vpop.permute.xlu0 %8430 }
 0x7c1   : > { %9884 = vmatmul.mubr.bf16.gmra.mrb[180].mxu1 %v13586_v35 }
 0x7c2   : > { %9893 = vmatprep.mubr.bf16.mxu1 %v13587_v36 }
 0x7c9   : > { %9894 = vmatmul.mubr.bf16.gmra.mrb[184].mxu1 %v13589_v24 }
 0x7ca   : > { %9903 = vmatprep.mubr.bf16.mxu1 %v13590_v19 }
 0x7d1   : > { %9904 = vmatmul.mubr.bf16.gmra.mrb[188].mxu1 %v13592_v18  ;;  %v13634_v18 = vld [vmem:[%s17396_s3 + $0x3a8] ss:$16 sps:$4 sm:$0xff]  }
 0x7d2   : > { %9913 = vmatprep.mubr.bf16.mxu1 %v13593_v44  ;;  %v8436_v44 = vpop.permute.xlu1 %8435 }
 0x7d9   : > { %9914 = vmatmul.mubr.bf16.gmra.mrb[192].mxu1 %v13595_v9 }
 0x7da   : > { %9923 = vmatprep.mubr.bf16.mxu1 %v13596_v5 }
 0x7e1   : > { %9924 = vmatmul.mubr.bf16.gmra.mrb[196].mxu1 %v13598_v53  ;;  %v13635_v53 = vld [vmem:[%s17396_s3 + $0x3cc] ss:$16 sps:$4 sm:$0xff]  }
 0x7e2   : > { %9933 = vmatprep.mubr.bf16.mxu1 %v13599_v11 }
 0x7e9   : > { %9934 = vmatmul.mubr.bf16.gmra.mrb[200].mxu1 %v13601_v15 }
 0x7ea   : > { %9943 = vmatprep.mubr.bf16.mxu1 %v13602_v63 }
 0x7f1   : > { %9944 = vmatmul.mubr.bf16.gmra.mrb[204].mxu1 %v13604_v60 }
 0x7f2   : > { %9953 = vmatprep.mubr.bf16.mxu1 %v13605_v37 }
 0x7f9   : > { %9954 = vmatmul.mubr.bf16.gmra.mrb[208].mxu1 %v13607_v50  ;;  %v13666_v50 = vmov 1966171168  }
 0x7fa   : > { %9963 = vmatprep.mubr.bf16.mxu1 %v13608_v14  ;;  %v10287_v14 = vunpack.c.l.s4 %v13666_v50 }
 0x801   : > { %9964 = vmatmul.mubr.bf16.gmra.mrb[212].mxu1 %v13610_v10 }
 0x802   : > { %9973 = vmatprep.mubr.bf16.mxu1 %v13611_v47 }
 0x809   : > { %9974 = vmatmul.mubr.bf16.gmra.mrb[216].mxu1 %v13613_v55 }
 0x80a   : > { %9983 = vmatprep.mubr.bf16.mxu1 %v13614_v3  ;;  %v8441_v3 = vpop.permute.xlu0 %8440 }
 0x811   : > { %9984 = vmatmul.mubr.bf16.gmra.mrb[220].mxu1 %v13616_v23  ;;  %v10273_v23 = vlaneseq }
 0x812   : > { %9993 = vmatprep.mubr.bf16.mxu1 %v13617_v49 }
 0x813   : > { %vm10408_vm0 = vcmp.lt.s32.totalorder %v10273_v23, 256 }
 0x819   : > { %9994 = vmatmul.mubr.bf16.gmra.mrb[224].mxu1 %v13619_v52 }
 0x81a   : > { %10003 = vmatprep.mubr.bf16.mxu1 %v13620_v30 }
 0x821   : > { %10004 = vmatmul.mubr.bf16.gmra.mrb[228].mxu1 %v13622_v33 }
 0x822   : > { %10013 = vmatprep.mubr.bf16.mxu1 %v13623_v45  ;;  %v13637_v45 = vld [vmem:[%s17396_s3 + $0x3c8] ss:$16 sps:$4 sm:$0xff]  }
 0x829   : > { %10014 = vmatmul.mubr.bf16.gmra.mrb[232].mxu1 %v13625_v28  ;;  %v8446_v28 = vpop.permute.xlu1 %8445 }
 0x82a   : > { %10023 = vmatprep.mubr.bf16.mxu1 %v13626_v61  ;;  %v10288_v61 = vunpack.c.0.s8 %v10287_v14 }
 0x82c   : > { %v9755_v39 = vpop.f32.mrb[128].mxu1 }
 0x82d   : > { %v11462_v16 = vadd.f32 %v9755_v39, %v8411_v20  ;;  %v9757_v56 = vpop.f32.mrb[129].mxu1 }
 0x82e   : > { %v11463_v17 = vadd.f32 %v9757_v56, %v8411_v20  ;;  %v9759_v4 = vpop.f32.mrb[130].mxu1 }
 0x82f   : > { %v11464_v26 = vadd.f32 %v9759_v4, %v8416_v59  ;;  %v9761_v29 = vpop.f32.mrb[131].mxu1  ;;  %v10074_v27 = vmax.f32 %v11462_v16, 0.0  ;;  %v13638_v16 = vld [vmem:[%s17396_s3 + $0x3ec] ss:$16 sps:$4 sm:$0xff]  }
 0x830   : > { %v11465_v62 = vadd.f32 %v9761_v29, %v8416_v59  ;;  %v10075_v48 = vmax.f32 %v11463_v17, 0.0  ;;  %v17350_v59 = vld.sshfl [vmem:[%s17398_s5] sm:$0x33 pattern:$0x75316420]  ;;  %v17353_v17 = vshrl.u32 %v10273_v23, 7 }
 0x831   : > { %v10076_v42 = vmax.f32 %v11464_v26, 0.0  ;;  %10024 = vmatmul.mubr.bf16.gmra.mrb[236].mxu1 %v13628_v12 }
 0x832   : > { %v10077_v6 = vmax.f32 %v11465_v62, 0.0  ;;  %10033 = vmatprep.mubr.bf16.mxu1 %v13629_v2  ;;  %v17356_v29 = vsub.s32 %v10288_v61, %v17353_v17 }
 0x833   : > { %v10203_v34 = vpack.c.bf16 %v10076_v42, %v10074_v27  ;;  %v10285_v42 = vcombine.high %v17350_v59, %v17350_v59 }
 0x834   : > { %v10204_v21 = vpack.c.bf16 %v10077_v6, %v10075_v48  ;;  %v9765_v57 = vpop.f32.mrb[132].mxu1  ;;  %v8451_v6 = vpop.permute.xlu0 %8450 }
 0x835   : > { %v11466_v51 = vadd.f32 %v9765_v57, %v8421_v38  ;;  %v9767_v0 = vpop.f32.mrb[133].mxu1 }
 0x836   : > { %v11467_v40 = vadd.f32 %v9767_v0, %v8421_v38  ;;  %v9769_v13 = vpop.f32.mrb[134].mxu1  ;;  %10306 = vmatprep.subr.bf16.mxu1 %v10204_v21  ;;  %v8456_v0 = vpop.permute.xlu1 %8455 }
 0x837   : > { %v11468_v1 = vadd.f32 %v9769_v13, %v8426_v7  ;;  %v9771_v46 = vpop.f32.mrb[135].mxu1  ;;  %10307 = vmatpush1.bf16.msra.mxu1 %v10203_v34  ;;  %v10078_v54 = vmax.f32 %v11466_v51, 0.0  ;;  %v13640_v51 = vld [vmem:[%s17396_s3 + $0x3e8] ss:$16 sps:$4 sm:$0xff]  }
 0x838   : > { %v11469_v41 = vadd.f32 %v9771_v46, %v8426_v7  ;;  %v10079_v43 = vmax.f32 %v11467_v40, 0.0  ;;  %v17364_v40 = vrot.slane %v10285_v42, %v17356_v29 }
 0x839   : > { %v10080_v32 = vmax.f32 %v11468_v1, 0.0  ;;  %10034 = vmatmul.mubr.bf16.gmra.mrb[240].mxu1 %v13631_v8 }
 0x83a   : > { %v10081_v31 = vmax.f32 %v11469_v41, 0.0  ;;  %10043 = vmatprep.mubr.bf16.mxu1 %v13632_v25 }
 0x83b   : > { %v10205_v58 = vpack.c.bf16 %v10080_v32, %v10078_v54 }
 0x83c   : > { %v10206_v35 = vpack.c.bf16 %v10081_v31, %v10079_v43  ;;  %v9775_v36 = vpop.f32.mrb[136].mxu1  ;;  %v8461_v31 = vpop.permute.xlu0 %8460 }
 0x83d   : > { %v11470_v24 = vadd.f32 %v9775_v36, %v8431_v22  ;;  %v9777_v19 = vpop.f32.mrb[137].mxu1 }
 0x83e   : > { %v11471_v9 = vadd.f32 %v9777_v19, %v8431_v22  ;;  %v9779_v5 = vpop.f32.mrb[138].mxu1  ;;  %10308 = vmatprep.subr.bf16.mxu1 %v10206_v35 }
 0x83f   : > { %v11472_v11 = vadd.f32 %v9779_v5, %v8436_v44  ;;  %v9781_v15 = vpop.f32.mrb[139].mxu1  ;;  %10309 = vmatpush1.bf16.msra.mxu1 %v10205_v58  ;;  %v10082_v60 = vmax.f32 %v11470_v24, 0.0  ;;  %v8466_v24 = vpop.permute.xlu1 %8465 }
 0x840   : > { %v11473_v63 = vadd.f32 %v9781_v15, %v8436_v44  ;;  %v10083_v10 = vmax.f32 %v11471_v9, 0.0 }
 0x841   : > { %v10084_v37 = vmax.f32 %v11472_v11, 0.0  ;;  %10044 = vmatmul.mubr.bf16.gmra.mrb[244].mxu1 %v13634_v18 }
 0x842   : > { %v10085_v47 = vmax.f32 %v11473_v63, 0.0  ;;  %10053 = vmatprep.mubr.bf16.mxu1 %v13635_v53 }
 0x843   : > { %v10207_v55 = vpack.c.bf16 %v10084_v37, %v10082_v60  ;;  %v8471_v37 = vpop.permute.xlu0 %8470 }
 0x844   : > { %v10208_v49 = vpack.c.bf16 %v10085_v47, %v10083_v10  ;;  %v9785_v52 = vpop.f32.mrb[140].mxu1 }
 0x845   : > { %v11474_v30 = vadd.f32 %v9785_v52, %v8441_v3  ;;  %v9787_v33 = vpop.f32.mrb[141].mxu1 }
 0x846   : > { %v11475_v20 = vadd.f32 %v9787_v33, %v8441_v3  ;;  %v9789_v39 = vpop.f32.mrb[142].mxu1  ;;  %10310 = vmatprep.subr.bf16.mxu1 %v10208_v49 }
 0x847   : > { %v11476_v56 = vadd.f32 %v9789_v39, %v8446_v28  ;;  %v9791_v12 = vpop.f32.mrb[143].mxu1  ;;  %10311 = vmatpush1.bf16.msra.mxu1 %v10207_v55  ;;  %v10086_v2 = vmax.f32 %v11474_v30, 0.0  ;;  %v8476_v55 = vpop.permute.xlu1 %8475 }
 0x848   : > { %v11477_v4 = vadd.f32 %v9791_v12, %v8446_v28  ;;  %v10087_v62 = vmax.f32 %v11475_v20, 0.0 }
 0x849   : > { %v10088_v26 = vmax.f32 %v11476_v56, 0.0  ;;  %10054 = vmatmul.mubr.bf16.gmra.mrb[248].mxu1 %v13637_v45 }
 0x84a   : > { %v10089_v27 = vmax.f32 %v11477_v4, 0.0  ;;  %10063 = vmatprep.mubr.bf16.mxu1 %v13638_v16  ;;  %v8481_v16 = vpop.permute.xlu0 %8480 }
 0x84b   : > { %v10209_v48 = vpack.c.bf16 %v10088_v26, %v10086_v2  ;;  %v8486_v26 = vpop.permute.xlu1 %8485 }
 0x84c   : > { %v10210_v34 = vpack.c.bf16 %v10089_v27, %v10087_v62  ;;  %v9795_v38 = vpop.f32.mrb[144].mxu1 }
 0x84d   : > { %v11478_v21 = vadd.f32 %v9795_v38, %v8451_v6  ;;  %v9797_v57 = vpop.f32.mrb[145].mxu1 }
 0x84e   : > { %v11479_v8 = vadd.f32 %v9797_v57, %v8451_v6  ;;  %v9799_v7 = vpop.f32.mrb[146].mxu1  ;;  %10312 = vmatprep.subr.bf16.mxu1 %v10210_v34 }
 0x84f   : > { %v11480_v13 = vadd.f32 %v9799_v7, %v8456_v0  ;;  %v9801_v25 = vpop.f32.mrb[147].mxu1  ;;  %10313 = vmatpush1.bf16.msra.mxu1 %v10209_v48  ;;  %v10090_v46 = vmax.f32 %v11478_v21, 0.0 }
 0x850   : > { %v11481_v1 = vadd.f32 %v9801_v25, %v8456_v0  ;;  %v10091_v54 = vmax.f32 %v11479_v8, 0.0  ;;  %v8491_v0 = vpop.permute.xlu0 %8490 }
 0x851   : > { %v10092_v41 = vmax.f32 %v11480_v13, 0.0  ;;  %10064 = vmatmul.mubr.bf16.gmra.mrb[252].mxu1 %v13640_v51 }
 0x852   : > { %v10093_v32 = vmax.f32 %v11481_v1, 0.0  ;;  %10338 = vmatprep.mubr.bf16.mxu1 %v17364_v40  ;;  %v8496_v1 = vpop.permute.xlu1 %8495 }
 0x853   : > { %v10211_v43 = vpack.c.bf16 %v10092_v41, %v10090_v46 }
 0x854   : > { %v10212_v58 = vpack.c.bf16 %v10093_v32, %v10091_v54  ;;  %v9805_v22 = vpop.f32.mrb[148].mxu1 }
 0x855   : > { %v11482_v35 = vadd.f32 %v9805_v22, %v8461_v31  ;;  %v9807_v36 = vpop.f32.mrb[149].mxu1 }
 0x856   : > { %v11483_v19 = vadd.f32 %v9807_v36, %v8461_v31  ;;  %v9809_v18 = vpop.f32.mrb[150].mxu1  ;;  %10314 = vmatprep.subr.bf16.mxu1 %v10212_v58 }
 0x857   : > { %v11484_v44 = vadd.f32 %v9809_v18, %v8466_v24  ;;  %v9811_v9 = vpop.f32.mrb[151].mxu1  ;;  %10315 = vmatpush1.bf16.msra.mxu1 %v10211_v43  ;;  %v10094_v53 = vmax.f32 %v11482_v35, 0.0 }
 0x858   : > { %v11485_v5 = vadd.f32 %v9811_v9, %v8466_v24  ;;  %v10095_v15 = vmax.f32 %v11483_v19, 0.0  ;;  %v8501_v24 = vpop.permute.xlu0 %8500 }
 0x859   : > { %v10096_v11 = vmax.f32 %v11484_v44, 0.0 }
 0x85a   : > { %v10097_v63 = vmax.f32 %v11485_v5, 0.0  ;;  %v8506_v5 = vpop.permute.xlu1 %8505 }
 0x85b   : > { %v10213_v60 = vpack.c.bf16 %v10096_v11, %v10094_v53 }
 0x85c   : > { %v10214_v50 = vpack.c.bf16 %v10097_v63, %v10095_v15  ;;  %v9815_v14 = vpop.f32.mrb[152].mxu1 }
 0x85d   : > { %v11486_v10 = vadd.f32 %v9815_v14, %v8471_v37  ;;  %v9817_v47 = vpop.f32.mrb[153].mxu1 }
 0x85e   : > { %v11487_v3 = vadd.f32 %v9817_v47, %v8471_v37  ;;  %v9819_v49 = vpop.f32.mrb[154].mxu1  ;;  %10316 = vmatprep.subr.bf16.mxu1 %v10214_v50 }
 0x85f   : > { %v11488_v52 = vadd.f32 %v9819_v49, %v8476_v55  ;;  %v9821_v30 = vpop.f32.mrb[155].mxu1  ;;  %10317 = vmatpush1.bf16.msra.mxu1 %v10213_v60  ;;  %v10098_v45 = vmax.f32 %v11486_v10, 0.0 }
 0x860   : > { %v11489_v33 = vadd.f32 %v9821_v30, %v8476_v55  ;;  %v10099_v61 = vmax.f32 %v11487_v3, 0.0  ;;  %v8511_v55 = vpop.permute.xlu0 %8510 }
 0x861   : > { %v10100_v28 = vmax.f32 %v11488_v52, 0.0 }
 0x862   : > { %v10101_v20 = vmax.f32 %v11489_v33, 0.0  ;;  %v8516_v33 = vpop.permute.xlu1 %8515 }
 0x863   : > { %v10215_v39 = vpack.c.bf16 %v10100_v28, %v10098_v45 }
 0x864   : > { %v10216_v56 = vpack.c.bf16 %v10101_v20, %v10099_v61  ;;  %v9825_v12 = vpop.f32.mrb[156].mxu1 }
 0x865   : > { %v11490_v4 = vadd.f32 %v9825_v12, %v8481_v16  ;;  %v9827_v2 = vpop.f32.mrb[157].mxu1 }
 0x866   : > { %v11491_v62 = vadd.f32 %v9827_v2, %v8481_v16  ;;  %v9829_v27 = vpop.f32.mrb[158].mxu1  ;;  %10318 = vmatprep.subr.bf16.mxu1 %v10216_v56 }
 0x867   : > { %v11492_v42 = vadd.f32 %v9829_v27, %v8486_v26  ;;  %v9831_v48 = vpop.f32.mrb[159].mxu1  ;;  %10319 = vmatpush1.bf16.msra.mxu1 %v10215_v39  ;;  %v10102_v34 = vmax.f32 %v11490_v4, 0.0 }
 0x868   : > { %v11493_v6 = vadd.f32 %v9831_v48, %v8486_v26  ;;  %v10103_v21 = vmax.f32 %v11491_v62, 0.0  ;;  %v8521_v26 = vpop.permute.xlu0 %8520 }
 0x869   : > { %v10104_v38 = vmax.f32 %v11492_v42, 0.0 }
 0x86a   : > { %v10105_v57 = vmax.f32 %v11493_v6, 0.0  ;;  %v8526_v6 = vpop.permute.xlu1 %8525 }
 0x86b   : > { %v10217_v51 = vpack.c.bf16 %v10104_v38, %v10102_v34 }
 0x86c   : > { %v10218_v8 = vpack.c.bf16 %v10105_v57, %v10103_v21  ;;  %v9835_v7 = vpop.f32.mrb[160].mxu1 }
 0x86d   : > { %v11494_v13 = vadd.f32 %v9835_v7, %v8491_v0  ;;  %v9837_v25 = vpop.f32.mrb[161].mxu1 }
 0x86e   : > { %v11495_v46 = vadd.f32 %v9837_v25, %v8491_v0  ;;  %v9839_v41 = vpop.f32.mrb[162].mxu1  ;;  %10320 = vmatprep.subr.bf16.mxu1 %v10218_v8 }
 0x86f   : > { %v11496_v54 = vadd.f32 %v9839_v41, %v8496_v1  ;;  %v9841_v32 = vpop.f32.mrb[163].mxu1  ;;  %10321 = vmatpush1.bf16.msra.mxu1 %v10217_v51  ;;  %v10106_v31 = vmax.f32 %v11494_v13, 0.0 }
 0x870   : > { %v11497_v43 = vadd.f32 %v9841_v32, %v8496_v1  ;;  %v10107_v22 = vmax.f32 %v11495_v46, 0.0  ;;  %v8531_v1 = vpop.permute.xlu0 %8530 }
 0x871   : > { %v10108_v58 = vmax.f32 %v11496_v54, 0.0 }
 0x872   : > { %v10109_v35 = vmax.f32 %v11497_v43, 0.0  ;;  %v8536_v43 = vpop.permute.xlu1 %8535 }
 0x873   : > { %v10219_v36 = vpack.c.bf16 %v10108_v58, %v10106_v31 }
 0x874   : > { %v10220_v19 = vpack.c.bf16 %v10109_v35, %v10107_v22  ;;  %v9845_v18 = vpop.f32.mrb[164].mxu1 }
 0x875   : > { %v11498_v44 = vadd.f32 %v9845_v18, %v8501_v24  ;;  %v9847_v9 = vpop.f32.mrb[165].mxu1 }
 0x876   : > { %v11499_v53 = vadd.f32 %v9847_v9, %v8501_v24  ;;  %v9849_v11 = vpop.f32.mrb[166].mxu1  ;;  %10322 = vmatprep.subr.bf16.mxu1 %v10220_v19 }
 0x877   : > { %v11500_v15 = vadd.f32 %v9849_v11, %v8506_v5  ;;  %v9851_v63 = vpop.f32.mrb[167].mxu1  ;;  %10323 = vmatpush1.bf16.msra.mxu1 %v10219_v36  ;;  %v10110_v37 = vmax.f32 %v11498_v44, 0.0 }
 0x878   : > { %v11501_v60 = vadd.f32 %v9851_v63, %v8506_v5  ;;  %v10111_v14 = vmax.f32 %v11499_v53, 0.0  ;;  %v8541_v5 = vpop.permute.xlu0 %8540 }
 0x879   : > { %v10112_v50 = vmax.f32 %v11500_v15, 0.0 }
 0x87a   : > { %v10113_v10 = vmax.f32 %v11501_v60, 0.0  ;;  %v8546_v60 = vpop.permute.xlu1 %8545 }
 0x87b   : > { %v10221_v47 = vpack.c.bf16 %v10112_v50, %v10110_v37 }
 0x87c   : > { %v10222_v3 = vpack.c.bf16 %v10113_v10, %v10111_v14  ;;  %v9855_v49 = vpop.f32.mrb[168].mxu1 }
 0x87d   : > { %v11502_v52 = vadd.f32 %v9855_v49, %v8511_v55  ;;  %v9857_v30 = vpop.f32.mrb[169].mxu1 }
 0x87e   : > { %v11503_v45 = vadd.f32 %v9857_v30, %v8511_v55  ;;  %v9859_v28 = vpop.f32.mrb[170].mxu1  ;;  %10324 = vmatprep.subr.bf16.mxu1 %v10222_v3 }
 0x87f   : > { %v11504_v61 = vadd.f32 %v9859_v28, %v8516_v33  ;;  %v9861_v20 = vpop.f32.mrb[171].mxu1  ;;  %10325 = vmatpush1.bf16.msra.mxu1 %v10221_v47  ;;  %v10114_v16 = vmax.f32 %v11502_v52, 0.0 }
 0x880   : > { %v11505_v39 = vadd.f32 %v9861_v20, %v8516_v33  ;;  %v10115_v12 = vmax.f32 %v11503_v45, 0.0  ;;  %v8551_v33 = vpop.permute.xlu0 %8550 }
 0x881   : > { %v10116_v56 = vmax.f32 %v11504_v61, 0.0 }
 0x882   : > { %v10117_v4 = vmax.f32 %v11505_v39, 0.0  ;;  %v8556_v39 = vpop.permute.xlu1 %8555 }
 0x883   : > { %v10223_v2 = vpack.c.bf16 %v10116_v56, %v10114_v16 }
 0x884   : > { %v10224_v62 = vpack.c.bf16 %v10117_v4, %v10115_v12  ;;  %v9865_v27 = vpop.f32.mrb[172].mxu1 }
 0x885   : > { %v11506_v42 = vadd.f32 %v9865_v27, %v8521_v26  ;;  %v9867_v48 = vpop.f32.mrb[173].mxu1 }
 0x886   : > { %v11507_v34 = vadd.f32 %v9867_v48, %v8521_v26  ;;  %v9869_v38 = vpop.f32.mrb[174].mxu1  ;;  %10326 = vmatprep.subr.bf16.mxu1 %v10224_v62 }
 0x887   : > { %v11508_v21 = vadd.f32 %v9869_v38, %v8526_v6  ;;  %v9871_v57 = vpop.f32.mrb[175].mxu1  ;;  %10327 = vmatpush1.bf16.msra.mxu1 %v10223_v2  ;;  %v10118_v0 = vmax.f32 %v11506_v42, 0.0 }
 0x888   : > { %v11509_v51 = vadd.f32 %v9871_v57, %v8526_v6  ;;  %v10119_v7 = vmax.f32 %v11507_v34, 0.0  ;;  %v8561_v6 = vpop.permute.xlu0 %8560 }
 0x889   : > { %v10120_v8 = vmax.f32 %v11508_v21, 0.0 }
 0x88a   : > { %v10121_v13 = vmax.f32 %v11509_v51, 0.0  ;;  %v8566_v51 = vpop.permute.xlu1 %8565 }
 0x88b   : > { %v10225_v25 = vpack.c.bf16 %v10120_v8, %v10118_v0 }
 0x88c   : > { %v10226_v46 = vpack.c.bf16 %v10121_v13, %v10119_v7  ;;  %v9875_v41 = vpop.f32.mrb[176].mxu1 }
 0x88d   : > { %v11510_v54 = vadd.f32 %v9875_v41, %v8531_v1  ;;  %v9877_v32 = vpop.f32.mrb[177].mxu1 }
 0x88e   : > { %v11511_v31 = vadd.f32 %v9877_v32, %v8531_v1  ;;  %v9879_v58 = vpop.f32.mrb[178].mxu1  ;;  %10328 = vmatprep.subr.bf16.mxu1 %v10226_v46 }
 0x88f   : > { %v11512_v22 = vadd.f32 %v9879_v58, %v8536_v43  ;;  %v9881_v35 = vpop.f32.mrb[179].mxu1  ;;  %10329 = vmatpush1.bf16.msra.mxu1 %v10225_v25  ;;  %v10122_v24 = vmax.f32 %v11510_v54, 0.0 }
 0x890   : > { %v11513_v36 = vadd.f32 %v9881_v35, %v8536_v43  ;;  %v10123_v18 = vmax.f32 %v11511_v31, 0.0  ;;  %v8571_v43 = vpop.permute.xlu0 %8570 }
 0x891   : > { %v10124_v19 = vmax.f32 %v11512_v22, 0.0 }
 0x892   : > { %v10125_v44 = vmax.f32 %v11513_v36, 0.0  ;;  %v8576_v36 = vpop.permute.xlu1 %8575 }
 0x893   : > { %v10227_v9 = vpack.c.bf16 %v10124_v19, %v10122_v24 }
 0x894   : > { %v10228_v53 = vpack.c.bf16 %v10125_v44, %v10123_v18  ;;  %v9885_v11 = vpop.f32.mrb[180].mxu1  ;;  %v17369_v18 = vrot.slane %v17350_v59, %v17356_v29 }
 0x895   : > { %v11514_v15 = vadd.f32 %v9885_v11, %v8541_v5  ;;  %v9887_v63 = vpop.f32.mrb[181].mxu1 }
 0x896   : > { %v11515_v37 = vadd.f32 %v9887_v63, %v8541_v5  ;;  %v9889_v50 = vpop.f32.mrb[182].mxu1  ;;  %10330 = vmatprep.subr.bf16.mxu1 %v10228_v53  ;;  %v10301_v5 = vcombine.high %v17364_v40, %v17364_v40 }
 0x897   : > { %v11516_v14 = vadd.f32 %v9889_v50, %v8546_v60  ;;  %v9891_v10 = vpop.f32.mrb[183].mxu1  ;;  %10331 = vmatpush1.bf16.msra.mxu1 %v10227_v9  ;;  %v10126_v55 = vmax.f32 %v11514_v15, 0.0  ;;  %v8581_v50 = vpop.permute.xlu0 %8580 }
 0x898   : > { %v11517_v47 = vadd.f32 %v9891_v10, %v8546_v60  ;;  %v10127_v49 = vmax.f32 %v11515_v37, 0.0 }
 0x899   : > { %v10128_v3 = vmax.f32 %v11516_v14, 0.0 }
 0x89a   : > { %v10129_v52 = vmax.f32 %v11517_v47, 0.0 }
 0x89b   : > { %v10229_v30 = vpack.c.bf16 %v10128_v3, %v10126_v55  ;;  %v8586_v55 = vpop.permute.xlu1 %8585 }
 0x89c   : > { %v10230_v45 = vpack.c.bf16 %v10129_v52, %v10127_v49  ;;  %v9895_v28 = vpop.f32.mrb[184].mxu1 }
 0x89d   : > { %v11518_v61 = vadd.f32 %v9895_v28, %v8551_v33  ;;  %v9897_v20 = vpop.f32.mrb[185].mxu1 }
 0x89e   : > { %v11519_v16 = vadd.f32 %v9897_v20, %v8551_v33  ;;  %v9899_v56 = vpop.f32.mrb[186].mxu1  ;;  %10332 = vmatprep.subr.bf16.mxu1 %v10230_v45 }
 0x89f   : > { %v11520_v12 = vadd.f32 %v9899_v56, %v8556_v39  ;;  %v9901_v4 = vpop.f32.mrb[187].mxu1  ;;  %10333 = vmatpush1.bf16.msra.mxu1 %v10229_v30  ;;  %v10130_v26 = vmax.f32 %v11518_v61, 0.0 }
 0x8a0   : > { %v11521_v2 = vadd.f32 %v9901_v4, %v8556_v39  ;;  %v10131_v27 = vmax.f32 %v11519_v16, 0.0  ;;  %v8591_v39 = vpop.permute.xlu0 %8590 }
 0x8a1   : > { %v10132_v62 = vmax.f32 %v11520_v12, 0.0 }
 0x8a2   : > { %v10133_v42 = vmax.f32 %v11521_v2, 0.0  ;;  %v8596_v2 = vpop.permute.xlu1 %8595 }
 0x8a3   : > { %v10231_v48 = vpack.c.bf16 %v10132_v62, %v10130_v26 }
 0x8a4   : > { %v10232_v34 = vpack.c.bf16 %v10133_v42, %v10131_v27  ;;  %v9905_v38 = vpop.f32.mrb[188].mxu1 }
 0x8a5   : > { %v11522_v21 = vadd.f32 %v9905_v38, %v8561_v6  ;;  %v9907_v57 = vpop.f32.mrb[189].mxu1 }
 0x8a6   : > { %v11523_v0 = vadd.f32 %v9907_v57, %v8561_v6  ;;  %v9909_v8 = vpop.f32.mrb[190].mxu1  ;;  %10334 = vmatprep.subr.bf16.mxu1 %v10232_v34 }
 0x8a7   : > { %v11524_v7 = vadd.f32 %v9909_v8, %v8566_v51  ;;  %v9911_v13 = vpop.f32.mrb[191].mxu1  ;;  %10335 = vmatpush1.bf16.msra.mxu1 %v10231_v48  ;;  %v10134_v1 = vmax.f32 %v11522_v21, 0.0 }
 0x8a8   : > { %v11525_v25 = vadd.f32 %v9911_v13, %v8566_v51  ;;  %v10135_v41 = vmax.f32 %v11523_v0, 0.0  ;;  %v8601_v51 = vpop.permute.xlu0 %8600 }
 0x8a9   : > { %v10136_v46 = vmax.f32 %v11524_v7, 0.0 }
 0x8aa   : > { %v10137_v54 = vmax.f32 %v11525_v25, 0.0  ;;  %v8606_v25 = vpop.permute.xlu1 %8605 }
 0x8ab   : > { %v10233_v32 = vpack.c.bf16 %v10136_v46, %v10134_v1 }
 0x8ac   : > { %v10234_v31 = vpack.c.bf16 %v10137_v54, %v10135_v41  ;;  %v9915_v58 = vpop.f32.mrb[192].mxu1 }
 0x8ad   : > { %v11526_v22 = vadd.f32 %v9915_v58, %v8571_v43  ;;  %v9917_v35 = vpop.f32.mrb[193].mxu1 }
 0x8ae   : > { %v11527_v24 = vadd.f32 %v9917_v35, %v8571_v43  ;;  %v9919_v19 = vpop.f32.mrb[194].mxu1  ;;  %10336 = vmatprep.subr.bf16.mxu1 %v10234_v31 }
 0x8af   : > { %v11528_v44 = vadd.f32 %v9919_v19, %v8576_v36  ;;  %v9921_v9 = vpop.f32.mrb[195].mxu1  ;;  %10337 = vmatpush1.bf16.msra.mxu1 %v10233_v32  ;;  %v10138_v11 = vmax.f32 %v11526_v22, 0.0 }
 0x8b0   : > { %v11529_v53 = vadd.f32 %v9921_v9, %v8576_v36  ;;  %v10139_v63 = vmax.f32 %v11527_v24, 0.0  ;;  %v8611_v36 = vpop.permute.xlu0 %8610 }
 0x8b1   : > { %v10140_v15 = vmax.f32 %v11528_v44, 0.0 }
 0x8b2   : > { %v10141_v60 = vmax.f32 %v11529_v53, 0.0  ;;  %10339 = vmatmul.mubr.bf16.vlgmr.msra.gmra.mrb[0].mxu1 %v17369_v18 }
 0x8b3   : > { %v10235_v37 = vpack.c.bf16 %v10140_v15, %v10138_v11  ;;  %10379 = vmatprep.mubr.bf16.mxu1 %v10301_v5  ;;  %v8616_v5 = vpop.permute.xlu1 %8615 }
 0x8b4   : > { %v10236_v14 = vpack.c.bf16 %v10141_v60, %v10139_v63  ;;  %v9925_v10 = vpop.f32.mrb[196].mxu1 }
 0x8b5   : > { %v11530_v59 = vadd.f32 %v9925_v10, %v8581_v50  ;;  %v9927_v47 = vpop.f32.mrb[197].mxu1 }
 0x8b6   : > { %v11531_v3 = vadd.f32 %v9927_v47, %v8581_v50  ;;  %v9929_v49 = vpop.f32.mrb[198].mxu1  ;;  %10347 = vmatprep.subr.bf16.mxu1 %v10236_v14  ;;  %v8621_v47 = vpop.permute.xlu0 %8620 }
 0x8b7   : > { %v11532_v52 = vadd.f32 %v9929_v49, %v8586_v55  ;;  %v9931_v40 = vpop.f32.mrb[199].mxu1  ;;  %10348 = vmatpush1.bf16.msra.mxu1 %v10235_v37  ;;  %v10142_v33 = vmax.f32 %v11530_v59, 0.0 }
 0x8b8   : > { %v11533_v30 = vadd.f32 %v9931_v40, %v8586_v55  ;;  %v10143_v28 = vmax.f32 %v11531_v3, 0.0  ;;  %v8626_v40 = vpop.permute.xlu1 %8625 }
 0x8b9   : > { %v10144_v45 = vmax.f32 %v11532_v52, 0.0 }
 0x8ba   : > { %v10145_v61 = vmax.f32 %v11533_v30, 0.0 }
 0x8bb   : > { %v10237_v20 = vpack.c.bf16 %v10144_v45, %v10142_v33 }
 0x8bc   : > { %v10238_v16 = vpack.c.bf16 %v10145_v61, %v10143_v28  ;;  %v9935_v56 = vpop.f32.mrb[200].mxu1 }
 0x8bd   : > { %v11534_v12 = vadd.f32 %v9935_v56, %v8591_v39  ;;  %v9937_v4 = vpop.f32.mrb[201].mxu1 }
 0x8be   : > { %v11535_v26 = vadd.f32 %v9937_v4, %v8591_v39  ;;  %v9939_v62 = vpop.f32.mrb[202].mxu1  ;;  %10349 = vmatprep.subr.bf16.mxu1 %v10238_v16  ;;  %v8631_v4 = vpop.permute.xlu0 %8630 }
 0x8bf   : > { %v11536_v27 = vadd.f32 %v9939_v62, %v8596_v2  ;;  %v9941_v42 = vpop.f32.mrb[203].mxu1  ;;  %10350 = vmatpush1.bf16.msra.mxu1 %v10237_v20  ;;  %v10146_v6 = vmax.f32 %v11534_v12, 0.0 }
 0x8c0   : > { %v11537_v48 = vadd.f32 %v9941_v42, %v8596_v2  ;;  %v10147_v38 = vmax.f32 %v11535_v26, 0.0  ;;  %v8636_v42 = vpop.permute.xlu1 %8635 }
 0x8c1   : > { %v10148_v34 = vmax.f32 %v11536_v27, 0.0 }
 0x8c2   : > { %v10149_v21 = vmax.f32 %v11537_v48, 0.0 }
 0x8c3   : > { %v10239_v57 = vpack.c.bf16 %v10148_v34, %v10146_v6 }
 0x8c4   : > { %v10240_v0 = vpack.c.bf16 %v10149_v21, %v10147_v38  ;;  %v9945_v8 = vpop.f32.mrb[204].mxu1 }
 0x8c5   : > { %v11538_v7 = vadd.f32 %v9945_v8, %v8601_v51  ;;  %v9947_v13 = vpop.f32.mrb[205].mxu1 }
 0x8c6   : > { %v11539_v1 = vadd.f32 %v9947_v13, %v8601_v51  ;;  %v9949_v46 = vpop.f32.mrb[206].mxu1  ;;  %10351 = vmatprep.subr.bf16.mxu1 %v10240_v0  ;;  %v8641_v13 = vpop.permute.xlu0 %8640 }
 0x8c7   : > { %v11540_v41 = vadd.f32 %v9949_v46, %v8606_v25  ;;  %v9951_v54 = vpop.f32.mrb[207].mxu1  ;;  %10352 = vmatpush1.bf16.msra.mxu1 %v10239_v57  ;;  %v10150_v43 = vmax.f32 %v11538_v7, 0.0 }
 0x8c8   : > { %v11541_v32 = vadd.f32 %v9951_v54, %v8606_v25  ;;  %v10151_v58 = vmax.f32 %v11539_v1, 0.0  ;;  %v8646_v54 = vpop.permute.xlu1 %8645 }
 0x8c9   : > { %v10152_v31 = vmax.f32 %v11540_v41, 0.0 }
 0x8ca   : > { %v10153_v22 = vmax.f32 %v11541_v32, 0.0 }
 0x8cb   : > { %v10241_v35 = vpack.c.bf16 %v10152_v31, %v10150_v43 }
 0x8cc   : > { %v10242_v24 = vpack.c.bf16 %v10153_v22, %v10151_v58  ;;  %v9955_v19 = vpop.f32.mrb[208].mxu1 }
 0x8cd   : > { %v11542_v44 = vadd.f32 %v9955_v19, %v8611_v36  ;;  %v9957_v9 = vpop.f32.mrb[209].mxu1 }
 0x8ce   : > { %v11543_v53 = vadd.f32 %v9957_v9, %v8611_v36  ;;  %v9959_v11 = vpop.f32.mrb[210].mxu1  ;;  %10353 = vmatprep.subr.bf16.mxu1 %v10242_v24  ;;  %v8651_v9 = vpop.permute.xlu0 %8650 }
 0x8cf   : > { %v11544_v15 = vadd.f32 %v9959_v11, %v8616_v5  ;;  %v9961_v63 = vpop.f32.mrb[211].mxu1  ;;  %10354 = vmatpush1.bf16.msra.mxu1 %v10241_v35  ;;  %v10154_v37 = vmax.f32 %v11542_v44, 0.0 }
 0x8d0   : > { %v11545_v60 = vadd.f32 %v9961_v63, %v8616_v5  ;;  %v10155_v14 = vmax.f32 %v11543_v53, 0.0  ;;  %v8656_v63 = vpop.permute.xlu1 %8655 }
 0x8d1   : > { %v10156_v50 = vmax.f32 %v11544_v15, 0.0 }
 0x8d2   : > { %v10157_v10 = vmax.f32 %v11545_v60, 0.0 }
 0x8d3   : > { %v10243_v59 = vpack.c.bf16 %v10156_v50, %v10154_v37 }
 0x8d4   : > { %v10244_v55 = vpack.c.bf16 %v10157_v10, %v10155_v14  ;;  %v9965_v3 = vpop.f32.mrb[212].mxu1 }
 0x8d5   : > { %v11546_v49 = vadd.f32 %v9965_v3, %v8621_v47  ;;  %v9967_v52 = vpop.f32.mrb[213].mxu1 }
 0x8d6   : > { %v11547_v30 = vadd.f32 %v9967_v52, %v8621_v47  ;;  %v9969_v33 = vpop.f32.mrb[214].mxu1  ;;  %10355 = vmatprep.subr.bf16.mxu1 %v10244_v55  ;;  %v8661_v52 = vpop.permute.xlu0 %8660 }
 0x8d7   : > { %v11548_v45 = vadd.f32 %v9969_v33, %v8626_v40  ;;  %v9971_v28 = vpop.f32.mrb[215].mxu1  ;;  %10356 = vmatpush1.bf16.msra.mxu1 %v10243_v59  ;;  %v10158_v20 = vmax.f32 %v11546_v49, 0.0 }
 0x8d8   : > { %v11549_v61 = vadd.f32 %v9971_v28, %v8626_v40  ;;  %v10159_v16 = vmax.f32 %v11547_v30, 0.0  ;;  %v8666_v28 = vpop.permute.xlu1 %8665 }
 0x8d9   : > { %v10160_v39 = vmax.f32 %v11548_v45, 0.0 }
 0x8da   : > { %v10161_v56 = vmax.f32 %v11549_v61, 0.0 }
 0x8db   : > { %v10245_v12 = vpack.c.bf16 %v10160_v39, %v10158_v20 }
 0x8dc   : > { %v10246_v2 = vpack.c.bf16 %v10161_v56, %v10159_v16  ;;  %v9975_v26 = vpop.f32.mrb[216].mxu1 }
 0x8dd   : > { %v11550_v62 = vadd.f32 %v9975_v26, %v8631_v4  ;;  %v9977_v27 = vpop.f32.mrb[217].mxu1 }
 0x8de   : > { %v11551_v48 = vadd.f32 %v9977_v27, %v8631_v4  ;;  %v9979_v6 = vpop.f32.mrb[218].mxu1  ;;  %10357 = vmatprep.subr.bf16.mxu1 %v10246_v2  ;;  %v8671_v27 = vpop.permute.xlu0 %8670 }
 0x8df   : > { %v11552_v34 = vadd.f32 %v9979_v6, %v8636_v42  ;;  %v9981_v38 = vpop.f32.mrb[219].mxu1  ;;  %10358 = vmatpush1.bf16.msra.mxu1 %v10245_v12  ;;  %v10162_v57 = vmax.f32 %v11550_v62, 0.0 }
 0x8e0   : > { %v11553_v21 = vadd.f32 %v9981_v38, %v8636_v42  ;;  %v10163_v0 = vmax.f32 %v11551_v48, 0.0  ;;  %v8676_v38 = vpop.permute.xlu1 %8675 }
 0x8e1   : > { %v10164_v51 = vmax.f32 %v11552_v34, 0.0 }
 0x8e2   : > { %v10165_v8 = vmax.f32 %v11553_v21, 0.0 }
 0x8e3   : > { %v10247_v7 = vpack.c.bf16 %v10164_v51, %v10162_v57 }
 0x8e4   : > { %v10248_v25 = vpack.c.bf16 %v10165_v8, %v10163_v0  ;;  %v9985_v1 = vpop.f32.mrb[220].mxu1 }
 0x8e5   : > { %v11554_v46 = vadd.f32 %v9985_v1, %v8641_v13  ;;  %v9987_v41 = vpop.f32.mrb[221].mxu1 }
 0x8e6   : > { %v11555_v32 = vadd.f32 %v9987_v41, %v8641_v13  ;;  %v9989_v43 = vpop.f32.mrb[222].mxu1  ;;  %10359 = vmatprep.subr.bf16.mxu1 %v10248_v25  ;;  %v8681_v41 = vpop.permute.xlu0 %8680 }
 0x8e7   : > { %v11556_v31 = vadd.f32 %v9989_v43, %v8646_v54  ;;  %v9991_v58 = vpop.f32.mrb[223].mxu1  ;;  %10360 = vmatpush1.bf16.msra.mxu1 %v10247_v7  ;;  %v10166_v35 = vmax.f32 %v11554_v46, 0.0 }
 0x8e8   : > { %v11557_v22 = vadd.f32 %v9991_v58, %v8646_v54  ;;  %v10167_v24 = vmax.f32 %v11555_v32, 0.0  ;;  %v8686_v58 = vpop.permute.xlu1 %8685 }
 0x8e9   : > { %v10168_v36 = vmax.f32 %v11556_v31, 0.0 }
 0x8ea   : > { %v10169_v19 = vmax.f32 %v11557_v22, 0.0 }
 0x8eb   : > { %v10249_v44 = vpack.c.bf16 %v10168_v36, %v10166_v35 }
 0x8ec   : > { %v10250_v5 = vpack.c.bf16 %v10169_v19, %v10167_v24  ;;  %v9995_v53 = vpop.f32.mrb[224].mxu1 }
 0x8ed   : > { %v11558_v11 = vadd.f32 %v9995_v53, %v8651_v9  ;;  %v9997_v15 = vpop.f32.mrb[225].mxu1 }
 0x8ee   : > { %v11559_v60 = vadd.f32 %v9997_v15, %v8651_v9  ;;  %v9999_v37 = vpop.f32.mrb[226].mxu1  ;;  %10361 = vmatprep.subr.bf16.mxu1 %v10250_v5  ;;  %v8691_v15 = vpop.permute.xlu0 %8690 }
 0x8ef   : > { %v11560_v50 = vadd.f32 %v9999_v37, %v8656_v63  ;;  %v10001_v14 = vpop.f32.mrb[227].mxu1  ;;  %10362 = vmatpush1.bf16.msra.mxu1 %v10249_v44  ;;  %v10170_v59 = vmax.f32 %v11558_v11, 0.0 }
 0x8f0   : > { %v11561_v10 = vadd.f32 %v10001_v14, %v8656_v63  ;;  %v10171_v55 = vmax.f32 %v11559_v60, 0.0  ;;  %v8696_v14 = vpop.permute.xlu1 %8695 }
 0x8f1   : > { %v10172_v47 = vmax.f32 %v11560_v50, 0.0 }
 0x8f2   : > { %v10173_v3 = vmax.f32 %v11561_v10, 0.0 }
 0x8f3   : > { %v10251_v49 = vpack.c.bf16 %v10172_v47, %v10170_v59 }
 0x8f4   : > { %v10252_v40 = vpack.c.bf16 %v10173_v3, %v10171_v55  ;;  %v10005_v30 = vpop.f32.mrb[228].mxu1 }
 0x8f5   : > { %v11562_v33 = vadd.f32 %v10005_v30, %v8661_v52  ;;  %v10007_v45 = vpop.f32.mrb[229].mxu1 }
 0x8f6   : > { %v11563_v61 = vadd.f32 %v10007_v45, %v8661_v52  ;;  %v10009_v20 = vpop.f32.mrb[230].mxu1  ;;  %10363 = vmatprep.subr.bf16.mxu1 %v10252_v40  ;;  %v8701_v45 = vpop.permute.xlu0 %8700 }
 0x8f7   : > { %v11564_v39 = vadd.f32 %v10009_v20, %v8666_v28  ;;  %v10011_v16 = vpop.f32.mrb[231].mxu1  ;;  %10364 = vmatpush1.bf16.msra.mxu1 %v10251_v49  ;;  %v10174_v12 = vmax.f32 %v11562_v33, 0.0 }
 0x8f8   : > { %v11565_v56 = vadd.f32 %v10011_v16, %v8666_v28  ;;  %v10175_v2 = vmax.f32 %v11563_v61, 0.0  ;;  %v8706_v16 = vpop.permute.xlu1 %8705 }
 0x8f9   : > { %v10176_v4 = vmax.f32 %v11564_v39, 0.0 }
 0x8fa   : > { %v10177_v26 = vmax.f32 %v11565_v56, 0.0 }
 0x8fb   : > { %v10253_v62 = vpack.c.bf16 %v10176_v4, %v10174_v12 }
 0x8fc   : > { %v10254_v42 = vpack.c.bf16 %v10177_v26, %v10175_v2  ;;  %v10015_v48 = vpop.f32.mrb[232].mxu1 }
 0x8fd   : > { %v11566_v6 = vadd.f32 %v10015_v48, %v8671_v27  ;;  %v10017_v34 = vpop.f32.mrb[233].mxu1 }
 0x8fe   : > { %v11567_v21 = vadd.f32 %v10017_v34, %v8671_v27  ;;  %v10019_v57 = vpop.f32.mrb[234].mxu1  ;;  %10365 = vmatprep.subr.bf16.mxu1 %v10254_v42  ;;  %v8711_v34 = vpop.permute.xlu0 %8710 }
 0x8ff   : > { %v11568_v51 = vadd.f32 %v10019_v57, %v8676_v38  ;;  %v10021_v0 = vpop.f32.mrb[235].mxu1  ;;  %10366 = vmatpush1.bf16.msra.mxu1 %v10253_v62  ;;  %v10178_v7 = vmax.f32 %v11566_v6, 0.0 }
 0x900   : > { %v11569_v8 = vadd.f32 %v10021_v0, %v8676_v38  ;;  %v10179_v25 = vmax.f32 %v11567_v21, 0.0  ;;  %v8716_v0 = vpop.permute.xlu1 %8715 }
 0x901   : > { %v10180_v13 = vmax.f32 %v11568_v51, 0.0 }
 0x902   : > { %v10181_v1 = vmax.f32 %v11569_v8, 0.0 }
 0x903   : > { %v10255_v46 = vpack.c.bf16 %v10180_v13, %v10178_v7 }
 0x904   : > { %v10256_v54 = vpack.c.bf16 %v10181_v1, %v10179_v25  ;;  %v10025_v32 = vpop.f32.mrb[236].mxu1 }
 0x905   : > { %v11570_v43 = vadd.f32 %v10025_v32, %v8681_v41  ;;  %v10027_v31 = vpop.f32.mrb[237].mxu1 }
 0x906   : > { %v11571_v22 = vadd.f32 %v10027_v31, %v8681_v41  ;;  %v10029_v35 = vpop.f32.mrb[238].mxu1  ;;  %10367 = vmatprep.subr.bf16.mxu1 %v10256_v54  ;;  %v8721_v31 = vpop.permute.xlu0 %8720 }
 0x907   : > { %v11572_v36 = vadd.f32 %v10029_v35, %v8686_v58  ;;  %v10031_v24 = vpop.f32.mrb[239].mxu1  ;;  %10368 = vmatpush1.bf16.msra.mxu1 %v10255_v46  ;;  %v10182_v44 = vmax.f32 %v11570_v43, 0.0 }
 0x908   : > { %v11573_v19 = vadd.f32 %v10031_v24, %v8686_v58  ;;  %v10183_v5 = vmax.f32 %v11571_v22, 0.0  ;;  %v8726_v24 = vpop.permute.xlu1 %8725 }
 0x909   : > { %v10184_v9 = vmax.f32 %v11572_v36, 0.0 }
 0x90a   : > { %v10185_v53 = vmax.f32 %v11573_v19, 0.0 }
 0x90b   : > { %v10257_v11 = vpack.c.bf16 %v10184_v9, %v10182_v44 }
 0x90c   : > { %v10258_v63 = vpack.c.bf16 %v10185_v53, %v10183_v5  ;;  %v10035_v60 = vpop.f32.mrb[240].mxu1 }
 0x90d   : > { %v11574_v37 = vadd.f32 %v10035_v60, %v8691_v15  ;;  %v10037_v50 = vpop.f32.mrb[241].mxu1 }
 0x90e   : > { %v11575_v10 = vadd.f32 %v10037_v50, %v8691_v15  ;;  %v10039_v59 = vpop.f32.mrb[242].mxu1  ;;  %10369 = vmatprep.subr.bf16.mxu1 %v10258_v63 }
 0x90f   : > { %v11576_v47 = vadd.f32 %v10039_v59, %v8696_v14  ;;  %v10041_v55 = vpop.f32.mrb[243].mxu1  ;;  %10370 = vmatpush1.bf16.msra.mxu1 %v10257_v11  ;;  %v10186_v49 = vmax.f32 %v11574_v37, 0.0  ;;  %v10271_v59 = vpop.permute.xlu0 %10270 }
 0x910   : > { %v11577_v3 = vadd.f32 %v10041_v55, %v8696_v14  ;;  %v10187_v40 = vmax.f32 %v11575_v10, 0.0  ;;  %v10300_v14 = vcombine.high %v17369_v18, %v17369_v18  ;;  %v10275_v10 = vsub.s32 0, %v17353_v17 }
 0x911   : > { %v10188_v52 = vmax.f32 %v11576_v47, 0.0 }
 0x912   : > { %v10189_v30 = vmax.f32 %v11577_v3, 0.0  ;;  %v10276_v47 = vrot.slane %v10271_v59, %v10275_v10 }
 0x913   : > { %v10259_v33 = vpack.c.bf16 %v10188_v52, %v10186_v49 }
 0x914   : > { %v10260_v28 = vpack.c.bf16 %v10189_v30, %v10187_v40  ;;  %v10045_v61 = vpop.f32.mrb[244].mxu1 }
 0x915   : > { %v11578_v20 = vadd.f32 %v10045_v61, %v8701_v45  ;;  %v10047_v39 = vpop.f32.mrb[245].mxu1 }
 0x916   : > { %v11579_v56 = vadd.f32 %v10047_v39, %v8701_v45  ;;  %v10049_v12 = vpop.f32.mrb[246].mxu1  ;;  %10371 = vmatprep.subr.bf16.mxu1 %v10260_v28 }
 0x917   : > { %v11580_v4 = vadd.f32 %v10049_v12, %v8706_v16  ;;  %v10051_v2 = vpop.f32.mrb[247].mxu1  ;;  %10372 = vmatpush1.bf16.msra.mxu1 %v10259_v33  ;;  %v10190_v62 = vmax.f32 %v11578_v20, 0.0 }
 0x918   : > { %v11581_v26 = vadd.f32 %v10051_v2, %v8706_v16  ;;  %v10191_v42 = vmax.f32 %v11579_v56, 0.0 }
 0x919   : > { %v10192_v27 = vmax.f32 %v11580_v4, 0.0 }
 0x91a   : > { %v10193_v48 = vmax.f32 %v11581_v26, 0.0 }
 0x91b   : > { %v10261_v6 = vpack.c.bf16 %v10192_v27, %v10190_v62 }
 0x91c   : > { %v10262_v38 = vpack.c.bf16 %v10193_v48, %v10191_v42  ;;  %v10055_v21 = vpop.f32.mrb[248].mxu1 }
 0x91d   : > { %v11582_v57 = vadd.f32 %v10055_v21, %v8711_v34  ;;  %v10057_v51 = vpop.f32.mrb[249].mxu1 }
 0x91e   : > { %v11583_v8 = vadd.f32 %v10057_v51, %v8711_v34  ;;  %v10059_v7 = vpop.f32.mrb[250].mxu1  ;;  %10373 = vmatprep.subr.bf16.mxu1 %v10262_v38 }
 0x91f   : > { %v11584_v13 = vadd.f32 %v10059_v7, %v8716_v0  ;;  %v10061_v25 = vpop.f32.mrb[251].mxu1  ;;  %10374 = vmatpush1.bf16.msra.mxu1 %v10261_v6  ;;  %v10194_v46 = vmax.f32 %v11582_v57, 0.0 }
 0x920   : > { %v11585_v1 = vadd.f32 %v10061_v25, %v8716_v0  ;;  %v10195_v54 = vmax.f32 %v11583_v8, 0.0 }
 0x921   : > { %v10196_v41 = vmax.f32 %v11584_v13, 0.0 }
 0x922   : > { %v10197_v32 = vmax.f32 %v11585_v1, 0.0 }
 0x923   : > { %v10263_v43 = vpack.c.bf16 %v10196_v41, %v10194_v46 }
 0x924   : > { %v10264_v58 = vpack.c.bf16 %v10197_v32, %v10195_v54  ;;  %v10065_v22 = vpop.f32.mrb[252].mxu1 }
 0x925   : > { %v11586_v35 = vadd.f32 %v10065_v22, %v8721_v31  ;;  %v10067_v36 = vpop.f32.mrb[253].mxu1 }
 0x926   : > { %v11587_v19 = vadd.f32 %v10067_v36, %v8721_v31  ;;  %v10069_v44 = vpop.f32.mrb[254].mxu1  ;;  %10375 = vmatprep.subr.bf16.mxu1 %v10264_v58 }
 0x927   : > { %v11588_v9 = vadd.f32 %v10069_v44, %v8726_v24  ;;  %v10071_v5 = vpop.f32.mrb[255].mxu1  ;;  %10376 = vmatpush1.bf16.msra.mxu1 %v10263_v43  ;;  %v10198_v11 = vmax.f32 %v11586_v35, 0.0 }
 0x928   : > { %v11589_v53 = vadd.f32 %v10071_v5, %v8726_v24  ;;  %v10199_v63 = vmax.f32 %v11587_v19, 0.0 }
 0x929   : > { %v10200_v15 = vmax.f32 %v11588_v9, 0.0 }
 0x92a   : > { %v10201_v60 = vmax.f32 %v11589_v53, 0.0 }
 0x92b   : > { %v10265_v37 = vpack.c.bf16 %v10200_v15, %v10198_v11 }
 0x92c   : > { %v10266_v50 = vpack.c.bf16 %v10201_v60, %v10199_v63 }
 0x92e   : > { %10377 = vmatprep.subr.bf16.mxu1 %v10266_v50 }
 0x92f   : > { %10378 = vmatpush1.bf16.msra.mxu1 %v10265_v37 }
 0x932   : > { %10380 = vmatmul.mubr.bf16.vlgmr.msra.gmra.mrb[0].mxu1 %v10300_v14 }
 0xa05   : > { %v10381_v55 = vpop.f32.mrb[0].mxu1 }
 0xa06   : > { %v11590_v3 = vadd.f32 %v10381_v55, %v10276_v47  ;;  %v10383_v49 = vpop.f32.mrb[1].mxu1 }
 0xa07   : > { %v11591_v52 = vadd.f32 %v10383_v49, %v10276_v47  ;;  %v10385_v40 = vpop.f32.mrb[2].mxu1 }
 0xa08   : > { %v10386_v30 = vpop.f32.mrb[3].mxu1 }
 0xa09   : > { %v10390_v33 = vcombine.low %v11590_v3, %v11591_v52 }
 0xa0b   : > { %v10397_v45 = vrot.slane %v10390_v33, %v17356_v29 }
 0xa0d   : > { %v10404_v17 = vrot.slane %v10397_v45, %v17356_v29 }
 0xa0f   : > { %10410 = vst.msk [vmem:[%s316_s12] sm:$0x3] %vm10408_vm0, %v10404_v17 }
 0xa10 PF: > { %s19_s28 = sadd.s32 1, %s13663_s28   ;;  %s17636_s26 = smov %s13659_s27 }
 0xa11   : > { %p16_p5 = scmp.ge.s32.totalorder %s19_s28, 4   ;;  %s17637_s27 = smov %s17639_s6 }
 0xa13   :  { %18 = sbr.rel (!%p16_p5) target bundleno = 3 (0x3), region = 78 }

</bundles_post_ra>
